<compile_context>
chip_gen: v7x
topology: tpu7x:2x2x1
jax: 0.10.0
libtpu: 0.0.40
codegen_flags: <defaults>
</compile_context>

<pallas_src>
import functools

import jax
import jax.numpy as jnp
from jax.experimental import pallas as pl
from jax.experimental.pallas import tpu as pltpu

_VMEM_SPEC = pl.BlockSpec(memory_space=pltpu.MemorySpace.VMEM)
_HIGHEST = jax.lax.Precision.HIGHEST


# ---------------------------------------------------------------------------
# One-time eager feature probes (run OUTSIDE jit; results become static args).
# ---------------------------------------------------------------------------
_ROLL_MODE = None          # ("tpu", np_convention) | ("jnp", True)
_MASKED_STORE_OK = None    # bool


def _roll_probe_kernel(x_ref, o_ref):
    o_ref[...] = pltpu.roll(x_ref[...], 1, axis=1)


def _probe_roll_mode():
    """Pin down pltpu.roll availability + sign convention, eagerly, once."""
    global _ROLL_MODE
    if _ROLL_MODE is None:
        x = jnp.broadcast_to(jnp.arange(128, dtype=jnp.float32), (8, 128))
        try:
            y = pl.pallas_call(
                _roll_probe_kernel,
                out_shape=jax.ShapeDtypeStruct((8, 128), jnp.float32),
                in_specs=[_VMEM_SPEC],
                out_specs=_VMEM_SPEC,
            )(x)
            # np.roll convention: out[i] = in[i - shift]  =>  out[1] == in[0] == 0
            _ROLL_MODE = ("tpu", bool(y[0, 1] == 0.0))
        except Exception:
            # pltpu.roll unavailable on this path: fall back to jnp.roll.
            _ROLL_MODE = ("jnp", True)
    return _ROLL_MODE


def _mstore_probe_kernel(x_ref, o_ref, s_ref):
    s_ref[...] = jnp.zeros(s_ref.shape, s_ref.dtype)
    lane = jax.lax.broadcasted_iota(jnp.int32, (1, 128), 1)
    mask = jnp.broadcast_to(lane < 64, (8, 128))
    pltpu.store(s_ref.at[pl.ds(8, 8), :], x_ref[...], mask=mask)
    o_ref[...] = s_ref[pl.ds(8, 8), :]


def _probe_masked_store():
    """Check pltpu.store(mask=...) into a sliced VMEM scratch runs & is right."""
    global _MASKED_STORE_OK
    if _MASKED_STORE_OK is None:
        if not hasattr(pltpu, "store"):
            _MASKED_STORE_OK = False
            return _MASKED_STORE_OK
        x = (jnp.arange(8, dtype=jnp.float32)[:, None] * 128.0
             + jnp.arange(128, dtype=jnp.float32)[None, :] + 1.0)
        try:
            y = pl.pallas_call(
                _mstore_probe_kernel,
                out_shape=jax.ShapeDtypeStruct((8, 128), jnp.float32),
                in_specs=[_VMEM_SPEC],
                out_specs=_VMEM_SPEC,
                scratch_shapes=[pltpu.VMEM((16, 128), jnp.float32)],
            )(x)
            expected = jnp.where(jnp.arange(128)[None, :] < 64, x, 0.0)
            _MASKED_STORE_OK = bool(jnp.max(jnp.abs(y - expected)) == 0.0)
        except Exception:
            _MASKED_STORE_OK = False
    return _MASKED_STORE_OK


# ---------------------------------------------------------------------------
# Kernel factory.  Everything is tiny (~1 MiB), so a single grid-less
# invocation with all operands resident in VMEM.
# ---------------------------------------------------------------------------
def _make_dyn_kernel(N, H, W, C, num_blocks, roll_mode, use_masked_store):
    HW = H * W
    M = N * HW                               # flattened batch*spatial lane axis
    roll_backend, roll_np = roll_mode

    def shift_lanes(v, k):
        # returns s with s[:, m] = v[:, (m + k) mod M]
        if k == 0:
            return v
        if roll_backend == "tpu":
            amt = (-k) % M if roll_np else k % M
            return pltpu.roll(v, amt, axis=1)
        return jnp.roll(v, -k, axis=1)       # safe fallback

    def kernel(x_ref, w0_ref, b0_ref, wres_ref, bres_ref, out_ref, patch_ref):
        # ---- lane coordinate helpers (lane m = n*HW + h*W + w) --------------
        lane = jax.lax.broadcasted_iota(jnp.int32, (1, M), 1)
        if (W & (W - 1)) == 0 and (H & (H - 1)) == 0:       # powers of two
            ww = jnp.bitwise_and(lane, W - 1)
            hh = jnp.bitwise_and(jnp.right_shift(lane, W.bit_length() - 1), H - 1)
        else:
            ww = lane % W
            hh = (lane // W) % H

        # ---- SAME-padding boundary masks, hoisted: computed once, shared by
        #      all 6 convolutions (mask pattern per tap is layer-invariant). ---
        masks = {}
        for t in range(9):
            dy, dx = t // 3 - 1, t % 3 - 1
            if dy == 0 and dx == 0:
                continue
            ok = ((hh + dy >= 0) & (hh + dy < H) &
                  (ww + dx >= 0) & (ww + dx < W))            # (1, M) bool
            if use_masked_store:
                masks[t] = jnp.broadcast_to(ok, (C, M))
            else:
                masks[t] = ok.astype(jnp.float32)

        if use_masked_store:
            # Masked lanes are never written by the masked stores below; they
            # must read as zeros in every conv, so zero the slab exactly once.
            patch_ref[...] = jnp.zeros(patch_ref.shape, patch_ref.dtype)

        # ---- conv_block: 1x1 conv (BN scale folded into w0) as ONE lane-dense
        #      GEMM on the (CIN, M) slab, + bias + ReLU.  h stays a value. -----
        h = jnp.dot(w0_ref[...], x_ref[...],
                    preferred_element_type=jnp.float32, precision=_HIGHEST)
        h = jnp.maximum(h + b0_ref[...], 0.0)                # (C, M)

        def conv3x3(cur, j):
            # im2col: 9 rolled (+ boundary-masked) copies of the (C, M) slab
            # stacked into (9C, M); wrapped lanes are exactly the zero-padding
            # positions (incl. across row / batch boundaries).  Then ONE fused
            # GEMM with K = 9C, lane-dense (C, M) output.
            for t in range(9):
                dy, dx = t // 3 - 1, t % 3 - 1
                k = dy * W + dx
                v = shift_lanes(cur, k)
                if k == 0:
                    patch_ref[pl.ds(t * C, C), :] = v
                elif use_masked_store:
                    pltpu.store(patch_ref.at[pl.ds(t * C, C), :], v, mask=masks[t])
                else:
                    patch_ref[pl.ds(t * C, C), :] = v * masks[t]
            y = jnp.dot(wres_ref[j], patch_ref[...],
                        preferred_element_type=jnp.float32, precision=_HIGHEST)
            return y + bres_ref[j]

        # ---- residual blocks, fully unrolled (static weight indices) --------
        for blk in range(num_blocks):
            res = h
            h = jnp.maximum(conv3x3(h, 2 * blk), 0.0)        # conv + BN + ReLU
            h = conv3x3(h, 2 * blk + 1)                      # conv + BN
            h = jnp.maximum(h + res, 0.0)                    # + residual, ReLU

        out_ref[...] = h                                     # one 128-lane store

    return kernel


# ---------------------------------------------------------------------------
# Jitted core + thin wrapper (probes run eagerly outside jit).
# ---------------------------------------------------------------------------
@functools.partial(jax.jit, static_argnums=(2, 3))
def _forward_jit(x_nchw, params, roll_mode, use_masked_store):
    x = x_nchw.astype(jnp.float32)
    N, CIN, H, W = x.shape
    C = params["w0"].shape[0]
    num_blocks = params["wres"].shape[0] // 2
    HW = H * W
    M = N * HW

    # channel-major (CIN, N*HW) slab: tiny (~20 KiB) transpose done by XLA.
    x_slab = jnp.transpose(x.reshape(N, CIN, HW), (1, 0, 2)).reshape(CIN, M)

    kernel = _make_dyn_kernel(N, H, W, C, num_blocks, roll_mode, use_masked_store)

    flops = 2 * CIN * C * M + (2 * num_blocks) * 2 * (9 * C) * C * M
    bytes_accessed = 4 * (CIN * M + 2 * C * M + C * CIN
                          + (2 * num_blocks) * (9 * C * C + C))
    try:
        cost = pl.CostEstimate(flops=flops, transcendentals=0,
                               bytes_accessed=bytes_accessed)
    except Exception:
        cost = None

    out = pl.pallas_call(
        kernel,
        out_shape=jax.ShapeDtypeStruct((C, M), jnp.float32),
        in_specs=[_VMEM_SPEC] * 5,
        out_specs=_VMEM_SPEC,
        scratch_shapes=[pltpu.VMEM((9 * C, M), jnp.float32)],   # fused im2col slab
        cost_estimate=cost,
    )(x_slab, params["w0"], params["b0"], params["wres"], params["bres"])

    # (C, N*HW) -> (N, C, H, W): tiny reshuffle done by XLA outside the kernel.
    state = jnp.transpose(out.reshape(C, N, HW), (1, 0, 2)).reshape(N, C, H, W)
    reward = jnp.zeros((N, 1), jnp.float32)          # torch.zeros((B, 1)) path
    # TODO(synk): reward head (reward_block/fc1/fc2/tanh) only runs when
    # intermediate_rewards=True; the module's default forward returns zeros.
    return state, reward


def dynamics_net_forward(x_nchw, params):
    # Probes execute eagerly, once, OUTSIDE jit (fixes the previous
    # TracerBoolConversionError); results enter the jitted core as statics.
    roll_mode = _probe_roll_mode()
    use_masked_store = _probe_masked_store()
    return _forward_jit(x_nchw, params, roll_mode, use_masked_store)


# ---------------------------------------------------------------------------
# Deterministic parameter construction (PyTorch layouts, BN folded on host).
# ---------------------------------------------------------------------------
def make_params(key, *, num_res_blocks=3, action_channels=8,
                res_block_channels=32, eps=1e-5):
    C = res_block_channels
    CIN = action_channels + C
    keys = iter(jax.random.split(key, 64))

    def conv_w(cout, cin, k):
        return 0.1 * jax.random.normal(next(keys), (cout, cin, k, k), jnp.float32)

    def bn(c):
        gamma = 1.0 + 0.1 * jax.random.normal(next(keys), (c,), jnp.float32)
        beta = 0.1 * jax.random.normal(next(keys), (c,), jnp.float32)
        mean = 0.1 * jax.random.normal(next(keys), (c,), jnp.float32)
        var = jnp.abs(jax.random.normal(next(keys), (c,), jnp.float32)) + 0.5
        return gamma, beta, mean, var

    def fold(conv_bias, bn_params):
        gamma, beta, mean, var = bn_params
        scale = gamma / jnp.sqrt(var + eps)
        shift = beta - mean * scale
        return scale, scale * conv_bias + shift

    # conv_block: Conv2d(CIN, C, 1) + BN  -> BN scale folded into the weight
    w = conv_w(C, CIN, 1)
    b = 0.1 * jax.random.normal(next(keys), (C,), jnp.float32)
    s0, b0 = fold(b, bn(C))
    w0 = w[:, :, 0, 0] * s0[:, None]                          # (C, CIN)

    # residual blocks: 2 x (Conv2d(C, C, 3, padding=1) + BN) per block
    wres, bres = [], []
    for _ in range(num_res_blocks):
        for _ in range(2):
            w = conv_w(C, C, 3)                               # (Cout, Cin, 3, 3)
            b = 0.1 * jax.random.normal(next(keys), (C,), jnp.float32)
            s, bb = fold(b, bn(C))
            # (Cout,Cin,KH,KW) -> (Cout,KH,KW,Cin) -> (Cout, 9*Cin), tap-major K
            wf = jnp.transpose(w, (0, 2, 3, 1)).reshape(C, 9 * C) * s[:, None]
            wres.append(wf)
            bres.append(bb)

    return dict(
        w0=w0,                                                # (C, CIN)
        b0=b0.reshape(C, 1),                                  # (C, 1)
        wres=jnp.stack(wres),                                 # (6, C, 9C)
        bres=jnp.stack(bres).reshape(num_res_blocks * 2, C, 1),
    )


# ---------------------------------------------------------------------------
# Pure-JAX reference (lax convolutions on the same folded params).
# ---------------------------------------------------------------------------
def ref_forward(x_nchw, params):
    x = jnp.transpose(x_nchw, (0, 2, 3, 1)).astype(jnp.float32)   # NHWC
    C = params["w0"].shape[0]
    dn = ("NHWC", "HWIO", "NHWC")

    w0_hwio = jnp.transpose(params["w0"], (1, 0)).reshape(1, 1, -1, C)
    h = jax.lax.conv_general_dilated(x, w0_hwio, (1, 1), "VALID",
                                     dimension_numbers=dn, precision=_HIGHEST)
    h = jnp.maximum(h + params["b0"].reshape(1, 1, 1, C), 0.0)

    nb = params["wres"].shape[0] // 2
    for blk in range(nb):
        res = h
        cur = h
        for ci in range(2):
            j = blk * 2 + ci
            w = jnp.transpose(params["wres"][j].reshape(C, 3, 3, C), (1, 2, 3, 0))
            y = jax.lax.conv_general_dilated(cur, w, (1, 1), "SAME",
                                             dimension_numbers=dn,
                                             precision=_HIGHEST)
            y = y + params["bres"][j].reshape(1, 1, 1, C)
            cur = jnp.maximum(y, 0.0) if ci == 0 else y
        h = jnp.maximum(cur + res, 0.0)

    state = jnp.transpose(h, (0, 3, 1, 2))
    reward = jnp.zeros((x.shape[0], 1), jnp.float32)
    return state, reward


if __name__ == "__main__":
    key = jax.random.PRNGKey(0)
    k_param, k_x = jax.random.split(key)

    # Input: (batch=2, action_channels + res_block_channels = 40, 8, 8), NCHW.
    x = jax.random.normal(k_x, (2, 40, 8, 8), jnp.float32)
    params = make_params(k_param)

    state, reward = dynamics_net_forward(x, params)
    jax.block_until_ready(state)
    jax.block_until_ready(reward)

    # correctness check against the pure-JAX reference
    state_ref, reward_ref = ref_forward(x, params)
    err = float(jnp.max(jnp.abs(state - state_ref)))
    assert err < 1e-3, f"state mismatch, max abs err = {err}"
    assert reward.shape == (2, 1) and float(jnp.max(jnp.abs(reward))) == 0.0

    print("KERNEL_OK")
</pallas_src>

<mosaic_0001>
module attributes {stable_mosaic.version = 11 : i64} {
  func.func @_roll_probe_kernel(%arg0: memref<8x128xf32, #tpu.memory_space<vmem>>, %arg1: memref<8x128xf32, #tpu.memory_space<vmem>>) attributes {dimension_semantics = [], scalar_prefetch = 0 : i64, scratch_operands = 0 : i64, tpu.core_type = #tpu.core_type<tc>} {
    %c0 = arith.constant 0 : index
    %c0_0 = arith.constant 0 : index
    %0 = vector.load %arg0[%c0, %c0_0] : memref<8x128xf32, #tpu.memory_space<vmem>>, vector<8x128xf32>
    %c1_i32 = arith.constant 1 : i32
    %1 = tpu.dynamic_rotate %0 by %c1_i32 dim 1 : vector<8x128xf32>, i32 -> vector<8x128xf32>
    %c0_1 = arith.constant 0 : index
    %c0_2 = arith.constant 0 : index
    %2 = vector.load %arg1[%c0_1, %c0_2] : memref<8x128xf32, #tpu.memory_space<vmem>>, vector<8x128xf32>
    tpu.vector_store %arg1[%c0_1, %c0_2], %1 {strides = array<i32>} : memref<8x128xf32, #tpu.memory_space<vmem>>, vector<8x128xf32>,
    return
  }
}

module attributes {stable_mosaic.version = 11 : i64} {
  func.func @_mstore_probe_kernel(%arg0: memref<8x128xf32, #tpu.memory_space<vmem>>, %arg1: memref<8x128xf32, #tpu.memory_space<vmem>>, %arg2: memref<16x128xf32, #tpu.memory_space<vmem>>) attributes {dimension_semantics = [], scalar_prefetch = 0 : i64, scratch_operands = 1 : i64, tpu.core_type = #tpu.core_type<tc>} {
    %cst = arith.constant 0.000000e+00 : f32
    %0 = vector.broadcast %cst : f32 to vector<16x128xf32>
    %c0 = arith.constant 0 : index
    %c0_0 = arith.constant 0 : index
    %1 = vector.load %arg2[%c0, %c0_0] : memref<16x128xf32, #tpu.memory_space<vmem>>, vector<16x128xf32>
    tpu.vector_store %arg2[%c0, %c0_0], %0 {strides = array<i32>} : memref<16x128xf32, #tpu.memory_space<vmem>>, vector<16x128xf32>,
    %2 = tpu.iota {dimensions = array<i32: 1>} : vector<1x128xi32>
    %c64_i32 = arith.constant 64 : i32
    %3 = vector.broadcast %c64_i32 : i32 to vector<1x128xi32>
    %4 = arith.cmpi slt, %2, %3 : vector<1x128xi32>
    %5 = vector.shape_cast %4 : vector<1x128xi1> to vector<1x128xi1>
    %6 = vector.broadcast %5 : vector<1x128xi1> to vector<8x128xi1>
    %c0_1 = arith.constant 0 : index
    %c0_2 = arith.constant 0 : index
    %7 = vector.load %arg0[%c0_1, %c0_2] : memref<8x128xf32, #tpu.memory_space<vmem>>, vector<8x128xf32>
    %c8 = arith.constant 8 : index
    %c0_3 = arith.constant 0 : index
    %8 = vector.load %arg2[%c8, %c0_3] : memref<16x128xf32, #tpu.memory_space<vmem>>, vector<8x128xf32>
    tpu.vector_store %arg2[%c8, %c0_3], %7 masked %6 {strides = array<i32>} : memref<16x128xf32, #tpu.memory_space<vmem>>, vector<8x128xf32>, vector<8x128xi1>
    %c8_4 = arith.constant 8 : index
    %c0_5 = arith.constant 0 : index
    %9 = vector.load %arg2[%c8_4, %c0_5] : memref<16x128xf32, #tpu.memory_space<vmem>>, vector<8x128xf32>
    %c0_6 = arith.constant 0 : index
    %c0_7 = arith.constant 0 : index
    %10 = vector.load %arg1[%c0_6, %c0_7] : memref<8x128xf32, #tpu.memory_space<vmem>>, vector<8x128xf32>
    tpu.vector_store %arg1[%c0_6, %c0_7], %9 {strides = array<i32>} : memref<8x128xf32, #tpu.memory_space<vmem>>, vector<8x128xf32>,
    return
  }
}

module attributes {stable_mosaic.version = 11 : i64} {
  func.func @kernel(%arg0: memref<40x128xf32, #tpu.memory_space<vmem>>, %arg1: memref<32x40xf32, #tpu.memory_space<vmem>>, %arg2: memref<32x1xf32, #tpu.memory_space<vmem>>, %arg3: memref<6x32x288xf32, #tpu.memory_space<vmem>>, %arg4: memref<6x32x1xf32, #tpu.memory_space<vmem>>, %arg5: memref<32x128xf32, #tpu.memory_space<vmem>>, %arg6: memref<288x128xf32, #tpu.memory_space<vmem>>) attributes {dimension_semantics = [], scalar_prefetch = 0 : i64, scratch_operands = 1 : i64, tpu.core_type = #tpu.core_type<tc>} {
    %0 = tpu.iota {dimensions = array<i32: 1>} : vector<1x128xi32>
    %c7_i32 = arith.constant 7 : i32
    %1 = vector.broadcast %c7_i32 : i32 to vector<1x128xi32>
    %2 = arith.andi %0, %1 : vector<1x128xi32>
    %c3_i32 = arith.constant 3 : i32
    %3 = vector.broadcast %c3_i32 : i32 to vector<1x128xi32>
    %4 = arith.shrsi %0, %3 : vector<1x128xi32>
    %c7_i32_0 = arith.constant 7 : i32
    %5 = vector.broadcast %c7_i32_0 : i32 to vector<1x128xi32>
    %6 = arith.andi %4, %5 : vector<1x128xi32>
    %c-1_i32 = arith.constant -1 : i32
    %7 = vector.broadcast %c-1_i32 : i32 to vector<1x128xi32>
    %8 = arith.addi %6, %7 : vector<1x128xi32>
    %c0_i32 = arith.constant 0 : i32
    %9 = vector.broadcast %c0_i32 : i32 to vector<1x128xi32>
    %10 = arith.cmpi sge, %8, %9 : vector<1x128xi32>
    %c-1_i32_1 = arith.constant -1 : i32
    %11 = vector.broadcast %c-1_i32_1 : i32 to vector<1x128xi32>
    %12 = arith.addi %6, %11 : vector<1x128xi32>
    %c8_i32 = arith.constant 8 : i32
    %13 = vector.broadcast %c8_i32 : i32 to vector<1x128xi32>
    %14 = arith.cmpi slt, %12, %13 : vector<1x128xi32>
    %15 = arith.andi %10, %14 : vector<1x128xi1>
    %c-1_i32_2 = arith.constant -1 : i32
    %16 = vector.broadcast %c-1_i32_2 : i32 to vector<1x128xi32>
    %17 = arith.addi %2, %16 : vector<1x128xi32>
    %c0_i32_3 = arith.constant 0 : i32
    %18 = vector.broadcast %c0_i32_3 : i32 to vector<1x128xi32>
    %19 = arith.cmpi sge, %17, %18 : vector<1x128xi32>
    %20 = arith.andi %15, %19 : vector<1x128xi1>
    %c-1_i32_4 = arith.constant -1 : i32
    %21 = vector.broadcast %c-1_i32_4 : i32 to vector<1x128xi32>
    %22 = arith.addi %2, %21 : vector<1x128xi32>
    %c8_i32_5 = arith.constant 8 : i32
    %23 = vector.broadcast %c8_i32_5 : i32 to vector<1x128xi32>
    %24 = arith.cmpi slt, %22, %23 : vector<1x128xi32>
    %25 = arith.andi %20, %24 : vector<1x128xi1>
    %26 = arith.extui %25 : vector<1x128xi1> to vector<1x128xi32>
    %27 = arith.sitofp %26 : vector<1x128xi32> to vector<1x128xf32>
    %c-1_i32_6 = arith.constant -1 : i32
    %28 = vector.broadcast %c-1_i32_6 : i32 to vector<1x128xi32>
    %29 = arith.addi %6, %28 : vector<1x128xi32>
    %c0_i32_7 = arith.constant 0 : i32
    %30 = vector.broadcast %c0_i32_7 : i32 to vector<1x128xi32>
    %31 = arith.cmpi sge, %29, %30 : vector<1x128xi32>
    %c-1_i32_8 = arith.constant -1 : i32
    %32 = vector.broadcast %c-1_i32_8 : i32 to vector<1x128xi32>
    %33 = arith.addi %6, %32 : vector<1x128xi32>
    %c8_i32_9 = arith.constant 8 : i32
    %34 = vector.broadcast %c8_i32_9 : i32 to vector<1x128xi32>
    %35 = arith.cmpi slt, %33, %34 : vector<1x128xi32>
    %36 = arith.andi %31, %35 : vector<1x128xi1>
    %c0_i32_10 = arith.constant 0 : i32
    %37 = vector.broadcast %c0_i32_10 : i32 to vector<1x128xi32>
    %38 = arith.addi %2, %37 : vector<1x128xi32>
    %c0_i32_11 = arith.constant 0 : i32
    %39 = vector.broadcast %c0_i32_11 : i32 to vector<1x128xi32>
    %40 = arith.cmpi sge, %38, %39 : vector<1x128xi32>
    %41 = arith.andi %36, %40 : vector<1x128xi1>
    %c0_i32_12 = arith.constant 0 : i32
    %42 = vector.broadcast %c0_i32_12 : i32 to vector<1x128xi32>
    %43 = arith.addi %2, %42 : vector<1x128xi32>
    %c8_i32_13 = arith.constant 8 : i32
    %44 = vector.broadcast %c8_i32_13 : i32 to vector<1x128xi32>
    %45 = arith.cmpi slt, %43, %44 : vector<1x128xi32>
    %46 = arith.andi %41, %45 : vector<1x128xi1>
    %47 = arith.extui %46 : vector<1x128xi1> to vector<1x128xi32>
    %48 = arith.sitofp %47 : vector<1x128xi32> to vector<1x128xf32>
    %c-1_i32_14 = arith.constant -1 : i32
    %49 = vector.broadcast %c-1_i32_14 : i32 to vector<1x128xi32>
    %50 = arith.addi %6, %49 : vector<1x128xi32>
    %c0_i32_15 = arith.constant 0 : i32
    %51 = vector.broadcast %c0_i32_15 : i32 to vector<1x128xi32>
    %52 = arith.cmpi sge, %50, %51 : vector<1x128xi32>
    %c-1_i32_16 = arith.constant -1 : i32
    %53 = vector.broadcast %c-1_i32_16 : i32 to vector<1x128xi32>
    %54 = arith.addi %6, %53 : vector<1x128xi32>
    %c8_i32_17 = arith.constant 8 : i32
    %55 = vector.broadcast %c8_i32_17 : i32 to vector<1x128xi32>
    %56 = arith.cmpi slt, %54, %55 : vector<1x128xi32>
    %57 = arith.andi %52, %56 : vector<1x128xi1>
    %c1_i32 = arith.constant 1 : i32
    %58 = vector.broadcast %c1_i32 : i32 to vector<1x128xi32>
    %59 = arith.addi %2, %58 : vector<1x128xi32>
    %c0_i32_18 = arith.constant 0 : i32
    %60 = vector.broadcast %c0_i32_18 : i32 to vector<1x128xi32>
    %61 = arith.cmpi sge, %59, %60 : vector<1x128xi32>
    %62 = arith.andi %57, %61 : vector<1x128xi1>
    %c1_i32_19 = arith.constant 1 : i32
    %63 = vector.broadcast %c1_i32_19 : i32 to vector<1x128xi32>
    %64 = arith.addi %2, %63 : vector<1x128xi32>
    %c8_i32_20 = arith.constant 8 : i32
    %65 = vector.broadcast %c8_i32_20 : i32 to vector<1x128xi32>
    %66 = arith.cmpi slt, %64, %65 : vector<1x128xi32>
    %67 = arith.andi %62, %66 : vector<1x128xi1>
    %68 = arith.extui %67 : vector<1x128xi1> to vector<1x128xi32>
    %69 = arith.sitofp %68 : vector<1x128xi32> to vector<1x128xf32>
    %c0_i32_21 = arith.constant 0 : i32
    %70 = vector.broadcast %c0_i32_21 : i32 to vector<1x128xi32>
    %71 = arith.addi %6, %70 : vector<1x128xi32>
    %c0_i32_22 = arith.constant 0 : i32
    %72 = vector.broadcast %c0_i32_22 : i32 to vector<1x128xi32>
    %73 = arith.cmpi sge, %71, %72 : vector<1x128xi32>
    %c0_i32_23 = arith.constant 0 : i32
    %74 = vector.broadcast %c0_i32_23 : i32 to vector<1x128xi32>
    %75 = arith.addi %6, %74 : vector<1x128xi32>
    %c8_i32_24 = arith.constant 8 : i32
    %76 = vector.broadcast %c8_i32_24 : i32 to vector<1x128xi32>
    %77 = arith.cmpi slt, %75, %76 : vector<1x128xi32>
    %78 = arith.andi %73, %77 : vector<1x128xi1>
    %c-1_i32_25 = arith.constant -1 : i32
    %79 = vector.broadcast %c-1_i32_25 : i32 to vector<1x128xi32>
    %80 = arith.addi %2, %79 : vector<1x128xi32>
    %c0_i32_26 = arith.constant 0 : i32
    %81 = vector.broadcast %c0_i32_26 : i32 to vector<1x128xi32>
    %82 = arith.cmpi sge, %80, %81 : vector<1x128xi32>
    %83 = arith.andi %78, %82 : vector<1x128xi1>
    %c-1_i32_27 = arith.constant -1 : i32
    %84 = vector.broadcast %c-1_i32_27 : i32 to vector<1x128xi32>
    %85 = arith.addi %2, %84 : vector<1x128xi32>
    %c8_i32_28 = arith.constant 8 : i32
    %86 = vector.broadcast %c8_i32_28 : i32 to vector<1x128xi32>
    %87 = arith.cmpi slt, %85, %86 : vector<1x128xi32>
    %88 = arith.andi %83, %87 : vector<1x128xi1>
    %89 = arith.extui %88 : vector<1x128xi1> to vector<1x128xi32>
    %90 = arith.sitofp %89 : vector<1x128xi32> to vector<1x128xf32>
    %c0_i32_29 = arith.constant 0 : i32
    %91 = vector.broadcast %c0_i32_29 : i32 to vector<1x128xi32>
    %92 = arith.addi %6, %91 : vector<1x128xi32>
    %c0_i32_30 = arith.constant 0 : i32
    %93 = vector.broadcast %c0_i32_30 : i32 to vector<1x128xi32>
    %94 = arith.cmpi sge, %92, %93 : vector<1x128xi32>
    %c0_i32_31 = arith.constant 0 : i32
    %95 = vector.broadcast %c0_i32_31 : i32 to vector<1x128xi32>
    %96 = arith.addi %6, %95 : vector<1x128xi32>
    %c8_i32_32 = arith.constant 8 : i32
    %97 = vector.broadcast %c8_i32_32 : i32 to vector<1x128xi32>
    %98 = arith.cmpi slt, %96, %97 : vector<1x128xi32>
    %99 = arith.andi %94, %98 : vector<1x128xi1>
    %c1_i32_33 = arith.constant 1 : i32
    %100 = vector.broadcast %c1_i32_33 : i32 to vector<1x128xi32>
    %101 = arith.addi %2, %100 : vector<1x128xi32>
    %c0_i32_34 = arith.constant 0 : i32
    %102 = vector.broadcast %c0_i32_34 : i32 to vector<1x128xi32>
    %103 = arith.cmpi sge, %101, %102 : vector<1x128xi32>
    %104 = arith.andi %99, %103 : vector<1x128xi1>
    %c1_i32_35 = arith.constant 1 : i32
    %105 = vector.broadcast %c1_i32_35 : i32 to vector<1x128xi32>
    %106 = arith.addi %2, %105 : vector<1x128xi32>
    %c8_i32_36 = arith.constant 8 : i32
    %107 = vector.broadcast %c8_i32_36 : i32 to vector<1x128xi32>
    %108 = arith.cmpi slt, %106, %107 : vector<1x128xi32>
    %109 = arith.andi %104, %108 : vector<1x128xi1>
    %110 = arith.extui %109 : vector<1x128xi1> to vector<1x128xi32>
    %111 = arith.sitofp %110 : vector<1x128xi32> to vector<1x128xf32>
    %c1_i32_37 = arith.constant 1 : i32
    %112 = vector.broadcast %c1_i32_37 : i32 to vector<1x128xi32>
    %113 = arith.addi %6, %112 : vector<1x128xi32>
    %c0_i32_38 = arith.constant 0 : i32
    %114 = vector.broadcast %c0_i32_38 : i32 to vector<1x128xi32>
    %115 = arith.cmpi sge, %113, %114 : vector<1x128xi32>
    %c1_i32_39 = arith.constant 1 : i32
    %116 = vector.broadcast %c1_i32_39 : i32 to vector<1x128xi32>
    %117 = arith.addi %6, %116 : vector<1x128xi32>
    %c8_i32_40 = arith.constant 8 : i32
    %118 = vector.broadcast %c8_i32_40 : i32 to vector<1x128xi32>
    %119 = arith.cmpi slt, %117, %118 : vector<1x128xi32>
    %120 = arith.andi %115, %119 : vector<1x128xi1>
    %c-1_i32_41 = arith.constant -1 : i32
    %121 = vector.broadcast %c-1_i32_41 : i32 to vector<1x128xi32>
    %122 = arith.addi %2, %121 : vector<1x128xi32>
    %c0_i32_42 = arith.constant 0 : i32
    %123 = vector.broadcast %c0_i32_42 : i32 to vector<1x128xi32>
    %124 = arith.cmpi sge, %122, %123 : vector<1x128xi32>
    %125 = arith.andi %120, %124 : vector<1x128xi1>
    %c-1_i32_43 = arith.constant -1 : i32
    %126 = vector.broadcast %c-1_i32_43 : i32 to vector<1x128xi32>
    %127 = arith.addi %2, %126 : vector<1x128xi32>
    %c8_i32_44 = arith.constant 8 : i32
    %128 = vector.broadcast %c8_i32_44 : i32 to vector<1x128xi32>
    %129 = arith.cmpi slt, %127, %128 : vector<1x128xi32>
    %130 = arith.andi %125, %129 : vector<1x128xi1>
    %131 = arith.extui %130 : vector<1x128xi1> to vector<1x128xi32>
    %132 = arith.sitofp %131 : vector<1x128xi32> to vector<1x128xf32>
    %c1_i32_45 = arith.constant 1 : i32
    %133 = vector.broadcast %c1_i32_45 : i32 to vector<1x128xi32>
    %134 = arith.addi %6, %133 : vector<1x128xi32>
    %c0_i32_46 = arith.constant 0 : i32
    %135 = vector.broadcast %c0_i32_46 : i32 to vector<1x128xi32>
    %136 = arith.cmpi sge, %134, %135 : vector<1x128xi32>
    %c1_i32_47 = arith.constant 1 : i32
    %137 = vector.broadcast %c1_i32_47 : i32 to vector<1x128xi32>
    %138 = arith.addi %6, %137 : vector<1x128xi32>
    %c8_i32_48 = arith.constant 8 : i32
    %139 = vector.broadcast %c8_i32_48 : i32 to vector<1x128xi32>
    %140 = arith.cmpi slt, %138, %139 : vector<1x128xi32>
    %141 = arith.andi %136, %140 : vector<1x128xi1>
    %c0_i32_49 = arith.constant 0 : i32
    %142 = vector.broadcast %c0_i32_49 : i32 to vector<1x128xi32>
    %143 = arith.addi %2, %142 : vector<1x128xi32>
    %c0_i32_50 = arith.constant 0 : i32
    %144 = vector.broadcast %c0_i32_50 : i32 to vector<1x128xi32>
    %145 = arith.cmpi sge, %143, %144 : vector<1x128xi32>
    %146 = arith.andi %141, %145 : vector<1x128xi1>
    %c0_i32_51 = arith.constant 0 : i32
    %147 = vector.broadcast %c0_i32_51 : i32 to vector<1x128xi32>
    %148 = arith.addi %2, %147 : vector<1x128xi32>
    %c8_i32_52 = arith.constant 8 : i32
    %149 = vector.broadcast %c8_i32_52 : i32 to vector<1x128xi32>
    %150 = arith.cmpi slt, %148, %149 : vector<1x128xi32>
    %151 = arith.andi %146, %150 : vector<1x128xi1>
    %152 = arith.extui %151 : vector<1x128xi1> to vector<1x128xi32>
    %153 = arith.sitofp %152 : vector<1x128xi32> to vector<1x128xf32>
    %c1_i32_53 = arith.constant 1 : i32
    %154 = vector.broadcast %c1_i32_53 : i32 to vector<1x128xi32>
    %155 = arith.addi %6, %154 : vector<1x128xi32>
    %c0_i32_54 = arith.constant 0 : i32
    %156 = vector.broadcast %c0_i32_54 : i32 to vector<1x128xi32>
    %157 = arith.cmpi sge, %155, %156 : vector<1x128xi32>
    %c1_i32_55 = arith.constant 1 : i32
    %158 = vector.broadcast %c1_i32_55 : i32 to vector<1x128xi32>
    %159 = arith.addi %6, %158 : vector<1x128xi32>
    %c8_i32_56 = arith.constant 8 : i32
    %160 = vector.broadcast %c8_i32_56 : i32 to vector<1x128xi32>
    %161 = arith.cmpi slt, %159, %160 : vector<1x128xi32>
    %162 = arith.andi %157, %161 : vector<1x128xi1>
    %c1_i32_57 = arith.constant 1 : i32
    %163 = vector.broadcast %c1_i32_57 : i32 to vector<1x128xi32>
    %164 = arith.addi %2, %163 : vector<1x128xi32>
    %c0_i32_58 = arith.constant 0 : i32
    %165 = vector.broadcast %c0_i32_58 : i32 to vector<1x128xi32>
    %166 = arith.cmpi sge, %164, %165 : vector<1x128xi32>
    %167 = arith.andi %162, %166 : vector<1x128xi1>
    %c1_i32_59 = arith.constant 1 : i32
    %168 = vector.broadcast %c1_i32_59 : i32 to vector<1x128xi32>
    %169 = arith.addi %2, %168 : vector<1x128xi32>
    %c8_i32_60 = arith.constant 8 : i32
    %170 = vector.broadcast %c8_i32_60 : i32 to vector<1x128xi32>
    %171 = arith.cmpi slt, %169, %170 : vector<1x128xi32>
    %172 = arith.andi %167, %171 : vector<1x128xi1>
    %173 = arith.extui %172 : vector<1x128xi1> to vector<1x128xi32>
    %174 = arith.sitofp %173 : vector<1x128xi32> to vector<1x128xf32>
    %c0 = arith.constant 0 : index
    %c0_61 = arith.constant 0 : index
    %175 = vector.load %arg1[%c0, %c0_61] : memref<32x40xf32, #tpu.memory_space<vmem>>, vector<32x40xf32>
    %c0_62 = arith.constant 0 : index
    %c0_63 = arith.constant 0 : index
    %176 = vector.load %arg0[%c0_62, %c0_63] : memref<40x128xf32, #tpu.memory_space<vmem>>, vector<40x128xf32>
    %cst = arith.constant dense<0.000000e+00> : vector<32x128xf32>
    %177 = tpu.matmul %175, %176, %cst {dimension_numbers = #tpu.dot_dimension_numbers<[1], [0], [0], [1], [0, 0, 1, 1], [], []>, precision = #tpu.contract_precision<fp32>} : vector<32x40xf32>, vector<40x128xf32>, vector<32x128xf32> -> vector<32x128xf32>
    %c0_64 = arith.constant 0 : index
    %c0_65 = arith.constant 0 : index
    %178 = vector.load %arg2[%c0_64, %c0_65] : memref<32x1xf32, #tpu.memory_space<vmem>>, vector<32x1xf32>
    %179 = vector.broadcast %178 : vector<32x1xf32> to vector<32x128xf32>
    %180 = arith.addf %177, %179 : vector<32x128xf32>
    %cst_66 = arith.constant 0.000000e+00 : f32
    %181 = vector.broadcast %cst_66 : f32 to vector<32x128xf32>
    %182 = arith.maximumf %180, %181 : vector<32x128xf32>
    %183 = vector.extract_strided_slice %182 {offsets = [0, 119], sizes = [32, 9], strides = [1, 1]} : vector<32x128xf32> to vector<32x9xf32>
    %184 = vector.extract_strided_slice %182 {offsets = [0, 0], sizes = [32, 119], strides = [1, 1]} : vector<32x128xf32> to vector<32x119xf32>
    %185 = tpu.concatenate %183, %184 in 1 : vector<32x9xf32>, vector<32x119xf32> -> vector<32x128xf32>
    %186 = vector.broadcast %27 : vector<1x128xf32> to vector<32x128xf32>
    %187 = arith.mulf %185, %186 : vector<32x128xf32>
    %c0_67 = arith.constant 0 : index
    %c0_68 = arith.constant 0 : index
    %188 = vector.load %arg6[%c0_67, %c0_68] : memref<288x128xf32, #tpu.memory_space<vmem>>, vector<32x128xf32>
    tpu.vector_store %arg6[%c0_67, %c0_68], %187 {strides = array<i32>} : memref<288x128xf32, #tpu.memory_space<vmem>>, vector<32x128xf32>,
    %189 = vector.extract_strided_slice %182 {offsets = [0, 120], sizes = [32, 8], strides = [1, 1]} : vector<32x128xf32> to vector<32x8xf32>
    %190 = vector.extract_strided_slice %182 {offsets = [0, 0], sizes = [32, 120], strides = [1, 1]} : vector<32x128xf32> to vector<32x120xf32>
    %191 = tpu.concatenate %189, %190 in 1 : vector<32x8xf32>, vector<32x120xf32> -> vector<32x128xf32>
    %192 = vector.broadcast %48 : vector<1x128xf32> to vector<32x128xf32>
    %193 = arith.mulf %191, %192 : vector<32x128xf32>
    %c32 = arith.constant 32 : index
    %c0_69 = arith.constant 0 : index
    %194 = vector.load %arg6[%c32, %c0_69] : memref<288x128xf32, #tpu.memory_space<vmem>>, vector<32x128xf32>
    tpu.vector_store %arg6[%c32, %c0_69], %193 {strides = array<i32>} : memref<288x128xf32, #tpu.memory_space<vmem>>, vector<32x128xf32>,
    %195 = vector.extract_strided_slice %182 {offsets = [0, 121], sizes = [32, 7], strides = [1, 1]} : vector<32x128xf32> to vector<32x7xf32>
    %196 = vector.extract_strided_slice %182 {offsets = [0, 0], sizes = [32, 121], strides = [1, 1]} : vector<32x128xf32> to vector<32x121xf32>
    %197 = tpu.concatenate %195, %196 in 1 : vector<32x7xf32>, vector<32x121xf32> -> vector<32x128xf32>
    %198 = vector.broadcast %69 : vector<1x128xf32> to vector<32x128xf32>
    %199 = arith.mulf %197, %198 : vector<32x128xf32>
    %c64 = arith.constant 64 : index
    %c0_70 = arith.constant 0 : index
    %200 = vector.load %arg6[%c64, %c0_70] : memref<288x128xf32, #tpu.memory_space<vmem>>, vector<32x128xf32>
    tpu.vector_store %arg6[%c64, %c0_70], %199 {strides = array<i32>} : memref<288x128xf32, #tpu.memory_space<vmem>>, vector<32x128xf32>,
    %201 = vector.extract_strided_slice %182 {offsets = [0, 127], sizes = [32, 1], strides = [1, 1]} : vector<32x128xf32> to vector<32x1xf32>
    %202 = vector.extract_strided_slice %182 {offsets = [0, 0], sizes = [32, 127], strides = [1, 1]} : vector<32x128xf32> to vector<32x127xf32>
    %203 = tpu.concatenate %201, %202 in 1 : vector<32x1xf32>, vector<32x127xf32> -> vector<32x128xf32>
    %204 = vector.broadcast %90 : vector<1x128xf32> to vector<32x128xf32>
    %205 = arith.mulf %203, %204 : vector<32x128xf32>
    %c96 = arith.constant 96 : index
    %c0_71 = arith.constant 0 : index
    %206 = vector.load %arg6[%c96, %c0_71] : memref<288x128xf32, #tpu.memory_space<vmem>>, vector<32x128xf32>
    tpu.vector_store %arg6[%c96, %c0_71], %205 {strides = array<i32>} : memref<288x128xf32, #tpu.memory_space<vmem>>, vector<32x128xf32>,
    %c128 = arith.constant 128 : index
    %c0_72 = arith.constant 0 : index
    %207 = vector.load %arg6[%c128, %c0_72] : memref<288x128xf32, #tpu.memory_space<vmem>>, vector<32x128xf32>
    tpu.vector_store %arg6[%c128, %c0_72], %182 {strides = array<i32>} : memref<288x128xf32, #tpu.memory_space<vmem>>, vector<32x128xf32>,
    %208 = vector.extract_strided_slice %182 {offsets = [0, 1], sizes = [32, 127], strides = [1, 1]} : vector<32x128xf32> to vector<32x127xf32>
    %209 = vector.extract_strided_slice %182 {offsets = [0, 0], sizes = [32, 1], strides = [1, 1]} : vector<32x128xf32> to vector<32x1xf32>
    %210 = tpu.concatenate %208, %209 in 1 : vector<32x127xf32>, vector<32x1xf32> -> vector<32x128xf32>
    %211 = vector.broadcast %111 : vector<1x128xf32> to vector<32x128xf32>
    %212 = arith.mulf %210, %211 : vector<32x128xf32>
    %c160 = arith.constant 160 : index
    %c0_73 = arith.constant 0 : index
    %213 = vector.load %arg6[%c160, %c0_73] : memref<288x128xf32, #tpu.memory_space<vmem>>, vector<32x128xf32>
    tpu.vector_store %arg6[%c160, %c0_73], %212 {strides = array<i32>} : memref<288x128xf32, #tpu.memory_space<vmem>>, vector<32x128xf32>,
    %214 = vector.extract_strided_slice %182 {offsets = [0, 7], sizes = [32, 121], strides = [1, 1]} : vector<32x128xf32> to vector<32x121xf32>
    %215 = vector.extract_strided_slice %182 {offsets = [0, 0], sizes = [32, 7], strides = [1, 1]} : vector<32x128xf32> to vector<32x7xf32>
    %216 = tpu.concatenate %214, %215 in 1 : vector<32x121xf32>, vector<32x7xf32> -> vector<32x128xf32>
    %217 = vector.broadcast %132 : vector<1x128xf32> to vector<32x128xf32>
    %218 = arith.mulf %216, %217 : vector<32x128xf32>
    %c192 = arith.constant 192 : index
    %c0_74 = arith.constant 0 : index
    %219 = vector.load %arg6[%c192, %c0_74] : memref<288x128xf32, #tpu.memory_space<vmem>>, vector<32x128xf32>
    tpu.vector_store %arg6[%c192, %c0_74], %218 {strides = array<i32>} : memref<288x128xf32, #tpu.memory_space<vmem>>, vector<32x128xf32>,
    %220 = vector.extract_strided_slice %182 {offsets = [0, 8], sizes = [32, 120], strides = [1, 1]} : vector<32x128xf32> to vector<32x120xf32>
    %221 = vector.extract_strided_slice %182 {offsets = [0, 0], sizes = [32, 8], strides = [1, 1]} : vector<32x128xf32> to vector<32x8xf32>
    %222 = tpu.concatenate %220, %221 in 1 : vector<32x120xf32>, vector<32x8xf32> -> vector<32x128xf32>
    %223 = vector.broadcast %153 : vector<1x128xf32> to vector<32x128xf32>
    %224 = arith.mulf %222, %223 : vector<32x128xf32>
    %c224 = arith.constant 224 : index
    %c0_75 = arith.constant 0 : index
    %225 = vector.load %arg6[%c224, %c0_75] : memref<288x128xf32, #tpu.memory_space<vmem>>, vector<32x128xf32>
    tpu.vector_store %arg6[%c224, %c0_75], %224 {strides = array<i32>} : memref<288x128xf32, #tpu.memory_space<vmem>>, vector<32x128xf32>,
    %226 = vector.extract_strided_slice %182 {offsets = [0, 9], sizes = [32, 119], strides = [1, 1]} : vector<32x128xf32> to vector<32x119xf32>
    %227 = vector.extract_strided_slice %182 {offsets = [0, 0], sizes = [32, 9], strides = [1, 1]} : vector<32x128xf32> to vector<32x9xf32>
    %228 = tpu.concatenate %226, %227 in 1 : vector<32x119xf32>, vector<32x9xf32> -> vector<32x128xf32>
    %229 = vector.broadcast %174 : vector<1x128xf32> to vector<32x128xf32>
    %230 = arith.mulf %228, %229 : vector<32x128xf32>
    %c256 = arith.constant 256 : index
    %c0_76 = arith.constant 0 : index
    %231 = vector.load %arg6[%c256, %c0_76] : memref<288x128xf32, #tpu.memory_space<vmem>>, vector<32x128xf32>
    tpu.vector_store %arg6[%c256, %c0_76], %230 {strides = array<i32>} : memref<288x128xf32, #tpu.memory_space<vmem>>, vector<32x128xf32>,
    %c0_77 = arith.constant 0 : index
    %c0_78 = arith.constant 0 : index
    %c0_79 = arith.constant 0 : index
    %232 = vector.load %arg3[%c0_77, %c0_78, %c0_79] : memref<6x32x288xf32, #tpu.memory_space<vmem>>, vector<1x32x288xf32>
    %233 = vector.shape_cast %232 : vector<1x32x288xf32> to vector<32x288xf32>
    %c0_80 = arith.constant 0 : index
    %c0_81 = arith.constant 0 : index
    %234 = vector.load %arg6[%c0_80, %c0_81] : memref<288x128xf32, #tpu.memory_space<vmem>>, vector<288x128xf32>
    %cst_82 = arith.constant dense<0.000000e+00> : vector<32x128xf32>
    %235 = tpu.matmul %233, %234, %cst_82 {dimension_numbers = #tpu.dot_dimension_numbers<[1], [0], [0], [1], [0, 0, 1, 1], [], []>, precision = #tpu.contract_precision<fp32>} : vector<32x288xf32>, vector<288x128xf32>, vector<32x128xf32> -> vector<32x128xf32>
    %c0_83 = arith.constant 0 : index
    %c0_84 = arith.constant 0 : index
    %c0_85 = arith.constant 0 : index
    %236 = vector.load %arg4[%c0_83, %c0_84, %c0_85] : memref<6x32x1xf32, #tpu.memory_space<vmem>>, vector<1x32x1xf32>
    %237 = vector.shape_cast %236 : vector<1x32x1xf32> to vector<32x1xf32>
    %238 = vector.broadcast %237 : vector<32x1xf32> to vector<32x128xf32>
    %239 = arith.addf %235, %238 : vector<32x128xf32>
    %cst_86 = arith.constant 0.000000e+00 : f32
    %240 = vector.broadcast %cst_86 : f32 to vector<32x128xf32>
    %241 = arith.maximumf %239, %240 : vector<32x128xf32>
    %242 = vector.extract_strided_slice %241 {offsets = [0, 119], sizes = [32, 9], strides = [1, 1]} : vector<32x128xf32> to vector<32x9xf32>
    %243 = vector.extract_strided_slice %241 {offsets = [0, 0], sizes = [32, 119], strides = [1, 1]} : vector<32x128xf32> to vector<32x119xf32>
    %244 = tpu.concatenate %242, %243 in 1 : vector<32x9xf32>, vector<32x119xf32> -> vector<32x128xf32>
    %245 = vector.broadcast %27 : vector<1x128xf32> to vector<32x128xf32>
    %246 = arith.mulf %244, %245 : vector<32x128xf32>
    %c0_87 = arith.constant 0 : index
    %c0_88 = arith.constant 0 : index
    %247 = vector.load %arg6[%c0_87, %c0_88] : memref<288x128xf32, #tpu.memory_space<vmem>>, vector<32x128xf32>
    tpu.vector_store %arg6[%c0_87, %c0_88], %246 {strides = array<i32>} : memref<288x128xf32, #tpu.memory_space<vmem>>, vector<32x128xf32>,
    %248 = vector.extract_strided_slice %241 {offsets = [0, 120], sizes = [32, 8], strides = [1, 1]} : vector<32x128xf32> to vector<32x8xf32>
    %249 = vector.extract_strided_slice %241 {offsets = [0, 0], sizes = [32, 120], strides = [1, 1]} : vector<32x128xf32> to vector<32x120xf32>
    %250 = tpu.concatenate %248, %249 in 1 : vector<32x8xf32>, vector<32x120xf32> -> vector<32x128xf32>
    %251 = vector.broadcast %48 : vector<1x128xf32> to vector<32x128xf32>
    %252 = arith.mulf %250, %251 : vector<32x128xf32>
    %c32_89 = arith.constant 32 : index
    %c0_90 = arith.constant 0 : index
    %253 = vector.load %arg6[%c32_89, %c0_90] : memref<288x128xf32, #tpu.memory_space<vmem>>, vector<32x128xf32>
    tpu.vector_store %arg6[%c32_89, %c0_90], %252 {strides = array<i32>} : memref<288x128xf32, #tpu.memory_space<vmem>>, vector<32x128xf32>,
    %254 = vector.extract_strided_slice %241 {offsets = [0, 121], sizes = [32, 7], strides = [1, 1]} : vector<32x128xf32> to vector<32x7xf32>
    %255 = vector.extract_strided_slice %241 {offsets = [0, 0], sizes = [32, 121], strides = [1, 1]} : vector<32x128xf32> to vector<32x121xf32>
    %256 = tpu.concatenate %254, %255 in 1 : vector<32x7xf32>, vector<32x121xf32> -> vector<32x128xf32>
    %257 = vector.broadcast %69 : vector<1x128xf32> to vector<32x128xf32>
    %258 = arith.mulf %256, %257 : vector<32x128xf32>
    %c64_91 = arith.constant 64 : index
    %c0_92 = arith.constant 0 : index
    %259 = vector.load %arg6[%c64_91, %c0_92] : memref<288x128xf32, #tpu.memory_space<vmem>>, vector<32x128xf32>
    tpu.vector_store %arg6[%c64_91, %c0_92], %258 {strides = array<i32>} : memref<288x128xf32, #tpu.memory_space<vmem>>, vector<32x128xf32>,
    %260 = vector.extract_strided_slice %241 {offsets = [0, 127], sizes = [32, 1], strides = [1, 1]} : vector<32x128xf32> to vector<32x1xf32>
    %261 = vector.extract_strided_slice %241 {offsets = [0, 0], sizes = [32, 127], strides = [1, 1]} : vector<32x128xf32> to vector<32x127xf32>
    %262 = tpu.concatenate %260, %261 in 1 : vector<32x1xf32>, vector<32x127xf32> -> vector<32x128xf32>
    %263 = vector.broadcast %90 : vector<1x128xf32> to vector<32x128xf32>
    %264 = arith.mulf %262, %263 : vector<32x128xf32>
    %c96_93 = arith.constant 96 : index
    %c0_94 = arith.constant 0 : index
    %265 = vector.load %arg6[%c96_93, %c0_94] : memref<288x128xf32, #tpu.memory_space<vmem>>, vector<32x128xf32>
    tpu.vector_store %arg6[%c96_93, %c0_94], %264 {strides = array<i32>} : memref<288x128xf32, #tpu.memory_space<vmem>>, vector<32x128xf32>,
    %c128_95 = arith.constant 128 : index
    %c0_96 = arith.constant 0 : index
    %266 = vector.load %arg6[%c128_95, %c0_96] : memref<288x128xf32, #tpu.memory_space<vmem>>, vector<32x128xf32>
    tpu.vector_store %arg6[%c128_95, %c0_96], %241 {strides = array<i32>} : memref<288x128xf32, #tpu.memory_space<vmem>>, vector<32x128xf32>,
    %267 = vector.extract_strided_slice %241 {offsets = [0, 1], sizes = [32, 127], strides = [1, 1]} : vector<32x128xf32> to vector<32x127xf32>
    %268 = vector.extract_strided_slice %241 {offsets = [0, 0], sizes = [32, 1], strides = [1, 1]} : vector<32x128xf32> to vector<32x1xf32>
    %269 = tpu.concatenate %267, %268 in 1 : vector<32x127xf32>, vector<32x1xf32> -> vector<32x128xf32>
    %270 = vector.broadcast %111 : vector<1x128xf32> to vector<32x128xf32>
    %271 = arith.mulf %269, %270 : vector<32x128xf32>
    %c160_97 = arith.constant 160 : index
    %c0_98 = arith.constant 0 : index
    %272 = vector.load %arg6[%c160_97, %c0_98] : memref<288x128xf32, #tpu.memory_space<vmem>>, vector<32x128xf32>
    tpu.vector_store %arg6[%c160_97, %c0_98], %271 {strides = array<i32>} : memref<288x128xf32, #tpu.memory_space<vmem>>, vector<32x128xf32>,
    %273 = vector.extract_strided_slice %241 {offsets = [0, 7], sizes = [32, 121], strides = [1, 1]} : vector<32x128xf32> to vector<32x121xf32>
    %274 = vector.extract_strided_slice %241 {offsets = [0, 0], sizes = [32, 7], strides = [1, 1]} : vector<32x128xf32> to vector<32x7xf32>
    %275 = tpu.concatenate %273, %274 in 1 : vector<32x121xf32>, vector<32x7xf32> -> vector<32x128xf32>
    %276 = vector.broadcast %132 : vector<1x128xf32> to vector<32x128xf32>
    %277 = arith.mulf %275, %276 : vector<32x128xf32>
    %c192_99 = arith.constant 192 : index
    %c0_100 = arith.constant 0 : index
    %278 = vector.load %arg6[%c192_99, %c0_100] : memref<288x128xf32, #tpu.memory_space<vmem>>, vector<32x128xf32>
    tpu.vector_store %arg6[%c192_99, %c0_100], %277 {strides = array<i32>} : memref<288x128xf32, #tpu.memory_space<vmem>>, vector<32x128xf32>,
    %279 = vector.extract_strided_slice %241 {offsets = [0, 8], sizes = [32, 120], strides = [1, 1]} : vector<32x128xf32> to vector<32x120xf32>
    %280 = vector.extract_strided_slice %241 {offsets = [0, 0], sizes = [32, 8], strides = [1, 1]} : vector<32x128xf32> to vector<32x8xf32>
    %281 = tpu.concatenate %279, %280 in 1 : vector<32x120xf32>, vector<32x8xf32> -> vector<32x128xf32>
    %282 = vector.broadcast %153 : vector<1x128xf32> to vector<32x128xf32>
    %283 = arith.mulf %281, %282 : vector<32x128xf32>
    %c224_101 = arith.constant 224 : index
    %c0_102 = arith.constant 0 : index
    %284 = vector.load %arg6[%c224_101, %c0_102] : memref<288x128xf32, #tpu.memory_space<vmem>>, vector<32x128xf32>
    tpu.vector_store %arg6[%c224_101, %c0_102], %283 {strides = array<i32>} : memref<288x128xf32, #tpu.memory_space<vmem>>, vector<32x128xf32>,
    %285 = vector.extract_strided_slice %241 {offsets = [0, 9], sizes = [32, 119], strides = [1, 1]} : vector<32x128xf32> to vector<32x119xf32>
    %286 = vector.extract_strided_slice %241 {offsets = [0, 0], sizes = [32, 9], strides = [1, 1]} : vector<32x128xf32> to vector<32x9xf32>
    %287 = tpu.concatenate %285, %286 in 1 : vector<32x119xf32>, vector<32x9xf32> -> vector<32x128xf32>
    %288 = vector.broadcast %174 : vector<1x128xf32> to vector<32x128xf32>
    %289 = arith.mulf %287, %288 : vector<32x128xf32>
    %c256_103 = arith.constant 256 : index
    %c0_104 = arith.constant 0 : index
    %290 = vector.load %arg6[%c256_103, %c0_104] : memref<288x128xf32, #tpu.memory_space<vmem>>, vector<32x128xf32>
    tpu.vector_store %arg6[%c256_103, %c0_104], %289 {strides = array<i32>} : memref<288x128xf32, #tpu.memory_space<vmem>>, vector<32x128xf32>,
    %c1 = arith.constant 1 : index
    %c0_105 = arith.constant 0 : index
    %c0_106 = arith.constant 0 : index
    %291 = vector.load %arg3[%c1, %c0_105, %c0_106] : memref<6x32x288xf32, #tpu.memory_space<vmem>>, vector<1x32x288xf32>
    %292 = vector.shape_cast %291 : vector<1x32x288xf32> to vector<32x288xf32>
    %c0_107 = arith.constant 0 : index
    %c0_108 = arith.constant 0 : index
    %293 = vector.load %arg6[%c0_107, %c0_108] : memref<288x128xf32, #tpu.memory_space<vmem>>, vector<288x128xf32>
    %cst_109 = arith.constant dense<0.000000e+00> : vector<32x128xf32>
    %294 = tpu.matmul %292, %293, %cst_109 {dimension_numbers = #tpu.dot_dimension_numbers<[1], [0], [0], [1], [0, 0, 1, 1], [], []>, precision = #tpu.contract_precision<fp32>} : vector<32x288xf32>, vector<288x128xf32>, vector<32x128xf32> -> vector<32x128xf32>
    %c1_110 = arith.constant 1 : index
    %c0_111 = arith.constant 0 : index
    %c0_112 = arith.constant 0 : index
    %295 = vector.load %arg4[%c1_110, %c0_111, %c0_112] : memref<6x32x1xf32, #tpu.memory_space<vmem>>, vector<1x32x1xf32>
    %296 = vector.shape_cast %295 : vector<1x32x1xf32> to vector<32x1xf32>
    %297 = vector.broadcast %296 : vector<32x1xf32> to vector<32x128xf32>
    %298 = arith.addf %294, %297 : vector<32x128xf32>
    %299 = arith.addf %298, %182 : vector<32x128xf32>
    %cst_113 = arith.constant 0.000000e+00 : f32
    %300 = vector.broadcast %cst_113 : f32 to vector<32x128xf32>
    %301 = arith.maximumf %299, %300 : vector<32x128xf32>
    %302 = vector.extract_strided_slice %301 {offsets = [0, 119], sizes = [32, 9], strides = [1, 1]} : vector<32x128xf32> to vector<32x9xf32>
    %303 = vector.extract_strided_slice %301 {offsets = [0, 0], sizes = [32, 119], strides = [1, 1]} : vector<32x128xf32> to vector<32x119xf32>
    %304 = tpu.concatenate %302, %303 in 1 : vector<32x9xf32>, vector<32x119xf32> -> vector<32x128xf32>
    %305 = vector.broadcast %27 : vector<1x128xf32> to vector<32x128xf32>
    %306 = arith.mulf %304, %305 : vector<32x128xf32>
    %c0_114 = arith.constant 0 : index
    %c0_115 = arith.constant 0 : index
    %307 = vector.load %arg6[%c0_114, %c0_115] : memref<288x128xf32, #tpu.memory_space<vmem>>, vector<32x128xf32>
    tpu.vector_store %arg6[%c0_114, %c0_115], %306 {strides = array<i32>} : memref<288x128xf32, #tpu.memory_space<vmem>>, vector<32x128xf32>,
    %308 = vector.extract_strided_slice %301 {offsets = [0, 120], sizes = [32, 8], strides = [1, 1]} : vector<32x128xf32> to vector<32x8xf32>
    %309 = vector.extract_strided_slice %301 {offsets = [0, 0], sizes = [32, 120], strides = [1, 1]} : vector<32x128xf32> to vector<32x120xf32>
    %310 = tpu.concatenate %308, %309 in 1 : vector<32x8xf32>, vector<32x120xf32> -> vector<32x128xf32>
    %311 = vector.broadcast %48 : vector<1x128xf32> to vector<32x128xf32>
    %312 = arith.mulf %310, %311 : vector<32x128xf32>
    %c32_116 = arith.constant 32 : index
    %c0_117 = arith.constant 0 : index
    %313 = vector.load %arg6[%c32_116, %c0_117] : memref<288x128xf32, #tpu.memory_space<vmem>>, vector<32x128xf32>
    tpu.vector_store %arg6[%c32_116, %c0_117], %312 {strides = array<i32>} : memref<288x128xf32, #tpu.memory_space<vmem>>, vector<32x128xf32>,
    %314 = vector.extract_strided_slice %301 {offsets = [0, 121], sizes = [32, 7], strides = [1, 1]} : vector<32x128xf32> to vector<32x7xf32>
    %315 = vector.extract_strided_slice %301 {offsets = [0, 0], sizes = [32, 121], strides = [1, 1]} : vector<32x128xf32> to vector<32x121xf32>
    %316 = tpu.concatenate %314, %315 in 1 : vector<32x7xf32>, vector<32x121xf32> -> vector<32x128xf32>
    %317 = vector.broadcast %69 : vector<1x128xf32> to vector<32x128xf32>
    %318 = arith.mulf %316, %317 : vector<32x128xf32>
    %c64_118 = arith.constant 64 : index
    %c0_119 = arith.constant 0 : index
    %319 = vector.load %arg6[%c64_118, %c0_119] : memref<288x128xf32, #tpu.memory_space<vmem>>, vector<32x128xf32>
    tpu.vector_store %arg6[%c64_118, %c0_119], %318 {strides = array<i32>} : memref<288x128xf32, #tpu.memory_space<vmem>>, vector<32x128xf32>,
    %320 = vector.extract_strided_slice %301 {offsets = [0, 127], sizes = [32, 1], strides = [1, 1]} : vector<32x128xf32> to vector<32x1xf32>
    %321 = vector.extract_strided_slice %301 {offsets = [0, 0], sizes = [32, 127], strides = [1, 1]} : vector<32x128xf32> to vector<32x127xf32>
    %322 = tpu.concatenate %320, %321 in 1 : vector<32x1xf32>, vector<32x127xf32> -> vector<32x128xf32>
    %323 = vector.broadcast %90 : vector<1x128xf32> to vector<32x128xf32>
    %324 = arith.mulf %322, %323 : vector<32x128xf32>
    %c96_120 = arith.constant 96 : index
    %c0_121 = arith.constant 0 : index
    %325 = vector.load %arg6[%c96_120, %c0_121] : memref<288x128xf32, #tpu.memory_space<vmem>>, vector<32x128xf32>
    tpu.vector_store %arg6[%c96_120, %c0_121], %324 {strides = array<i32>} : memref<288x128xf32, #tpu.memory_space<vmem>>, vector<32x128xf32>,
    %c128_122 = arith.constant 128 : index
    %c0_123 = arith.constant 0 : index
    %326 = vector.load %arg6[%c128_122, %c0_123] : memref<288x128xf32, #tpu.memory_space<vmem>>, vector<32x128xf32>
    tpu.vector_store %arg6[%c128_122, %c0_123], %301 {strides = array<i32>} : memref<288x128xf32, #tpu.memory_space<vmem>>, vector<32x128xf32>,
    %327 = vector.extract_strided_slice %301 {offsets = [0, 1], sizes = [32, 127], strides = [1, 1]} : vector<32x128xf32> to vector<32x127xf32>
    %328 = vector.extract_strided_slice %301 {offsets = [0, 0], sizes = [32, 1], strides = [1, 1]} : vector<32x128xf32> to vector<32x1xf32>
    %329 = tpu.concatenate %327, %328 in 1 : vector<32x127xf32>, vector<32x1xf32> -> vector<32x128xf32>
    %330 = vector.broadcast %111 : vector<1x128xf32> to vector<32x128xf32>
    %331 = arith.mulf %329, %330 : vector<32x128xf32>
    %c160_124 = arith.constant 160 : index
    %c0_125 = arith.constant 0 : index
    %332 = vector.load %arg6[%c160_124, %c0_125] : memref<288x128xf32, #tpu.memory_space<vmem>>, vector<32x128xf32>
    tpu.vector_store %arg6[%c160_124, %c0_125], %331 {strides = array<i32>} : memref<288x128xf32, #tpu.memory_space<vmem>>, vector<32x128xf32>,
    %333 = vector.extract_strided_slice %301 {offsets = [0, 7], sizes = [32, 121], strides = [1, 1]} : vector<32x128xf32> to vector<32x121xf32>
    %334 = vector.extract_strided_slice %301 {offsets = [0, 0], sizes = [32, 7], strides = [1, 1]} : vector<32x128xf32> to vector<32x7xf32>
    %335 = tpu.concatenate %333, %334 in 1 : vector<32x121xf32>, vector<32x7xf32> -> vector<32x128xf32>
    %336 = vector.broadcast %132 : vector<1x128xf32> to vector<32x128xf32>
    %337 = arith.mulf %335, %336 : vector<32x128xf32>
    %c192_126 = arith.constant 192 : index
    %c0_127 = arith.constant 0 : index
    %338 = vector.load %arg6[%c192_126, %c0_127] : memref<288x128xf32, #tpu.memory_space<vmem>>, vector<32x128xf32>
    tpu.vector_store %arg6[%c192_126, %c0_127], %337 {strides = array<i32>} : memref<288x128xf32, #tpu.memory_space<vmem>>, vector<32x128xf32>,
    %339 = vector.extract_strided_slice %301 {offsets = [0, 8], sizes = [32, 120], strides = [1, 1]} : vector<32x128xf32> to vector<32x120xf32>
    %340 = vector.extract_strided_slice %301 {offsets = [0, 0], sizes = [32, 8], strides = [1, 1]} : vector<32x128xf32> to vector<32x8xf32>
    %341 = tpu.concatenate %339, %340 in 1 : vector<32x120xf32>, vector<32x8xf32> -> vector<32x128xf32>
    %342 = vector.broadcast %153 : vector<1x128xf32> to vector<32x128xf32>
    %343 = arith.mulf %341, %342 : vector<32x128xf32>
    %c224_128 = arith.constant 224 : index
    %c0_129 = arith.constant 0 : index
    %344 = vector.load %arg6[%c224_128, %c0_129] : memref<288x128xf32, #tpu.memory_space<vmem>>, vector<32x128xf32>
    tpu.vector_store %arg6[%c224_128, %c0_129], %343 {strides = array<i32>} : memref<288x128xf32, #tpu.memory_space<vmem>>, vector<32x128xf32>,
    %345 = vector.extract_strided_slice %301 {offsets = [0, 9], sizes = [32, 119], strides = [1, 1]} : vector<32x128xf32> to vector<32x119xf32>
    %346 = vector.extract_strided_slice %301 {offsets = [0, 0], sizes = [32, 9], strides = [1, 1]} : vector<32x128xf32> to vector<32x9xf32>
    %347 = tpu.concatenate %345, %346 in 1 : vector<32x119xf32>, vector<32x9xf32> -> vector<32x128xf32>
    %348 = vector.broadcast %174 : vector<1x128xf32> to vector<32x128xf32>
    %349 = arith.mulf %347, %348 : vector<32x128xf32>
    %c256_130 = arith.constant 256 : index
    %c0_131 = arith.constant 0 : index
    %350 = vector.load %arg6[%c256_130, %c0_131] : memref<288x128xf32, #tpu.memory_space<vmem>>, vector<32x128xf32>
    tpu.vector_store %arg6[%c256_130, %c0_131], %349 {strides = array<i32>} : memref<288x128xf32, #tpu.memory_space<vmem>>, vector<32x128xf32>,
    %c2 = arith.constant 2 : index
    %c0_132 = arith.constant 0 : index
    %c0_133 = arith.constant 0 : index
    %351 = vector.load %arg3[%c2, %c0_132, %c0_133] : memref<6x32x288xf32, #tpu.memory_space<vmem>>, vector<1x32x288xf32>
    %352 = vector.shape_cast %351 : vector<1x32x288xf32> to vector<32x288xf32>
    %c0_134 = arith.constant 0 : index
    %c0_135 = arith.constant 0 : index
    %353 = vector.load %arg6[%c0_134, %c0_135] : memref<288x128xf32, #tpu.memory_space<vmem>>, vector<288x128xf32>
    %cst_136 = arith.constant dense<0.000000e+00> : vector<32x128xf32>
    %354 = tpu.matmul %352, %353, %cst_136 {dimension_numbers = #tpu.dot_dimension_numbers<[1], [0], [0], [1], [0, 0, 1, 1], [], []>, precision = #tpu.contract_precision<fp32>} : vector<32x288xf32>, vector<288x128xf32>, vector<32x128xf32> -> vector<32x128xf32>
    %c2_137 = arith.constant 2 : index
    %c0_138 = arith.constant 0 : index
    %c0_139 = arith.constant 0 : index
    %355 = vector.load %arg4[%c2_137, %c0_138, %c0_139] : memref<6x32x1xf32, #tpu.memory_space<vmem>>, vector<1x32x1xf32>
    %356 = vector.shape_cast %355 : vector<1x32x1xf32> to vector<32x1xf32>
    %357 = vector.broadcast %356 : vector<32x1xf32> to vector<32x128xf32>
    %358 = arith.addf %354, %357 : vector<32x128xf32>
    %cst_140 = arith.constant 0.000000e+00 : f32
    %359 = vector.broadcast %cst_140 : f32 to vector<32x128xf32>
    %360 = arith.maximumf %358, %359 : vector<32x128xf32>
    %361 = vector.extract_strided_slice %360 {offsets = [0, 119], sizes = [32, 9], strides = [1, 1]} : vector<32x128xf32> to vector<32x9xf32>
    %362 = vector.extract_strided_slice %360 {offsets = [0, 0], sizes = [32, 119], strides = [1, 1]} : vector<32x128xf32> to vector<32x119xf32>
    %363 = tpu.concatenate %361, %362 in 1 : vector<32x9xf32>, vector<32x119xf32> -> vector<32x128xf32>
    %364 = vector.broadcast %27 : vector<1x128xf32> to vector<32x128xf32>
    %365 = arith.mulf %363, %364 : vector<32x128xf32>
    %c0_141 = arith.constant 0 : index
    %c0_142 = arith.constant 0 : index
    %366 = vector.load %arg6[%c0_141, %c0_142] : memref<288x128xf32, #tpu.memory_space<vmem>>, vector<32x128xf32>
    tpu.vector_store %arg6[%c0_141, %c0_142], %365 {strides = array<i32>} : memref<288x128xf32, #tpu.memory_space<vmem>>, vector<32x128xf32>,
    %367 = vector.extract_strided_slice %360 {offsets = [0, 120], sizes = [32, 8], strides = [1, 1]} : vector<32x128xf32> to vector<32x8xf32>
    %368 = vector.extract_strided_slice %360 {offsets = [0, 0], sizes = [32, 120], strides = [1, 1]} : vector<32x128xf32> to vector<32x120xf32>
    %369 = tpu.concatenate %367, %368 in 1 : vector<32x8xf32>, vector<32x120xf32> -> vector<32x128xf32>
    %370 = vector.broadcast %48 : vector<1x128xf32> to vector<32x128xf32>
    %371 = arith.mulf %369, %370 : vector<32x128xf32>
    %c32_143 = arith.constant 32 : index
    %c0_144 = arith.constant 0 : index
    %372 = vector.load %arg6[%c32_143, %c0_144] : memref<288x128xf32, #tpu.memory_space<vmem>>, vector<32x128xf32>
    tpu.vector_store %arg6[%c32_143, %c0_144], %371 {strides = array<i32>} : memref<288x128xf32, #tpu.memory_space<vmem>>, vector<32x128xf32>,
    %373 = vector.extract_strided_slice %360 {offsets = [0, 121], sizes = [32, 7], strides = [1, 1]} : vector<32x128xf32> to vector<32x7xf32>
    %374 = vector.extract_strided_slice %360 {offsets = [0, 0], sizes = [32, 121], strides = [1, 1]} : vector<32x128xf32> to vector<32x121xf32>
    %375 = tpu.concatenate %373, %374 in 1 : vector<32x7xf32>, vector<32x121xf32> -> vector<32x128xf32>
    %376 = vector.broadcast %69 : vector<1x128xf32> to vector<32x128xf32>
    %377 = arith.mulf %375, %376 : vector<32x128xf32>
    %c64_145 = arith.constant 64 : index
    %c0_146 = arith.constant 0 : index
    %378 = vector.load %arg6[%c64_145, %c0_146] : memref<288x128xf32, #tpu.memory_space<vmem>>, vector<32x128xf32>
    tpu.vector_store %arg6[%c64_145, %c0_146], %377 {strides = array<i32>} : memref<288x128xf32, #tpu.memory_space<vmem>>, vector<32x128xf32>,
    %379 = vector.extract_strided_slice %360 {offsets = [0, 127], sizes = [32, 1], strides = [1, 1]} : vector<32x128xf32> to vector<32x1xf32>
    %380 = vector.extract_strided_slice %360 {offsets = [0, 0], sizes = [32, 127], strides = [1, 1]} : vector<32x128xf32> to vector<32x127xf32>
    %381 = tpu.concatenate %379, %380 in 1 : vector<32x1xf32>, vector<32x127xf32> -> vector<32x128xf32>
    %382 = vector.broadcast %90 : vector<1x128xf32> to vector<32x128xf32>
    %383 = arith.mulf %381, %382 : vector<32x128xf32>
    %c96_147 = arith.constant 96 : index
    %c0_148 = arith.constant 0 : index
    %384 = vector.load %arg6[%c96_147, %c0_148] : memref<288x128xf32, #tpu.memory_space<vmem>>, vector<32x128xf32>
    tpu.vector_store %arg6[%c96_147, %c0_148], %383 {strides = array<i32>} : memref<288x128xf32, #tpu.memory_space<vmem>>, vector<32x128xf32>,
    %c128_149 = arith.constant 128 : index
    %c0_150 = arith.constant 0 : index
    %385 = vector.load %arg6[%c128_149, %c0_150] : memref<288x128xf32, #tpu.memory_space<vmem>>, vector<32x128xf32>
    tpu.vector_store %arg6[%c128_149, %c0_150], %360 {strides = array<i32>} : memref<288x128xf32, #tpu.memory_space<vmem>>, vector<32x128xf32>,
    %386 = vector.extract_strided_slice %360 {offsets = [0, 1], sizes = [32, 127], strides = [1, 1]} : vector<32x128xf32> to vector<32x127xf32>
    %387 = vector.extract_strided_slice %360 {offsets = [0, 0], sizes = [32, 1], strides = [1, 1]} : vector<32x128xf32> to vector<32x1xf32>
    %388 = tpu.concatenate %386, %387 in 1 : vector<32x127xf32>, vector<32x1xf32> -> vector<32x128xf32>
    %389 = vector.broadcast %111 : vector<1x128xf32> to vector<32x128xf32>
    %390 = arith.mulf %388, %389 : vector<32x128xf32>
    %c160_151 = arith.constant 160 : index
    %c0_152 = arith.constant 0 : index
    %391 = vector.load %arg6[%c160_151, %c0_152] : memref<288x128xf32, #tpu.memory_space<vmem>>, vector<32x128xf32>
    tpu.vector_store %arg6[%c160_151, %c0_152], %390 {strides = array<i32>} : memref<288x128xf32, #tpu.memory_space<vmem>>, vector<32x128xf32>,
    %392 = vector.extract_strided_slice %360 {offsets = [0, 7], sizes = [32, 121], strides = [1, 1]} : vector<32x128xf32> to vector<32x121xf32>
    %393 = vector.extract_strided_slice %360 {offsets = [0, 0], sizes = [32, 7], strides = [1, 1]} : vector<32x128xf32> to vector<32x7xf32>
    %394 = tpu.concatenate %392, %393 in 1 : vector<32x121xf32>, vector<32x7xf32> -> vector<32x128xf32>
    %395 = vector.broadcast %132 : vector<1x128xf32> to vector<32x128xf32>
    %396 = arith.mulf %394, %395 : vector<32x128xf32>
    %c192_153 = arith.constant 192 : index
    %c0_154 = arith.constant 0 : index
    %397 = vector.load %arg6[%c192_153, %c0_154] : memref<288x128xf32, #tpu.memory_space<vmem>>, vector<32x128xf32>
    tpu.vector_store %arg6[%c192_153, %c0_154], %396 {strides = array<i32>} : memref<288x128xf32, #tpu.memory_space<vmem>>, vector<32x128xf32>,
    %398 = vector.extract_strided_slice %360 {offsets = [0, 8], sizes = [32, 120], strides = [1, 1]} : vector<32x128xf32> to vector<32x120xf32>
    %399 = vector.extract_strided_slice %360 {offsets = [0, 0], sizes = [32, 8], strides = [1, 1]} : vector<32x128xf32> to vector<32x8xf32>
    %400 = tpu.concatenate %398, %399 in 1 : vector<32x120xf32>, vector<32x8xf32> -> vector<32x128xf32>
    %401 = vector.broadcast %153 : vector<1x128xf32> to vector<32x128xf32>
    %402 = arith.mulf %400, %401 : vector<32x128xf32>
    %c224_155 = arith.constant 224 : index
    %c0_156 = arith.constant 0 : index
    %403 = vector.load %arg6[%c224_155, %c0_156] : memref<288x128xf32, #tpu.memory_space<vmem>>, vector<32x128xf32>
    tpu.vector_store %arg6[%c224_155, %c0_156], %402 {strides = array<i32>} : memref<288x128xf32, #tpu.memory_space<vmem>>, vector<32x128xf32>,
    %404 = vector.extract_strided_slice %360 {offsets = [0, 9], sizes = [32, 119], strides = [1, 1]} : vector<32x128xf32> to vector<32x119xf32>
    %405 = vector.extract_strided_slice %360 {offsets = [0, 0], sizes = [32, 9], strides = [1, 1]} : vector<32x128xf32> to vector<32x9xf32>
    %406 = tpu.concatenate %404, %405 in 1 : vector<32x119xf32>, vector<32x9xf32> -> vector<32x128xf32>
    %407 = vector.broadcast %174 : vector<1x128xf32> to vector<32x128xf32>
    %408 = arith.mulf %406, %407 : vector<32x128xf32>
    %c256_157 = arith.constant 256 : index
    %c0_158 = arith.constant 0 : index
    %409 = vector.load %arg6[%c256_157, %c0_158] : memref<288x128xf32, #tpu.memory_space<vmem>>, vector<32x128xf32>
    tpu.vector_store %arg6[%c256_157, %c0_158], %408 {strides = array<i32>} : memref<288x128xf32, #tpu.memory_space<vmem>>, vector<32x128xf32>,
    %c3 = arith.constant 3 : index
    %c0_159 = arith.constant 0 : index
    %c0_160 = arith.constant 0 : index
    %410 = vector.load %arg3[%c3, %c0_159, %c0_160] : memref<6x32x288xf32, #tpu.memory_space<vmem>>, vector<1x32x288xf32>
    %411 = vector.shape_cast %410 : vector<1x32x288xf32> to vector<32x288xf32>
    %c0_161 = arith.constant 0 : index
    %c0_162 = arith.constant 0 : index
    %412 = vector.load %arg6[%c0_161, %c0_162] : memref<288x128xf32, #tpu.memory_space<vmem>>, vector<288x128xf32>
    %cst_163 = arith.constant dense<0.000000e+00> : vector<32x128xf32>
    %413 = tpu.matmul %411, %412, %cst_163 {dimension_numbers = #tpu.dot_dimension_numbers<[1], [0], [0], [1], [0, 0, 1, 1], [], []>, precision = #tpu.contract_precision<fp32>} : vector<32x288xf32>, vector<288x128xf32>, vector<32x128xf32> -> vector<32x128xf32>
    %c3_164 = arith.constant 3 : index
    %c0_165 = arith.constant 0 : index
    %c0_166 = arith.constant 0 : index
    %414 = vector.load %arg4[%c3_164, %c0_165, %c0_166] : memref<6x32x1xf32, #tpu.memory_space<vmem>>, vector<1x32x1xf32>
    %415 = vector.shape_cast %414 : vector<1x32x1xf32> to vector<32x1xf32>
    %416 = vector.broadcast %415 : vector<32x1xf32> to vector<32x128xf32>
    %417 = arith.addf %413, %416 : vector<32x128xf32>
    %418 = arith.addf %417, %301 : vector<32x128xf32>
    %cst_167 = arith.constant 0.000000e+00 : f32
    %419 = vector.broadcast %cst_167 : f32 to vector<32x128xf32>
    %420 = arith.maximumf %418, %419 : vector<32x128xf32>
    %421 = vector.extract_strided_slice %420 {offsets = [0, 119], sizes = [32, 9], strides = [1, 1]} : vector<32x128xf32> to vector<32x9xf32>
    %422 = vector.extract_strided_slice %420 {offsets = [0, 0], sizes = [32, 119], strides = [1, 1]} : vector<32x128xf32> to vector<32x119xf32>
    %423 = tpu.concatenate %421, %422 in 1 : vector<32x9xf32>, vector<32x119xf32> -> vector<32x128xf32>
    %424 = vector.broadcast %27 : vector<1x128xf32> to vector<32x128xf32>
    %425 = arith.mulf %423, %424 : vector<32x128xf32>
    %c0_168 = arith.constant 0 : index
    %c0_169 = arith.constant 0 : index
    %426 = vector.load %arg6[%c0_168, %c0_169] : memref<288x128xf32, #tpu.memory_space<vmem>>, vector<32x128xf32>
    tpu.vector_store %arg6[%c0_168, %c0_169], %425 {strides = array<i32>} : memref<288x128xf32, #tpu.memory_space<vmem>>, vector<32x128xf32>,
    %427 = vector.extract_strided_slice %420 {offsets = [0, 120], sizes = [32, 8], strides = [1, 1]} : vector<32x128xf32> to vector<32x8xf32>
    %428 = vector.extract_strided_slice %420 {offsets = [0, 0], sizes = [32, 120], strides = [1, 1]} : vector<32x128xf32> to vector<32x120xf32>
    %429 = tpu.concatenate %427, %428 in 1 : vector<32x8xf32>, vector<32x120xf32> -> vector<32x128xf32>
    %430 = vector.broadcast %48 : vector<1x128xf32> to vector<32x128xf32>
    %431 = arith.mulf %429, %430 : vector<32x128xf32>
    %c32_170 = arith.constant 32 : index
    %c0_171 = arith.constant 0 : index
    %432 = vector.load %arg6[%c32_170, %c0_171] : memref<288x128xf32, #tpu.memory_space<vmem>>, vector<32x128xf32>
    tpu.vector_store %arg6[%c32_170, %c0_171], %431 {strides = array<i32>} : memref<288x128xf32, #tpu.memory_space<vmem>>, vector<32x128xf32>,
    %433 = vector.extract_strided_slice %420 {offsets = [0, 121], sizes = [32, 7], strides = [1, 1]} : vector<32x128xf32> to vector<32x7xf32>
    %434 = vector.extract_strided_slice %420 {offsets = [0, 0], sizes = [32, 121], strides = [1, 1]} : vector<32x128xf32> to vector<32x121xf32>
    %435 = tpu.concatenate %433, %434 in 1 : vector<32x7xf32>, vector<32x121xf32> -> vector<32x128xf32>
    %436 = vector.broadcast %69 : vector<1x128xf32> to vector<32x128xf32>
    %437 = arith.mulf %435, %436 : vector<32x128xf32>
    %c64_172 = arith.constant 64 : index
    %c0_173 = arith.constant 0 : index
    %438 = vector.load %arg6[%c64_172, %c0_173] : memref<288x128xf32, #tpu.memory_space<vmem>>, vector<32x128xf32>
    tpu.vector_store %arg6[%c64_172, %c0_173], %437 {strides = array<i32>} : memref<288x128xf32, #tpu.memory_space<vmem>>, vector<32x128xf32>,
    %439 = vector.extract_strided_slice %420 {offsets = [0, 127], sizes = [32, 1], strides = [1, 1]} : vector<32x128xf32> to vector<32x1xf32>
    %440 = vector.extract_strided_slice %420 {offsets = [0, 0], sizes = [32, 127], strides = [1, 1]} : vector<32x128xf32> to vector<32x127xf32>
    %441 = tpu.concatenate %439, %440 in 1 : vector<32x1xf32>, vector<32x127xf32> -> vector<32x128xf32>
    %442 = vector.broadcast %90 : vector<1x128xf32> to vector<32x128xf32>
    %443 = arith.mulf %441, %442 : vector<32x128xf32>
    %c96_174 = arith.constant 96 : index
    %c0_175 = arith.constant 0 : index
    %444 = vector.load %arg6[%c96_174, %c0_175] : memref<288x128xf32, #tpu.memory_space<vmem>>, vector<32x128xf32>
    tpu.vector_store %arg6[%c96_174, %c0_175], %443 {strides = array<i32>} : memref<288x128xf32, #tpu.memory_space<vmem>>, vector<32x128xf32>,
    %c128_176 = arith.constant 128 : index
    %c0_177 = arith.constant 0 : index
    %445 = vector.load %arg6[%c128_176, %c0_177] : memref<288x128xf32, #tpu.memory_space<vmem>>, vector<32x128xf32>
    tpu.vector_store %arg6[%c128_176, %c0_177], %420 {strides = array<i32>} : memref<288x128xf32, #tpu.memory_space<vmem>>, vector<32x128xf32>,
    %446 = vector.extract_strided_slice %420 {offsets = [0, 1], sizes = [32, 127], strides = [1, 1]} : vector<32x128xf32> to vector<32x127xf32>
    %447 = vector.extract_strided_slice %420 {offsets = [0, 0], sizes = [32, 1], strides = [1, 1]} : vector<32x128xf32> to vector<32x1xf32>
    %448 = tpu.concatenate %446, %447 in 1 : vector<32x127xf32>, vector<32x1xf32> -> vector<32x128xf32>
    %449 = vector.broadcast %111 : vector<1x128xf32> to vector<32x128xf32>
    %450 = arith.mulf %448, %449 : vector<32x128xf32>
    %c160_178 = arith.constant 160 : index
    %c0_179 = arith.constant 0 : index
    %451 = vector.load %arg6[%c160_178, %c0_179] : memref<288x128xf32, #tpu.memory_space<vmem>>, vector<32x128xf32>
    tpu.vector_store %arg6[%c160_178, %c0_179], %450 {strides = array<i32>} : memref<288x128xf32, #tpu.memory_space<vmem>>, vector<32x128xf32>,
    %452 = vector.extract_strided_slice %420 {offsets = [0, 7], sizes = [32, 121], strides = [1, 1]} : vector<32x128xf32> to vector<32x121xf32>
    %453 = vector.extract_strided_slice %420 {offsets = [0, 0], sizes = [32, 7], strides = [1, 1]} : vector<32x128xf32> to vector<32x7xf32>
    %454 = tpu.concatenate %452, %453 in 1 : vector<32x121xf32>, vector<32x7xf32> -> vector<32x128xf32>
    %455 = vector.broadcast %132 : vector<1x128xf32> to vector<32x128xf32>
    %456 = arith.mulf %454, %455 : vector<32x128xf32>
    %c192_180 = arith.constant 192 : index
    %c0_181 = arith.constant 0 : index
    %457 = vector.load %arg6[%c192_180, %c0_181] : memref<288x128xf32, #tpu.memory_space<vmem>>, vector<32x128xf32>
    tpu.vector_store %arg6[%c192_180, %c0_181], %456 {strides = array<i32>} : memref<288x128xf32, #tpu.memory_space<vmem>>, vector<32x128xf32>,
    %458 = vector.extract_strided_slice %420 {offsets = [0, 8], sizes = [32, 120], strides = [1, 1]} : vector<32x128xf32> to vector<32x120xf32>
    %459 = vector.extract_strided_slice %420 {offsets = [0, 0], sizes = [32, 8], strides = [1, 1]} : vector<32x128xf32> to vector<32x8xf32>
    %460 = tpu.concatenate %458, %459 in 1 : vector<32x120xf32>, vector<32x8xf32> -> vector<32x128xf32>
    %461 = vector.broadcast %153 : vector<1x128xf32> to vector<32x128xf32>
    %462 = arith.mulf %460, %461 : vector<32x128xf32>
    %c224_182 = arith.constant 224 : index
    %c0_183 = arith.constant 0 : index
    %463 = vector.load %arg6[%c224_182, %c0_183] : memref<288x128xf32, #tpu.memory_space<vmem>>, vector<32x128xf32>
    tpu.vector_store %arg6[%c224_182, %c0_183], %462 {strides = array<i32>} : memref<288x128xf32, #tpu.memory_space<vmem>>, vector<32x128xf32>,
    %464 = vector.extract_strided_slice %420 {offsets = [0, 9], sizes = [32, 119], strides = [1, 1]} : vector<32x128xf32> to vector<32x119xf32>
    %465 = vector.extract_strided_slice %420 {offsets = [0, 0], sizes = [32, 9], strides = [1, 1]} : vector<32x128xf32> to vector<32x9xf32>
    %466 = tpu.concatenate %464, %465 in 1 : vector<32x119xf32>, vector<32x9xf32> -> vector<32x128xf32>
    %467 = vector.broadcast %174 : vector<1x128xf32> to vector<32x128xf32>
    %468 = arith.mulf %466, %467 : vector<32x128xf32>
    %c256_184 = arith.constant 256 : index
    %c0_185 = arith.constant 0 : index
    %469 = vector.load %arg6[%c256_184, %c0_185] : memref<288x128xf32, #tpu.memory_space<vmem>>, vector<32x128xf32>
    tpu.vector_store %arg6[%c256_184, %c0_185], %468 {strides = array<i32>} : memref<288x128xf32, #tpu.memory_space<vmem>>, vector<32x128xf32>,
    %c4 = arith.constant 4 : index
    %c0_186 = arith.constant 0 : index
    %c0_187 = arith.constant 0 : index
    %470 = vector.load %arg3[%c4, %c0_186, %c0_187] : memref<6x32x288xf32, #tpu.memory_space<vmem>>, vector<1x32x288xf32>
    %471 = vector.shape_cast %470 : vector<1x32x288xf32> to vector<32x288xf32>
    %c0_188 = arith.constant 0 : index
    %c0_189 = arith.constant 0 : index
    %472 = vector.load %arg6[%c0_188, %c0_189] : memref<288x128xf32, #tpu.memory_space<vmem>>, vector<288x128xf32>
    %cst_190 = arith.constant dense<0.000000e+00> : vector<32x128xf32>
    %473 = tpu.matmul %471, %472, %cst_190 {dimension_numbers = #tpu.dot_dimension_numbers<[1], [0], [0], [1], [0, 0, 1, 1], [], []>, precision = #tpu.contract_precision<fp32>} : vector<32x288xf32>, vector<288x128xf32>, vector<32x128xf32> -> vector<32x128xf32>
    %c4_191 = arith.constant 4 : index
    %c0_192 = arith.constant 0 : index
    %c0_193 = arith.constant 0 : index
    %474 = vector.load %arg4[%c4_191, %c0_192, %c0_193] : memref<6x32x1xf32, #tpu.memory_space<vmem>>, vector<1x32x1xf32>
    %475 = vector.shape_cast %474 : vector<1x32x1xf32> to vector<32x1xf32>
    %476 = vector.broadcast %475 : vector<32x1xf32> to vector<32x128xf32>
    %477 = arith.addf %473, %476 : vector<32x128xf32>
    %cst_194 = arith.constant 0.000000e+00 : f32
    %478 = vector.broadcast %cst_194 : f32 to vector<32x128xf32>
    %479 = arith.maximumf %477, %478 : vector<32x128xf32>
    %480 = vector.extract_strided_slice %479 {offsets = [0, 119], sizes = [32, 9], strides = [1, 1]} : vector<32x128xf32> to vector<32x9xf32>
    %481 = vector.extract_strided_slice %479 {offsets = [0, 0], sizes = [32, 119], strides = [1, 1]} : vector<32x128xf32> to vector<32x119xf32>
    %482 = tpu.concatenate %480, %481 in 1 : vector<32x9xf32>, vector<32x119xf32> -> vector<32x128xf32>
    %483 = vector.broadcast %27 : vector<1x128xf32> to vector<32x128xf32>
    %484 = arith.mulf %482, %483 : vector<32x128xf32>
    %c0_195 = arith.constant 0 : index
    %c0_196 = arith.constant 0 : index
    %485 = vector.load %arg6[%c0_195, %c0_196] : memref<288x128xf32, #tpu.memory_space<vmem>>, vector<32x128xf32>
    tpu.vector_store %arg6[%c0_195, %c0_196], %484 {strides = array<i32>} : memref<288x128xf32, #tpu.memory_space<vmem>>, vector<32x128xf32>,
    %486 = vector.extract_strided_slice %479 {offsets = [0, 120], sizes = [32, 8], strides = [1, 1]} : vector<32x128xf32> to vector<32x8xf32>
    %487 = vector.extract_strided_slice %479 {offsets = [0, 0], sizes = [32, 120], strides = [1, 1]} : vector<32x128xf32> to vector<32x120xf32>
    %488 = tpu.concatenate %486, %487 in 1 : vector<32x8xf32>, vector<32x120xf32> -> vector<32x128xf32>
    %489 = vector.broadcast %48 : vector<1x128xf32> to vector<32x128xf32>
    %490 = arith.mulf %488, %489 : vector<32x128xf32>
    %c32_197 = arith.constant 32 : index
    %c0_198 = arith.constant 0 : index
    %491 = vector.load %arg6[%c32_197, %c0_198] : memref<288x128xf32, #tpu.memory_space<vmem>>, vector<32x128xf32>
    tpu.vector_store %arg6[%c32_197, %c0_198], %490 {strides = array<i32>} : memref<288x128xf32, #tpu.memory_space<vmem>>, vector<32x128xf32>,
    %492 = vector.extract_strided_slice %479 {offsets = [0, 121], sizes = [32, 7], strides = [1, 1]} : vector<32x128xf32> to vector<32x7xf32>
    %493 = vector.extract_strided_slice %479 {offsets = [0, 0], sizes = [32, 121], strides = [1, 1]} : vector<32x128xf32> to vector<32x121xf32>
    %494 = tpu.concatenate %492, %493 in 1 : vector<32x7xf32>, vector<32x121xf32> -> vector<32x128xf32>
    %495 = vector.broadcast %69 : vector<1x128xf32> to vector<32x128xf32>
    %496 = arith.mulf %494, %495 : vector<32x128xf32>
    %c64_199 = arith.constant 64 : index
    %c0_200 = arith.constant 0 : index
    %497 = vector.load %arg6[%c64_199, %c0_200] : memref<288x128xf32, #tpu.memory_space<vmem>>, vector<32x128xf32>
    tpu.vector_store %arg6[%c64_199, %c0_200], %496 {strides = array<i32>} : memref<288x128xf32, #tpu.memory_space<vmem>>, vector<32x128xf32>,
    %498 = vector.extract_strided_slice %479 {offsets = [0, 127], sizes = [32, 1], strides = [1, 1]} : vector<32x128xf32> to vector<32x1xf32>
    %499 = vector.extract_strided_slice %479 {offsets = [0, 0], sizes = [32, 127], strides = [1, 1]} : vector<32x128xf32> to vector<32x127xf32>
    %500 = tpu.concatenate %498, %499 in 1 : vector<32x1xf32>, vector<32x127xf32> -> vector<32x128xf32>
    %501 = vector.broadcast %90 : vector<1x128xf32> to vector<32x128xf32>
    %502 = arith.mulf %500, %501 : vector<32x128xf32>
    %c96_201 = arith.constant 96 : index
    %c0_202 = arith.constant 0 : index
    %503 = vector.load %arg6[%c96_201, %c0_202] : memref<288x128xf32, #tpu.memory_space<vmem>>, vector<32x128xf32>
    tpu.vector_store %arg6[%c96_201, %c0_202], %502 {strides = array<i32>} : memref<288x128xf32, #tpu.memory_space<vmem>>, vector<32x128xf32>,
    %c128_203 = arith.constant 128 : index
    %c0_204 = arith.constant 0 : index
    %504 = vector.load %arg6[%c128_203, %c0_204] : memref<288x128xf32, #tpu.memory_space<vmem>>, vector<32x128xf32>
    tpu.vector_store %arg6[%c128_203, %c0_204], %479 {strides = array<i32>} : memref<288x128xf32, #tpu.memory_space<vmem>>, vector<32x128xf32>,
    %505 = vector.extract_strided_slice %479 {offsets = [0, 1], sizes = [32, 127], strides = [1, 1]} : vector<32x128xf32> to vector<32x127xf32>
    %506 = vector.extract_strided_slice %479 {offsets = [0, 0], sizes = [32, 1], strides = [1, 1]} : vector<32x128xf32> to vector<32x1xf32>
    %507 = tpu.concatenate %505, %506 in 1 : vector<32x127xf32>, vector<32x1xf32> -> vector<32x128xf32>
    %508 = vector.broadcast %111 : vector<1x128xf32> to vector<32x128xf32>
    %509 = arith.mulf %507, %508 : vector<32x128xf32>
    %c160_205 = arith.constant 160 : index
    %c0_206 = arith.constant 0 : index
    %510 = vector.load %arg6[%c160_205, %c0_206] : memref<288x128xf32, #tpu.memory_space<vmem>>, vector<32x128xf32>
    tpu.vector_store %arg6[%c160_205, %c0_206], %509 {strides = array<i32>} : memref<288x128xf32, #tpu.memory_space<vmem>>, vector<32x128xf32>,
    %511 = vector.extract_strided_slice %479 {offsets = [0, 7], sizes = [32, 121], strides = [1, 1]} : vector<32x128xf32> to vector<32x121xf32>
    %512 = vector.extract_strided_slice %479 {offsets = [0, 0], sizes = [32, 7], strides = [1, 1]} : vector<32x128xf32> to vector<32x7xf32>
    %513 = tpu.concatenate %511, %512 in 1 : vector<32x121xf32>, vector<32x7xf32> -> vector<32x128xf32>
    %514 = vector.broadcast %132 : vector<1x128xf32> to vector<32x128xf32>
    %515 = arith.mulf %513, %514 : vector<32x128xf32>
    %c192_207 = arith.constant 192 : index
    %c0_208 = arith.constant 0 : index
    %516 = vector.load %arg6[%c192_207, %c0_208] : memref<288x128xf32, #tpu.memory_space<vmem>>, vector<32x128xf32>
    tpu.vector_store %arg6[%c192_207, %c0_208], %515 {strides = array<i32>} : memref<288x128xf32, #tpu.memory_space<vmem>>, vector<32x128xf32>,
    %517 = vector.extract_strided_slice %479 {offsets = [0, 8], sizes = [32, 120], strides = [1, 1]} : vector<32x128xf32> to vector<32x120xf32>
    %518 = vector.extract_strided_slice %479 {offsets = [0, 0], sizes = [32, 8], strides = [1, 1]} : vector<32x128xf32> to vector<32x8xf32>
    %519 = tpu.concatenate %517, %518 in 1 : vector<32x120xf32>, vector<32x8xf32> -> vector<32x128xf32>
    %520 = vector.broadcast %153 : vector<1x128xf32> to vector<32x128xf32>
    %521 = arith.mulf %519, %520 : vector<32x128xf32>
    %c224_209 = arith.constant 224 : index
    %c0_210 = arith.constant 0 : index
    %522 = vector.load %arg6[%c224_209, %c0_210] : memref<288x128xf32, #tpu.memory_space<vmem>>, vector<32x128xf32>
    tpu.vector_store %arg6[%c224_209, %c0_210], %521 {strides = array<i32>} : memref<288x128xf32, #tpu.memory_space<vmem>>, vector<32x128xf32>,
    %523 = vector.extract_strided_slice %479 {offsets = [0, 9], sizes = [32, 119], strides = [1, 1]} : vector<32x128xf32> to vector<32x119xf32>
    %524 = vector.extract_strided_slice %479 {offsets = [0, 0], sizes = [32, 9], strides = [1, 1]} : vector<32x128xf32> to vector<32x9xf32>
    %525 = tpu.concatenate %523, %524 in 1 : vector<32x119xf32>, vector<32x9xf32> -> vector<32x128xf32>
    %526 = vector.broadcast %174 : vector<1x128xf32> to vector<32x128xf32>
    %527 = arith.mulf %525, %526 : vector<32x128xf32>
    %c256_211 = arith.constant 256 : index
    %c0_212 = arith.constant 0 : index
    %528 = vector.load %arg6[%c256_211, %c0_212] : memref<288x128xf32, #tpu.memory_space<vmem>>, vector<32x128xf32>
    tpu.vector_store %arg6[%c256_211, %c0_212], %527 {strides = array<i32>} : memref<288x128xf32, #tpu.memory_space<vmem>>, vector<32x128xf32>,
    %c5 = arith.constant 5 : index
    %c0_213 = arith.constant 0 : index
    %c0_214 = arith.constant 0 : index
    %529 = vector.load %arg3[%c5, %c0_213, %c0_214] : memref<6x32x288xf32, #tpu.memory_space<vmem>>, vector<1x32x288xf32>
    %530 = vector.shape_cast %529 : vector<1x32x288xf32> to vector<32x288xf32>
    %c0_215 = arith.constant 0 : index
    %c0_216 = arith.constant 0 : index
    %531 = vector.load %arg6[%c0_215, %c0_216] : memref<288x128xf32, #tpu.memory_space<vmem>>, vector<288x128xf32>
    %cst_217 = arith.constant dense<0.000000e+00> : vector<32x128xf32>
    %532 = tpu.matmul %530, %531, %cst_217 {dimension_numbers = #tpu.dot_dimension_numbers<[1], [0], [0], [1], [0, 0, 1, 1], [], []>, precision = #tpu.contract_precision<fp32>} : vector<32x288xf32>, vector<288x128xf32>, vector<32x128xf32> -> vector<32x128xf32>
    %c5_218 = arith.constant 5 : index
    %c0_219 = arith.constant 0 : index
    %c0_220 = arith.constant 0 : index
    %533 = vector.load %arg4[%c5_218, %c0_219, %c0_220] : memref<6x32x1xf32, #tpu.memory_space<vmem>>, vector<1x32x1xf32>
    %534 = vector.shape_cast %533 : vector<1x32x1xf32> to vector<32x1xf32>
    %535 = vector.broadcast %534 : vector<32x1xf32> to vector<32x128xf32>
    %536 = arith.addf %532, %535 : vector<32x128xf32>
    %537 = arith.addf %536, %420 : vector<32x128xf32>
    %cst_221 = arith.constant 0.000000e+00 : f32
    %538 = vector.broadcast %cst_221 : f32 to vector<32x128xf32>
    %539 = arith.maximumf %537, %538 : vector<32x128xf32>
    %c0_222 = arith.constant 0 : index
    %c0_223 = arith.constant 0 : index
    %540 = vector.load %arg5[%c0_222, %c0_223] : memref<32x128xf32, #tpu.memory_space<vmem>>, vector<32x128xf32>
    tpu.vector_store %arg5[%c0_222, %c0_223], %539 {strides = array<i32>} : memref<32x128xf32, #tpu.memory_space<vmem>>, vector<32x128xf32>,
    return
  }
}

</mosaic_0001>

<bundles_post_ra>
// kernel: tpu_custom_call.1
= control target key start
LH: loop header
LB: loop body
LE: loop exit
PB: predicated region body
PF: predicated region fallthrough
CT: control target
= control target key end

     0   :  { %6 = vsyncpa [#allocation3], 0  ;;  %s128_s0 = inlined_call_operand.hbm [shape: f32[8,128], index: 0, kind: input, shape index: {}]   ;;  %s129_s1 = inlined_call_operand.hbm [shape: f32[8,128], index: 1, kind: output, shape index: {}]  }
   0x1   :  { %7 = vsyncpa [#allocation4], 0  ;;  %s91_s6 = smov [#allocation2]   ;;  %s43_s10 = scalar_lea.hbm %s128_s0, 128 }
   0x2   :  { %s14_s7 = sshll.u32 %s91_s6, 4  ;;  %p44_p0 = scmp.ne.s32.totalorder %s128_s0, %s43_s10  ;;  %s15_s7 = int_to_ptr.vmem [resolvable:$true] %s14_s7 }
   0x3   :  { %p47_p1 = scmp.lt.u32.totalorder %s43_s10, %s128_s0 }
   0x5   :  { %p49_p2 = pnand %p47_p1, %p44_p0 }
   0x7   :  { %52 = shalt.err (!%p49_p2)
}
   0x8   :  { %s53_s15 = scalar_lea.vmem %s15_s7, 128  ;;  %p58_p4 = scmp.lt.s32.totalorder %s15_s7, %s15_s7 }
   0x9   :  { %p54_p3 = scmp.ne.s32.totalorder %s15_s7, %s53_s15  ;;  %p59_p5 = scmp.lt.s32.totalorder %s53_s15, %s53_s15 }
   0xb   :  { %p60_p6 = por %p59_p5, %p58_p4 }
   0xd   :  { %p61_p7 = pnand %p60_p6, %p54_p3 }
   0xf   :  { %64 = shalt.err (!%p61_p7)
}
  0x10   :  { %17 = dma.hbm_to_vmem [thread:$0]  %s128_s0, 128, %s15_s7, [#allocation3]  }
  0x11   :  { %87 = dma.done.wait [#allocation3], 128  }
  0x12   :  { %88 = vsyncadd [#allocation3], 4294967168  ;;  %v21_v0 = vld [vmem:[#allocation2] sm:$0xff]  ;;  %s92_s18 = smov 1   ;;  %s93_s19 = smov [#allocation5]  }
  0x13   :  { %22 = vrot.lane.b32.xlu0 %v21_v0, %s92_s18  ;;  %s31_s20 = sshll.u32 %s93_s19, 4  ;;  %s32_s20 = int_to_ptr.vmem [resolvable:$true] %s31_s20 }
  0x14   :  { %s65_s21 = scalar_lea.vmem %s32_s20, 128  ;;  %p70_p9 = scmp.lt.s32.totalorder %s32_s20, %s32_s20 }
  0x15   :  { %p66_p8 = scmp.ne.s32.totalorder %s32_s20, %s65_s21  ;;  %p71_p10 = scmp.lt.s32.totalorder %s65_s21, %s65_s21 }
  0x17   :  { %p72_p11 = por %p71_p10, %p70_p9 }
  0x19   :  { %p73_p12 = pnand %p72_p11, %p66_p8 }
  0x85   :  { %v23_v1 = vpop.permute.xlu0 %22 }
  0x86   :  { %24 = vst [vmem:[#allocation5] sm:$0xff] %v23_v1 }
  0x87   :  { %76 = shalt.err (!%p73_p12)
}
  0x88   :  { %s77_s0 = scalar_lea.hbm %s129_s1, 128 }
  0x89   :  { %p78_p13 = scmp.ne.s32.totalorder %s129_s1, %s77_s0  ;;  %p81_p0 = scmp.lt.u32.totalorder %s77_s0, %s129_s1 }
  0x8b   :  { %p83_p1 = pnand %p81_p0, %p78_p13 }
  0x8d   :  { %86 = shalt.err (!%p83_p1)
}
  0x8e   :  { %34 = dma.vmem_to_hbm [thread:$0]  %s32_s20, 128, %s129_s1, [#allocation4]  }
  0x8f   :  { %89 = dma.done.wait [#allocation4], 128  }
  0x90   :  { %90 = vsyncadd [#allocation4], 4294967168 }
  0x91   :  { %38 = vsyncpa [#allocation3], 1 }
  0x92   :  { %39 = vsyncpa [#allocation4], 1 }

// kernel: tpu_custom_call.1
= control target key start
LH: loop header
LB: loop body
LE: loop exit
PB: predicated region body
PF: predicated region fallthrough
CT: control target
= control target key end

     0   :  { %6 = vsyncpa [#allocation4], 0  ;;  %s135_s0 = inlined_call_operand.hbm [shape: f32[8,128], index: 0, kind: input, shape index: {}]   ;;  %s136_s1 = inlined_call_operand.hbm [shape: f32[8,128], index: 1, kind: output, shape index: {}]  }
   0x1   :  { %7 = vsyncpa [#allocation5], 0  ;;  %s98_s6 = smov [#allocation3]   ;;  %s50_s10 = scalar_lea.hbm %s135_s0, 128 }
   0x2   :  { %s14_s7 = sshll.u32 %s98_s6, 4  ;;  %p51_p0 = scmp.ne.s32.totalorder %s135_s0, %s50_s10  ;;  %s15_s7 = int_to_ptr.vmem [resolvable:$true] %s14_s7 }
   0x3   :  { %p54_p1 = scmp.lt.u32.totalorder %s50_s10, %s135_s0 }
   0x5   :  { %p56_p2 = pnand %p54_p1, %p51_p0 }
   0x7   :  { %59 = shalt.err (!%p56_p2)
}
   0x8   :  { %s60_s15 = scalar_lea.vmem %s15_s7, 128  ;;  %p65_p4 = scmp.lt.s32.totalorder %s15_s7, %s15_s7 }
   0x9   :  { %p61_p3 = scmp.ne.s32.totalorder %s15_s7, %s60_s15  ;;  %p66_p5 = scmp.lt.s32.totalorder %s60_s15, %s60_s15 }
   0xb   :  { %p67_p6 = por %p66_p5, %p65_p4 }
   0xd   :  { %p68_p7 = pnand %p67_p6, %p61_p3 }
   0xf   :  { %71 = shalt.err (!%p68_p7)
}
  0x10   :  { %17 = dma.hbm_to_vmem [thread:$0]  %s135_s0, 128, %s15_s7, [#allocation4]  }
  0x11   :  { %94 = dma.done.wait [#allocation4], 128  }
  0x12   :  { %95 = vsyncadd [#allocation4], 4294967168  ;;  %v23_v0 = vlaneseq  ;;  %v99_v1 = vmov 0.0   ;;  %v28_v3 = vld [vmem:[#allocation3] sm:$0xff]  ;;  %s100_s18 = smov [#allocation6]  }
  0x13   :  { %22 = vst [vmem:[#allocation2 + $0x8] sm:$0xff] %v99_v1  ;;  %s38_s19 = sshll.u32 %s100_s18, 4  ;;  %s39_s19 = int_to_ptr.vmem [resolvable:$true] %s38_s19 }
  0x14   :  { %v24_v2 = vand.u32 127, %v23_v0  ;;  %s72_s20 = scalar_lea.vmem %s39_s19, 128  ;;  %p77_p9 = scmp.lt.s32.totalorder %s39_s19, %s39_s19 }
  0x15   :  { %p73_p8 = scmp.ne.s32.totalorder %s39_s19, %s72_s20  ;;  %p78_p10 = scmp.lt.s32.totalorder %s72_s20, %s72_s20 }
  0x16   :  { %vm25_vm0 = vcmp.lt.s32.totalorder %v24_v2, 64 }
  0x17   :  { %29 = vst.msk [vmem:[#allocation2 + $0x8] sm:$0xff] %vm25_vm0, %v28_v3  ;;  %p79_p11 = por %p78_p10, %p77_p9 }
  0x19   :  { %p80_p12 = pnand %p79_p11, %p73_p8 }
  0x1e   :  { %v30_v4 = vld [vmem:[#allocation2 + $0x8] sm:$0xff] }
  0x1f   :  { %31 = vst [vmem:[#allocation6] sm:$0xff] %v30_v4 }
  0x20   :  { %83 = shalt.err (!%p80_p12)
}
  0x21   :  { %s84_s22 = scalar_lea.hbm %s136_s1, 128 }
  0x22   :  { %p85_p13 = scmp.ne.s32.totalorder %s136_s1, %s84_s22  ;;  %p88_p0 = scmp.lt.u32.totalorder %s84_s22, %s136_s1 }
  0x24   :  { %p90_p1 = pnand %p88_p0, %p85_p13 }
  0x26   :  { %93 = shalt.err (!%p90_p1)
}
  0x27   :  { %41 = dma.vmem_to_hbm [thread:$0]  %s39_s19, 128, %s136_s1, [#allocation5]  }
  0x28   :  { %96 = dma.done.wait [#allocation5], 128  }
  0x29   :  { %97 = vsyncadd [#allocation5], 4294967168 }
  0x2a   :  { %45 = vsyncpa [#allocation4], 1 }
  0x2b   :  { %46 = vsyncpa [#allocation5], 1 }

// kernel: _forward_jit.1
= control target key start
LH: loop header
LB: loop body
LE: loop exit
PB: predicated region body
PF: predicated region fallthrough
CT: control target
= control target key end

     0   :  { %10 = vsyncpa [#allocation4], 0  ;;  %s16448_s18 = smov [#allocation3]   ;;  %s21384_s0 = inlined_call_operand.vmem [shape: f32[40,128], index: 0, kind: input, shape index: {}]   ;;  %s21385_s1 = inlined_call_operand.vmem [shape: f32[32,40], index: 1, kind: input, shape index: {}]   ;;  %s21386_s2 = inlined_call_operand.vmem [shape: f32[32,1], index: 2, kind: input, shape index: {}]   ;;  %s21387_s3 = inlined_call_operand.hbm [shape: f32[6,32,288], index: 3, kind: input, shape index: {}]   ;;  %s21388_s4 = inlined_call_operand.vmem [shape: f32[6,32,1], index: 4, kind: input, shape index: {}]   ;;  %s21389_s5 = inlined_call_operand.vmem [shape: f32[32,128], index: 5, kind: output, shape index: {}]  }
   0x1   :  { %s22_s19 = sshll.u32 %s16448_s18, 4  ;;  %s16424_s22 = scalar_lea.hbm %s21387_s3, 9216  ;;  %s23_s19 = int_to_ptr.vmem [resolvable:$true] %s22_s19 }
   0x2   :  { %p16425_p0 = scmp.ne.s32.totalorder %s21387_s3, %s16424_s22  ;;  %p16428_p1 = scmp.lt.u32.totalorder %s16424_s22, %s21387_s3 }
   0x4   :  { %p16430_p2 = pnand %p16428_p1, %p16425_p0 }
   0x6   :  { %16433 = shalt.err (!%p16430_p2)
}
   0x7   :  { %s16434_s27 = scalar_lea.vmem %s23_s19, 9216  ;;  %p16439_p4 = scmp.lt.s32.totalorder %s23_s19, %s23_s19 }
   0x8   :  { %p16435_p3 = scmp.ne.s32.totalorder %s23_s19, %s16434_s27  ;;  %p16440_p5 = scmp.lt.s32.totalorder %s16434_s27, %s16434_s27 }
   0xa   :  { %p16441_p6 = por %p16440_p5, %p16439_p4 }
   0xc   :  { %p16442_p7 = pnand %p16441_p6, %p16435_p3 }
   0xe   :  { %16445 = shalt.err (!%p16442_p7)
}
   0xf   :  { %s16449_s28 = smov 384   ;;  %s16450_s29 = smov 24  }
  0x10   :  { %28 = dma.hbm_to_vmem [thread:$0]  %s21387_s3, 9216, %s23_s19, [#allocation4], %s16449_s28, %s16449_s28, %s16450_s29  }
  0x11   :  { %16446 = dma.done.wait [#allocation4], 9216  }
  0x12   :  { %16447 = vsyncadd [#allocation4], 4294958080  ;;  %v16451_v0 = vmov 0   ;;  %vm123_vm0 = vcmask 326656   ;;  %v94_v1 = vld [vmem:[%s21384_s0] sm:$0xff]  ;;  %v95_v2 = vld [vmem:[%s21384_s0 + $0x8] sm:$0xff] }
  0x13   :  { %16422 = vset.pattern.permute.xlu0 %v16451_v0  ;;  %16423 = vset.pattern.permute.xlu1 %v16451_v0  ;;  %v96_v3 = vld [vmem:[%s21384_s0 + $0x10] sm:$0xff]  ;;  %v137_v4 = vand.u32 4294901760, %v94_v1  ;;  %v140_v5 = vand.u32 4294901760, %v95_v2  ;;  %v97_v6 = vld [vmem:[%s21384_s0 + $0x18] sm:$0xff]  ;;  %v98_v8 = vld [vmem:[%s21384_s0 + $0x20] sm:$0xff]  ;;  %s16454_s6 = smov 8  }
  0x14   :  { %v143_v7 = vand.u32 4294901760, %v96_v3  ;;  %v90_v9 = vld [vmem:[%s21385_s1] sm:$0xff]  ;;  %v146_v10 = vand.u32 4294901760, %v97_v6  ;;  %v16521_v11 = vand.u32 4294901760, %v98_v8  ;;  %v91_v17 = vld [vmem:[%s21385_s1 + $0x8] sm:$0xff]  ;;  %v101_v19 = vld [vmem:[%s21386_s2 + $0x10] sm:$0xff] }
  0x15   :  { %v125_v12 = vsel %vm123_vm0, %v90_v9, 0  ;;  %v16524_v13 = vpack.c.bf16 %v140_v5, %v137_v4  ;;  %v16526_v14 = vsub.f32 %v94_v1, %v137_v4  ;;  %v16528_v15 = vsub.f32 %v95_v2, %v140_v5  ;;  %v99_v18 = vld [vmem:[%s21386_s2] sm:$0xff]  ;;  %v92_v23 = vld [vmem:[%s21385_s1 + $0x10] sm:$0xff]  ;;  %115 = vperm.xlu1 %16423, %v101_v19   ;;  %v93_v28 = vld [vmem:[%s21385_s1 + $0x18] sm:$0xff]  ;;  %s16452_s1 = smov 9   ;;  %s16455_s7 = smov 121  }
  0x16   :  { %v16530_v16 = vsub.f32 %v96_v3, %v143_v7  ;;  %v16541_v20 = vsub.f32 %v97_v6, %v146_v10  ;;  %v16544_v21 = vsub.f32 %v98_v8, %v16521_v11  ;;  %v16546_v22 = vand.u32 4294901760, %v125_v12  ;;  %105 = vperm.xlu0 %16422, %v99_v18   ;;  %v100_v29 = vld [vmem:[%s21386_s2 + $0x8] sm:$0xff]  ;;  %v102_v30 = vld [vmem:[%s21386_s2 + $0x18] sm:$0xff]  ;;  %s16453_s2 = smov 127   ;;  %s16456_s8 = smov 7  }
  0x17   :  { %v249_v24 = vand.u32 4294901760, %v16526_v14  ;;  %v256_v25 = vand.u32 4294901760, %v16528_v15  ;;  %v16553_v26 = vpack.c.bf16 %v146_v10, %v143_v7  ;;  %14754 = vmatprep.subr.bf16.mxu1 %v16524_v13  ;;  %v128_v33 = vsel %vm123_vm0, %v91_v17, 0  ;;  %s16457_s9 = smov 120   ;;  %s16458_s10 = smov 1  }
  0x18   :  { %v263_v27 = vand.u32 4294901760, %v16530_v16  ;;  %v270_v31 = vand.u32 4294901760, %v16541_v20  ;;  %v16568_v32 = vand.u32 4294901760, %v16544_v21  ;;  %14179 = vmatprep.mubr.f32.mxu0 %v16546_v22  ;;  %14756 = vmatpush3.bf16.msra.mxu1 %v16524_v13  ;;  %v16582_v37 = vand.u32 4294901760, %v128_v33  ;;  %s16459_s11 = smov 119  }
  0x19   :  { %v250_v34 = vsub.f32 %v16526_v14, %v249_v24  ;;  %v257_v35 = vsub.f32 %v16528_v15, %v256_v25  ;;  %14758 = vmatprep.subr.bf16.mxu1 %v16553_v26  ;;  %v131_v39 = vsel %vm123_vm0, %v92_v23, 0  ;;  %v134_v40 = vsel %vm123_vm0, %v93_v28, 0  ;;  %120 = vperm.xlu1 %16423, %v102_v30  }
  0x1a   :  { %v264_v36 = vsub.f32 %v16530_v16, %v263_v27  ;;  %v271_v38 = vsub.f32 %v16541_v20, %v270_v31  ;;  %110 = vperm.xlu0 %16422, %v100_v29   ;;  %v217_v44 = vsub.f32 %v128_v33, %v16582_v37  ;;  %v278_v46 = vsub.f32 %v16544_v21, %v16568_v32 }
  0x1b   :  { %v251_v41 = vand.u32 4294901760, %v250_v34  ;;  %v258_v42 = vand.u32 4294901760, %v257_v35  ;;  %v16593_v47 = vand.u32 4294901760, %v131_v39  ;;  %v16596_v49 = vand.u32 4294901760, %v134_v40 }
  0x1c   :  { %v265_v43 = vand.u32 4294901760, %v264_v36  ;;  %v272_v45 = vand.u32 4294901760, %v271_v38  ;;  %14760 = vmatpush3.bf16.msra.mxu1 %v16553_v26  ;;  %v207_v50 = vsub.f32 %v125_v12, %v16546_v22  ;;  %v218_v51 = vand.u32 4294901760, %v217_v44 }
  0x1d   :  { %v14761_v48 = vpack.c.bf16 %v258_v42, %v251_v41  ;;  %14161 = vmatprep.subr.mxu1 %v16521_v11  ;;  %v227_v53 = vsub.f32 %v131_v39, %v16593_v47  ;;  %v237_v54 = vsub.f32 %v134_v40, %v16596_v49  ;;  %v279_v58 = vand.u32 4294901760, %v278_v46 }
  0x1e   :  { %v14765_v52 = vpack.c.bf16 %v272_v45, %v265_v43  ;;  %v208_v55 = vand.u32 4294901760, %v207_v50  ;;  %v219_v56 = vsub.f32 %v217_v44, %v218_v51  ;;  %v14769_v2 = vpack.c.bf16 %v16528_v15, %v16526_v14  ;;  %v936_v45 = vld [vmem:[#allocation3 + $0x8] sm:$0xff] }
  0x1f   :  { %14762 = vmatprep.subr.bf16.mxu0 %v14761_v48  ;;  %v228_v57 = vand.u32 4294901760, %v227_v53  ;;  %v238_v59 = vand.u32 4294901760, %v237_v54  ;;  %v14773_v3 = vpack.c.bf16 %v16541_v20, %v16530_v16  ;;  %v14785_v5 = vpack.c.bf16 %v256_v25, %v249_v24 }
  0x20   :  { %14764 = vmatpush3.bf16.msra.mxu0 %v14761_v48  ;;  %14162 = vmatpush3.msra.mxu1 %v16521_v11  ;;  %v209_v60 = vsub.f32 %v207_v50, %v208_v55  ;;  %v220_v61 = vand.u32 4294901760, %v219_v56  ;;  %v14789_v6 = vpack.c.bf16 %v270_v31, %v263_v27  ;;  %v16701_v46 = vand.u32 4294901760, %v936_v45 }
  0x21   :  { %14766 = vmatprep.subr.bf16.mxu0 %v14765_v52  ;;  %v229_v62 = vsub.f32 %v227_v53, %v228_v57  ;;  %v239_v0 = vsub.f32 %v237_v54, %v238_v59 }
  0x22   :  { %v210_v63 = vand.u32 4294901760, %v209_v60  ;;  %21828 = vst [vmem:[#allocation11_spill] sm:$0xff] %v16701_v46 }
  0x23   :  { %v230_v1 = vand.u32 4294901760, %v229_v62  ;;  %v240_v4 = vand.u32 4294901760, %v239_v0 }
  0x24   :  { %14768 = vmatpush3.bf16.msra.mxu0 %v14765_v52  ;;  %14163 = vmatprep.mubr.f32.mxu1 %v210_v63  ;;  %v983_v52 = vld [vmem:[%s21388_s4] sm:$0xff]  ;;  %v21403_v63 = vmov 0.0  }
  0x25   :  { %14177 = vmatprep.subr.mxu0 %v279_v58  ;;  %14164 = vmatmul.mubr.f32.vlgmr.msra.gmra.mrb[0].mxu1 %v220_v61 }
  0x26   :  { %14166 = vmatprep.mubr.f32.mxu1 %v230_v1 }
  0x28   :  { %14178 = vmatpush3.msra.mxu0 %v279_v58 }
  0x29   :  { %14770 = vmatprep.subr.bf16.mxu0 %v14769_v2  ;;  %14180 = vmatmul.mubr.f32.vlgmr.msra.gmra.mrb[0].mxu0 %v16582_v37 }
  0x2a   :  { %14772 = vmatpush3.bf16.msra.mxu0 %v14769_v2  ;;  %14182 = vmatprep.mubr.f32.mxu0 %v16593_v47 }
  0x2b   :  { %14774 = vmatprep.subr.bf16.mxu0 %v14773_v3  ;;  %14167 = vmatmul.mubr.f32.gmra.mrb[2].mxu1 %v240_v4 }
  0x2d   :  { %14183 = vmatmul.mubr.f32.gmra.mrb[2].mxu0 %v16596_v49 }
  0x2e   :  { %14776 = vmatpush3.bf16.msra.mxu0 %v14773_v3  ;;  %14195 = vmatprep.mubr.f32.mxu0 %v207_v50 }
  0x2f   :  { %14193 = vmatprep.subr.mxu0 %v16544_v21 }
  0x32   :  { %14194 = vmatpush3.msra.mxu0 %v16544_v21 }
  0x33   :  { %14778 = vmatprep.subr.bf16.mxu0 %v16524_v13  ;;  %14196 = vmatmul.mubr.f32.vlgmr.msra.gmra.mrb[0].mxu0 %v217_v44 }
  0x34   :  { %14780 = vmatpush3.bf16.msra.mxu0 %v16524_v13  ;;  %14198 = vmatprep.mubr.f32.mxu0 %v227_v53  ;;  %v986_v53 = vld [vmem:[%s21388_s4 + $0x18] sm:$0xff] }
  0x35   :  { %14782 = vmatprep.subr.bf16.mxu0 %v16553_v26 }
  0x37   :  { %14199 = vmatmul.mubr.f32.gmra.mrb[2].mxu0 %v237_v54  ;;  %v985_v54 = vld [vmem:[%s21388_s4 + $0x10] sm:$0xff] }
  0x38   :  { %14784 = vmatpush3.bf16.msra.mxu0 %v16553_v26  ;;  %14211 = vmatprep.mubr.f32.mxu0 %v208_v55  ;;  %v34_v55 = vlaneseq }
  0x39   :  { %14209 = vmatprep.subr.mxu0 %v16521_v11 }
  0x3a   :  { %v35_v56 = vand.u32 127, %v34_v55 }
  0x3c   :  { %14210 = vmatpush3.msra.mxu0 %v16521_v11 }
  0x3d   :  { %14786 = vmatprep.subr.bf16.mxu0 %v14785_v5  ;;  %14212 = vmatmul.mubr.f32.vlgmr.msra.gmra.mrb[0].mxu0 %v218_v51  ;;  %v984_v51 = vld [vmem:[%s21388_s4 + $0x8] sm:$0xff] }
  0x3e   :  { %14788 = vmatpush3.bf16.msra.mxu0 %v14785_v5  ;;  %14214 = vmatprep.mubr.f32.mxu0 %v228_v57  ;;  %v37_v57 = vshra.s32 %v35_v56, 3 }
  0x3f   :  { %14790 = vmatprep.subr.bf16.mxu0 %v14789_v6 }
  0x40   :  { %v38_v58 = vand.u32 7, %v37_v57  ;;  %v944_v57 = vld [vmem:[#allocation3 + $0x48] sm:$0xff] }
  0x41   :  { %14215 = vmatmul.mubr.f32.gmra.mrb[2].mxu0 %v238_v59  ;;  %v36_v59 = vand.u32 7, %v35_v56  ;;  %v945_v56 = vld [vmem:[#allocation3 + $0x50] sm:$0xff] }
  0x42   :  { %14792 = vmatpush3.bf16.msra.mxu0 %v14789_v6  ;;  %14227 = vmatprep.mubr.f32.mxu0 %v16546_v22  ;;  %v39_v60 = vadd.s32 4294967295, %v38_v58  ;;  %vm63_vm6 = vcmp.ge.s32.totalorder %v38_v58, 0  ;;  %vm64_vm7 = vcmp.lt.s32.totalorder %v38_v58, 8 }
  0x43   :  { %14225 = vmatprep.subr.mxu0 %v16568_v32  ;;  %v16747_v61 = vadd.s32 4294967295, %v36_v59  ;;  %vm16806_vm9 = vmand %vm63_vm6, %vm64_vm7 }
  0x44   :  { %vm40_vm1 = vcmp.ge.s32.totalorder %v39_v60, 0  ;;  %vm41_vm2 = vcmp.lt.s32.totalorder %v39_v60, 8 }
  0x45   :  { %vm16749_vm3 = vmand %vm40_vm1, %vm41_vm2  ;;  %vm44_vm4 = vcmp.ge.s32.totalorder %v16747_v61, 0  ;;  %vm1007_vm2 = vcmask 261120  }
  0x46   :  { %14226 = vmatpush3.msra.mxu0 %v16568_v32  ;;  %vm45_vm5 = vmand %vm16749_vm3, %vm44_vm4 }
  0x47   :  { %14794 = vmatprep.subr.bf16.mxu0 %v16524_v13  ;;  %14228 = vmatmul.mubr.f32.vlgmr.msra.gmra.mrb[0].mxu0 %v16582_v37  ;;  %v16759_v0 = vsel %vm45_vm5, 1.0, %v21403_v63  ;;  %vm16882_vm0 = vmand %vm16806_vm9, %vm44_vm4 }
  0x48   :  { %14796 = vmatpush3.bf16.msra.mxu0 %v16524_v13  ;;  %14230 = vmatprep.mubr.f32.mxu0 %v16593_v47  ;;  %21832 = vst [vmem:[#allocation13_spill] sm:$0xff] %v16759_v0 }
  0x49   :  { %14798 = vmatprep.subr.bf16.mxu0 %v16553_v26 }
  0x4b   :  { %14231 = vmatmul.mubr.f32.gmra.mrb[2].mxu0 %v16596_v49 }
  0x4c   :  { %14800 = vmatpush3.bf16.msra.mxu0 %v16553_v26  ;;  %14243 = vmatprep.mubr.f32.mxu0 %v16546_v22 }
  0x4d   :  { %14241 = vmatprep.subr.mxu0 %v16521_v11 }
  0x50   :  { %14242 = vmatpush3.msra.mxu0 %v16521_v11 }
  0x51   :  { %14244 = vmatmul.mubr.f32.vlgmr.msra.gmra.mrb[0].mxu0 %v16582_v37 }
  0x52   :  { %14246 = vmatprep.mubr.f32.mxu0 %v16593_v47  ;;  %v16706_v47 = vsub.f32 %v936_v45, %v16701_v46 }
  0x54   :  { %21829 = vst [vmem:[#allocation12_spill] sm:$0xff] %v16706_v47  ;;  %v21393_v48 = vand.u32 4294901760, %v16706_v47 }
  0x55   :  { %14247 = vmatmul.mubr.f32.gmra.mrb[2].mxu0 %v16596_v49 }
  0x56   :  { %1560 = vmatprep.mubr.f32.mxu0 %v16706_v47  ;;  %v1119_v49 = vsub.f32 %v16706_v47, %v21393_v48 }
  0x58   :  { %v1120_v50 = vand.u32 4294901760, %v1119_v49 }
  0x5a   :  { %1121 = vmatprep.mubr.f32.mxu1 %v1120_v50 }
  0x94   :  { %v116_v13 = vpop.permute.xlu1 %115 }
  0x95   :  { %v106_v12 = vpop.permute.xlu0 %105 }
  0x98   :  { %v121_v15 = vpop.permute.xlu1 %120 }
  0x99   :  { %v111_v14 = vpop.permute.xlu0 %110 }
  0xf8   :  { %v14165_v7 = vpop.f32.mrb[0].mxu1 }
  0xf9   :  { %v212_v8 = vpop.f32.mrb[1].mxu1  ;;  %v223_v16 = vadd.f32 %v14165_v7, %v111_v14 }
  0xfa   :  { %v213_v17 = vadd.f32 %v212_v8, %v106_v12 }
  0xfe   :  { %v14168_v9 = vpop.f32.mrb[2].mxu1 }
  0xff   :  { %v232_v10 = vpop.f32.mrb[3].mxu1  ;;  %v243_v11 = vadd.f32 %v14168_v9, %v121_v15 }
 0x100   :  { %v233_v22 = vadd.f32 %v232_v10, %v116_v13 }
 0x124   :  { %v14245_v18 = vpop.f32.mrb[0].mxu0 }
 0x125   :  { %v16242_v19 = vadd.f32 %v14245_v18, %v223_v16  ;;  %v741_v20 = vpop.f32.mrb[1].mxu0 }
 0x126   :  { %v16244_v21 = vadd.f32 %v741_v20, %v213_v17 }
 0x127   :  { %v16642_v23 = vmax.f32 %v16242_v19, 0.0 }
 0x128   :  { %v16644_v24 = vmax.f32 %v16244_v21, 0.0  ;;  %v14248_v25 = vpop.f32.mrb[2].mxu0  ;;  %v935_v21 = vld [vmem:[#allocation3] sm:$0xff] }
 0x129   :  { %21823 = vst [vmem:[#allocation6_spill] sm:$0xff] %v16642_v23  ;;  %v16246_v26 = vadd.f32 %v14248_v25, %v243_v11  ;;  %v753_v27 = vpop.f32.mrb[3].mxu0  ;;  %773 = vrot.lane.b32.xlu1 %v16642_v23, %s16452_s1  ;;  %v1072_v28 = vand.u32 4294901760, %v16642_v23  ;;  %v939_v25 = vld [vmem:[#allocation3 + $0x20] sm:$0xff] }
 0x12a   :  { %21824 = vst [vmem:[#allocation7_spill] sm:$0xff] %v16644_v24  ;;  %v16248_v29 = vadd.f32 %v753_v27, %v233_v22  ;;  %771 = vrot.lane.b32.xlu0 %v16644_v24, %s16452_s1  ;;  %v1069_v30 = vand.u32 4294901760, %v16644_v24  ;;  %v16791_v22 = vadd.s32 1, %v36_v59  ;;  %v942_v27 = vld [vmem:[#allocation3 + $0x38] sm:$0xff] }
 0x12b   :  { %v1298_v31 = vsub.f32 %v16642_v23, %v1072_v28  ;;  %v16685_v43 = vmax.f32 %v16246_v26, 0.0  ;;  %v938_v26 = vld [vmem:[#allocation3 + $0x18] sm:$0xff] }
 0x12c   :  { %v16653_v32 = vpack.c.bf16 %v1072_v28, %v1069_v30  ;;  %v1291_v33 = vsub.f32 %v16644_v24, %v1069_v30  ;;  %v16687_v44 = vmax.f32 %v16248_v29, 0.0  ;;  %v74_v28 = vadd.s32 1, %v38_v58  ;;  %v941_v29 = vld [vmem:[#allocation3 + $0x30] sm:$0xff] }
 0x12d   :  { %857 = vrot.lane.b32.xlu1 %v16642_v23, %s16453_s2  ;;  %v1299_v34 = vand.u32 4294901760, %v1298_v31  ;;  %21826 = vst [vmem:[#allocation9_spill] sm:$0xff] %v16685_v43  ;;  %v1078_v5 = vand.u32 4294901760, %v16685_v43  ;;  %vm59_vm8 = vcmp.lt.s32.totalorder %v16791_v22, 8 }
 0x12e   :  { %21825 = vst [vmem:[#allocation8_spill] sm:$0xff] %v16653_v32  ;;  %855 = vrot.lane.b32.xlu0 %v16644_v24, %s16453_s2  ;;  %14802 = vmatprep.subr.bf16.mxu1 %v16653_v32  ;;  %v14865_v35 = vpack.c.bf16 %v1298_v31, %v1291_v33  ;;  %v1292_v36 = vand.u32 4294901760, %v1291_v33  ;;  %21827 = vst [vmem:[#allocation10_spill] sm:$0xff] %v16687_v44  ;;  %v1075_v4 = vand.u32 4294901760, %v16687_v44  ;;  %vm75_vm10 = vcmp.ge.s32.totalorder %v74_v28, 0 }
 0x12f   :  { %v1300_v37 = vsub.f32 %v1298_v31, %v1299_v34  ;;  %v16773_v14 = vsub.f32 %v16685_v43, %v1078_v5  ;;  %v16795_v31 = vand.u32 4294901760, %v935_v21  ;;  %vm76_vm11 = vcmp.lt.s32.totalorder %v74_v28, 8  ;;  %vm71_vm12 = vmand %vm16806_vm9, %vm59_vm8 }
 0x130   :  { %14866 = vmatprep.subr.bf16.mxu0 %v14865_v35  ;;  %v1293_v38 = vsub.f32 %v1291_v33, %v1292_v36  ;;  %v16661_v39 = vpack.c.bf16 %v1299_v34, %v1292_v36  ;;  %v16770_v13 = vsub.f32 %v16687_v44, %v1075_v4  ;;  %v16779_v17 = vpack.c.bf16 %v1078_v5, %v1075_v4  ;;  %vm16834_vm13 = vmand %vm75_vm10, %vm76_vm11 }
 0x131   :  { %793 = vrot.lane.b32.xlu1 %v16642_v23, %s16454_s6  ;;  %v1301_v40 = vand.u32 4294901760, %v1300_v37  ;;  %21835 = vst [vmem:[#allocation16_spill] sm:$0xff] %v16795_v31  ;;  %v16799_v34 = vand.u32 4294901760, %v939_v25  ;;  %v16801_v35 = vand.u32 4294901760, %v938_v26  ;;  %v16803_v36 = vand.u32 4294901760, %v942_v27  ;;  %vm78_vm14 = vmand %vm16834_vm13, %vm44_vm4 }
 0x132   :  { %791 = vrot.lane.b32.xlu0 %v16644_v24, %s16454_s6  ;;  %v1294_v41 = vand.u32 4294901760, %v1293_v38  ;;  %21834 = vst [vmem:[#allocation15_spill] sm:$0xff] %v16779_v17  ;;  %v14869_v11 = vpack.c.bf16 %v16773_v14, %v16770_v13  ;;  %v16810_v38 = vand.u32 4294901760, %v941_v29  ;;  %v1306_v45 = vand.u32 4294901760, %v16770_v13  ;;  %vm60_vm15 = vmand %vm16749_vm3, %vm59_vm8 }
 0x133   :  { %21836 = vst [vmem:[#allocation17_spill] sm:$0xff] %v16799_v34  ;;  %21837 = vst [vmem:[#allocation18_spill] sm:$0xff] %v16801_v35  ;;  %v1313_v49 = vand.u32 4294901760, %v16773_v14  ;;  %v16842_v58 = vsel %vm71_vm12, 1.0, %v21403_v63 }
 0x134   :  { %v16667_v42 = vpack.c.bf16 %v1301_v40, %v1294_v41  ;;  %21838 = vst [vmem:[#allocation19_spill] sm:$0xff] %v16803_v36  ;;  %21841 = vst [vmem:[#allocation20_spill] sm:$0xff] %v16810_v38  ;;  %v16815_v41 = vsub.f32 %v935_v21, %v16795_v31  ;;  %v16839_v55 = vsub.f32 %v941_v29, %v16810_v38  ;;  %v16876_v21 = vsel %vm78_vm14, 1.0, %v21403_v63 }
 0x135   :  { %877 = vrot.lane.b32.xlu1 %v16642_v23, %s16455_s7  ;;  %21845 = vst [vmem:[#allocation22_spill] sm:$0xff] %v16842_v58  ;;  %21849 = vst [vmem:[#allocation26_spill] sm:$0xff] %v16876_v21 }
 0x136   :  { %875 = vrot.lane.b32.xlu0 %v16644_v24, %s16455_s7  ;;  %21844 = vst [vmem:[#allocation21_spill] sm:$0xff] %v16839_v55  ;;  %v21392_v60 = vand.u32 4294901760, %v16815_v41  ;;  %vm17220_vm1 = vmand %vm16834_vm13, %vm59_vm8 }
 0x139   :  { %813 = vrot.lane.b32.xlu1 %v16642_v23, %s16456_s8 }
 0x13a   :  { %811 = vrot.lane.b32.xlu0 %v16644_v24, %s16456_s8 }
 0x13d   :  { %897 = vrot.lane.b32.xlu1 %v16642_v23, %s16457_s9 }
 0x13e   :  { %895 = vrot.lane.b32.xlu0 %v16644_v24, %s16457_s9 }
 0x141   :  { %833 = vrot.lane.b32.xlu1 %v16642_v23, %s16458_s10 }
 0x142   :  { %831 = vrot.lane.b32.xlu0 %v16644_v24, %s16458_s10 }
 0x145   :  { %777 = vrot.lane.b32.xlu1 %v16685_v43, %s16452_s1 }
 0x146   :  { %775 = vrot.lane.b32.xlu0 %v16687_v44, %s16452_s1 }
 0x149   :  { %861 = vrot.lane.b32.xlu1 %v16685_v43, %s16453_s2 }
 0x14a   :  { %859 = vrot.lane.b32.xlu0 %v16687_v44, %s16453_s2 }
 0x14d   :  { %797 = vrot.lane.b32.xlu1 %v16685_v43, %s16454_s6 }
 0x14e   :  { %795 = vrot.lane.b32.xlu0 %v16687_v44, %s16454_s6 }
 0x151   :  { %881 = vrot.lane.b32.xlu1 %v16685_v43, %s16455_s7 }
 0x152   :  { %879 = vrot.lane.b32.xlu0 %v16687_v44, %s16455_s7 }
 0x155   :  { %817 = vrot.lane.b32.xlu1 %v16685_v43, %s16456_s8 }
 0x156   :  { %815 = vrot.lane.b32.xlu0 %v16687_v44, %s16456_s8 }
 0x159   :  { %901 = vrot.lane.b32.xlu1 %v16685_v43, %s16457_s9 }
 0x15a   :  { %899 = vrot.lane.b32.xlu0 %v16687_v44, %s16457_s9 }
 0x15d   :  { %837 = vrot.lane.b32.xlu1 %v16685_v43, %s16458_s10 }
 0x15e   :  { %835 = vrot.lane.b32.xlu0 %v16687_v44, %s16458_s10 }
 0x161   :  { %917 = vrot.lane.b32.xlu1 %v16642_v23, %s16459_s11 }
 0x162   :  { %915 = vrot.lane.b32.xlu0 %v16644_v24, %s16459_s11 }
 0x165   :  { %921 = vrot.lane.b32.xlu1 %v16685_v43, %s16459_s11  ;;  %v16934_v43 = vsel %vm16882_vm0, 1.0, %v21403_v63 }
 0x166   :  { %919 = vrot.lane.b32.xlu0 %v16687_v44, %s16459_s11  ;;  %21856 = vst [vmem:[#allocation31_spill] sm:$0xff] %v16934_v43 }
 0x169   :  { %994 = vperm.xlu1 %16423, %v984_v51   ;;  %v16826_v51 = vsub.f32 %v939_v25, %v16799_v34 }
 0x16a   :  { %989 = vperm.xlu0 %16422, %v983_v52   ;;  %v16829_v52 = vsub.f32 %v938_v26, %v16801_v35 }
 0x16b   :  { %v21390_v4 = vand.u32 4294901760, %v16826_v51 }
 0x16c   :  { %v21391_v5 = vand.u32 4294901760, %v16829_v52 }
 0x16d   :  { %1004 = vperm.xlu1 %16423, %v986_v53   ;;  %v16832_v53 = vsub.f32 %v942_v27, %v16803_v36  ;;  %v16894_v27 = vsel %vm60_vm15, 1.0, %v21403_v63  ;;  %v16901_v61 = vsub.f32 %v16826_v51, %v21390_v4 }
 0x16e   :  { %999 = vperm.xlu0 %16422, %v985_v54   ;;  %21852 = vst [vmem:[#allocation27_spill] sm:$0xff] %v16894_v27  ;;  %v16906_v29 = vsub.f32 %v16829_v52, %v21391_v5 }
 0x19b   :  { %v774_v1 = vpop.permute.xlu1 %773 }
 0x19c   :  { %v784_v2 = vmul.f32 %v16759_v0, %v774_v1  ;;  %v772_v3 = vpop.permute.xlu0 %771  ;;  %v1307_v1 = vsub.f32 %v16770_v13, %v1306_v45  ;;  %v16865_v13 = vand.u32 4294901760, %v944_v57 }
 0x19d   :  { %v783_v6 = vmul.f32 %v16759_v0, %v772_v3 }
 0x19e   :  { %v1024_v7 = vand.u32 4294901760, %v784_v2  ;;  %21847 = vst [vmem:[#allocation24_spill] sm:$0xff] %v16865_v13  ;;  %v1308_v62 = vand.u32 4294901760, %v1307_v1  ;;  %v16916_v1 = vsel %vm16834_vm13, 1.0, %v21403_v63  ;;  %v16927_v5 = vsub.f32 %v944_v57, %v16865_v13 }
 0x19f   :  { %v1021_v8 = vand.u32 4294901760, %v783_v6  ;;  %v16765_v9 = vpop.permute.xlu1 %857  ;;  %21853 = vst [vmem:[#allocation28_spill] sm:$0xff] %v16916_v1  ;;  %v16941_v57 = vpack.c.bf16 %v1313_v49, %v1306_v45 }
 0x1a0   :  { %v16767_v10 = vsub.f32 %v784_v2, %v1024_v7  ;;  %v856_v12 = vpop.permute.xlu0 %855  ;;  %v1314_v2 = vsub.f32 %v16773_v14, %v1313_v49  ;;  %v868_v14 = vmul.f32 %v16842_v58, %v16765_v9  ;;  %v16891_v9 = vsub.f32 %v16815_v41, %v21392_v60  ;;  %21855 = vst [vmem:[#allocation30_spill] sm:$0xff] %v16927_v5 }
 0x1a1   :  { %v16775_v15 = vpack.c.bf16 %v1024_v7, %v1021_v8  ;;  %v16777_v16 = vsub.f32 %v783_v6, %v1021_v8  ;;  %v21394_v6 = vand.u32 4294901760, %v16832_v53  ;;  %v21396_v7 = vand.u32 4294901760, %v16839_v55 }
 0x1a2   :  { %v16863_v8 = vand.u32 4294901760, %v945_v56  ;;  %v1084_v60 = vand.u32 4294901760, %v868_v14 }
 0x1a3   :  { %21833 = vst [vmem:[#allocation14_spill] sm:$0xff] %v16775_v15  ;;  %v16781_v18 = vpop.permute.xlu1 %793  ;;  %14804 = vmatpush3.bf16.msra.mxu1 %v16775_v15  ;;  %v14867_v19 = vpack.c.bf16 %v16767_v10, %v16777_v16  ;;  %v16911_v37 = vsub.f32 %v16832_v53, %v21394_v6 }
 0x1a4   :  { %v16786_v20 = vpop.permute.xlu0 %791  ;;  %14806 = vmatprep.subr.bf16.mxu1 %v16779_v17  ;;  %21846 = vst [vmem:[#allocation23_spill] sm:$0xff] %v16863_v8  ;;  %v16924_v4 = vsub.f32 %v945_v56, %v16863_v8 }
 0x1a5   :  { %14868 = vmatpush3.bf16.msra.mxu0 %v14867_v19  ;;  %v867_v19 = vmul.f32 %v16842_v58, %v856_v12  ;;  %v1315_v12 = vand.u32 4294901760, %v1314_v2  ;;  %v16921_v2 = vsub.f32 %v16839_v55, %v21396_v7 }
 0x1a6   :  { %14870 = vmatprep.subr.bf16.mxu0 %v14869_v11  ;;  %v16873_v11 = vsel %vm16749_vm3, 1.0, %v21403_v63 }
 0x1a7   :  { %v16793_v30 = vpop.permute.xlu1 %877  ;;  %21848 = vst [vmem:[#allocation25_spill] sm:$0xff] %v16873_v11  ;;  %21854 = vst [vmem:[#allocation29_spill] sm:$0xff] %v16921_v2  ;;  %v1081_v48 = vand.u32 4294901760, %v867_v19  ;;  %v804_v6 = vmul.f32 %v16873_v11, %v16781_v18  ;;  %v803_v7 = vmul.f32 %v16873_v11, %v16786_v20  ;;  %v16939_v23 = vpack.c.bf16 %v1315_v12, %v1308_v62 }
 0x1a8   :  { %v16797_v33 = vpop.permute.xlu0 %875  ;;  %v16951_v12 = vsub.f32 %v868_v14, %v1084_v60  ;;  %v888_v25 = vmul.f32 %v16876_v21, %v16793_v30 }
 0x1a9   :  { %v16953_v45 = vsub.f32 %v867_v19, %v1081_v48  ;;  %v1033_v56 = vand.u32 4294901760, %v803_v7  ;;  %v887_v20 = vmul.f32 %v16876_v21, %v16797_v33  ;;  %v16963_v19 = vpack.c.bf16 %v1084_v60, %v1081_v48 }
 0x1ab   :  { %v16812_v40 = vpop.permute.xlu1 %813  ;;  %21857 = vst [vmem:[#allocation32_spill] sm:$0xff] %v16963_v19  ;;  %v14873_v48 = vpack.c.bf16 %v16951_v12, %v16953_v45  ;;  %v16980_v60 = vsub.f32 %v803_v7, %v1033_v56 }
 0x1ac   :  { %v16823_v50 = vpop.permute.xlu0 %811 }
 0x1af   :  { %v16844_v59 = vpop.permute.xlu1 %897 }
 0x1b0   :  { %v16853_v3 = vpop.permute.xlu0 %895 }
 0x1b3   :  { %v16886_v26 = vpop.permute.xlu1 %833 }
 0x1b4   :  { %v16896_v28 = vpop.permute.xlu0 %831 }
 0x1b7   :  { %v778_v44 = vpop.permute.xlu1 %777 }
 0x1b8   :  { %v786_v24 = vmul.f32 %v16759_v0, %v778_v44  ;;  %v776_v47 = vpop.permute.xlu0 %775  ;;  %v1036_v44 = vand.u32 4294901760, %v804_v6 }
 0x1b9   :  { %v785_v63 = vmul.f32 %v16759_v0, %v776_v47  ;;  %v16967_v0 = vmul.f32 %v16894_v27, %v16812_v40 }
 0x1ba   :  { %v1030_v49 = vand.u32 4294901760, %v786_v24  ;;  %v16974_v36 = vsub.f32 %v804_v6, %v1036_v44  ;;  %v1093_v6 = vand.u32 4294901760, %v887_v20 }
 0x1bb   :  { %v1027_v13 = vand.u32 4294901760, %v785_v63  ;;  %v862_v47 = vpop.permute.xlu1 %861  ;;  %v1048_v7 = vand.u32 4294901760, %v16967_v0 }
 0x1bc   :  { %v16960_v8 = vsub.f32 %v786_v24, %v1030_v49  ;;  %v870_v14 = vmul.f32 %v16842_v58, %v862_v47  ;;  %v860_v62 = vpop.permute.xlu0 %859  ;;  %v823_v24 = vmul.f32 %v16894_v27, %v16823_v50  ;;  %v1096_v47 = vand.u32 4294901760, %v888_v25 }
 0x1bd   :  { %v16969_v18 = vpack.c.bf16 %v1030_v49, %v1027_v13  ;;  %v16971_v38 = vsub.f32 %v785_v63, %v1027_v13  ;;  %v869_v30 = vmul.f32 %v16842_v58, %v860_v62  ;;  %v16985_v13 = vpack.c.bf16 %v1036_v44, %v1033_v56 }
 0x1be   :  { %v1090_v33 = vand.u32 4294901760, %v870_v14  ;;  %v1045_v34 = vand.u32 4294901760, %v823_v24  ;;  %v16999_v56 = vmul.f32 %v16916_v1, %v16844_v59  ;;  %v17012_v59 = vsub.f32 %v887_v20, %v1093_v6 }
 0x1bf   :  { %21858 = vst [vmem:[#allocation33_spill] sm:$0xff] %v16969_v18  ;;  %v1087_v40 = vand.u32 4294901760, %v869_v30  ;;  %v798_v35 = vpop.permute.xlu1 %797  ;;  %14808 = vmatpush3.bf16.msra.mxu1 %v16969_v18  ;;  %v14871_v63 = vpack.c.bf16 %v16960_v8, %v16971_v38  ;;  %21859 = vst [vmem:[#allocation34_spill] sm:$0xff] %v16985_v13 }
 0x1c0   :  { %v16987_v62 = vsub.f32 %v870_v14, %v1090_v33  ;;  %v806_v50 = vmul.f32 %v16873_v11, %v798_v35  ;;  %v796_v49 = vpop.permute.xlu0 %795  ;;  %14810 = vmatprep.subr.bf16.mxu1 %v16963_v19  ;;  %v17003_v35 = vmul.f32 %v16916_v1, %v16853_v3  ;;  %v17005_v14 = vsub.f32 %v888_v25, %v1096_v47 }
 0x1c1   :  { %v16992_v58 = vsub.f32 %v869_v30, %v1087_v40  ;;  %v805_v17 = vmul.f32 %v16873_v11, %v796_v49  ;;  %14872 = vmatpush3.bf16.msra.mxu0 %v14871_v63  ;;  %v16995_v18 = vpack.c.bf16 %v1090_v33, %v1087_v40  ;;  %v14875_v33 = vpack.c.bf16 %v16974_v36, %v16980_v60 }
 0x1c2   :  { %v1042_v44 = vand.u32 4294901760, %v806_v50  ;;  %14874 = vmatprep.subr.bf16.mxu0 %v14873_v48  ;;  %v17018_v25 = vpack.c.bf16 %v1096_v47, %v1093_v6  ;;  %v17021_v48 = vsub.f32 %v16967_v0, %v1048_v7  ;;  %v17028_v20 = vsub.f32 %v823_v24, %v1045_v34 }
 0x1c3   :  { %21860 = vst [vmem:[#allocation35_spill] sm:$0xff] %v16995_v18  ;;  %v1039_v30 = vand.u32 4294901760, %v805_v17  ;;  %v882_v19 = vpop.permute.xlu1 %881  ;;  %14812 = vmatpush3.bf16.msra.mxu1 %v16985_v13  ;;  %v14877_v40 = vpack.c.bf16 %v16987_v62, %v16992_v58  ;;  %v844_v47 = vmul.f32 %v16934_v43, %v16886_v26  ;;  %v843_v0 = vmul.f32 %v16934_v43, %v16896_v28 }
 0x1c4   :  { %v17014_v63 = vsub.f32 %v806_v50, %v1042_v44  ;;  %v890_v3 = vmul.f32 %v16876_v21, %v882_v19  ;;  %v880_v49 = vpop.permute.xlu0 %879  ;;  %14814 = vmatprep.subr.bf16.mxu1 %v16995_v18  ;;  %21861 = vst [vmem:[#allocation36_spill] sm:$0xff] %v17018_v25  ;;  %v1108_v50 = vand.u32 4294901760, %v16999_v56  ;;  %v1105_v19 = vand.u32 4294901760, %v17003_v35 }
 0x1c5   :  { %v17023_v11 = vpack.c.bf16 %v1042_v44, %v1039_v30  ;;  %v17025_v13 = vsub.f32 %v805_v17, %v1039_v30  ;;  %v889_v15 = vmul.f32 %v16876_v21, %v880_v49  ;;  %14876 = vmatpush3.bf16.msra.mxu0 %v14875_v33  ;;  %v14881_v26 = vpack.c.bf16 %v17005_v14, %v17012_v59 }
 0x1c6   :  { %v1102_v31 = vand.u32 4294901760, %v890_v3  ;;  %14878 = vmatprep.subr.bf16.mxu0 %v14877_v40  ;;  %v17046_v28 = vpack.c.bf16 %v1048_v7, %v1045_v34  ;;  %v1060_v34 = vand.u32 4294901760, %v844_v47  ;;  %v1057_v7 = vand.u32 4294901760, %v843_v0 }
 0x1c7   :  { %21862 = vst [vmem:[#allocation37_spill] sm:$0xff] %v17023_v11  ;;  %v1099_v6 = vand.u32 4294901760, %v889_v15  ;;  %v818_v17 = vpop.permute.xlu1 %817  ;;  %14816 = vmatpush3.bf16.msra.mxu1 %v17023_v11  ;;  %v14879_v24 = vpack.c.bf16 %v17014_v63, %v17025_v13 }
 0x1c8   :  { %v17040_v30 = vsub.f32 %v890_v3, %v1102_v31  ;;  %v826_v33 = vmul.f32 %v16894_v27, %v818_v17  ;;  %v816_v40 = vpop.permute.xlu0 %815  ;;  %14818 = vmatprep.subr.bf16.mxu1 %v17018_v25  ;;  %21863 = vst [vmem:[#allocation38_spill] sm:$0xff] %v17046_v28  ;;  %v17054_v3 = vsub.f32 %v16999_v56, %v1108_v50  ;;  %v21865_v56 = vand.u32 4294901760, %v16767_v10 }
 0x1c9   :  { %v17048_v49 = vsub.f32 %v889_v15, %v1099_v6  ;;  %v825_v21 = vmul.f32 %v16894_v27, %v816_v40  ;;  %14880 = vmatpush3.bf16.msra.mxu0 %v14879_v24  ;;  %v17051_v11 = vpack.c.bf16 %v1102_v31, %v1099_v6  ;;  %v17057_v17 = vsub.f32 %v17003_v35, %v1105_v19 }
 0x1ca   :  { %v1054_v44 = vand.u32 4294901760, %v826_v33  ;;  %14882 = vmatprep.subr.bf16.mxu0 %v14881_v26  ;;  %v14883_v25 = vpack.c.bf16 %v17021_v48, %v17028_v20  ;;  %v1188_v6 = vsub.f32 %v16767_v10, %v21865_v56  ;;  %v21866_v35 = vand.u32 4294901760, %v16777_v16 }
 0x1cb   :  { %21864 = vst [vmem:[#allocation39_spill] sm:$0xff] %v17051_v11  ;;  %v1051_v15 = vand.u32 4294901760, %v825_v21  ;;  %v902_v18 = vpop.permute.xlu1 %901  ;;  %14820 = vmatpush3.bf16.msra.mxu1 %v17046_v28  ;;  %v14885_v31 = vpack.c.bf16 %v17040_v30, %v17048_v49 }
 0x1cc   :  { %v1181_v24 = vsub.f32 %v16777_v16, %v21866_v35  ;;  %v17070_v40 = vsub.f32 %v826_v33, %v1054_v44  ;;  %v910_v26 = vmul.f32 %v16916_v1, %v902_v18  ;;  %v900_v27 = vpop.permute.xlu0 %899  ;;  %14822 = vmatprep.subr.bf16.mxu1 %v17051_v11  ;;  %v17081_v33 = vpack.c.bf16 %v1108_v50, %v1105_v19 }
 0x1cd   :  { %v17075_v32 = vpack.c.bf16 %v1054_v44, %v1051_v15  ;;  %v17077_v46 = vsub.f32 %v825_v21, %v1051_v15  ;;  %v909_v55 = vmul.f32 %v16916_v1, %v900_v27  ;;  %14884 = vmatpush3.bf16.msra.mxu0 %v14883_v25  ;;  %v14889_v18 = vpack.c.bf16 %v17054_v3, %v17057_v17 }
 0x1ce   :  { %v1114_v2 = vand.u32 4294901760, %v910_v26  ;;  %14886 = vmatprep.subr.bf16.mxu0 %v14885_v31  ;;  %21868 = vst [vmem:[#allocation41_spill] sm:$0xff] %v17081_v33  ;;  %v17085_v35 = vsub.f32 %v844_v47, %v1060_v34  ;;  %v17087_v11 = vsub.f32 %v843_v0, %v1057_v7  ;;  %v17092_v27 = vpack.c.bf16 %v1060_v34, %v1057_v7 }
 0x1cf   :  { %21867 = vst [vmem:[#allocation40_spill] sm:$0xff] %v17075_v32  ;;  %v1111_v44 = vand.u32 4294901760, %v909_v55  ;;  %v838_v28 = vpop.permute.xlu1 %837  ;;  %14824 = vmatpush3.bf16.msra.mxu1 %v17075_v32  ;;  %v14887_v21 = vpack.c.bf16 %v17070_v40, %v17077_v46  ;;  %v21467_v47 = vand.u32 4294901760, %v16971_v38  ;;  %v1189_v34 = vand.u32 4294901760, %v1188_v6 }
 0x1d0   :  { %21869 = vst [vmem:[#allocation42_spill] sm:$0xff] %v17092_v27  ;;  %v17095_v50 = vsub.f32 %v910_v26, %v1114_v2  ;;  %v846_v19 = vmul.f32 %v16934_v43, %v838_v28  ;;  %v836_v15 = vpop.permute.xlu0 %835  ;;  %14826 = vmatprep.subr.bf16.mxu1 %v17081_v33  ;;  %v1182_v7 = vand.u32 4294901760, %v1181_v24  ;;  %v21872_v26 = vand.u32 4294901760, %v16951_v12 }
 0x1d1   :  { %v17100_v0 = vsub.f32 %v909_v55, %v1111_v44  ;;  %v845_v31 = vmul.f32 %v16934_v43, %v836_v15  ;;  %14888 = vmatpush3.bf16.msra.mxu0 %v14887_v21  ;;  %v17103_v56 = vpack.c.bf16 %v1114_v2, %v1111_v44  ;;  %v1215_v25 = vand.u32 4294901760, %v16974_v36 }
 0x1d2   :  { %v1066_v1 = vand.u32 4294901760, %v846_v19  ;;  %14890 = vmatprep.subr.bf16.mxu0 %v14889_v18  ;;  %v1328_v28 = vsub.f32 %v16951_v12, %v21872_v26  ;;  %v14891_v55 = vpack.c.bf16 %v17085_v35, %v17087_v11  ;;  %v1208_v6 = vand.u32 4294901760, %v16980_v60 }
 0x1d3   :  { %21870 = vst [vmem:[#allocation43_spill] sm:$0xff] %v17100_v0  ;;  %21871 = vst [vmem:[#allocation44_spill] sm:$0xff] %v17103_v56  ;;  %v1063_v33 = vand.u32 4294901760, %v845_v31  ;;  %14828 = vmatpush3.bf16.msra.mxu1 %v17092_v27  ;;  %v14893_v2 = vpack.c.bf16 %v17095_v50, %v17100_v0  ;;  %v21873_v44 = vand.u32 4294901760, %v16953_v45  ;;  %v21874_v15 = vand.u32 4294901760, %v16960_v8 }
 0x1d4   :  { %v17116_v18 = vsub.f32 %v846_v19, %v1066_v1  ;;  %14830 = vmatprep.subr.bf16.mxu1 %v17103_v56  ;;  %v1195_v43 = vsub.f32 %v16971_v38, %v21467_v47  ;;  %v1209_v47 = vsub.f32 %v16980_v60, %v1208_v6  ;;  %v21879_v19 = vand.u32 4294901760, %v17005_v14 }
 0x1d5   :  { %v1321_v21 = vsub.f32 %v16953_v45, %v21873_v44  ;;  %v1202_v26 = vsub.f32 %v16960_v8, %v21874_v15  ;;  %v17128_v27 = vpack.c.bf16 %v1066_v1, %v1063_v33  ;;  %v17130_v32 = vsub.f32 %v845_v31, %v1063_v33  ;;  %14892 = vmatpush3.bf16.msra.mxu0 %v14891_v55 }
 0x1d6   :  { %14894 = vmatprep.subr.bf16.mxu0 %v14893_v2  ;;  %v21877_v44 = vand.u32 4294901760, %v16924_v4  ;;  %v21878_v15 = vand.u32 4294901760, %v16927_v5  ;;  %v1348_v1 = vand.u32 4294901760, %v17012_v59  ;;  %v14835_v31 = vpack.c.bf16 %v1189_v34, %v1182_v7 }
 0x1d7   :  { %21875 = vst [vmem:[#allocation45_spill] sm:$0xff] %v17128_v27  ;;  %21876 = vst [vmem:[#allocation46_spill] sm:$0xff] %v17130_v32  ;;  %14832 = vmatpush3.bf16.msra.mxu1 %v17128_v27  ;;  %v14895_v33 = vpack.c.bf16 %v17116_v18, %v17130_v32  ;;  %v1329_v55 = vand.u32 4294901760, %v1328_v28  ;;  %v1216_v2 = vsub.f32 %v16974_v36, %v1215_v25  ;;  %v1203_v24 = vand.u32 4294901760, %v1202_v26 }
 0x1d8   :  { %v17137_v56 = vsub.f32 %v16924_v4, %v21877_v44  ;;  %v17142_v0 = vsub.f32 %v16927_v5, %v21878_v15  ;;  %14834 = vmatprep.subr.bf16.mxu1 %v16667_v42  ;;  %v1322_v44 = vand.u32 4294901760, %v1321_v21  ;;  %v17154_v15 = vsub.f32 %v17005_v14, %v21879_v19 }
 0x1d9   :  { %v1196_v5 = vand.u32 4294901760, %v1195_v43  ;;  %v1229_v27 = vand.u32 4294901760, %v17014_v63  ;;  %v1222_v32 = vand.u32 4294901760, %v17025_v13  ;;  %14896 = vmatpush3.bf16.msra.mxu0 %v14895_v33  ;;  %v21880_v34 = vand.u32 4294901760, %v16891_v9 }
 0x1da   :  { %14930 = vmatprep.subr.bf16.mxu0 %v16661_v39  ;;  %v21881_v42 = vand.u32 4294901760, %v16777_v16  ;;  %v21882_v36 = vand.u32 4294901760, %v16767_v10  ;;  %v21883_v7 = vand.u32 4294901760, %v16992_v58  ;;  %v21884_v43 = vand.u32 4294901760, %v16987_v62 }
 0x1db   :  { %1127 = vmatmul.mubr.f32.vlgmr.msra.gmra.mrb[4].mxu1 %v21880_v34  ;;  %v1165_v26 = vand.u32 4294901760, %v17137_v56  ;;  %v1243_v9 = vand.u32 4294901760, %v17021_v48  ;;  %v1236_v19 = vand.u32 4294901760, %v17028_v20  ;;  %v21885_v39 = vand.u32 4294901760, %v16901_v61 }
 0x1dc   :  { %v14931_v60 = vpack.c.bf16 %v21882_v36, %v21881_v42  ;;  %v1335_v28 = vsub.f32 %v16992_v58, %v21883_v7  ;;  %v1342_v21 = vsub.f32 %v16987_v62, %v21884_v43  ;;  %14836 = vmatpush3.bf16.msra.mxu1 %v14835_v31  ;;  %v21886_v10 = vand.u32 4294901760, %v16953_v45  ;;  %1563 = vmatmul.mubr.f32.vlgmr.msra.gmra.mrb[4].mxu0 %v16815_v41 }
 0x1dd   :  { %1136 = vmatprep.mubr.f32.mxu1 %v21885_v39  ;;  %v21887_v16 = vand.u32 4294901760, %v16951_v12  ;;  %v1349_v34 = vsub.f32 %v17012_v59, %v1348_v1  ;;  %v1217_v42 = vand.u32 4294901760, %v1216_v2  ;;  %v1210_v36 = vand.u32 4294901760, %v1209_v47  ;;  %14838 = vmatprep.subr.bf16.mxu1 %v16939_v23 }
 0x1de   :  { %v14841_v56 = vpack.c.bf16 %v1329_v55, %v1322_v44  ;;  %v14939_v7 = vpack.c.bf16 %v1215_v25, %v1208_v6  ;;  %v1230_v61 = vsub.f32 %v17014_v63, %v1229_v27  ;;  %v1223_v45 = vsub.f32 %v17025_v13, %v1222_v32  ;;  %14932 = vmatpush3.bf16.msra.mxu0 %v14931_v60 }
 0x1df   :  { %v14937_v33 = vpack.c.bf16 %v21887_v16, %v21886_v10  ;;  %v14839_v12 = vpack.c.bf16 %v1203_v24, %v1196_v5  ;;  %v1357_v59 = vand.u32 4294901760, %v17154_v15  ;;  %1569 = vmatprep.mubr.f32.mxu0 %v16826_v51  ;;  %v1369_v23 = vand.u32 4294901760, %v17040_v30  ;;  %14934 = vmatprep.subr.bf16.mxu0 %v16941_v57 }
 0x1e0   :  { %v1362_v47 = vand.u32 4294901760, %v17048_v49  ;;  %v21888_v25 = vand.u32 4294901760, %v16906_v29  ;;  %v1336_v6 = vand.u32 4294901760, %v1335_v28  ;;  %v1343_v31 = vand.u32 4294901760, %v1342_v21  ;;  %1572 = vmatmul.mubr.f32.gmra.mrb[6].mxu0 %v16829_v52 }
 0x1e1   :  { %v1244_v55 = vsub.f32 %v17021_v48, %v1243_v9  ;;  %v1237_v5 = vsub.f32 %v17028_v20, %v1236_v19  ;;  %14840 = vmatpush3.bf16.msra.mxu1 %v14839_v12  ;;  %v21889_v24 = vand.u32 4294901760, %v16911_v37  ;;  %v21890_v2 = vand.u32 4294901760, %v16971_v38  ;;  %1578 = vmatprep.mubr.f32.mxu0 %v16832_v53 }
 0x1e2   :  { %1142 = vmatmul.mubr.f32.gmra.mrb[6].mxu1 %v21888_v25  ;;  %v21891_v29 = vand.u32 4294901760, %v16960_v8  ;;  %v1350_v57 = vand.u32 4294901760, %v1349_v34  ;;  %v1383_v15 = vand.u32 4294901760, %v17054_v3  ;;  %v1376_v60 = vand.u32 4294901760, %v17057_v17  ;;  %14842 = vmatprep.subr.bf16.mxu1 %v14841_v56 }
 0x1e3   :  { %1151 = vmatprep.mubr.f32.mxu1 %v21889_v24  ;;  %v14843_v28 = vpack.c.bf16 %v1217_v42, %v1210_v36  ;;  %v21892_v43 = vand.u32 4294901760, %v17005_v14  ;;  %v1231_v39 = vand.u32 4294901760, %v1230_v61  ;;  %v1224_v37 = vand.u32 4294901760, %v1223_v45  ;;  %v21895_v14 = vld [vmem:[#allocation29_spill] sm:$0xff] }
 0x1e4   :  { %v14935_v44 = vpack.c.bf16 %v21891_v29, %v21890_v2  ;;  %v1257_v10 = vand.u32 4294901760, %v17070_v40  ;;  %v1250_v38 = vand.u32 4294901760, %v17077_v46  ;;  %v14845_v16 = vpack.c.bf16 %v1343_v31, %v1336_v6  ;;  %v21899_v31 = vld [vmem:[#allocation21_spill] sm:$0xff]  ;;  %v21902_v29 = vld [vmem:[#allocation43_spill] sm:$0xff] }
 0x1e5   :  { %v14945_v21 = vpack.c.bf16 %v21892_v43, %v1348_v1  ;;  %v21896_v1 = vand.u32 4294901760, %v21895_v14  ;;  %v1171_v34 = vand.u32 4294901760, %v17142_v0  ;;  %v1363_v42 = vsub.f32 %v17048_v49, %v1362_v47  ;;  %14844 = vmatpush3.bf16.msra.mxu1 %v14843_v28  ;;  %1581 = vmatmul.mubr.f32.gmra.mrb[8].mxu0 %v21899_v31 }
 0x1e6   :  { %14936 = vmatpush3.bf16.msra.mxu0 %v14935_v44  ;;  %v1370_v22 = vsub.f32 %v17040_v30, %v1369_v23  ;;  %v1245_v54 = vand.u32 4294901760, %v1244_v55  ;;  %v1238_v36 = vand.u32 4294901760, %v1237_v5  ;;  %v1271_v56 = vand.u32 4294901760, %v17085_v35  ;;  %14846 = vmatprep.subr.bf16.mxu1 %v14845_v16  ;;  %v918_v55 = vpop.permute.xlu1 %917  ;;  %v916_v5 = vpop.permute.xlu0 %915 }
 0x1e7   :  { %1157 = vmatmul.mubr.f32.gmra.mrb[8].mxu1 %v21896_v1  ;;  %14938 = vmatprep.subr.bf16.mxu0 %v14937_v33  ;;  %v14849_v61 = vpack.c.bf16 %v1357_v59, %v1350_v57  ;;  %v1264_v33 = vand.u32 4294901760, %v17087_v11  ;;  %v21897_v0 = vand.u32 4294901760, %v16992_v58  ;;  %v21898_v45 = vand.u32 4294901760, %v16987_v62 }
 0x1e8   :  { %1166 = vmatprep.mubr.f32.mxu1 %v1165_v26  ;;  %v1377_v25 = vsub.f32 %v17057_v17, %v1376_v60  ;;  %v1384_v6 = vsub.f32 %v17054_v3, %v1383_v15  ;;  %v1258_v26 = vsub.f32 %v17070_v40, %v1257_v10  ;;  %v1251_v58 = vsub.f32 %v17077_v46, %v1250_v38 }
 0x1e9   :  { %v14941_v12 = vpack.c.bf16 %v21898_v45, %v21897_v0  ;;  %v21900_v62 = vmov 0.0   ;;  %v14847_v24 = vpack.c.bf16 %v1231_v39, %v1224_v37  ;;  %1587 = vmatprep.mubr.f32.mxu0 %v16924_v4  ;;  %v1397_v2 = vand.u32 4294901760, %v17095_v50  ;;  %v21903_v37 = vld [vmem:[#allocation11_spill] sm:$0xff] }
 0x1ea   :  { %v17255_v59 = vsel %vm17220_vm1, 1.0, %v21900_v62  ;;  %14940 = vmatpush3.bf16.msra.mxu0 %v14939_v7  ;;  %v1390_v44 = vand.u32 4294901760, %v21902_v29  ;;  %v1364_v57 = vand.u32 4294901760, %v1363_v42  ;;  %v1371_v28 = vand.u32 4294901760, %v1370_v22  ;;  %v937_v62 = vld [vmem:[#allocation3 + $0x10] sm:$0xff]  ;;  %v920_v40 = vpop.permute.xlu0 %919 }
 0x1eb   :  { %21901 = vst [vmem:[#allocation29_spill] sm:$0xff] %v17255_v59  ;;  %1172 = vmatmul.mubr.f32.gmra.mrb[10].mxu1 %v1171_v34  ;;  %14942 = vmatprep.subr.bf16.mxu0 %v14941_v12  ;;  %v1272_v43 = vsub.f32 %v17085_v35, %v1271_v56  ;;  %v14943_v7 = vpack.c.bf16 %v1229_v27, %v1222_v32  ;;  %v1385_v16 = vand.u32 4294901760, %v1384_v6  ;;  %v21904_v34 = vld [vmem:[#allocation30_spill] sm:$0xff]  ;;  %v1259_v13 = vand.u32 4294901760, %v1258_v26 }
 0x1ec   :  { %14848 = vmatpush3.bf16.msra.mxu1 %v14847_v24  ;;  %v14851_v39 = vpack.c.bf16 %v1245_v54, %v1238_v36  ;;  %1402 = vmatprep.mubr.f32.mxu1 %v21903_v37  ;;  %v1265_v8 = vsub.f32 %v17087_v11, %v1264_v33  ;;  %v17272_v14 = vmul.f32 %v17255_v59, %v918_v55  ;;  %v1252_v63 = vand.u32 4294901760, %v1251_v58  ;;  %v21905_v27 = vld [vmem:[#allocation46_spill] sm:$0xff]  ;;  %v940_v55 = vld [vmem:[#allocation3 + $0x28] sm:$0xff] }
 0x1ed   :  { %v17275_v1 = vmul.f32 %v17255_v59, %v916_v5  ;;  %14850 = vmatprep.subr.bf16.mxu1 %v14849_v61  ;;  %1590 = vmatmul.mubr.f32.gmra.mrb[10].mxu0 %v21904_v34  ;;  %v1285_v32 = vand.u32 4294901760, %v17116_v18  ;;  %v1278_v42 = vand.u32 4294901760, %v21905_v27  ;;  %v14853_v22 = vpack.c.bf16 %v1371_v28, %v1364_v57 }
 0x1ee   :  { %14944 = vmatpush3.bf16.msra.mxu0 %v14943_v7  ;;  %1897 = vmatprep.mubr.f32.mxu0 %v21903_v37  ;;  %v1378_v54 = vand.u32 4294901760, %v1377_v25  ;;  %v1391_v36 = vsub.f32 %v21902_v29, %v1390_v44  ;;  %v1398_v61 = vsub.f32 %v17095_v50, %v1397_v2  ;;  %v14947_v0 = vpack.c.bf16 %v1243_v9, %v1236_v19  ;;  %v21906_v50 = vld [vmem:[#allocation8_spill] sm:$0xff] }
 0x1ef   :  { %14946 = vmatprep.subr.bf16.mxu0 %v14945_v21  ;;  %v1273_v45 = vand.u32 4294901760, %v1272_v43  ;;  %v2054_v12 = vand.u32 4294901760, %v17272_v14  ;;  %v2051_v21 = vand.u32 4294901760, %v17275_v1  ;;  %v14949_v25 = vpack.c.bf16 %v1369_v23, %v1362_v47  ;;  %v922_v23 = vpop.permute.xlu1 %921 }
 0x1f0   :  { %14852 = vmatpush3.bf16.msra.mxu1 %v14851_v39  ;;  %v1266_v6 = vand.u32 4294901760, %v1265_v8  ;;  %v1286_v26 = vsub.f32 %v17116_v18, %v1285_v32  ;;  %v1279_v58 = vsub.f32 %v21905_v27, %v1278_v42  ;;  %v14855_v20 = vpack.c.bf16 %v1259_v13, %v1252_v63  ;;  %v946_v39 = vld [vmem:[#allocation3 + $0x58] sm:$0xff] }
 0x1f1   :  { %14854 = vmatprep.subr.bf16.mxu1 %v14853_v22  ;;  %v14857_v48 = vpack.c.bf16 %v1385_v16, %v1378_v54  ;;  %v1392_v9 = vand.u32 4294901760, %v1391_v36  ;;  %v1399_v19 = vand.u32 4294901760, %v1398_v61  ;;  %v14951_v49 = vpack.c.bf16 %v1257_v10, %v1250_v38  ;;  %v21909_v22 = vld [vmem:[#allocation17_spill] sm:$0xff] }
 0x1f2   :  { %14948 = vmatpush3.bf16.msra.mxu0 %v14947_v0  ;;  %v17304_v30 = vsub.f32 %v17272_v14, %v2054_v12  ;;  %v17307_v18 = vsub.f32 %v17275_v1, %v2051_v21  ;;  %v14953_v47 = vpack.c.bf16 %v1383_v15, %v1376_v60  ;;  %v1287_v46 = vand.u32 4294901760, %v1286_v26  ;;  %v943_v15 = vld [vmem:[#allocation3 + $0x40] sm:$0xff] }
 0x1f3   :  { %14950 = vmatprep.subr.bf16.mxu0 %v14949_v25  ;;  %v1280_v5 = vand.u32 4294901760, %v1279_v58  ;;  %v14859_v10 = vpack.c.bf16 %v1273_v45, %v1266_v6  ;;  %v14861_v38 = vpack.c.bf16 %v1399_v19, %v1392_v9  ;;  %v1009_v24 = vsel %vm1007_vm2, %v937_v62, 0  ;;  %v21910_v45 = vld [vmem:[#allocation15_spill] sm:$0xff]  ;;  %v21911_v26 = vld [vmem:[#allocation18_spill] sm:$0xff]  ;;  %v21912_v58 = vld [vmem:[#allocation33_spill] sm:$0xff] }
 0x1f4   :  { %14856 = vmatpush3.bf16.msra.mxu1 %v14855_v20  ;;  %v930_v57 = vmul.f32 %v17255_v59, %v922_v23  ;;  %v14955_v17 = vpack.c.bf16 %v1271_v56, %v1264_v33  ;;  %v1012_v3 = vsel %vm1007_vm2, %v940_v55, 0  ;;  %v2169_v60 = vand.u32 4294901760, %v17304_v30  ;;  %v21913_v20 = vld [vmem:[#allocation19_spill] sm:$0xff] }
 0x1f5   :  { %14858 = vmatprep.subr.bf16.mxu1 %v14857_v48  ;;  %v2162_v28 = vand.u32 4294901760, %v17307_v18  ;;  %v929_v43 = vmul.f32 %v17255_v59, %v920_v40  ;;  %v14957_v7 = vpack.c.bf16 %v1397_v2, %v1390_v44  ;;  %v14863_v11 = vpack.c.bf16 %v1287_v46, %v1280_v5  ;;  %v21915_v46 = vld [vmem:[#allocation20_spill] sm:$0xff]  ;;  %v21916_v5 = vld [vmem:[#allocation34_spill] sm:$0xff]  ;;  %v21917_v40 = vld [vmem:[#allocation23_spill] sm:$0xff] }
 0x1f6   :  { %14952 = vmatpush3.bf16.msra.mxu0 %v14951_v49  ;;  %v17327_v35 = vand.u32 4294901760, %v1009_v24  ;;  %v1015_v56 = vsel %vm1007_vm2, %v943_v15, 0  ;;  %v2060_v33 = vand.u32 4294901760, %v930_v57  ;;  %v14959_v8 = vpack.c.bf16 %v1285_v32, %v1278_v42  ;;  %v21907_v32 = vld [vmem:[#allocation16_spill] sm:$0xff]  ;;  %v21908_v42 = vld [vmem:[#allocation14_spill] sm:$0xff] }
 0x1f7   :  { %14954 = vmatprep.subr.bf16.mxu0 %v14953_v47  ;;  %v17330_v14 = vand.u32 4294901760, %v1012_v3  ;;  %v1018_v1 = vsel %vm1007_vm2, %v946_v39, 0  ;;  %v17333_v16 = vpack.c.bf16 %v2054_v12, %v2051_v21  ;;  %v2057_v29 = vand.u32 4294901760, %v929_v43  ;;  %v21914_v49 = vld [vmem:[#allocation32_spill] sm:$0xff] }
 0x1f8   :  { %14860 = vmatpush3.bf16.msra.mxu1 %v14859_v10  ;;  %v2163_v2 = vsub.f32 %v17307_v18, %v2162_v28  ;;  %v2170_v44 = vsub.f32 %v17304_v30, %v2169_v60  ;;  %v17343_v13 = vsub.f32 %v1009_v24, %v17327_v35  ;;  %v17345_v63 = vand.u32 4294901760, %v1015_v56  ;;  %v21918_v10 = vld [vmem:[#allocation35_spill] sm:$0xff]  ;;  %v21921_v39 = vld [vmem:[#allocation12_spill] sm:$0xff] }
 0x1f9   :  { %14862 = vmatprep.subr.bf16.mxu1 %v14861_v38  ;;  %v17349_v27 = vsub.f32 %v930_v57, %v2060_v33  ;;  %v17354_v54 = vsub.f32 %v1012_v3, %v17330_v14  ;;  %v17356_v36 = vand.u32 4294901760, %v1018_v1  ;;  %v17358_v61 = vpack.c.bf16 %v2060_v33, %v2057_v29 }
 0x1fa   :  { %14956 = vmatpush3.bf16.msra.mxu0 %v14955_v17  ;;  %v17360_v0 = vsub.f32 %v929_v43, %v2057_v29  ;;  %v2164_v12 = vand.u32 4294901760, %v2163_v2  ;;  %v2171_v21 = vand.u32 4294901760, %v2170_v44  ;;  %v2121_v25 = vand.u32 4294901760, %v17343_v13  ;;  %v21919_v43 = vld [vmem:[#allocation24_spill] sm:$0xff]  ;;  %v21924_v44 = vld [vmem:[#allocation38_spill] sm:$0xff] }
 0x1fb   :  { %14958 = vmatprep.subr.bf16.mxu0 %v14957_v7  ;;  %v17368_v6 = vsub.f32 %v1015_v56, %v17345_v63  ;;  %v2131_v48 = vand.u32 4294901760, %v17354_v54  ;;  %v2183_v9 = vand.u32 4294901760, %v17349_v27  ;;  %v17380_v23 = vsub.f32 %v1018_v1, %v17356_v36  ;;  %v21920_v7 = vld [vmem:[#allocation37_spill] sm:$0xff]  ;;  %v21923_v56 = vld [vmem:[#allocation36_spill] sm:$0xff] }
 0x1fc   :  { %14864 = vmatpush3.bf16.msra.mxu1 %v14863_v11  ;;  %v2176_v19 = vand.u32 4294901760, %v17360_v0  ;;  %v15001_v62 = vpack.c.bf16 %v2171_v21, %v2164_v12  ;;  %v2122_v47 = vsub.f32 %v17343_v13, %v2121_v25  ;;  %v21922_v11 = vand.u32 4294901760, %v21921_v39  ;;  %v21925_v12 = vld [vmem:[#allocation39_spill] sm:$0xff]  ;;  %v21926_v39 = vld [vmem:[#allocation40_spill] sm:$0xff] }
 0x1fd   :  { %14898 = vmatprep.subr.bf16.mxu1 %v21906_v50  ;;  %v2141_v55 = vand.u32 4294901760, %v17368_v6  ;;  %v2132_v38 = vsub.f32 %v17354_v54, %v2131_v48  ;;  %v2184_v57 = vsub.f32 %v17349_v27, %v2183_v9  ;;  %v2151_v17 = vand.u32 4294901760, %v17380_v23 }
 0x1fe   :  { %14960 = vmatpush3.bf16.msra.mxu0 %v14959_v8  ;;  %v2177_v24 = vsub.f32 %v17360_v0, %v2176_v19  ;;  %v2123_v3 = vand.u32 4294901760, %v2122_v47 }
 0x1ff   :  { %1404 = vmatmul.mubr.f32.vlgmr.msra.gmra.mrb[12].mxu1 %v21907_v32  ;;  %14994 = vmatprep.subr.bf16.mxu0 %v17333_v16  ;;  %v2142_v15 = vsub.f32 %v17368_v6, %v2141_v55  ;;  %v2133_v33 = vand.u32 4294901760, %v2132_v38  ;;  %v2185_v1 = vand.u32 4294901760, %v2184_v57  ;;  %v2152_v29 = vsub.f32 %v17380_v23, %v2151_v17  ;;  %v21927_v38 = vld [vmem:[#allocation41_spill] sm:$0xff]  ;;  %v21928_v57 = vld [vmem:[#allocation42_spill] sm:$0xff] }
 0x200   :  { %14900 = vmatpush3.bf16.msra.mxu1 %v21908_v42  ;;  %1409 = vmatprep.mubr.f32.mxu1 %v21909_v22  ;;  %v2178_v8 = vand.u32 4294901760, %v2177_v24  ;;  %v15009_v24 = vpack.c.bf16 %v17304_v30, %v17307_v18  ;;  %v15029_v30 = vpack.c.bf16 %v2183_v9, %v2176_v19 }
 0x201   :  { %14902 = vmatprep.subr.bf16.mxu1 %v21910_v45  ;;  %1899 = vmatmul.mubr.f32.vlgmr.msra.gmra.mrb[12].mxu0 %v21907_v32  ;;  %v2143_v2 = vand.u32 4294901760, %v2142_v15  ;;  %v2153_v47 = vand.u32 4294901760, %v2152_v29  ;;  %v21930_v15 = vld [vmem:[#allocation45_spill] sm:$0xff] }
 0x202   :  { %14996 = vmatpush3.bf16.msra.mxu0 %v17333_v16  ;;  %1904 = vmatprep.mubr.f32.mxu0 %v21909_v22  ;;  %v15005_v21 = vpack.c.bf16 %v2185_v1, %v2178_v8 }
 0x203   :  { %1411 = vmatmul.mubr.f32.gmra.mrb[14].mxu1 %v21911_v26  ;;  %14998 = vmatprep.subr.bf16.mxu0 %v17358_v61 }
 0x204   :  { %14904 = vmatpush3.bf16.msra.mxu1 %v21912_v58  ;;  %1416 = vmatprep.mubr.f32.mxu1 %v21913_v20 }
 0x205   :  { %14906 = vmatprep.subr.bf16.mxu1 %v21914_v49  ;;  %1906 = vmatmul.mubr.f32.gmra.mrb[14].mxu0 %v21911_v26 }
 0x206   :  { %15000 = vmatpush3.bf16.msra.mxu0 %v17358_v61  ;;  %1911 = vmatprep.mubr.f32.mxu0 %v21913_v20 }
 0x207   :  { %1418 = vmatmul.mubr.f32.gmra.mrb[16].mxu1 %v21915_v46  ;;  %15002 = vmatprep.subr.bf16.mxu0 %v15001_v62 }
 0x208   :  { %14908 = vmatpush3.bf16.msra.mxu1 %v21916_v5  ;;  %1423 = vmatprep.mubr.f32.mxu1 %v21917_v40 }
 0x209   :  { %14910 = vmatprep.subr.bf16.mxu1 %v21918_v10  ;;  %1913 = vmatmul.mubr.f32.gmra.mrb[16].mxu0 %v21915_v46 }
 0x20a   :  { %1918 = vmatprep.mubr.f32.mxu0 %v21917_v40 }
 0x20b   :  { %1425 = vmatmul.mubr.f32.gmra.mrb[18].mxu1 %v21919_v43 }
 0x20c   :  { %14912 = vmatpush3.bf16.msra.mxu1 %v21920_v7  ;;  %1694 = vmatprep.mubr.f32.mxu1 %v21922_v11  ;;  %v21931_v11 = vand.u32 4294901760, %v16815_v41  ;;  %v21934_v41 = vand.u32 4294901760, %v16832_v53  ;;  %v21936_v53 = vand.u32 4294901760, %v16924_v4 }
 0x20d   :  { %14914 = vmatprep.subr.bf16.mxu1 %v21923_v56  ;;  %1920 = vmatmul.mubr.f32.gmra.mrb[18].mxu0 %v21919_v43 }
 0x20e   :  { %14257 = vmatprep.mubr.f32.mxu0 %v2123_v3  ;;  %v21929_v3 = vld [vmem:[#allocation44_spill] sm:$0xff] }
 0x210   :  { %14916 = vmatpush3.bf16.msra.mxu1 %v21924_v44 }
 0x211   :  { %14918 = vmatprep.subr.bf16.mxu1 %v21925_v12  ;;  %14258 = vmatmul.mubr.f32.vlgmr.msra.gmra.mrb[20].mxu0 %v2133_v33  ;;  %v21932_v33 = vand.u32 4294901760, %v16826_v51  ;;  %v15025_v51 = vpack.c.bf16 %v2169_v60, %v2162_v28 }
 0x212   :  { %15004 = vmatpush3.bf16.msra.mxu0 %v15001_v62  ;;  %14260 = vmatprep.mubr.f32.mxu0 %v2143_v2  ;;  %v15013_v62 = vpack.c.bf16 %v17349_v27, %v17360_v0 }
 0x213   :  { %15006 = vmatprep.subr.bf16.mxu0 %v15005_v21 }
 0x214   :  { %14920 = vmatpush3.bf16.msra.mxu1 %v21926_v39 }
 0x215   :  { %14922 = vmatprep.subr.bf16.mxu1 %v21927_v38  ;;  %14261 = vmatmul.mubr.f32.gmra.mrb[22].mxu0 %v2153_v47 }
 0x216   :  { %15008 = vmatpush3.bf16.msra.mxu0 %v15005_v21  ;;  %14271 = vmatprep.mubr.f32.mxu0 %v17327_v35 }
 0x217   :  { %15010 = vmatprep.subr.bf16.mxu0 %v15009_v24 }
 0x218   :  { %14924 = vmatpush3.bf16.msra.mxu1 %v21928_v57 }
 0x219   :  { %14926 = vmatprep.subr.bf16.mxu1 %v21929_v3  ;;  %14272 = vmatmul.mubr.f32.vlgmr.msra.gmra.mrb[20].mxu0 %v17330_v14 }
 0x21a   :  { %15012 = vmatpush3.bf16.msra.mxu0 %v15009_v24  ;;  %14274 = vmatprep.mubr.f32.mxu0 %v17345_v63 }
 0x21b   :  { %15014 = vmatprep.subr.bf16.mxu0 %v15013_v62 }
 0x21c   :  { %14928 = vmatpush3.bf16.msra.mxu1 %v21930_v15 }
 0x21d   :  { %14962 = vmatprep.subr.bf16.mxu1 %v21906_v50  ;;  %14275 = vmatmul.mubr.f32.gmra.mrb[22].mxu0 %v17356_v36  ;;  %v21933_v50 = vand.u32 4294901760, %v16829_v52  ;;  %v21935_v52 = vand.u32 4294901760, %v21899_v31  ;;  %v21937_v31 = vand.u32 4294901760, %v21904_v34 }
 0x21e   :  { %15016 = vmatpush3.bf16.msra.mxu0 %v15013_v62  ;;  %14285 = vmatprep.mubr.f32.mxu0 %v17343_v13 }
 0x21f   :  { %15018 = vmatprep.subr.bf16.mxu0 %v17333_v16  ;;  %1698 = vmatmul.mubr.f32.vlgmr.msra.gmra.mrb[20].mxu1 %v21931_v11 }
 0x220   :  { %14964 = vmatpush3.bf16.msra.mxu1 %v21908_v42  ;;  %1705 = vmatprep.mubr.f32.mxu1 %v21932_v33 }
 0x221   :  { %14966 = vmatprep.subr.bf16.mxu1 %v21910_v45  ;;  %14286 = vmatmul.mubr.f32.vlgmr.msra.gmra.mrb[20].mxu0 %v17354_v54 }
 0x222   :  { %15020 = vmatpush3.bf16.msra.mxu0 %v17333_v16  ;;  %14288 = vmatprep.mubr.f32.mxu0 %v17368_v6 }
 0x223   :  { %15022 = vmatprep.subr.bf16.mxu0 %v17358_v61  ;;  %1709 = vmatmul.mubr.f32.gmra.mrb[22].mxu1 %v21933_v50 }
 0x224   :  { %14968 = vmatpush3.bf16.msra.mxu1 %v21912_v58  ;;  %1716 = vmatprep.mubr.f32.mxu1 %v21934_v41 }
 0x225   :  { %14970 = vmatprep.subr.bf16.mxu1 %v21914_v49  ;;  %14289 = vmatmul.mubr.f32.gmra.mrb[22].mxu0 %v17380_v23 }
 0x226   :  { %15024 = vmatpush3.bf16.msra.mxu0 %v17358_v61  ;;  %14299 = vmatprep.mubr.f32.mxu0 %v2121_v25 }
 0x227   :  { %15026 = vmatprep.subr.bf16.mxu0 %v15025_v51  ;;  %1720 = vmatmul.mubr.f32.gmra.mrb[24].mxu1 %v21935_v52 }
 0x228   :  { %14972 = vmatpush3.bf16.msra.mxu1 %v21916_v5  ;;  %1727 = vmatprep.mubr.f32.mxu1 %v21936_v53 }
 0x229   :  { %14974 = vmatprep.subr.bf16.mxu1 %v21918_v10  ;;  %14300 = vmatmul.mubr.f32.vlgmr.msra.gmra.mrb[20].mxu0 %v2131_v48  ;;  %v990_v48 = vpop.permute.xlu0 %989  ;;  %v995_v10 = vpop.permute.xlu1 %994 }
 0x22a   :  { %15028 = vmatpush3.bf16.msra.mxu0 %v15025_v51  ;;  %14302 = vmatprep.mubr.f32.mxu0 %v2141_v55 }
 0x22b   :  { %15030 = vmatprep.subr.bf16.mxu0 %v15029_v30  ;;  %1731 = vmatmul.mubr.f32.gmra.mrb[26].mxu1 %v21937_v31 }
 0x22c   :  { %14976 = vmatpush3.bf16.msra.mxu1 %v21920_v7  ;;  %2022 = vmatprep.mubr.f32.mxu1 %v21903_v37 }
 0x22d   :  { %14978 = vmatprep.subr.bf16.mxu1 %v21923_v56  ;;  %14303 = vmatmul.mubr.f32.gmra.mrb[22].mxu0 %v2151_v17  ;;  %v1005_v11 = vpop.permute.xlu1 %1004 }
 0x22e   :  { %15032 = vmatpush3.bf16.msra.mxu0 %v15029_v30  ;;  %14313 = vmatprep.mubr.f32.mxu0 %v17327_v35 }
 0x22f   :  { %15034 = vmatprep.subr.bf16.mxu0 %v17333_v16 }
 0x230   :  { %14980 = vmatpush3.bf16.msra.mxu1 %v21924_v44 }
 0x231   :  { %14982 = vmatprep.subr.bf16.mxu1 %v21925_v12  ;;  %14314 = vmatmul.mubr.f32.vlgmr.msra.gmra.mrb[20].mxu0 %v17330_v14  ;;  %v1000_v12 = vpop.permute.xlu0 %999 }
 0x232   :  { %15036 = vmatpush3.bf16.msra.mxu0 %v17333_v16  ;;  %14316 = vmatprep.mubr.f32.mxu0 %v17345_v63 }
 0x233   :  { %15038 = vmatprep.subr.bf16.mxu0 %v17358_v61 }
 0x234   :  { %14984 = vmatpush3.bf16.msra.mxu1 %v21926_v39 }
 0x235   :  { %14986 = vmatprep.subr.bf16.mxu1 %v21927_v38  ;;  %14317 = vmatmul.mubr.f32.gmra.mrb[22].mxu0 %v17356_v36 }
 0x236   :  { %15040 = vmatpush3.bf16.msra.mxu0 %v17358_v61  ;;  %14327 = vmatprep.mubr.f32.mxu0 %v17327_v35 }
 0x238   :  { %14988 = vmatpush3.bf16.msra.mxu1 %v21928_v57 }
 0x239   :  { %14990 = vmatprep.subr.bf16.mxu1 %v21929_v3  ;;  %14328 = vmatmul.mubr.f32.vlgmr.msra.gmra.mrb[20].mxu0 %v17330_v14 }
 0x23a   :  { %14330 = vmatprep.mubr.f32.mxu0 %v17345_v63 }
 0x23c   :  { %14992 = vmatpush3.bf16.msra.mxu1 %v21930_v15 }
 0x23d   :  { %14331 = vmatmul.mubr.f32.gmra.mrb[22].mxu0 %v17356_v36 }
 0x23f   :  { %2024 = vmatmul.mubr.f32.vlgmr.msra.gmra.mrb[28].mxu1 %v21907_v32 }
 0x240   :  { %2029 = vmatprep.mubr.f32.mxu1 %v21909_v22 }
 0x243   :  { %2031 = vmatmul.mubr.f32.gmra.mrb[30].mxu1 %v21911_v26 }
 0x244   :  { %2036 = vmatprep.mubr.f32.mxu1 %v21913_v20 }
 0x247   :  { %2038 = vmatmul.mubr.f32.gmra.mrb[32].mxu1 %v21915_v46 }
 0x248   :  { %2043 = vmatprep.mubr.f32.mxu1 %v21917_v40 }
 0x24b   :  { %2045 = vmatmul.mubr.f32.gmra.mrb[34].mxu1 %v21919_v43 }
 0x2ae   :  { %v12313_v4 = vpop.f32.mrb[4].mxu1 }
 0x2af   :  { %v12314_v37 = vpop.f32.mrb[5].mxu1  ;;  %v12401_v18 = vpop.f32.mrb[4].mxu0 }
 0x2b0   :  { %v12315_v34 = vadd.f32 %v12314_v37, %v12313_v4  ;;  %v12402_v60 = vpop.f32.mrb[5].mxu0 }
 0x2b1   :  { %v12403_v35 = vadd.f32 %v12402_v60, %v12401_v18 }
 0x2b2   :  { %v1129_v19 = vadd.f32 %v12315_v34, %v990_v48 }
 0x2b3   :  { %v12404_v13 = vpop.f32.mrb[6].mxu0 }
 0x2b4   :  { %v12405_v63 = vpop.f32.mrb[7].mxu0 }
 0x2b5   :  { %v12316_v28 = vpop.f32.mrb[6].mxu1  ;;  %v12406_v27 = vadd.f32 %v12405_v63, %v12404_v13 }
 0x2b6   :  { %v12317_v14 = vpop.f32.mrb[7].mxu1 }
 0x2b7   :  { %v12318_v16 = vadd.f32 %v12317_v14, %v12316_v28 }
 0x2b8   :  { %v12407_v54 = vpop.f32.mrb[8].mxu0 }
 0x2b9   :  { %v12408_v36 = vpop.f32.mrb[9].mxu0  ;;  %v1144_v43 = vadd.f32 %v12318_v16, %v995_v10 }
 0x2ba   :  { %v12319_v32 = vpop.f32.mrb[8].mxu1  ;;  %v12409_v0 = vadd.f32 %v12408_v36, %v12407_v54 }
 0x2bb   :  { %v12320_v42 = vpop.f32.mrb[9].mxu1 }
 0x2bc   :  { %v12321_v22 = vadd.f32 %v12320_v42, %v12319_v32 }
 0x2be   :  { %v12322_v61 = vpop.f32.mrb[10].mxu1  ;;  %v1159_v47 = vadd.f32 %v12321_v22, %v1000_v12 }
 0x2bf   :  { %v12323_v45 = vpop.f32.mrb[11].mxu1 }
 0x2c0   :  { %v12324_v25 = vadd.f32 %v12323_v45, %v12322_v61  ;;  %v12410_v6 = vpop.f32.mrb[10].mxu0 }
 0x2c1   :  { %v12411_v26 = vpop.f32.mrb[11].mxu0 }
 0x2c2   :  { %v12412_v58 = vadd.f32 %v12411_v26, %v12410_v6  ;;  %v1174_v50 = vadd.f32 %v12324_v25, %v1005_v11 }
 0x2d2   :  { %v12357_v20 = vpop.f32.mrb[12].mxu1 }
 0x2d3   :  { %v12358_v9 = vpop.f32.mrb[13].mxu1 }
 0x2d4   :  { %v12359_v49 = vadd.f32 %v12358_v9, %v12357_v20  ;;  %v12489_v23 = vpop.f32.mrb[12].mxu0 }
 0x2d5   :  { %v12490_v55 = vpop.f32.mrb[13].mxu0 }
 0x2d6   :  { %v1406_v46 = vadd.f32 %v12359_v49, %v1129_v19  ;;  %v12360_v5 = vpop.f32.mrb[14].mxu1  ;;  %v12491_v40 = vadd.f32 %v12490_v55, %v12489_v23 }
 0x2d7   :  { %v12361_v17 = vpop.f32.mrb[15].mxu1 }
 0x2d8   :  { %v12362_v7 = vadd.f32 %v12361_v17, %v12360_v5  ;;  %v12492_v56 = vpop.f32.mrb[14].mxu0  ;;  %v1565_v8 = vadd.f32 %v12403_v35, %v1406_v46 }
 0x2d9   :  { %v12493_v1 = vpop.f32.mrb[15].mxu0 }
 0x2da   :  { %v1413_v29 = vadd.f32 %v12362_v7, %v1144_v43  ;;  %v12363_v2 = vpop.f32.mrb[16].mxu1  ;;  %v12494_v44 = vadd.f32 %v12493_v1, %v12492_v56 }
 0x2db   :  { %v12364_v21 = vpop.f32.mrb[17].mxu1 }
 0x2dc   :  { %v12365_v39 = vadd.f32 %v12364_v21, %v12363_v2  ;;  %v12495_v38 = vpop.f32.mrb[16].mxu0  ;;  %v1574_v24 = vadd.f32 %v12406_v27, %v1413_v29 }
 0x2dd   :  { %v12496_v57 = vpop.f32.mrb[17].mxu0 }
 0x2de   :  { %v1420_v3 = vadd.f32 %v12365_v39, %v1159_v47  ;;  %v12366_v62 = vpop.f32.mrb[18].mxu1  ;;  %v12497_v15 = vadd.f32 %v12496_v57, %v12495_v38 }
 0x2df   :  { %v12367_v33 = vpop.f32.mrb[19].mxu1 }
 0x2e0   :  { %v12368_v41 = vadd.f32 %v12367_v33, %v12366_v62  ;;  %v12498_v51 = vpop.f32.mrb[18].mxu0  ;;  %v1583_v52 = vadd.f32 %v12409_v0, %v1420_v3 }
 0x2e1   :  { %v12499_v53 = vpop.f32.mrb[19].mxu0 }
 0x2e2   :  { %v1427_v30 = vadd.f32 %v12368_v41, %v1174_v50  ;;  %v12500_v31 = vadd.f32 %v12499_v53, %v12498_v51 }
 0x2e4   :  { %v1592_v4 = vadd.f32 %v12412_v58, %v1427_v30 }
 0x2f2   :  { %v12445_v37 = vpop.f32.mrb[20].mxu1 }
 0x2f3   :  { %v12446_v34 = vpop.f32.mrb[21].mxu1 }
 0x2f4   :  { %v12447_v18 = vadd.f32 %v12446_v34, %v12445_v37 }
 0x2f6   :  { %v1700_v60 = vadd.f32 %v12447_v18, %v1565_v8  ;;  %v12448_v28 = vpop.f32.mrb[22].mxu1 }
 0x2f7   :  { %v12449_v35 = vpop.f32.mrb[23].mxu1 }
 0x2f8   :  { %v12450_v14 = vadd.f32 %v12449_v35, %v12448_v28  ;;  %v1901_v16 = vadd.f32 %v12491_v40, %v1700_v60 }
 0x2fa   :  { %v1711_v13 = vadd.f32 %v12450_v14, %v1574_v24  ;;  %v12451_v63 = vpop.f32.mrb[24].mxu1 }
 0x2fb   :  { %v12452_v32 = vpop.f32.mrb[25].mxu1 }
 0x2fc   :  { %v12453_v27 = vadd.f32 %v12452_v32, %v12451_v63  ;;  %v1908_v42 = vadd.f32 %v12494_v44, %v1711_v13 }
 0x2fe   :  { %v1722_v22 = vadd.f32 %v12453_v27, %v1583_v52  ;;  %v12454_v54 = vpop.f32.mrb[26].mxu1 }
 0x2ff   :  { %v12455_v36 = vpop.f32.mrb[27].mxu1 }
 0x300   :  { %v12456_v61 = vadd.f32 %v12455_v36, %v12454_v54  ;;  %v1915_v0 = vadd.f32 %v12497_v15, %v1722_v22  ;;  %v2838_v22 = vld [vmem:[#allocation3 + $0x68] sm:$0xff] }
 0x301   :  { %v17582_v54 = vand.u32 4294901760, %v2838_v22 }
 0x302   :  { %v1733_v45 = vadd.f32 %v12456_v61, %v1592_v4 }
 0x303   :  { %v17585_v36 = vsub.f32 %v2838_v22, %v17582_v54 }
 0x304   :  { %v1922_v25 = vadd.f32 %v12500_v31, %v1733_v45 }
 0x305   :  { %21940 = vst [vmem:[#allocation11_spill] sm:$0xff] %v17585_v36  ;;  %v21477_v61 = vand.u32 4294901760, %v17585_v36  ;;  %3462 = vmatprep.mubr.f32.mxu0 %v17585_v36 }
 0x30c   :  { %v14329_v6 = vpop.f32.mrb[20].mxu0 }
 0x30d   :  { %v2642_v26 = vpop.f32.mrb[21].mxu0 }
 0x310   :  { %v14332_v58 = vpop.f32.mrb[22].mxu0 }
 0x311   :  { %v2654_v20 = vpop.f32.mrb[23].mxu0 }
 0x312   :  { %v12533_v48 = vpop.f32.mrb[28].mxu1 }
 0x313   :  { %v12534_v9 = vpop.f32.mrb[29].mxu1 }
 0x314   :  { %v12535_v19 = vadd.f32 %v12534_v9, %v12533_v48  ;;  %v21941_v48 = vld [vmem:[#allocation13_spill] sm:$0xff] }
 0x316   :  { %v2026_v49 = vadd.f32 %v12535_v19, %v1901_v16  ;;  %v12536_v23 = vpop.f32.mrb[30].mxu1 }
 0x317   :  { %v12537_v55 = vpop.f32.mrb[31].mxu1 }
 0x318   :  { %v16250_v46 = vadd.f32 %v2642_v26, %v2026_v49  ;;  %v12538_v5 = vadd.f32 %v12537_v55, %v12536_v23  ;;  %v12209_v26 = vld [vmem:[%s21388_s4 + $0x30] sm:$0xff] }
 0x31a   :  { %v17505_v40 = vmax.f32 %v16250_v46, 0.0  ;;  %v2033_v10 = vadd.f32 %v12538_v5, %v1908_v42  ;;  %v12539_v17 = vpop.f32.mrb[32].mxu1 }
 0x31b   :  { %v12540_v43 = vpop.f32.mrb[33].mxu1 }
 0x31c   :  { %v16249_v7 = vadd.f32 %v14329_v6, %v2033_v10  ;;  %v12541_v56 = vadd.f32 %v12540_v43, %v12539_v17  ;;  %2672 = vrot.lane.b32.xlu0 %v17505_v40, %s16452_s1  ;;  %v2971_v8 = vand.u32 4294901760, %v17505_v40  ;;  %v12208_v6 = vld [vmem:[%s21388_s4 + $0x28] sm:$0xff] }
 0x31e   :  { %v17510_v1 = vmax.f32 %v16249_v7, 0.0  ;;  %v2040_v29 = vadd.f32 %v12541_v56, %v1915_v0  ;;  %v12542_v2 = vpop.f32.mrb[34].mxu1  ;;  %v3193_v44 = vsub.f32 %v17505_v40, %v2971_v8  ;;  %v3021_v0 = vsub.f32 %v17585_v36, %v21477_v61 }
 0x31f   :  { %v12543_v12 = vpop.f32.mrb[35].mxu1 }
 0x320   :  { %v16252_v21 = vadd.f32 %v2654_v20, %v2040_v29  ;;  %v12544_v47 = vadd.f32 %v12543_v12, %v12542_v2  ;;  %2674 = vrot.lane.b32.xlu1 %v17510_v1, %s16452_s1  ;;  %2756 = vrot.lane.b32.xlu0 %v17505_v40, %s16453_s2  ;;  %v2974_v39 = vand.u32 4294901760, %v17510_v1  ;;  %v3194_v38 = vand.u32 4294901760, %v3193_v44  ;;  %v2841_v29 = vld [vmem:[#allocation3 + $0x80] sm:$0xff]  ;;  %v2840_v2 = vld [vmem:[#allocation3 + $0x78] sm:$0xff] }
 0x321   :  { %v3022_v45 = vand.u32 4294901760, %v3021_v0  ;;  %v2846_v0 = vld [vmem:[#allocation3 + $0xa8] sm:$0xff] }
 0x322   :  { %v17518_v24 = vmax.f32 %v16252_v21, 0.0  ;;  %v2047_v57 = vadd.f32 %v12544_v47, %v1922_v25  ;;  %v17520_v3 = vpack.c.bf16 %v2974_v39, %v2971_v8  ;;  %v3200_v62 = vsub.f32 %v17510_v1, %v2974_v39  ;;  %v12207_v25 = vld [vmem:[%s21388_s4 + $0x20] sm:$0xff] }
 0x323   :  { %v3195_v15 = vsub.f32 %v3193_v44, %v3194_v38  ;;  %3023 = vmatprep.mubr.f32.mxu1 %v3022_v45  ;;  %v17637_v47 = vand.u32 4294901760, %v2841_v29  ;;  %v17639_v39 = vand.u32 4294901760, %v2840_v2 }
 0x324   :  { %21938 = vst [vmem:[#allocation21_spill] sm:$0xff] %v17520_v3  ;;  %v16251_v11 = vadd.f32 %v14332_v58, %v2047_v57  ;;  %2758 = vrot.lane.b32.xlu1 %v17510_v1, %s16453_s2  ;;  %2692 = vrot.lane.b32.xlu0 %v17505_v40, %s16454_s6  ;;  %v15105_v33 = vpack.c.bf16 %v3200_v62, %v3193_v44  ;;  %v2977_v50 = vand.u32 4294901760, %v17518_v24  ;;  %v3201_v41 = vand.u32 4294901760, %v3200_v62  ;;  %v12210_v58 = vld [vmem:[%s21388_s4 + $0x38] sm:$0xff] }
 0x325   :  { %15042 = vmatprep.subr.bf16.mxu1 %v17520_v3  ;;  %v3196_v4 = vand.u32 4294901760, %v3195_v15  ;;  %21944 = vst [vmem:[#allocation8_spill] sm:$0xff] %v17637_v47  ;;  %21945 = vst [vmem:[#allocation16_spill] sm:$0xff] %v17639_v39 }
 0x326   :  { %v2667_v51 = vmax.f32 %v16251_v11, 0.0  ;;  %15106 = vmatprep.subr.bf16.mxu0 %v15105_v33  ;;  %v17530_v52 = vsub.f32 %v17518_v24, %v2977_v50  ;;  %v3202_v53 = vsub.f32 %v3200_v62, %v3201_v41  ;;  %v17532_v30 = vpack.c.bf16 %v3201_v41, %v3194_v38  ;;  %v2844_v38 = vld [vmem:[#allocation3 + $0x98] sm:$0xff] }
 0x327   :  { %v17649_v11 = vsub.f32 %v2841_v29, %v17637_v47  ;;  %v17652_v33 = vsub.f32 %v2840_v2, %v17639_v39 }
 0x328   :  { %2694 = vrot.lane.b32.xlu1 %v17510_v1, %s16454_s6  ;;  %2776 = vrot.lane.b32.xlu0 %v17505_v40, %s16455_s7  ;;  %v2980_v31 = vand.u32 4294901760, %v2667_v51  ;;  %v3203_v37 = vand.u32 4294901760, %v3202_v53  ;;  %v3208_v34 = vand.u32 4294901760, %v17530_v52 }
 0x32a   :  { %v17539_v18 = vpack.c.bf16 %v2980_v31, %v2977_v50  ;;  %v17541_v60 = vsub.f32 %v2667_v51, %v2980_v31  ;;  %v17543_v28 = vpack.c.bf16 %v3203_v37, %v3196_v4  ;;  %v3209_v14 = vsub.f32 %v17530_v52, %v3208_v34  ;;  %v2847_v4 = vld [vmem:[#allocation3 + $0xb0] sm:$0xff] }
 0x32b   :  { %v17654_v50 = vand.u32 4294901760, %v2844_v38  ;;  %v21475_v31 = vand.u32 4294901760, %v17649_v11  ;;  %v21474_v37 = vand.u32 4294901760, %v17652_v33  ;;  %v17680_v22 = vand.u32 4294901760, %v2847_v4 }
 0x32c   :  { %21939 = vst [vmem:[#allocation43_spill] sm:$0xff] %v17539_v18  ;;  %2778 = vrot.lane.b32.xlu1 %v17510_v1, %s16455_s7  ;;  %2712 = vrot.lane.b32.xlu0 %v17505_v40, %s16456_s8  ;;  %v15109_v35 = vpack.c.bf16 %v17541_v60, %v17530_v52  ;;  %v3215_v16 = vand.u32 4294901760, %v17541_v60  ;;  %v3210_v32 = vand.u32 4294901760, %v3209_v14 }
 0x32d   :  { %21946 = vst [vmem:[#allocation14_spill] sm:$0xff] %v17654_v50  ;;  %21949 = vst [vmem:[#allocation15_spill] sm:$0xff] %v17680_v22 }
 0x32e   :  { %v3216_v13 = vsub.f32 %v17541_v60, %v3215_v16  ;;  %v17554_v63 = vpack.c.bf16 %v3215_v16, %v3208_v34  ;;  %v17666_v34 = vsub.f32 %v2844_v38, %v17654_v50 }
 0x330   :  { %2714 = vrot.lane.b32.xlu1 %v17510_v1, %s16456_s8  ;;  %2796 = vrot.lane.b32.xlu0 %v17505_v40, %s16457_s9  ;;  %v3217_v27 = vand.u32 4294901760, %v3216_v13 }
 0x332   :  { %v17560_v42 = vpack.c.bf16 %v3217_v27, %v3210_v32 }
 0x334   :  { %2798 = vrot.lane.b32.xlu1 %v17510_v1, %s16457_s9  ;;  %2732 = vrot.lane.b32.xlu0 %v17505_v40, %s16458_s10 }
 0x338   :  { %2734 = vrot.lane.b32.xlu1 %v17510_v1, %s16458_s10  ;;  %2676 = vrot.lane.b32.xlu0 %v17518_v24, %s16452_s1 }
 0x33c   :  { %2678 = vrot.lane.b32.xlu1 %v2667_v51, %s16452_s1  ;;  %2760 = vrot.lane.b32.xlu0 %v17518_v24, %s16453_s2 }
 0x340   :  { %2762 = vrot.lane.b32.xlu1 %v2667_v51, %s16453_s2  ;;  %2696 = vrot.lane.b32.xlu0 %v17518_v24, %s16454_s6 }
 0x344   :  { %2698 = vrot.lane.b32.xlu1 %v2667_v51, %s16454_s6  ;;  %2780 = vrot.lane.b32.xlu0 %v17518_v24, %s16455_s7 }
 0x348   :  { %2782 = vrot.lane.b32.xlu1 %v2667_v51, %s16455_s7  ;;  %2716 = vrot.lane.b32.xlu0 %v17518_v24, %s16456_s8 }
 0x34c   :  { %2718 = vrot.lane.b32.xlu1 %v2667_v51, %s16456_s8  ;;  %2800 = vrot.lane.b32.xlu0 %v17518_v24, %s16457_s9 }
 0x350   :  { %2802 = vrot.lane.b32.xlu1 %v2667_v51, %s16457_s9  ;;  %2736 = vrot.lane.b32.xlu0 %v17518_v24, %s16458_s10 }
 0x354   :  { %2738 = vrot.lane.b32.xlu1 %v2667_v51, %s16458_s10  ;;  %2816 = vrot.lane.b32.xlu0 %v17505_v40, %s16459_s11 }
 0x358   :  { %2818 = vrot.lane.b32.xlu1 %v17510_v1, %s16459_s11  ;;  %2820 = vrot.lane.b32.xlu0 %v17518_v24, %s16459_s11  ;;  %v2837_v1 = vld [vmem:[#allocation3 + $0x60] sm:$0xff]  ;;  %v2843_v24 = vld [vmem:[#allocation3 + $0x90] sm:$0xff] }
 0x359   :  { %v17635_v21 = vand.u32 4294901760, %v2837_v1  ;;  %v17656_v41 = vand.u32 4294901760, %v2843_v24 }
 0x35b   :  { %21943 = vst [vmem:[#allocation46_spill] sm:$0xff] %v17635_v21  ;;  %v17646_v15 = vsub.f32 %v2837_v1, %v17635_v21  ;;  %21947 = vst [vmem:[#allocation17_spill] sm:$0xff] %v17656_v41  ;;  %v17669_v60 = vsub.f32 %v2843_v24, %v17656_v41  ;;  %v21955_v41 = vld [vmem:[#allocation27_spill] sm:$0xff] }
 0x35c   :  { %2822 = vrot.lane.b32.xlu1 %v2667_v51, %s16459_s11  ;;  %2892 = vperm.xlu0 %16422, %v12207_v25   ;;  %v17686_v25 = vsub.f32 %v17649_v11, %v21475_v31 }
 0x35d   :  { %v21476_v53 = vand.u32 4294901760, %v17646_v15 }
 0x35f   :  { %v17678_v27 = vsub.f32 %v17646_v15, %v21476_v53 }
 0x360   :  { %2897 = vperm.xlu1 %16423, %v12208_v6   ;;  %2902 = vperm.xlu0 %16422, %v12209_v26   ;;  %v17691_v6 = vsub.f32 %v17652_v33, %v21474_v37  ;;  %v21478_v26 = vand.u32 4294901760, %v17666_v34  ;;  %v21952_v37 = vld [vmem:[#allocation26_spill] sm:$0xff] }
 0x364   :  { %2907 = vperm.xlu1 %16423, %v12210_v58   ;;  %v21480_v58 = vand.u32 4294901760, %v17669_v60 }
 0x38e   :  { %v2673_v20 = vpop.permute.xlu0 %2672 }
 0x38f   :  { %v2684_v9 = vmul.f32 %v21941_v48, %v2673_v20  ;;  %v21950_v20 = vld [vmem:[#allocation25_spill] sm:$0xff] }
 0x391   :  { %v2923_v23 = vand.u32 4294901760, %v2684_v9 }
 0x392   :  { %v2675_v19 = vpop.permute.xlu1 %2674  ;;  %v2757_v49 = vpop.permute.xlu0 %2756 }
 0x393   :  { %v2685_v55 = vmul.f32 %v21941_v48, %v2675_v19  ;;  %v17620_v10 = vsub.f32 %v2684_v9, %v2923_v23  ;;  %v17696_v19 = vand.u32 4294901760, %v2846_v0 }
 0x395   :  { %v2926_v46 = vand.u32 4294901760, %v2685_v55  ;;  %21951 = vst [vmem:[#allocation18_spill] sm:$0xff] %v17696_v19  ;;  %v17719_v53 = vsub.f32 %v2846_v0, %v17696_v19 }
 0x396   :  { %v2759_v5 = vpop.permute.xlu1 %2758  ;;  %v2693_v40 = vpop.permute.xlu0 %2692 }
 0x397   :  { %v17622_v17 = vpack.c.bf16 %v2926_v46, %v2923_v23  ;;  %v17624_v43 = vsub.f32 %v2685_v55, %v2926_v46  ;;  %v2704_v1 = vmul.f32 %v21950_v20, %v2693_v40 }
 0x399   :  { %21942 = vst [vmem:[#allocation30_spill] sm:$0xff] %v17622_v17  ;;  %15044 = vmatpush3.bf16.msra.mxu1 %v17622_v17  ;;  %v15107_v7 = vpack.c.bf16 %v17624_v43, %v17620_v10 }
 0x39a   :  { %v2695_v56 = vpop.permute.xlu1 %2694  ;;  %v2777_v8 = vpop.permute.xlu0 %2776  ;;  %15046 = vmatprep.subr.bf16.mxu1 %v17539_v18 }
 0x39b   :  { %15108 = vmatpush3.bf16.msra.mxu0 %v15107_v7  ;;  %v2705_v9 = vmul.f32 %v21950_v20, %v2695_v56  ;;  %v17700_v7 = vsub.f32 %v2847_v4, %v17680_v22  ;;  %v17715_v4 = vsub.f32 %v17669_v60, %v21480_v58  ;;  %v2788_v31 = vmul.f32 %v21952_v37, %v2777_v8 }
 0x39c   :  { %15110 = vmatprep.subr.bf16.mxu0 %v15109_v35  ;;  %v21948_v35 = vld [vmem:[#allocation22_spill] sm:$0xff] }
 0x39d   :  { %v2768_v14 = vmul.f32 %v21948_v35, %v2757_v49  ;;  %v2769_v16 = vmul.f32 %v21948_v35, %v2759_v5  ;;  %v2938_v40 = vand.u32 4294901760, %v2705_v9 }
 0x39e   :  { %v2779_v44 = vpop.permute.xlu1 %2778  ;;  %v17633_v12 = vpop.permute.xlu0 %2712 }
 0x39f   :  { %v2983_v49 = vand.u32 4294901760, %v2768_v14  ;;  %v2986_v23 = vand.u32 4294901760, %v2769_v16  ;;  %v2789_v24 = vmul.f32 %v21952_v37, %v2779_v44  ;;  %v17737_v19 = vsub.f32 %v2705_v9, %v2938_v40 }
 0x3a0   :  { %v2995_v44 = vand.u32 4294901760, %v2788_v31 }
 0x3a1   :  { %v17723_v61 = vsub.f32 %v2769_v16, %v2986_v23  ;;  %v17735_v16 = vpack.c.bf16 %v2986_v23, %v2983_v49 }
 0x3a2   :  { %v17641_v57 = vpop.permute.xlu1 %2714  ;;  %v17643_v62 = vpop.permute.xlu0 %2796 }
 0x3a3   :  { %21954 = vst [vmem:[#allocation19_spill] sm:$0xff] %v17735_v16  ;;  %v2725_v5 = vmul.f32 %v21955_v41, %v17641_v57 }
 0x3a5   :  { %v2950_v18 = vand.u32 4294901760, %v2725_v5 }
 0x3a6   :  { %v17658_v51 = vpop.permute.xlu1 %2798  ;;  %v17660_v52 = vpop.permute.xlu0 %2732 }
 0x3a7   :  { %v17785_v47 = vsub.f32 %v2725_v5, %v2950_v18 }
 0x3aa   :  { %v17673_v13 = vpop.permute.xlu1 %2734  ;;  %v2677_v32 = vpop.permute.xlu0 %2676 }
 0x3ab   :  { %v2686_v45 = vmul.f32 %v21941_v48, %v2677_v32  ;;  %v17710_v32 = vsub.f32 %v17666_v34, %v21478_v26 }
 0x3ad   :  { %v2929_v29 = vand.u32 4294901760, %v2686_v45 }
 0x3ae   :  { %v2679_v55 = vpop.permute.xlu1 %2678  ;;  %v2761_v46 = vpop.permute.xlu0 %2760 }
 0x3af   :  { %v2687_v2 = vmul.f32 %v21941_v48, %v2679_v55  ;;  %v2770_v56 = vmul.f32 %v21948_v35, %v2761_v46  ;;  %v17721_v46 = vsub.f32 %v2768_v14, %v2983_v49  ;;  %v2935_v48 = vand.u32 4294901760, %v2704_v1 }
 0x3b0   :  { %v17727_v58 = vsub.f32 %v2686_v45, %v2929_v29 }
 0x3b1   :  { %v2932_v55 = vand.u32 4294901760, %v2687_v2  ;;  %v2989_v22 = vand.u32 4294901760, %v2770_v56  ;;  %v15113_v9 = vpack.c.bf16 %v17723_v61, %v17721_v46  ;;  %v17749_v49 = vsub.f32 %v2704_v1, %v2935_v48 }
 0x3b2   :  { %v2763_v26 = vpop.permute.xlu1 %2762  ;;  %v2697_v38 = vpop.permute.xlu0 %2696  ;;  %v17751_v57 = vpack.c.bf16 %v2938_v40, %v2935_v48 }
 0x3b3   :  { %v17729_v36 = vpack.c.bf16 %v2932_v55, %v2929_v29  ;;  %v17731_v8 = vsub.f32 %v2687_v2, %v2932_v55  ;;  %v2771_v0 = vmul.f32 %v21948_v35, %v2763_v26  ;;  %v2706_v14 = vmul.f32 %v21950_v20, %v2697_v38 }
 0x3b4   :  { %v2998_v29 = vand.u32 4294901760, %v2789_v24  ;;  %v2724_v2 = vmul.f32 %v21955_v41, %v17633_v12  ;;  %21956 = vst [vmem:[#allocation32_spill] sm:$0xff] %v17751_v57  ;;  %v17754_v50 = vsub.f32 %v2770_v56, %v2989_v22  ;;  %v15115_v48 = vpack.c.bf16 %v17737_v19, %v17749_v49 }
 0x3b5   :  { %21953 = vst [vmem:[#allocation33_spill] sm:$0xff] %v17729_v36  ;;  %15048 = vmatpush3.bf16.msra.mxu1 %v17729_v36  ;;  %v15111_v45 = vpack.c.bf16 %v17731_v8, %v17727_v58  ;;  %v2992_v26 = vand.u32 4294901760, %v2771_v0  ;;  %v2941_v23 = vand.u32 4294901760, %v2706_v14 }
 0x3b6   :  { %v2699_v55 = vpop.permute.xlu1 %2698  ;;  %v2781_v38 = vpop.permute.xlu0 %2780  ;;  %15050 = vmatprep.subr.bf16.mxu1 %v17735_v16  ;;  %v17761_v16 = vsub.f32 %v2788_v31, %v2995_v44  ;;  %v17766_v40 = vsub.f32 %v2789_v24, %v2998_v29  ;;  %v2947_v56 = vand.u32 4294901760, %v2724_v2 }
 0x3b7   :  { %v2707_v35 = vmul.f32 %v21950_v20, %v2699_v55  ;;  %15112 = vmatpush3.bf16.msra.mxu0 %v15111_v45  ;;  %v17756_v36 = vsub.f32 %v2771_v0, %v2992_v26  ;;  %v2790_v12 = vmul.f32 %v21952_v37, %v2781_v38  ;;  %v17759_v39 = vpack.c.bf16 %v2992_v26, %v2989_v22  ;;  %v21958_v0 = vld [vmem:[#allocation28_spill] sm:$0xff] }
 0x3b8   :  { %15114 = vmatprep.subr.bf16.mxu0 %v15113_v9  ;;  %v2809_v45 = vmul.f32 %v21958_v0, %v17658_v51  ;;  %v17773_v22 = vsub.f32 %v2706_v14, %v2941_v23  ;;  %v2808_v20 = vmul.f32 %v21958_v0, %v17643_v62  ;;  %v21961_v14 = vld [vmem:[#allocation31_spill] sm:$0xff]  ;;  %v15121_v5 = vpack.c.bf16 %v17766_v40, %v17761_v16 }
 0x3b9   :  { %21957 = vst [vmem:[#allocation20_spill] sm:$0xff] %v17759_v39  ;;  %v2944_v1 = vand.u32 4294901760, %v2707_v35  ;;  %15052 = vmatpush3.bf16.msra.mxu1 %v17751_v57  ;;  %v15117_v31 = vpack.c.bf16 %v17756_v36, %v17754_v50  ;;  %v3001_v51 = vand.u32 4294901760, %v2790_v12 }
 0x3ba   :  { %v2783_v55 = vpop.permute.xlu1 %2782  ;;  %v2717_v38 = vpop.permute.xlu0 %2716  ;;  %15054 = vmatprep.subr.bf16.mxu1 %v17759_v39  ;;  %v17783_v39 = vpack.c.bf16 %v2998_v29, %v2995_v44  ;;  %v3010_v62 = vand.u32 4294901760, %v2809_v45 }
 0x3bb   :  { %v17775_v26 = vpack.c.bf16 %v2944_v1, %v2941_v23  ;;  %v17777_v9 = vsub.f32 %v2707_v35, %v2944_v1  ;;  %v2791_v24 = vmul.f32 %v21952_v37, %v2783_v55  ;;  %15116 = vmatpush3.bf16.msra.mxu0 %v15115_v48  ;;  %v2726_v57 = vmul.f32 %v21955_v41, %v2717_v38 }
 0x3bc   :  { %15118 = vmatprep.subr.bf16.mxu0 %v15117_v31  ;;  %21960 = vst [vmem:[#allocation23_spill] sm:$0xff] %v17783_v39  ;;  %v2745_v23 = vmul.f32 %v21961_v14, %v17673_v13  ;;  %v17792_v1 = vsub.f32 %v2724_v2, %v2947_v56  ;;  %v2744_v48 = vmul.f32 %v21961_v14, %v17660_v52  ;;  %v3007_v2 = vand.u32 4294901760, %v2808_v20 }
 0x3bd   :  { %21959 = vst [vmem:[#allocation34_spill] sm:$0xff] %v17775_v26  ;;  %v3004_v17 = vand.u32 4294901760, %v2791_v24  ;;  %15056 = vmatpush3.bf16.msra.mxu1 %v17775_v26  ;;  %v15119_v35 = vpack.c.bf16 %v17777_v9, %v17773_v22  ;;  %v17799_v13 = vpack.c.bf16 %v2950_v18, %v2947_v56  ;;  %v2953_v38 = vand.u32 4294901760, %v2726_v57 }
 0x3be   :  { %v2719_v55 = vpop.permute.xlu1 %2718  ;;  %v2801_v44 = vpop.permute.xlu0 %2800  ;;  %15058 = vmatprep.subr.bf16.mxu1 %v17783_v39  ;;  %v17804_v37 = vsub.f32 %v2790_v12, %v3001_v51  ;;  %v2962_v39 = vand.u32 4294901760, %v2745_v23  ;;  %v15123_v18 = vpack.c.bf16 %v17785_v47, %v17792_v1  ;;  %v2959_v12 = vand.u32 4294901760, %v2744_v48 }
 0x3bf   :  { %21962 = vst [vmem:[#allocation35_spill] sm:$0xff] %v17799_v13  ;;  %v17801_v29 = vsub.f32 %v2791_v24, %v3004_v17  ;;  %v2727_v31 = vmul.f32 %v21955_v41, %v2719_v55  ;;  %15120 = vmatpush3.bf16.msra.mxu0 %v15119_v35  ;;  %v2810_v52 = vmul.f32 %v21958_v0, %v2801_v44 }
 0x3c0   :  { %15122 = vmatprep.subr.bf16.mxu0 %v15121_v5  ;;  %v17807_v26 = vpack.c.bf16 %v3004_v17, %v3001_v51  ;;  %v17814_v35 = vsub.f32 %v2809_v45, %v3010_v62  ;;  %v17819_v51 = vsub.f32 %v2726_v57, %v2953_v38  ;;  %v17826_v24 = vsub.f32 %v2808_v20, %v3007_v2 }
 0x3c1   :  { %v2956_v21 = vand.u32 4294901760, %v2727_v31  ;;  %15060 = vmatpush3.bf16.msra.mxu1 %v17799_v13  ;;  %v15125_v17 = vpack.c.bf16 %v17801_v29, %v17804_v37  ;;  %v3013_v45 = vand.u32 4294901760, %v2810_v52  ;;  %v17829_v3 = vpack.c.bf16 %v3010_v62, %v3007_v2 }
 0x3c2   :  { %21963 = vst [vmem:[#allocation24_spill] sm:$0xff] %v17807_v26  ;;  %v2803_v55 = vpop.permute.xlu1 %2802  ;;  %v2737_v41 = vpop.permute.xlu0 %2736  ;;  %15062 = vmatprep.subr.bf16.mxu1 %v17807_v26  ;;  %v3082_v26 = vand.u32 4294901760, %v17620_v10  ;;  %v17832_v59 = vsub.f32 %v2745_v23, %v2962_v39  ;;  %v15129_v23 = vpack.c.bf16 %v17814_v35, %v17826_v24 }
 0x3c3   :  { %v17821_v44 = vpack.c.bf16 %v2956_v21, %v2953_v38  ;;  %v17823_v5 = vsub.f32 %v2727_v31, %v2956_v21  ;;  %v2811_v56 = vmul.f32 %v21958_v0, %v2803_v55  ;;  %15124 = vmatpush3.bf16.msra.mxu0 %v15123_v18  ;;  %v2746_v13 = vmul.f32 %v21961_v14, %v2737_v41 }
 0x3c4   :  { %15126 = vmatprep.subr.bf16.mxu0 %v15125_v17  ;;  %21965 = vst [vmem:[#allocation12_spill] sm:$0xff] %v17829_v3  ;;  %v21966_v38 = vand.u32 4294901760, %v17624_v43  ;;  %v17840_v31 = vsub.f32 %v2744_v48, %v2959_v12  ;;  %v17842_v41 = vpack.c.bf16 %v2962_v39, %v2959_v12  ;;  %v17852_v48 = vsub.f32 %v2810_v52, %v3013_v45 }
 0x3c5   :  { %21964 = vst [vmem:[#allocation37_spill] sm:$0xff] %v17821_v44  ;;  %v3016_v57 = vand.u32 4294901760, %v2811_v56  ;;  %15064 = vmatpush3.bf16.msra.mxu1 %v17821_v44  ;;  %v15127_v21 = vpack.c.bf16 %v17823_v5, %v17819_v51  ;;  %v2965_v55 = vand.u32 4294901760, %v2746_v13  ;;  %v21969_v12 = vand.u32 4294901760, %v17700_v7 }
 0x3c6   :  { %v3090_v20 = vsub.f32 %v17624_v43, %v21966_v38  ;;  %21967 = vst [vmem:[#allocation36_spill] sm:$0xff] %v17842_v41  ;;  %v2739_v62 = vpop.permute.xlu1 %2738  ;;  %15066 = vmatprep.subr.bf16.mxu1 %v17829_v3  ;;  %v3083_v2 = vsub.f32 %v17620_v10, %v3082_v26  ;;  %v21970_v10 = vand.u32 4294901760, %v17731_v8  ;;  %v21979_v44 = vand.u32 4294901760, %v17756_v36 }
 0x3c7   :  { %v17848_v18 = vsub.f32 %v2811_v56, %v3016_v57  ;;  %v2747_v17 = vmul.f32 %v21961_v14, %v2739_v62  ;;  %15128 = vmatpush3.bf16.msra.mxu0 %v15127_v21  ;;  %v17854_v39 = vpack.c.bf16 %v3016_v57, %v3013_v45  ;;  %v17859_v0 = vsub.f32 %v17700_v7, %v21969_v12 }
 0x3c8   :  { %15130 = vmatprep.subr.bf16.mxu0 %v15129_v23  ;;  %v15131_v21 = vpack.c.bf16 %v17832_v59, %v17840_v31  ;;  %v3091_v52 = vand.u32 4294901760, %v3090_v20  ;;  %v3104_v23 = vsub.f32 %v17731_v8, %v21970_v10  ;;  %v17874_v12 = vsub.f32 %v2746_v13, %v2965_v55 }
 0x3c9   :  { %21968 = vst [vmem:[#allocation38_spill] sm:$0xff] %v17854_v39  ;;  %v2968_v3 = vand.u32 4294901760, %v2747_v17  ;;  %15068 = vmatpush3.bf16.msra.mxu1 %v17842_v41  ;;  %v15133_v57 = vpack.c.bf16 %v17848_v18, %v17852_v48  ;;  %v21972_v45 = vand.u32 4294901760, %v17723_v61  ;;  %v3052_v14 = vand.u32 4294901760, %v17710_v32 }
 0x3ca   :  { %15070 = vmatprep.subr.bf16.mxu1 %v17854_v39  ;;  %v3084_v41 = vand.u32 4294901760, %v3083_v2  ;;  %v21974_v32 = vand.u32 4294901760, %v17721_v46  ;;  %v3105_v13 = vand.u32 4294901760, %v3104_v23  ;;  %v3257_v20 = vand.u32 4294901760, %v17766_v40 }
 0x3cb   :  { %v17876_v56 = vpack.c.bf16 %v2968_v3, %v2965_v55  ;;  %v17878_v38 = vsub.f32 %v2747_v17, %v2968_v3  ;;  %15132 = vmatpush3.bf16.msra.mxu0 %v15131_v21  ;;  %v3230_v62 = vsub.f32 %v17723_v61, %v21972_v45  ;;  %v21973_v55 = vand.u32 4294901760, %v17727_v58 }
 0x3cc   :  { %15134 = vmatprep.subr.bf16.mxu0 %v15133_v57  ;;  %v3223_v45 = vsub.f32 %v17721_v46, %v21974_v32  ;;  %v21975_v57 = vand.u32 4294901760, %v17719_v53  ;;  %v3131_v21 = vand.u32 4294901760, %v17777_v9  ;;  %v21977_v32 = vand.u32 4294901760, %v17678_v27 }
 0x3cd   :  { %21971 = vst [vmem:[#allocation39_spill] sm:$0xff] %v17876_v56  ;;  %v3097_v3 = vsub.f32 %v17727_v58, %v21973_v55  ;;  %15072 = vmatpush3.bf16.msra.mxu1 %v17876_v56  ;;  %v15135_v17 = vpack.c.bf16 %v17878_v38, %v17874_v12  ;;  %v21976_v55 = vand.u32 4294901760, %v17737_v19  ;;  %v21978_v2 = vand.u32 4294901760, %v17624_v43 }
 0x3ce   :  { %15074 = vmatprep.subr.bf16.mxu1 %v17543_v28  ;;  %v17902_v10 = vsub.f32 %v17719_v53, %v21975_v57  ;;  %v15075_v28 = vpack.c.bf16 %v3091_v52, %v3084_v41  ;;  %v3231_v56 = vand.u32 4294901760, %v3230_v62  ;;  %v21980_v23 = vand.u32 4294901760, %v17749_v49 }
 0x3cf   :  { %v3118_v39 = vsub.f32 %v17737_v19, %v21976_v55  ;;  %15136 = vmatpush3.bf16.msra.mxu0 %v15135_v17  ;;  %v15171_v57 = vpack.c.bf16 %v21978_v2, %v3082_v26  ;;  %v3244_v55 = vsub.f32 %v17756_v36, %v21979_v44  ;;  %v3250_v41 = vand.u32 4294901760, %v17761_v16 }
 0x3d0   :  { %3029 = vmatmul.mubr.f32.vlgmr.msra.gmra.mrb[36].mxu1 %v21977_v32  ;;  %15170 = vmatprep.subr.bf16.mxu0 %v17532_v30  ;;  %v3111_v17 = vsub.f32 %v17749_v49, %v21980_v23  ;;  %v3098_v52 = vand.u32 4294901760, %v3097_v3  ;;  %v3124_v27 = vand.u32 4294901760, %v17773_v22  ;;  %v21981_v30 = vand.u32 4294901760, %v17686_v25 }
 0x3d1   :  { %15076 = vmatpush3.bf16.msra.mxu1 %v15075_v28  ;;  %v3138_v43 = vand.u32 4294901760, %v17792_v1  ;;  %v3224_v26 = vand.u32 4294901760, %v3223_v45  ;;  %v21982_v44 = vand.u32 4294901760, %v17754_v50  ;;  %v3073_v2 = vand.u32 4294901760, %v17902_v10 }
 0x3d2   :  { %3038 = vmatprep.mubr.f32.mxu1 %v21981_v30  ;;  %15078 = vmatprep.subr.bf16.mxu1 %v17560_v42  ;;  %v3119_v3 = vand.u32 4294901760, %v3118_v39  ;;  %v3145_v32 = vand.u32 4294901760, %v17785_v47  ;;  %v3132_v25 = vsub.f32 %v17777_v9, %v3131_v21  ;;  %v15079_v28 = vpack.c.bf16 %v3105_v13, %v3098_v52 }
 0x3d3   :  { %3465 = vmatmul.mubr.f32.vlgmr.msra.gmra.mrb[24].mxu0 %v17646_v15  ;;  %v3237_v62 = vsub.f32 %v17754_v50, %v21982_v44  ;;  %v3271_v42 = vand.u32 4294901760, %v17801_v29  ;;  %v21983_v45 = vand.u32 4294901760, %v17691_v6  ;;  %v15081_v23 = vpack.c.bf16 %v3231_v56, %v3224_v26 }
 0x3d4   :  { %15172 = vmatpush3.bf16.msra.mxu0 %v15171_v57  ;;  %3471 = vmatprep.mubr.f32.mxu0 %v17649_v11  ;;  %v3245_v10 = vand.u32 4294901760, %v3244_v55  ;;  %v3258_v39 = vsub.f32 %v17766_v40, %v3257_v20  ;;  %v3112_v30 = vand.u32 4294901760, %v3111_v17  ;;  %v3125_v13 = vsub.f32 %v17773_v22, %v3124_v27 }
 0x3d5   :  { %3044 = vmatmul.mubr.f32.gmra.mrb[38].mxu1 %v21983_v45  ;;  %15174 = vmatprep.subr.bf16.mxu0 %v17554_v63  ;;  %v21984_v57 = vand.u32 4294901760, %v17727_v58  ;;  %v21985_v6 = vand.u32 4294901760, %v17731_v8  ;;  %v3251_v63 = vsub.f32 %v17761_v16, %v3250_v41  ;;  %v3139_v56 = vsub.f32 %v17792_v1, %v3138_v43 }
 0x3d6   :  { %15080 = vmatpush3.bf16.msra.mxu1 %v15079_v28  ;;  %3053 = vmatprep.mubr.f32.mxu1 %v3052_v14  ;;  %v3264_v55 = vand.u32 4294901760, %v17804_v37  ;;  %v21986_v17 = vand.u32 4294901760, %v17721_v46  ;;  %v21987_v14 = vand.u32 4294901760, %v17723_v61  ;;  %v3238_v58 = vand.u32 4294901760, %v3237_v62 }
 0x3d7   :  { %v15175_v52 = vpack.c.bf16 %v21985_v6, %v21984_v57  ;;  %15082 = vmatprep.subr.bf16.mxu1 %v15081_v23  ;;  %3474 = vmatmul.mubr.f32.gmra.mrb[26].mxu0 %v17652_v33  ;;  %v3146_v8 = vsub.f32 %v17785_v47, %v3145_v32  ;;  %v3133_v44 = vand.u32 4294901760, %v3132_v25  ;;  %v3159_v28 = vand.u32 4294901760, %v17823_v5 }
 0x3d8   :  { %v15177_v26 = vpack.c.bf16 %v21987_v14, %v21986_v17  ;;  %v15083_v45 = vpack.c.bf16 %v3119_v3, %v3112_v30  ;;  %3480 = vmatprep.mubr.f32.mxu0 %v17666_v34  ;;  %v3285_v23 = vand.u32 4294901760, %v17814_v35  ;;  %v21988_v46 = vand.u32 4294901760, %v17715_v4 }
 0x3d9   :  { %15176 = vmatpush3.bf16.msra.mxu0 %v15175_v52  ;;  %v15085_v61 = vpack.c.bf16 %v3245_v10, %v3238_v58  ;;  %v3259_v62 = vand.u32 4294901760, %v3258_v39  ;;  %v3272_v57 = vsub.f32 %v17801_v29, %v3271_v42  ;;  %v3126_v6 = vand.u32 4294901760, %v3125_v13 }
 0x3da   :  { %3059 = vmatmul.mubr.f32.gmra.mrb[40].mxu1 %v21988_v46  ;;  %15178 = vmatprep.subr.bf16.mxu0 %v15177_v26  ;;  %v3152_v25 = vand.u32 4294901760, %v17819_v51  ;;  %v21989_v3 = vand.u32 4294901760, %v17859_v0  ;;  %v21990_v30 = vand.u32 4294901760, %v17749_v49  ;;  %v21991_v52 = vand.u32 4294901760, %v17737_v19 }
 0x3db   :  { %15084 = vmatpush3.bf16.msra.mxu1 %v15083_v45  ;;  %v3252_v17 = vand.u32 4294901760, %v3251_v63  ;;  %v3140_v14 = vand.u32 4294901760, %v3139_v56  ;;  %v3278_v10 = vand.u32 4294901760, %v17826_v24  ;;  %v21992_v39 = vand.u32 4294901760, %v17754_v50  ;;  %3483 = vmatmul.mubr.f32.gmra.mrb[28].mxu0 %v17669_v60  ;;  %v2819_v56 = vpop.permute.xlu1 %2818 }
 0x3dc   :  { %3068 = vmatprep.mubr.f32.mxu1 %v21989_v3  ;;  %v15179_v4 = vpack.c.bf16 %v21991_v52, %v21990_v30  ;;  %15086 = vmatprep.subr.bf16.mxu1 %v15085_v61  ;;  %v21993_v13 = vand.u32 4294901760, %v17756_v36  ;;  %v3265_v0 = vsub.f32 %v17804_v37, %v3264_v55  ;;  %v3147_v49 = vand.u32 4294901760, %v3146_v8  ;;  %v2817_v3 = vpop.permute.xlu0 %2816 }
 0x3dd   :  { %v3173_v19 = vand.u32 4294901760, %v17832_v59  ;;  %v3160_v63 = vsub.f32 %v17823_v5, %v3159_v28  ;;  %v15087_v58 = vpack.c.bf16 %v3133_v44, %v3126_v6  ;;  %3489 = vmatprep.mubr.f32.mxu0 %v17700_v7  ;;  %v3299_v36 = vand.u32 4294901760, %v17848_v18 }
 0x3de   :  { %v15181_v26 = vpack.c.bf16 %v21993_v13, %v21992_v39  ;;  %15180 = vmatpush3.bf16.msra.mxu0 %v15179_v4  ;;  %3074 = vmatmul.mubr.f32.gmra.mrb[42].mxu1 %v3073_v2  ;;  %v15089_v50 = vpack.c.bf16 %v3259_v62, %v3252_v17  ;;  %v3273_v45 = vand.u32 4294901760, %v3272_v57  ;;  %v3286_v8 = vsub.f32 %v17814_v35, %v3285_v23  ;;  %v21994_v57 = vld [vmem:[#allocation29_spill] sm:$0xff]  ;;  %v2845_v35 = vld [vmem:[#allocation3 + $0xa0] sm:$0xff] }
 0x3df   :  { %v3166_v46 = vand.u32 4294901760, %v17840_v31  ;;  %v3153_v61 = vsub.f32 %v17819_v51, %v3152_v25  ;;  %15088 = vmatpush3.bf16.msra.mxu1 %v15087_v58  ;;  %v15183_v2 = vpack.c.bf16 %v3131_v21, %v3124_v27  ;;  %v15185_v44 = vpack.c.bf16 %v3257_v20, %v3250_v41  ;;  %3304 = vmatprep.mubr.f32.mxu1 %v17582_v54 }
 0x3e0   :  { %15182 = vmatprep.subr.bf16.mxu0 %v15181_v26  ;;  %v3292_v62 = vand.u32 4294901760, %v17852_v48  ;;  %v18013_v6 = vmul.f32 %v21994_v57, %v2819_v56  ;;  %15090 = vmatprep.subr.bf16.mxu1 %v15089_v50  ;;  %v3266_v30 = vand.u32 4294901760, %v3265_v0  ;;  %v3279_v22 = vsub.f32 %v17826_v24, %v3278_v10 }
 0x3e1   :  { %3492 = vmatmul.mubr.f32.gmra.mrb[30].mxu0 %v17719_v53  ;;  %v3174_v16 = vsub.f32 %v17832_v59, %v3173_v19  ;;  %v3161_v40 = vand.u32 4294901760, %v3160_v63  ;;  %v3187_v9 = vand.u32 4294901760, %v17878_v38  ;;  %v15091_v20 = vpack.c.bf16 %v3147_v49, %v3140_v14 }
 0x3e2   :  { %15184 = vmatpush3.bf16.msra.mxu0 %v15183_v2  ;;  %3799 = vmatprep.mubr.f32.mxu0 %v17582_v54  ;;  %v18025_v21 = vmul.f32 %v21994_v57, %v2817_v3  ;;  %v15093_v41 = vpack.c.bf16 %v3273_v45, %v3266_v30  ;;  %v3287_v27 = vand.u32 4294901760, %v3286_v8  ;;  %v3300_v52 = vsub.f32 %v17848_v18, %v3299_v36  ;;  %v2823_v8 = vpop.permute.xlu1 %2822  ;;  %v2821_v3 = vpop.permute.xlu0 %2820 }
 0x3e3   :  { %15186 = vmatprep.subr.bf16.mxu0 %v15185_v44  ;;  %v3167_v4 = vsub.f32 %v17840_v31, %v3166_v46  ;;  %v3154_v17 = vand.u32 4294901760, %v3153_v61  ;;  %v3180_v39 = vand.u32 4294901760, %v17874_v12  ;;  %15092 = vmatpush3.bf16.msra.mxu1 %v15091_v20  ;;  %v15187_v14 = vpack.c.bf16 %v3145_v32, %v3138_v43  ;;  %v2842_v61 = vld [vmem:[#allocation3 + $0x88] sm:$0xff] }
 0x3e4   :  { %v3956_v13 = vand.u32 4294901760, %v18013_v6  ;;  %15094 = vmatprep.subr.bf16.mxu1 %v15093_v41  ;;  %v15189_v26 = vpack.c.bf16 %v3271_v42, %v3264_v55  ;;  %v3280_v0 = vand.u32 4294901760, %v3279_v22  ;;  %v3293_v49 = vsub.f32 %v17852_v48, %v3292_v62  ;;  %v2839_v48 = vld [vmem:[#allocation3 + $0x70] sm:$0xff]  ;;  %v21996_v41 = vld [vmem:[#allocation46_spill] sm:$0xff] }
 0x3e5   :  { %v3175_v63 = vand.u32 4294901760, %v3174_v16  ;;  %v3188_v56 = vsub.f32 %v17878_v38, %v3187_v9  ;;  %v15095_v1 = vpack.c.bf16 %v3161_v40, %v3154_v17  ;;  %v3953_v47 = vand.u32 4294901760, %v18025_v21  ;;  %v21995_v16 = vld [vmem:[#allocation21_spill] sm:$0xff] }
 0x3e6   :  { %15188 = vmatpush3.bf16.msra.mxu0 %v15187_v14  ;;  %v15097_v43 = vpack.c.bf16 %v3287_v27, %v3280_v0  ;;  %v3301_v32 = vand.u32 4294901760, %v3300_v52  ;;  %v3168_v58 = vand.u32 4294901760, %v3167_v4  ;;  %v3181_v37 = vsub.f32 %v17874_v12, %v3180_v39  ;;  %v21997_v52 = vld [vmem:[#allocation30_spill] sm:$0xff]  ;;  %v21998_v4 = vld [vmem:[#allocation8_spill] sm:$0xff] }
 0x3e7   :  { %15190 = vmatprep.subr.bf16.mxu0 %v15189_v26  ;;  %15096 = vmatpush3.bf16.msra.mxu1 %v15095_v1  ;;  %v15191_v29 = vpack.c.bf16 %v3159_v28, %v3152_v25  ;;  %v18054_v42 = vsub.f32 %v18013_v6, %v3956_v13  ;;  %v15193_v55 = vpack.c.bf16 %v3285_v23, %v3278_v10  ;;  %v3294_v50 = vand.u32 4294901760, %v3293_v49  ;;  %v22000_v1 = vld [vmem:[#allocation16_spill] sm:$0xff] }
 0x3e8   :  { %15098 = vmatprep.subr.bf16.mxu1 %v15097_v43  ;;  %v3189_v45 = vand.u32 4294901760, %v3188_v56  ;;  %v15099_v12 = vpack.c.bf16 %v3175_v63, %v3168_v58  ;;  %v18061_v51 = vsub.f32 %v18025_v21, %v3953_v47  ;;  %v2911_v28 = vsel %vm1007_vm2, %v2839_v48, 0  ;;  %v22001_v43 = vld [vmem:[#allocation33_spill] sm:$0xff] }
 0x3e9   :  { %v15101_v5 = vpack.c.bf16 %v3301_v32, %v3294_v50  ;;  %v3182_v25 = vand.u32 4294901760, %v3181_v37  ;;  %v15195_v24 = vpack.c.bf16 %v3173_v19, %v3166_v46  ;;  %v4071_v23 = vand.u32 4294901760, %v18054_v42  ;;  %v2848_v46 = vld [vmem:[#allocation3 + $0xb8] sm:$0xff]  ;;  %v22002_v32 = vld [vmem:[#allocation14_spill] sm:$0xff]  ;;  %v22003_v37 = vld [vmem:[#allocation19_spill] sm:$0xff] }
 0x3ea   :  { %15192 = vmatpush3.bf16.msra.mxu0 %v15191_v29  ;;  %v2831_v10 = vmul.f32 %v21994_v57, %v2823_v8  ;;  %v15197_v2 = vpack.c.bf16 %v3299_v36, %v3292_v62  ;;  %v2914_v44 = vsel %vm1007_vm2, %v2842_v61, 0  ;;  %v18073_v30 = vand.u32 4294901760, %v2911_v28  ;;  %v22005_v61 = vld [vmem:[#allocation32_spill] sm:$0xff] }
 0x3eb   :  { %15194 = vmatprep.subr.bf16.mxu0 %v15193_v55  ;;  %15100 = vmatpush3.bf16.msra.mxu1 %v15099_v12  ;;  %v15103_v6 = vpack.c.bf16 %v3189_v45, %v3182_v25  ;;  %v4064_v31 = vand.u32 4294901760, %v18061_v51  ;;  %v2830_v59 = vmul.f32 %v21994_v57, %v2821_v3  ;;  %v2917_v19 = vsel %vm1007_vm2, %v2845_v35, 0  ;;  %v22004_v12 = vld [vmem:[#allocation17_spill] sm:$0xff] }
 0x3ec   :  { %15102 = vmatprep.subr.bf16.mxu1 %v15101_v5  ;;  %v15199_v22 = vpack.c.bf16 %v3187_v9, %v3180_v39  ;;  %v18080_v18 = vand.u32 4294901760, %v2914_v44  ;;  %v18082_v36 = vpack.c.bf16 %v3956_v13, %v3953_v47  ;;  %v3962_v62 = vand.u32 4294901760, %v2831_v10  ;;  %v21999_v13 = vld [vmem:[#allocation43_spill] sm:$0xff] }
 0x3ed   :  { %v4072_v40 = vsub.f32 %v18054_v42, %v4071_v23  ;;  %v18089_v20 = vsub.f32 %v2911_v28, %v18073_v30  ;;  %v18091_v21 = vand.u32 4294901760, %v2917_v19  ;;  %v2920_v38 = vsel %vm1007_vm2, %v2848_v46, 0  ;;  %v22006_v5 = vld [vmem:[#allocation15_spill] sm:$0xff]  ;;  %v22007_v28 = vld [vmem:[#allocation20_spill] sm:$0xff] }
 0x3ee   :  { %15196 = vmatpush3.bf16.msra.mxu0 %v15195_v24  ;;  %v3959_v9 = vand.u32 4294901760, %v2830_v59  ;;  %v4065_v27 = vsub.f32 %v18061_v51, %v4064_v31  ;;  %v18102_v17 = vsub.f32 %v2914_v44, %v18080_v18  ;;  %v18106_v14 = vsub.f32 %v2831_v10, %v3962_v62  ;;  %v22012_v46 = vld [vmem:[#allocation23_spill] sm:$0xff] }
 0x3ef   :  { %15198 = vmatprep.subr.bf16.mxu0 %v15197_v2  ;;  %15104 = vmatpush3.bf16.msra.mxu1 %v15103_v6  ;;  %v4073_v26 = vand.u32 4294901760, %v4072_v40  ;;  %v18110_v0 = vand.u32 4294901760, %v2920_v38  ;;  %v4023_v49 = vand.u32 4294901760, %v18089_v20  ;;  %v18116_v63 = vsub.f32 %v2917_v19, %v18091_v21  ;;  %v22008_v2 = vld [vmem:[#allocation18_spill] sm:$0xff] }
 0x3f0   :  { %15138 = vmatprep.subr.bf16.mxu1 %v21995_v16  ;;  %v18104_v39 = vpack.c.bf16 %v3962_v62, %v3959_v9  ;;  %v18118_v56 = vsub.f32 %v2830_v59, %v3959_v9  ;;  %v4066_v47 = vand.u32 4294901760, %v4065_v27  ;;  %v4085_v58 = vand.u32 4294901760, %v18106_v14  ;;  %v22009_v6 = vld [vmem:[#allocation34_spill] sm:$0xff]  ;;  %v22010_v59 = vld [vmem:[#allocation11_spill] sm:$0xff] }
 0x3f1   :  { %v4033_v48 = vand.u32 4294901760, %v18102_v17  ;;  %v18129_v55 = vsub.f32 %v2920_v38, %v18110_v0  ;;  %v4024_v50 = vsub.f32 %v18089_v20, %v4023_v49  ;;  %v4043_v45 = vand.u32 4294901760, %v18116_v63  ;;  %v22013_v27 = vld [vmem:[#allocation35_spill] sm:$0xff] }
 0x3f2   :  { %15200 = vmatpush3.bf16.msra.mxu0 %v15199_v22  ;;  %3306 = vmatmul.mubr.f32.vlgmr.msra.gmra.mrb[44].mxu1 %v21996_v41  ;;  %v15241_v29 = vpack.c.bf16 %v4073_v26, %v4066_v47  ;;  %v4078_v8 = vand.u32 4294901760, %v18118_v56  ;;  %v4086_v3 = vsub.f32 %v18106_v14, %v4085_v58  ;;  %v22011_v19 = vand.u32 4294901760, %v22010_v59  ;;  %v22014_v26 = vld [vmem:[#allocation24_spill] sm:$0xff]  ;;  %v22015_v59 = vld [vmem:[#allocation37_spill] sm:$0xff] }
 0x3f3   :  { %15234 = vmatprep.subr.bf16.mxu0 %v18082_v36  ;;  %15140 = vmatpush3.bf16.msra.mxu1 %v21997_v52  ;;  %v4034_v25 = vsub.f32 %v18102_v17, %v4033_v48  ;;  %v4053_v24 = vand.u32 4294901760, %v18129_v55  ;;  %v4025_v35 = vand.u32 4294901760, %v4024_v50  ;;  %v4044_v10 = vsub.f32 %v18116_v63, %v4043_v45 }
 0x3f4   :  { %3311 = vmatprep.mubr.f32.mxu1 %v21998_v4  ;;  %15142 = vmatprep.subr.bf16.mxu1 %v21999_v13  ;;  %v4079_v44 = vsub.f32 %v18118_v56, %v4078_v8  ;;  %v4087_v62 = vand.u32 4294901760, %v4086_v3  ;;  %v15249_v3 = vpack.c.bf16 %v18054_v42, %v18061_v51  ;;  %v15269_v42 = vpack.c.bf16 %v4085_v58, %v4078_v8  ;;  %v2893_v58 = vpop.permute.xlu0 %2892 }
 0x3f5   :  { %3801 = vmatmul.mubr.f32.vlgmr.msra.gmra.mrb[32].mxu0 %v21996_v41  ;;  %v4035_v22 = vand.u32 4294901760, %v4034_v25  ;;  %v4054_v40 = vsub.f32 %v18129_v55, %v4053_v24  ;;  %v4045_v38 = vand.u32 4294901760, %v4044_v10  ;;  %v22016_v25 = vld [vmem:[#allocation12_spill] sm:$0xff]  ;;  %v22018_v10 = vld [vmem:[#allocation38_spill] sm:$0xff] }
 0x3f6   :  { %15236 = vmatpush3.bf16.msra.mxu0 %v18082_v36  ;;  %3806 = vmatprep.mubr.f32.mxu0 %v21998_v4  ;;  %v4080_v9 = vand.u32 4294901760, %v4079_v44  ;;  %v22019_v44 = vld [vmem:[#allocation39_spill] sm:$0xff] }
 0x3f7   :  { %3313 = vmatmul.mubr.f32.gmra.mrb[46].mxu1 %v22000_v1  ;;  %15238 = vmatprep.subr.bf16.mxu0 %v18104_v39  ;;  %v4055_v50 = vand.u32 4294901760, %v4054_v40 }
 0x3f8   :  { %15144 = vmatpush3.bf16.msra.mxu1 %v22001_v43  ;;  %3318 = vmatprep.mubr.f32.mxu1 %v22002_v32  ;;  %v15245_v47 = vpack.c.bf16 %v4087_v62, %v4080_v9 }
 0x3f9   :  { %15146 = vmatprep.subr.bf16.mxu1 %v22003_v37  ;;  %3808 = vmatmul.mubr.f32.gmra.mrb[34].mxu0 %v22000_v1 }
 0x3fa   :  { %15240 = vmatpush3.bf16.msra.mxu0 %v18104_v39  ;;  %3813 = vmatprep.mubr.f32.mxu0 %v22002_v32 }
 0x3fb   :  { %3320 = vmatmul.mubr.f32.gmra.mrb[48].mxu1 %v22004_v12  ;;  %15242 = vmatprep.subr.bf16.mxu0 %v15241_v29 }
 0x3fc   :  { %15148 = vmatpush3.bf16.msra.mxu1 %v22005_v61  ;;  %3325 = vmatprep.mubr.f32.mxu1 %v22006_v5 }
 0x3fd   :  { %15150 = vmatprep.subr.bf16.mxu1 %v22007_v28  ;;  %3815 = vmatmul.mubr.f32.gmra.mrb[36].mxu0 %v22004_v12 }
 0x3fe   :  { %3820 = vmatprep.mubr.f32.mxu0 %v22006_v5 }
 0x3ff   :  { %3327 = vmatmul.mubr.f32.gmra.mrb[50].mxu1 %v22008_v2 }
 0x400   :  { %15152 = vmatpush3.bf16.msra.mxu1 %v22009_v6  ;;  %3596 = vmatprep.mubr.f32.mxu1 %v22011_v19  ;;  %v22020_v19 = vand.u32 4294901760, %v17646_v15  ;;  %v22023_v15 = vand.u32 4294901760, %v17666_v34  ;;  %v22025_v34 = vand.u32 4294901760, %v17700_v7 }
 0x401   :  { %15154 = vmatprep.subr.bf16.mxu1 %v22012_v46  ;;  %3822 = vmatmul.mubr.f32.gmra.mrb[38].mxu0 %v22008_v2 }
 0x402   :  { %14341 = vmatprep.mubr.f32.mxu0 %v4025_v35  ;;  %v22017_v35 = vld [vmem:[#allocation36_spill] sm:$0xff] }
 0x404   :  { %15156 = vmatpush3.bf16.msra.mxu1 %v22013_v27 }
 0x405   :  { %15158 = vmatprep.subr.bf16.mxu1 %v22014_v26  ;;  %14342 = vmatmul.mubr.f32.vlgmr.msra.gmra.mrb[40].mxu0 %v4035_v22  ;;  %v22021_v22 = vand.u32 4294901760, %v17649_v11  ;;  %v15265_v11 = vpack.c.bf16 %v4071_v23, %v4064_v31 }
 0x406   :  { %15244 = vmatpush3.bf16.msra.mxu0 %v15241_v29  ;;  %14344 = vmatprep.mubr.f32.mxu0 %v4045_v38  ;;  %v15253_v29 = vpack.c.bf16 %v18106_v14, %v18118_v56 }
 0x407   :  { %15246 = vmatprep.subr.bf16.mxu0 %v15245_v47 }
 0x408   :  { %15160 = vmatpush3.bf16.msra.mxu1 %v22015_v59 }
 0x409   :  { %15162 = vmatprep.subr.bf16.mxu1 %v22016_v25  ;;  %14345 = vmatmul.mubr.f32.gmra.mrb[42].mxu0 %v4055_v50 }
 0x40a   :  { %15248 = vmatpush3.bf16.msra.mxu0 %v15245_v47  ;;  %14355 = vmatprep.mubr.f32.mxu0 %v18073_v30 }
 0x40b   :  { %15250 = vmatprep.subr.bf16.mxu0 %v15249_v3 }
 0x40c   :  { %15164 = vmatpush3.bf16.msra.mxu1 %v22017_v35 }
 0x40d   :  { %15166 = vmatprep.subr.bf16.mxu1 %v22018_v10  ;;  %14356 = vmatmul.mubr.f32.vlgmr.msra.gmra.mrb[40].mxu0 %v18080_v18 }
 0x40e   :  { %15252 = vmatpush3.bf16.msra.mxu0 %v15249_v3  ;;  %14358 = vmatprep.mubr.f32.mxu0 %v18091_v21 }
 0x40f   :  { %15254 = vmatprep.subr.bf16.mxu0 %v15253_v29 }
 0x410   :  { %15168 = vmatpush3.bf16.msra.mxu1 %v22019_v44 }
 0x411   :  { %15202 = vmatprep.subr.bf16.mxu1 %v21995_v16  ;;  %14359 = vmatmul.mubr.f32.gmra.mrb[42].mxu0 %v18110_v0  ;;  %v22022_v16 = vand.u32 4294901760, %v17652_v33  ;;  %v22024_v33 = vand.u32 4294901760, %v17669_v60  ;;  %v22026_v60 = vand.u32 4294901760, %v17719_v53 }
 0x412   :  { %15256 = vmatpush3.bf16.msra.mxu0 %v15253_v29  ;;  %14369 = vmatprep.mubr.f32.mxu0 %v18089_v20 }
 0x413   :  { %15258 = vmatprep.subr.bf16.mxu0 %v18082_v36  ;;  %3600 = vmatmul.mubr.f32.vlgmr.msra.gmra.mrb[52].mxu1 %v22020_v19 }
 0x414   :  { %15204 = vmatpush3.bf16.msra.mxu1 %v21997_v52  ;;  %3607 = vmatprep.mubr.f32.mxu1 %v22021_v22 }
 0x415   :  { %15206 = vmatprep.subr.bf16.mxu1 %v21999_v13  ;;  %14370 = vmatmul.mubr.f32.vlgmr.msra.gmra.mrb[40].mxu0 %v18102_v17 }
 0x416   :  { %15260 = vmatpush3.bf16.msra.mxu0 %v18082_v36  ;;  %14372 = vmatprep.mubr.f32.mxu0 %v18116_v63 }
 0x417   :  { %15262 = vmatprep.subr.bf16.mxu0 %v18104_v39  ;;  %3611 = vmatmul.mubr.f32.gmra.mrb[54].mxu1 %v22022_v16 }
 0x418   :  { %15208 = vmatpush3.bf16.msra.mxu1 %v22001_v43  ;;  %3618 = vmatprep.mubr.f32.mxu1 %v22023_v15 }
 0x419   :  { %15210 = vmatprep.subr.bf16.mxu1 %v22003_v37  ;;  %14373 = vmatmul.mubr.f32.gmra.mrb[42].mxu0 %v18129_v55 }
 0x41a   :  { %15264 = vmatpush3.bf16.msra.mxu0 %v18104_v39  ;;  %14383 = vmatprep.mubr.f32.mxu0 %v4023_v49 }
 0x41b   :  { %15266 = vmatprep.subr.bf16.mxu0 %v15265_v11  ;;  %3622 = vmatmul.mubr.f32.gmra.mrb[56].mxu1 %v22024_v33 }
 0x41c   :  { %15212 = vmatpush3.bf16.msra.mxu1 %v22005_v61  ;;  %3629 = vmatprep.mubr.f32.mxu1 %v22025_v34 }
 0x41d   :  { %15214 = vmatprep.subr.bf16.mxu1 %v22007_v28  ;;  %14384 = vmatmul.mubr.f32.vlgmr.msra.gmra.mrb[40].mxu0 %v4033_v48  ;;  %v2898_v28 = vpop.permute.xlu1 %2897 }
 0x41e   :  { %15268 = vmatpush3.bf16.msra.mxu0 %v15265_v11  ;;  %14386 = vmatprep.mubr.f32.mxu0 %v4043_v45 }
 0x41f   :  { %15270 = vmatprep.subr.bf16.mxu0 %v15269_v42  ;;  %3633 = vmatmul.mubr.f32.gmra.mrb[58].mxu1 %v22026_v60 }
 0x420   :  { %15216 = vmatpush3.bf16.msra.mxu1 %v22009_v6  ;;  %3924 = vmatprep.mubr.f32.mxu1 %v17582_v54 }
 0x421   :  { %15218 = vmatprep.subr.bf16.mxu1 %v22012_v46  ;;  %14387 = vmatmul.mubr.f32.gmra.mrb[42].mxu0 %v4053_v24  ;;  %v2908_v19 = vpop.permute.xlu1 %2907 }
 0x422   :  { %15272 = vmatpush3.bf16.msra.mxu0 %v15269_v42  ;;  %14397 = vmatprep.mubr.f32.mxu0 %v18073_v30 }
 0x423   :  { %15274 = vmatprep.subr.bf16.mxu0 %v18082_v36 }
 0x424   :  { %15220 = vmatpush3.bf16.msra.mxu1 %v22013_v27 }
 0x425   :  { %15222 = vmatprep.subr.bf16.mxu1 %v22014_v26  ;;  %14398 = vmatmul.mubr.f32.vlgmr.msra.gmra.mrb[40].mxu0 %v18080_v18  ;;  %v2903_v26 = vpop.permute.xlu0 %2902 }
 0x426   :  { %15276 = vmatpush3.bf16.msra.mxu0 %v18082_v36  ;;  %14400 = vmatprep.mubr.f32.mxu0 %v18091_v21 }
 0x427   :  { %15278 = vmatprep.subr.bf16.mxu0 %v18104_v39 }
 0x428   :  { %15224 = vmatpush3.bf16.msra.mxu1 %v22015_v59 }
 0x429   :  { %15226 = vmatprep.subr.bf16.mxu1 %v22016_v25  ;;  %14401 = vmatmul.mubr.f32.gmra.mrb[42].mxu0 %v18110_v0 }
 0x42a   :  { %15280 = vmatpush3.bf16.msra.mxu0 %v18104_v39  ;;  %14411 = vmatprep.mubr.f32.mxu0 %v18073_v30 }
 0x42c   :  { %15228 = vmatpush3.bf16.msra.mxu1 %v22017_v35 }
 0x42d   :  { %15230 = vmatprep.subr.bf16.mxu1 %v22018_v10  ;;  %14412 = vmatmul.mubr.f32.vlgmr.msra.gmra.mrb[40].mxu0 %v18080_v18 }
 0x42e   :  { %14414 = vmatprep.mubr.f32.mxu0 %v18091_v21 }
 0x430   :  { %15232 = vmatpush3.bf16.msra.mxu1 %v22019_v44 }
 0x431   :  { %14415 = vmatmul.mubr.f32.gmra.mrb[42].mxu0 %v18110_v0 }
 0x433   :  { %3926 = vmatmul.mubr.f32.vlgmr.msra.gmra.mrb[60].mxu1 %v21996_v41 }
 0x434   :  { %3931 = vmatprep.mubr.f32.mxu1 %v21998_v4 }
 0x437   :  { %3933 = vmatmul.mubr.f32.gmra.mrb[62].mxu1 %v22000_v1 }
 0x438   :  { %3938 = vmatprep.mubr.f32.mxu1 %v22002_v32 }
 0x43b   :  { %3940 = vmatmul.mubr.f32.gmra.mrb[64].mxu1 %v22004_v12 }
 0x43c   :  { %3945 = vmatprep.mubr.f32.mxu1 %v22006_v5 }
 0x43f   :  { %3947 = vmatmul.mubr.f32.gmra.mrb[66].mxu1 %v22008_v2 }
 0x4a3   :  { %v12625_v54 = vpop.f32.mrb[36].mxu1 }
 0x4a4   :  { %v12626_v53 = vpop.f32.mrb[37].mxu1 }
 0x4a5   :  { %v12627_v7 = vadd.f32 %v12626_v53, %v12625_v54 }
 0x4a6   :  { %v12713_v51 = vpop.f32.mrb[24].mxu0 }
 0x4a7   :  { %v12714_v23 = vpop.f32.mrb[25].mxu0  ;;  %v3031_v48 = vadd.f32 %v12627_v7, %v2893_v58 }
 0x4a8   :  { %v12628_v30 = vpop.f32.mrb[38].mxu1  ;;  %v12715_v31 = vadd.f32 %v12714_v23, %v12713_v51 }
 0x4a9   :  { %v12629_v18 = vpop.f32.mrb[39].mxu1 }
 0x4aa   :  { %v12630_v36 = vadd.f32 %v12629_v18, %v12628_v30  ;;  %v12716_v20 = vpop.f32.mrb[26].mxu0 }
 0x4ab   :  { %v12717_v21 = vpop.f32.mrb[27].mxu0 }
 0x4ac   :  { %v12718_v52 = vadd.f32 %v12717_v21, %v12716_v20  ;;  %v3046_v2 = vadd.f32 %v12630_v36, %v2898_v28 }
 0x4ad   :  { %v12631_v41 = vpop.f32.mrb[40].mxu1 }
 0x4ae   :  { %v12632_v4 = vpop.f32.mrb[41].mxu1  ;;  %v12719_v39 = vpop.f32.mrb[28].mxu0 }
 0x4af   :  { %v12633_v17 = vadd.f32 %v12632_v4, %v12631_v41  ;;  %v12720_v14 = vpop.f32.mrb[29].mxu0 }
 0x4b0   :  { %v12721_v0 = vadd.f32 %v12720_v14, %v12719_v39 }
 0x4b1   :  { %v12634_v13 = vpop.f32.mrb[42].mxu1  ;;  %v3061_v50 = vadd.f32 %v12633_v17, %v2903_v26 }
 0x4b2   :  { %v12635_v49 = vpop.f32.mrb[43].mxu1 }
 0x4b3   :  { %v12636_v63 = vadd.f32 %v12635_v49, %v12634_v13 }
 0x4b4   :  { %v12722_v56 = vpop.f32.mrb[30].mxu0 }
 0x4b5   :  { %v12723_v1 = vpop.f32.mrb[31].mxu0  ;;  %v3076_v16 = vadd.f32 %v12636_v63, %v2908_v19 }
 0x4b6   :  { %v12724_v43 = vadd.f32 %v12723_v1, %v12722_v56 }
 0x4c5   :  { %v12669_v32 = vpop.f32.mrb[44].mxu1 }
 0x4c6   :  { %v12670_v37 = vpop.f32.mrb[45].mxu1 }
 0x4c7   :  { %v12671_v55 = vadd.f32 %v12670_v37, %v12669_v32 }
 0x4c8   :  { %v12801_v45 = vpop.f32.mrb[32].mxu0 }
 0x4c9   :  { %v12802_v8 = vpop.f32.mrb[33].mxu0  ;;  %v3308_v12 = vadd.f32 %v12671_v55, %v3031_v48 }
 0x4ca   :  { %v12672_v61 = vpop.f32.mrb[46].mxu1  ;;  %v12803_v5 = vadd.f32 %v12802_v8, %v12801_v45 }
 0x4cb   :  { %v12673_v24 = vpop.f32.mrb[47].mxu1  ;;  %v3467_v62 = vadd.f32 %v12715_v31, %v3308_v12 }
 0x4cc   :  { %v12674_v6 = vadd.f32 %v12673_v24, %v12672_v61  ;;  %v12804_v46 = vpop.f32.mrb[34].mxu0 }
 0x4cd   :  { %v12805_v40 = vpop.f32.mrb[35].mxu0 }
 0x4ce   :  { %v3315_v38 = vadd.f32 %v12674_v6, %v3046_v2  ;;  %v12675_v9 = vpop.f32.mrb[48].mxu1  ;;  %v12806_v27 = vadd.f32 %v12805_v40, %v12804_v46 }
 0x4cf   :  { %v12676_v47 = vpop.f32.mrb[49].mxu1 }
 0x4d0   :  { %v12677_v59 = vadd.f32 %v12676_v47, %v12675_v9  ;;  %v12807_v25 = vpop.f32.mrb[36].mxu0  ;;  %v3476_v3 = vadd.f32 %v12718_v52, %v3315_v38  ;;  %v22029_v38 = vld [vmem:[#allocation6_spill] sm:$0xff] }
 0x4d1   :  { %v12808_v35 = vpop.f32.mrb[37].mxu0 }
 0x4d2   :  { %v3322_v10 = vadd.f32 %v12677_v59, %v3061_v50  ;;  %v12678_v29 = vpop.f32.mrb[50].mxu1  ;;  %v12809_v44 = vadd.f32 %v12808_v35, %v12807_v25 }
 0x4d3   :  { %v12679_v22 = vpop.f32.mrb[51].mxu1 }
 0x4d4   :  { %v12680_v15 = vadd.f32 %v12679_v22, %v12678_v29  ;;  %v12810_v11 = vpop.f32.mrb[38].mxu0  ;;  %v3485_v33 = vadd.f32 %v12721_v0, %v3322_v10 }
 0x4d5   :  { %v12811_v34 = vpop.f32.mrb[39].mxu0 }
 0x4d6   :  { %v3329_v42 = vadd.f32 %v12680_v15, %v3076_v16  ;;  %v12812_v60 = vadd.f32 %v12811_v34, %v12810_v11 }
 0x4d8   :  { %v3494_v54 = vadd.f32 %v12724_v43, %v3329_v42 }
 0x4e6   :  { %v12757_v53 = vpop.f32.mrb[52].mxu1 }
 0x4e7   :  { %v12758_v7 = vpop.f32.mrb[53].mxu1 }
 0x4e8   :  { %v12759_v51 = vadd.f32 %v12758_v7, %v12757_v53  ;;  %v22032_v7 = vld [vmem:[#allocation10_spill] sm:$0xff] }
 0x4ea   :  { %v3602_v23 = vadd.f32 %v12759_v51, %v3467_v62  ;;  %v12760_v30 = vpop.f32.mrb[54].mxu1 }
 0x4eb   :  { %v12761_v31 = vpop.f32.mrb[55].mxu1 }
 0x4ec   :  { %v12762_v18 = vadd.f32 %v12761_v31, %v12760_v30  ;;  %v3803_v36 = vadd.f32 %v12803_v5, %v3602_v23  ;;  %v22027_v5 = vld [vmem:[#allocation7_spill] sm:$0xff]  ;;  %v22034_v30 = vld [vmem:[#allocation9_spill] sm:$0xff] }
 0x4ee   :  { %v3613_v20 = vadd.f32 %v12762_v18, %v3476_v3  ;;  %v12763_v21 = vpop.f32.mrb[56].mxu1 }
 0x4ef   :  { %v12764_v41 = vpop.f32.mrb[57].mxu1 }
 0x4f0   :  { %v12765_v52 = vadd.f32 %v12764_v41, %v12763_v21  ;;  %v3810_v4 = vadd.f32 %v12806_v27, %v3613_v20 }
 0x4f2   :  { %v3624_v17 = vadd.f32 %v12765_v52, %v3485_v33  ;;  %v12766_v39 = vpop.f32.mrb[58].mxu1  ;;  %v12211_v52 = vld [vmem:[%s21388_s4 + $0x40] sm:$0xff] }
 0x4f3   :  { %v12767_v14 = vpop.f32.mrb[59].mxu1 }
 0x4f4   :  { %v12768_v13 = vadd.f32 %v12767_v14, %v12766_v39  ;;  %v3817_v0 = vadd.f32 %v12809_v44, %v3624_v17  ;;  %v12212_v39 = vld [vmem:[%s21388_s4 + $0x48] sm:$0xff]  ;;  %v12213_v14 = vld [vmem:[%s21388_s4 + $0x50] sm:$0xff] }
 0x4f6   :  { %v3635_v49 = vadd.f32 %v12768_v13, %v3494_v54  ;;  %v12214_v13 = vld [vmem:[%s21388_s4 + $0x58] sm:$0xff] }
 0x4f8   :  { %v3824_v63 = vadd.f32 %v12812_v60, %v3635_v49  ;;  %v22037_v49 = vld [vmem:[#allocation13_spill] sm:$0xff] }
 0x500   :  { %v14413_v56 = vpop.f32.mrb[40].mxu0 }
 0x501   :  { %v4544_v1 = vpop.f32.mrb[41].mxu0 }
 0x504   :  { %v14416_v43 = vpop.f32.mrb[42].mxu0 }
 0x505   :  { %v4556_v32 = vpop.f32.mrb[43].mxu0 }
 0x506   :  { %v12845_v58 = vpop.f32.mrb[60].mxu1 }
 0x507   :  { %v12846_v37 = vpop.f32.mrb[61].mxu1 }
 0x508   :  { %v12847_v48 = vadd.f32 %v12846_v37, %v12845_v58 }
 0x50a   :  { %v3928_v55 = vadd.f32 %v12847_v48, %v3803_v36  ;;  %v12848_v45 = vpop.f32.mrb[62].mxu1  ;;  %v4744_v36 = vld [vmem:[#allocation3 + $0xc8] sm:$0xff] }
 0x50b   :  { %v12849_v8 = vpop.f32.mrb[63].mxu1  ;;  %v18336_v20 = vand.u32 4294901760, %v4744_v36 }
 0x50c   :  { %v16254_v12 = vadd.f32 %v4544_v1, %v3928_v55  ;;  %v12850_v61 = vadd.f32 %v12849_v8, %v12848_v45 }
 0x50d   :  { %v18339_v21 = vsub.f32 %v4744_v36, %v18336_v20 }
 0x50e   :  { %v4566_v28 = vadd.f32 %v16254_v12, %v22027_v5  ;;  %v3935_v24 = vadd.f32 %v12850_v61, %v3810_v4  ;;  %v12851_v2 = vpop.f32.mrb[64].mxu1 }
 0x50f   :  { %v12852_v6 = vpop.f32.mrb[65].mxu1  ;;  %22036 = vst [vmem:[#allocation21_spill] sm:$0xff] %v18339_v21  ;;  %v21539_v41 = vand.u32 4294901760, %v18339_v21  ;;  %5368 = vmatprep.mubr.f32.mxu0 %v18339_v21 }
 0x510   :  { %v18256_v46 = vmax.f32 %v4566_v28, 0.0  ;;  %v16253_v62 = vadd.f32 %v14413_v56, %v3935_v24  ;;  %v12853_v40 = vadd.f32 %v12852_v6, %v12851_v2 }
 0x511   :  { %v4927_v4 = vsub.f32 %v18339_v21, %v21539_v41 }
 0x512   :  { %22028 = vst [vmem:[#allocation40_spill] sm:$0xff] %v18256_v46  ;;  %v4567_v9 = vadd.f32 %v16253_v62, %v22029_v38  ;;  %v3942_v27 = vadd.f32 %v12853_v40, %v3817_v0  ;;  %v12854_v26 = vpop.f32.mrb[66].mxu1  ;;  %4578 = vrot.lane.b32.xlu0 %v18256_v46, %s16452_s1  ;;  %v4877_v47 = vand.u32 4294901760, %v18256_v46  ;;  %v4743_v38 = vld [vmem:[#allocation3 + $0xc0] sm:$0xff] }
 0x513   :  { %v12855_v50 = vpop.f32.mrb[67].mxu1  ;;  %v4928_v17 = vand.u32 4294901760, %v4927_v4 }
 0x514   :  { %v18262_v59 = vmax.f32 %v4567_v9, 0.0  ;;  %v16256_v25 = vadd.f32 %v4556_v32, %v3942_v27  ;;  %v12856_v3 = vadd.f32 %v12855_v50, %v12854_v26  ;;  %v5099_v35 = vsub.f32 %v18256_v46, %v4877_v47  ;;  %v4747_v9 = vld [vmem:[#allocation3 + $0xe0] sm:$0xff]  ;;  %v4746_v27 = vld [vmem:[#allocation3 + $0xd8] sm:$0xff] }
 0x515   :  { %4929 = vmatprep.mubr.f32.mxu1 %v4928_v17  ;;  %v18390_v50 = vand.u32 4294901760, %v4743_v38 }
 0x516   :  { %22030 = vst [vmem:[#allocation41_spill] sm:$0xff] %v18262_v59  ;;  %v3949_v10 = vadd.f32 %v12856_v3, %v3824_v63  ;;  %4580 = vrot.lane.b32.xlu1 %v18262_v59, %s16452_s1  ;;  %4662 = vrot.lane.b32.xlu0 %v18256_v46, %s16453_s2  ;;  %v4880_v29 = vand.u32 4294901760, %v18262_v59  ;;  %v5100_v44 = vand.u32 4294901760, %v5099_v35  ;;  %v4568_v51 = vadd.f32 %v16256_v25, %v22032_v7 }
 0x517   :  { %22040 = vst [vmem:[#allocation8_spill] sm:$0xff] %v18390_v50  ;;  %v18392_v25 = vand.u32 4294901760, %v4747_v9  ;;  %v18394_v3 = vand.u32 4294901760, %v4746_v27 }
 0x518   :  { %v16255_v19 = vadd.f32 %v14416_v43, %v3949_v10  ;;  %v18270_v22 = vpack.c.bf16 %v4880_v29, %v4877_v47  ;;  %v5106_v16 = vsub.f32 %v18262_v59, %v4880_v29  ;;  %v5101_v11 = vsub.f32 %v5099_v35, %v5100_v44  ;;  %v4749_v29 = vld [vmem:[#allocation3 + $0xf0] sm:$0xff] }
 0x519   :  { %v18299_v23 = vmax.f32 %v4568_v51, 0.0  ;;  %22041 = vst [vmem:[#allocation43_spill] sm:$0xff] %v18392_v25  ;;  %22042 = vst [vmem:[#allocation16_spill] sm:$0xff] %v18394_v3 }
 0x51a   :  { %22031 = vst [vmem:[#allocation42_spill] sm:$0xff] %v18270_v22  ;;  %4664 = vrot.lane.b32.xlu1 %v18262_v59, %s16453_s2  ;;  %4598 = vrot.lane.b32.xlu0 %v18256_v46, %s16454_s6  ;;  %v15345_v15 = vpack.c.bf16 %v5106_v16, %v5099_v35  ;;  %v5107_v33 = vand.u32 4294901760, %v5106_v16  ;;  %v5102_v60 = vand.u32 4294901760, %v5101_v11  ;;  %v4569_v31 = vadd.f32 %v16255_v19, %v22034_v30  ;;  %v4750_v35 = vld [vmem:[#allocation3 + $0xf8] sm:$0xff] }
 0x51b   :  { %15282 = vmatprep.subr.bf16.mxu1 %v18270_v22  ;;  %22033 = vst [vmem:[#allocation44_spill] sm:$0xff] %v18299_v23  ;;  %v4883_v37 = vand.u32 4294901760, %v18299_v23  ;;  %v18403_v11 = vand.u32 4294901760, %v4750_v35 }
 0x51c   :  { %15346 = vmatprep.subr.bf16.mxu0 %v15345_v15  ;;  %v5108_v34 = vsub.f32 %v5106_v16, %v5107_v33  ;;  %v18278_v42 = vpack.c.bf16 %v5107_v33, %v5100_v44  ;;  %v18306_v18 = vmax.f32 %v4569_v31, 0.0  ;;  %v18401_v16 = vsub.f32 %v4743_v38, %v18390_v50 }
 0x51d   :  { %v5113_v24 = vsub.f32 %v18299_v23, %v4883_v37  ;;  %22043 = vst [vmem:[#allocation33_spill] sm:$0xff] %v18403_v11  ;;  %v18406_v33 = vsub.f32 %v4747_v9, %v18392_v25  ;;  %v18419_v36 = vsub.f32 %v4750_v35, %v18403_v11 }
 0x51e   :  { %4600 = vrot.lane.b32.xlu1 %v18262_v59, %s16454_s6  ;;  %4682 = vrot.lane.b32.xlu0 %v18256_v46, %s16455_s7  ;;  %v5109_v54 = vand.u32 4294901760, %v5108_v34  ;;  %22035 = vst [vmem:[#allocation45_spill] sm:$0xff] %v18306_v18  ;;  %v4886_v43 = vand.u32 4294901760, %v18306_v18  ;;  %v18409_v34 = vsub.f32 %v4746_v27, %v18394_v3  ;;  %v21537_v30 = vand.u32 4294901760, %v18401_v16 }
 0x51f   :  { %v5114_v15 = vand.u32 4294901760, %v5113_v24  ;;  %v21536_v4 = vand.u32 4294901760, %v18406_v33 }
 0x520   :  { %v18284_v53 = vpack.c.bf16 %v5109_v54, %v5102_v60  ;;  %v5120_v8 = vsub.f32 %v18306_v18, %v4886_v43  ;;  %v18377_v28 = vpack.c.bf16 %v4886_v43, %v4883_v37  ;;  %v18411_v60 = vand.u32 4294901760, %v4749_v29  ;;  %v4752_v37 = vld [vmem:[#allocation3 + $0x108] sm:$0xff] }
 0x521   :  { %v5115_v31 = vsub.f32 %v5113_v24, %v5114_v15  ;;  %v21538_v17 = vand.u32 4294901760, %v18409_v34  ;;  %v18455_v35 = vand.u32 4294901760, %v4752_v37 }
 0x522   :  { %4684 = vrot.lane.b32.xlu1 %v18262_v59, %s16455_s7  ;;  %4618 = vrot.lane.b32.xlu0 %v18256_v46, %s16456_s8  ;;  %22039 = vst [vmem:[#allocation30_spill] sm:$0xff] %v18377_v28  ;;  %v15349_v40 = vpack.c.bf16 %v5120_v8, %v5113_v24  ;;  %v5121_v10 = vand.u32 4294901760, %v5120_v8  ;;  %22044 = vst [vmem:[#allocation14_spill] sm:$0xff] %v18411_v60  ;;  %v21542_v24 = vand.u32 4294901760, %v18419_v36 }
 0x523   :  { %22048 = vst [vmem:[#allocation17_spill] sm:$0xff] %v18455_v35 }
 0x524   :  { %v5122_v54 = vsub.f32 %v5120_v8, %v5121_v10  ;;  %v5116_v8 = vand.u32 4294901760, %v5115_v31  ;;  %v18453_v27 = vpack.c.bf16 %v5121_v10, %v5114_v15  ;;  %v18467_v10 = vsub.f32 %v18419_v36, %v21542_v24 }
 0x526   :  { %4620 = vrot.lane.b32.xlu1 %v18262_v59, %s16456_s8  ;;  %4702 = vrot.lane.b32.xlu0 %v18256_v46, %s16457_s9 }
 0x52a   :  { %4704 = vrot.lane.b32.xlu1 %v18262_v59, %s16457_s9  ;;  %4638 = vrot.lane.b32.xlu0 %v18256_v46, %s16458_s10 }
 0x52e   :  { %4640 = vrot.lane.b32.xlu1 %v18262_v59, %s16458_s10  ;;  %4582 = vrot.lane.b32.xlu0 %v18299_v23, %s16452_s1 }
 0x532   :  { %4584 = vrot.lane.b32.xlu1 %v18306_v18, %s16452_s1  ;;  %4666 = vrot.lane.b32.xlu0 %v18299_v23, %s16453_s2 }
 0x536   :  { %4668 = vrot.lane.b32.xlu1 %v18306_v18, %s16453_s2  ;;  %4602 = vrot.lane.b32.xlu0 %v18299_v23, %s16454_s6 }
 0x53a   :  { %4604 = vrot.lane.b32.xlu1 %v18306_v18, %s16454_s6  ;;  %4686 = vrot.lane.b32.xlu0 %v18299_v23, %s16455_s7 }
 0x53e   :  { %4688 = vrot.lane.b32.xlu1 %v18306_v18, %s16455_s7  ;;  %4622 = vrot.lane.b32.xlu0 %v18299_v23, %s16456_s8 }
 0x542   :  { %4624 = vrot.lane.b32.xlu1 %v18306_v18, %s16456_s8  ;;  %4706 = vrot.lane.b32.xlu0 %v18299_v23, %s16457_s9 }
 0x546   :  { %4708 = vrot.lane.b32.xlu1 %v18306_v18, %s16457_s9  ;;  %4642 = vrot.lane.b32.xlu0 %v18299_v23, %s16458_s10 }
 0x54a   :  { %4644 = vrot.lane.b32.xlu1 %v18306_v18, %s16458_s10  ;;  %4722 = vrot.lane.b32.xlu0 %v18256_v46, %s16459_s11 }
 0x54e   :  { %4724 = vrot.lane.b32.xlu1 %v18262_v59, %s16459_s11  ;;  %4726 = vrot.lane.b32.xlu0 %v18299_v23, %s16459_s11  ;;  %v18480_v23 = vsub.f32 %v4752_v37, %v18455_v35 }
 0x552   :  { %4728 = vrot.lane.b32.xlu1 %v18306_v18, %s16459_s11  ;;  %4798 = vperm.xlu0 %16422, %v12211_v52   ;;  %v4753_v52 = vld [vmem:[#allocation3 + $0x110] sm:$0xff] }
 0x556   :  { %4803 = vperm.xlu1 %16423, %v12212_v39   ;;  %4808 = vperm.xlu0 %16422, %v12213_v14   ;;  %v18424_v39 = vsub.f32 %v4749_v29, %v18411_v60  ;;  %v5123_v14 = vand.u32 4294901760, %v5122_v54  ;;  %v22052_v60 = vld [vmem:[#allocation27_spill] sm:$0xff] }
 0x558   :  { %v18451_v9 = vpack.c.bf16 %v5123_v14, %v5116_v8 }
 0x55a   :  { %4813 = vperm.xlu1 %16423, %v12214_v13   ;;  %v22045_v13 = vld [vmem:[#allocation22_spill] sm:$0xff] }
 0x584   :  { %v4579_v0 = vpop.permute.xlu0 %4578 }
 0x585   :  { %v4590_v63 = vmul.f32 %v22037_v49, %v4579_v0 }
 0x587   :  { %v4829_v32 = vand.u32 4294901760, %v4590_v63 }
 0x588   :  { %v4581_v56 = vpop.permute.xlu1 %4580  ;;  %v4663_v1 = vpop.permute.xlu0 %4662 }
 0x589   :  { %v4591_v58 = vmul.f32 %v22037_v49, %v4581_v56  ;;  %v18371_v12 = vsub.f32 %v4590_v63, %v4829_v32  ;;  %v4674_v0 = vmul.f32 %v22045_v13, %v4663_v1  ;;  %v18442_v1 = vsub.f32 %v18406_v33, %v21536_v4  ;;  %v22049_v4 = vld [vmem:[#allocation26_spill] sm:$0xff] }
 0x58b   :  { %v4832_v48 = vand.u32 4294901760, %v4591_v58  ;;  %v4889_v29 = vand.u32 4294901760, %v4674_v0 }
 0x58c   :  { %v4665_v55 = vpop.permute.xlu1 %4664  ;;  %v18368_v45 = vpop.permute.xlu0 %4598 }
 0x58d   :  { %v18373_v61 = vpack.c.bf16 %v4832_v48, %v4829_v32  ;;  %v18375_v5 = vsub.f32 %v4591_v58, %v4832_v48  ;;  %v4675_v63 = vmul.f32 %v22045_v13, %v4665_v55  ;;  %v18433_v32 = vsub.f32 %v18401_v16, %v21537_v30 }
 0x58e   :  { %v18435_v58 = vand.u32 4294901760, %v4753_v52  ;;  %v18447_v55 = vsub.f32 %v18409_v34, %v21538_v17  ;;  %v18482_v24 = vsub.f32 %v4674_v0, %v4889_v29 }
 0x58f   :  { %22038 = vst [vmem:[#allocation46_spill] sm:$0xff] %v18373_v61  ;;  %15284 = vmatpush3.bf16.msra.mxu1 %v18373_v61  ;;  %v15347_v2 = vpack.c.bf16 %v18375_v5, %v18371_v12  ;;  %v4892_v54 = vand.u32 4294901760, %v4675_v63 }
 0x590   :  { %v4601_v6 = vpop.permute.xlu1 %4600  ;;  %v18383_v62 = vpop.permute.xlu0 %4682  ;;  %15286 = vmatprep.subr.bf16.mxu1 %v18377_v28  ;;  %22046 = vst [vmem:[#allocation19_spill] sm:$0xff] %v18435_v58  ;;  %v18459_v30 = vsub.f32 %v4753_v52, %v18435_v58 }
 0x591   :  { %15348 = vmatpush3.bf16.msra.mxu0 %v15347_v2  ;;  %v21544_v2 = vand.u32 4294901760, %v18424_v39  ;;  %v18497_v35 = vpack.c.bf16 %v4892_v54, %v4889_v29 }
 0x592   :  { %15350 = vmatprep.subr.bf16.mxu0 %v15349_v40  ;;  %v22047_v40 = vld [vmem:[#allocation25_spill] sm:$0xff] }
 0x593   :  { %v4611_v38 = vmul.f32 %v22047_v40, %v4601_v6  ;;  %v4610_v17 = vmul.f32 %v22047_v40, %v18368_v45  ;;  %v18475_v52 = vsub.f32 %v18424_v39, %v21544_v2  ;;  %22051 = vst [vmem:[#allocation15_spill] sm:$0xff] %v18497_v35 }
 0x594   :  { %v18386_v26 = vpop.permute.xlu1 %4684  ;;  %v18388_v47 = vpop.permute.xlu0 %4618 }
 0x595   :  { %v4844_v45 = vand.u32 4294901760, %v4611_v38  ;;  %v4695_v8 = vmul.f32 %v22049_v4, %v18386_v26  ;;  %v4841_v46 = vand.u32 4294901760, %v4610_v17 }
 0x597   :  { %v18499_v58 = vsub.f32 %v4611_v38, %v4844_v45  ;;  %v18511_v29 = vsub.f32 %v4610_v17, %v4841_v46 }
 0x598   :  { %v18396_v44 = vpop.permute.xlu1 %4620  ;;  %v18398_v19 = vpop.permute.xlu0 %4702 }
 0x599   :  { %v4631_v2 = vmul.f32 %v22052_v60, %v18396_v44  ;;  %v18513_v44 = vpack.c.bf16 %v4844_v45, %v4841_v46  ;;  %v15355_v46 = vpack.c.bf16 %v18499_v58, %v18511_v29 }
 0x59b   :  { %22053 = vst [vmem:[#allocation20_spill] sm:$0xff] %v18513_v44  ;;  %v4856_v28 = vand.u32 4294901760, %v4631_v2 }
 0x59c   :  { %v18413_v7 = vpop.permute.xlu1 %4704  ;;  %v18415_v51 = vpop.permute.xlu0 %4638 }
 0x59d   :  { %v18547_v25 = vsub.f32 %v4631_v2, %v4856_v28 }
 0x5a0   :  { %v18428_v56 = vpop.permute.xlu1 %4640  ;;  %v4583_v43 = vpop.permute.xlu0 %4582 }
 0x5a1   :  { %v4592_v48 = vmul.f32 %v22037_v49, %v4583_v43 }
 0x5a3   :  { %v4835_v41 = vand.u32 4294901760, %v4592_v48 }
 0x5a4   :  { %v4585_v31 = vpop.permute.xlu1 %4584  ;;  %v4667_v43 = vpop.permute.xlu0 %4666 }
 0x5a5   :  { %v4593_v6 = vmul.f32 %v22037_v49, %v4585_v31  ;;  %v4676_v15 = vmul.f32 %v22045_v13, %v4667_v43  ;;  %v4694_v31 = vmul.f32 %v22049_v4, %v18383_v62  ;;  %v18484_v43 = vsub.f32 %v4675_v63, %v4892_v54 }
 0x5a6   :  { %v18489_v49 = vsub.f32 %v4592_v48, %v4835_v41  ;;  %v4630_v48 = vmul.f32 %v22052_v60, %v18388_v47 }
 0x5a7   :  { %v4838_v18 = vand.u32 4294901760, %v4593_v6  ;;  %v4895_v37 = vand.u32 4294901760, %v4676_v15  ;;  %v4901_v26 = vand.u32 4294901760, %v4694_v31  ;;  %v15353_v38 = vpack.c.bf16 %v18484_v43, %v18482_v24 }
 0x5a8   :  { %v4669_v14 = vpop.permute.xlu1 %4668  ;;  %v4603_v59 = vpop.permute.xlu0 %4602 }
 0x5a9   :  { %v18491_v21 = vpack.c.bf16 %v4838_v18, %v4835_v41  ;;  %v18493_v62 = vsub.f32 %v4593_v6, %v4838_v18  ;;  %v4677_v0 = vmul.f32 %v22045_v13, %v4669_v14  ;;  %v4612_v63 = vmul.f32 %v22047_v40, %v4603_v59 }
 0x5aa   :  { %v4904_v18 = vand.u32 4294901760, %v4695_v8  ;;  %v18516_v11 = vsub.f32 %v4676_v15, %v4895_v37  ;;  %v4853_v15 = vand.u32 4294901760, %v4630_v48 }
 0x5ab   :  { %22050 = vst [vmem:[#allocation32_spill] sm:$0xff] %v18491_v21  ;;  %15288 = vmatpush3.bf16.msra.mxu1 %v18491_v21  ;;  %v15351_v41 = vpack.c.bf16 %v18493_v62, %v18489_v49  ;;  %v4898_v6 = vand.u32 4294901760, %v4677_v0  ;;  %v4847_v54 = vand.u32 4294901760, %v4612_v63 }
 0x5ac   :  { %v4605_v14 = vpop.permute.xlu1 %4604  ;;  %v4687_v59 = vpop.permute.xlu0 %4686  ;;  %15290 = vmatprep.subr.bf16.mxu1 %v18497_v35  ;;  %v18523_v35 = vsub.f32 %v4694_v31, %v4901_v26  ;;  %v18528_v45 = vsub.f32 %v4695_v8, %v4904_v18 }
 0x5ad   :  { %v4613_v13 = vmul.f32 %v22047_v40, %v4605_v14  ;;  %15352 = vmatpush3.bf16.msra.mxu0 %v15351_v41  ;;  %v18518_v21 = vsub.f32 %v4677_v0, %v4898_v6  ;;  %v4696_v47 = vmul.f32 %v22049_v4, %v4687_v59  ;;  %v18521_v3 = vpack.c.bf16 %v4898_v6, %v4895_v37  ;;  %v22055_v0 = vld [vmem:[#allocation28_spill] sm:$0xff] }
 0x5ae   :  { %15354 = vmatprep.subr.bf16.mxu0 %v15353_v38  ;;  %v4715_v41 = vmul.f32 %v22055_v0, %v18413_v7  ;;  %v18535_v37 = vsub.f32 %v4612_v63, %v4847_v54  ;;  %v4714_v40 = vmul.f32 %v22055_v0, %v18398_v19  ;;  %v22058_v63 = vld [vmem:[#allocation31_spill] sm:$0xff]  ;;  %v15361_v2 = vpack.c.bf16 %v18528_v45, %v18523_v35 }
 0x5af   :  { %22054 = vst [vmem:[#allocation18_spill] sm:$0xff] %v18521_v3  ;;  %v4850_v17 = vand.u32 4294901760, %v4613_v13  ;;  %15292 = vmatpush3.bf16.msra.mxu1 %v18513_v44  ;;  %v15357_v31 = vpack.c.bf16 %v18518_v21, %v18516_v11  ;;  %v4907_v7 = vand.u32 4294901760, %v4696_v47 }
 0x5b0   :  { %v4689_v14 = vpop.permute.xlu1 %4688  ;;  %v4623_v59 = vpop.permute.xlu0 %4622  ;;  %15294 = vmatprep.subr.bf16.mxu1 %v18521_v3  ;;  %v18545_v3 = vpack.c.bf16 %v4904_v18, %v4901_v26  ;;  %v4916_v19 = vand.u32 4294901760, %v4715_v41 }
 0x5b1   :  { %v18537_v6 = vpack.c.bf16 %v4850_v17, %v4847_v54  ;;  %v18539_v38 = vsub.f32 %v4613_v13, %v4850_v17  ;;  %v4697_v8 = vmul.f32 %v22049_v4, %v4689_v14  ;;  %15356 = vmatpush3.bf16.msra.mxu0 %v15355_v46  ;;  %v4632_v44 = vmul.f32 %v22052_v60, %v4623_v59 }
 0x5b2   :  { %15358 = vmatprep.subr.bf16.mxu0 %v15357_v31  ;;  %22057 = vst [vmem:[#allocation11_spill] sm:$0xff] %v18545_v3  ;;  %v4651_v54 = vmul.f32 %v22058_v63, %v18428_v56  ;;  %v18554_v17 = vsub.f32 %v4630_v48, %v4853_v15  ;;  %v4650_v46 = vmul.f32 %v22058_v63, %v18415_v51  ;;  %v4913_v48 = vand.u32 4294901760, %v4714_v40 }
 0x5b3   :  { %22056 = vst [vmem:[#allocation34_spill] sm:$0xff] %v18537_v6  ;;  %v4910_v61 = vand.u32 4294901760, %v4697_v8  ;;  %15296 = vmatpush3.bf16.msra.mxu1 %v18537_v6  ;;  %v15359_v13 = vpack.c.bf16 %v18539_v38, %v18535_v37  ;;  %v18561_v56 = vpack.c.bf16 %v4856_v28, %v4853_v15  ;;  %v4859_v59 = vand.u32 4294901760, %v4632_v44 }
 0x5b4   :  { %v4625_v14 = vpop.permute.xlu1 %4624  ;;  %v4707_v26 = vpop.permute.xlu0 %4706  ;;  %15298 = vmatprep.subr.bf16.mxu1 %v18545_v3  ;;  %v18566_v4 = vsub.f32 %v4696_v47, %v4907_v7  ;;  %v4868_v3 = vand.u32 4294901760, %v4651_v54  ;;  %v15363_v28 = vpack.c.bf16 %v18547_v25, %v18554_v17  ;;  %v4865_v47 = vand.u32 4294901760, %v4650_v46 }
 0x5b5   :  { %22059 = vst [vmem:[#allocation23_spill] sm:$0xff] %v18561_v56  ;;  %v18563_v18 = vsub.f32 %v4697_v8, %v4910_v61  ;;  %v4633_v31 = vmul.f32 %v22052_v60, %v4625_v14  ;;  %15360 = vmatpush3.bf16.msra.mxu0 %v15359_v13  ;;  %v4716_v51 = vmul.f32 %v22055_v0, %v4707_v26 }
 0x5b6   :  { %15362 = vmatprep.subr.bf16.mxu0 %v15361_v2  ;;  %v18569_v6 = vpack.c.bf16 %v4910_v61, %v4907_v7  ;;  %v18576_v13 = vsub.f32 %v4715_v41, %v4916_v19  ;;  %v18581_v7 = vsub.f32 %v4632_v44, %v4859_v59  ;;  %v18588_v8 = vsub.f32 %v4714_v40, %v4913_v48 }
 0x5b7   :  { %v4862_v50 = vand.u32 4294901760, %v4633_v31  ;;  %15300 = vmatpush3.bf16.msra.mxu1 %v18561_v56  ;;  %v15365_v61 = vpack.c.bf16 %v18563_v18, %v18566_v4  ;;  %v4919_v41 = vand.u32 4294901760, %v4716_v51  ;;  %v18591_v22 = vpack.c.bf16 %v4916_v19, %v4913_v48 }
 0x5b8   :  { %22060 = vst [vmem:[#allocation35_spill] sm:$0xff] %v18569_v6  ;;  %v4709_v14 = vpop.permute.xlu1 %4708  ;;  %v4643_v60 = vpop.permute.xlu0 %4642  ;;  %15302 = vmatprep.subr.bf16.mxu1 %v18569_v6  ;;  %v4988_v6 = vand.u32 4294901760, %v18371_v12  ;;  %v18594_v57 = vsub.f32 %v4651_v54, %v4868_v3  ;;  %v15369_v54 = vpack.c.bf16 %v18576_v13, %v18588_v8 }
 0x5b9   :  { %v18583_v26 = vpack.c.bf16 %v4862_v50, %v4859_v59  ;;  %v18585_v2 = vsub.f32 %v4633_v31, %v4862_v50  ;;  %v4717_v15 = vmul.f32 %v22055_v0, %v4709_v14  ;;  %15364 = vmatpush3.bf16.msra.mxu0 %v15363_v28  ;;  %v4652_v56 = vmul.f32 %v22058_v63, %v4643_v60 }
 0x5ba   :  { %15366 = vmatprep.subr.bf16.mxu0 %v15365_v61  ;;  %22062 = vst [vmem:[#allocation37_spill] sm:$0xff] %v18591_v22  ;;  %v22063_v59 = vand.u32 4294901760, %v18375_v5  ;;  %v18602_v31 = vsub.f32 %v4650_v46, %v4865_v47  ;;  %v18604_v60 = vpack.c.bf16 %v4868_v3, %v4865_v47  ;;  %v18614_v46 = vsub.f32 %v4716_v51, %v4919_v41 }
 0x5bb   :  { %22061 = vst [vmem:[#allocation24_spill] sm:$0xff] %v18583_v26  ;;  %v4922_v44 = vand.u32 4294901760, %v4717_v15  ;;  %15304 = vmatpush3.bf16.msra.mxu1 %v18583_v26  ;;  %v15367_v50 = vpack.c.bf16 %v18585_v2, %v18581_v7  ;;  %v4871_v14 = vand.u32 4294901760, %v4652_v56  ;;  %v22066_v47 = vand.u32 4294901760, %v18459_v30 }
 0x5bc   :  { %v4996_v40 = vsub.f32 %v18375_v5, %v22063_v59  ;;  %22064 = vst [vmem:[#allocation12_spill] sm:$0xff] %v18604_v60  ;;  %v4645_v19 = vpop.permute.xlu1 %4644  ;;  %15306 = vmatprep.subr.bf16.mxu1 %v18591_v22  ;;  %v4989_v48 = vsub.f32 %v18371_v12, %v4988_v6  ;;  %v22067_v12 = vand.u32 4294901760, %v18493_v62  ;;  %v22076_v26 = vand.u32 4294901760, %v18518_v21 }
 0x5bd   :  { %v18610_v28 = vsub.f32 %v4717_v15, %v4922_v44  ;;  %v4653_v61 = vmul.f32 %v22058_v63, %v4645_v19  ;;  %15368 = vmatpush3.bf16.msra.mxu0 %v15367_v50  ;;  %v18616_v3 = vpack.c.bf16 %v4922_v44, %v4919_v41  ;;  %v18621_v0 = vsub.f32 %v18459_v30, %v22066_v47 }
 0x5be   :  { %15370 = vmatprep.subr.bf16.mxu0 %v15369_v54  ;;  %v15371_v50 = vpack.c.bf16 %v18594_v57, %v18602_v31  ;;  %v4997_v51 = vand.u32 4294901760, %v4996_v40  ;;  %v5010_v54 = vsub.f32 %v18493_v62, %v22067_v12  ;;  %v18636_v47 = vsub.f32 %v4652_v56, %v4871_v14 }
 0x5bf   :  { %22065 = vst [vmem:[#allocation36_spill] sm:$0xff] %v18616_v3  ;;  %v4874_v22 = vand.u32 4294901760, %v4653_v61  ;;  %15308 = vmatpush3.bf16.msra.mxu1 %v18604_v60  ;;  %v15373_v44 = vpack.c.bf16 %v18610_v28, %v18614_v46  ;;  %v22069_v41 = vand.u32 4294901760, %v18484_v43  ;;  %v4958_v63 = vand.u32 4294901760, %v18467_v10 }
 0x5c0   :  { %15310 = vmatprep.subr.bf16.mxu1 %v18616_v3  ;;  %v4990_v60 = vand.u32 4294901760, %v4989_v48  ;;  %v22071_v10 = vand.u32 4294901760, %v18482_v24  ;;  %v5011_v56 = vand.u32 4294901760, %v5010_v54  ;;  %v5163_v40 = vand.u32 4294901760, %v18528_v45 }
 0x5c1   :  { %v18638_v15 = vpack.c.bf16 %v4874_v22, %v4871_v14  ;;  %v18640_v59 = vsub.f32 %v4653_v61, %v4874_v22  ;;  %15372 = vmatpush3.bf16.msra.mxu0 %v15371_v50  ;;  %v5136_v19 = vsub.f32 %v18484_v43, %v22069_v41  ;;  %v22070_v14 = vand.u32 4294901760, %v18489_v49 }
 0x5c2   :  { %15374 = vmatprep.subr.bf16.mxu0 %v15373_v44  ;;  %v5129_v41 = vsub.f32 %v18482_v24, %v22071_v10  ;;  %v22072_v44 = vand.u32 4294901760, %v18480_v23  ;;  %v5037_v50 = vand.u32 4294901760, %v18539_v38  ;;  %v22074_v10 = vand.u32 4294901760, %v18433_v32 }
 0x5c3   :  { %22068 = vst [vmem:[#allocation38_spill] sm:$0xff] %v18638_v15  ;;  %v5003_v22 = vsub.f32 %v18489_v49, %v22070_v14  ;;  %15312 = vmatpush3.bf16.msra.mxu1 %v18638_v15  ;;  %v15375_v61 = vpack.c.bf16 %v18640_v59, %v18636_v47  ;;  %v22073_v14 = vand.u32 4294901760, %v18499_v58  ;;  %v22075_v48 = vand.u32 4294901760, %v18375_v5 }
 0x5c4   :  { %15314 = vmatprep.subr.bf16.mxu1 %v18284_v53  ;;  %v18664_v12 = vsub.f32 %v18480_v23, %v22072_v44  ;;  %v15315_v53 = vpack.c.bf16 %v4997_v51, %v4990_v60  ;;  %v5137_v15 = vand.u32 4294901760, %v5136_v19  ;;  %v22077_v54 = vand.u32 4294901760, %v18511_v29 }
 0x5c5   :  { %v5024_v3 = vsub.f32 %v18499_v58, %v22073_v14  ;;  %15376 = vmatpush3.bf16.msra.mxu0 %v15375_v61  ;;  %v15411_v44 = vpack.c.bf16 %v22075_v48, %v4988_v6  ;;  %v5150_v14 = vsub.f32 %v18518_v21, %v22076_v26  ;;  %v5156_v60 = vand.u32 4294901760, %v18523_v35 }
 0x5c6   :  { %4935 = vmatmul.mubr.f32.vlgmr.msra.gmra.mrb[68].mxu1 %v22074_v10  ;;  %15410 = vmatprep.subr.bf16.mxu0 %v18278_v42  ;;  %v5017_v61 = vsub.f32 %v18511_v29, %v22077_v54  ;;  %v5004_v51 = vand.u32 4294901760, %v5003_v22  ;;  %v5030_v32 = vand.u32 4294901760, %v18535_v37  ;;  %v22078_v42 = vand.u32 4294901760, %v18442_v1 }
 0x5c7   :  { %15316 = vmatpush3.bf16.msra.mxu1 %v15315_v53  ;;  %v5044_v5 = vand.u32 4294901760, %v18554_v17  ;;  %v5130_v6 = vand.u32 4294901760, %v5129_v41  ;;  %v22079_v26 = vand.u32 4294901760, %v18516_v11  ;;  %v4979_v48 = vand.u32 4294901760, %v18664_v12 }
 0x5c8   :  { %4944 = vmatprep.mubr.f32.mxu1 %v22078_v42  ;;  %15318 = vmatprep.subr.bf16.mxu1 %v18451_v9  ;;  %v5025_v22 = vand.u32 4294901760, %v5024_v3  ;;  %v5051_v10 = vand.u32 4294901760, %v18547_v25  ;;  %v5038_v1 = vsub.f32 %v18539_v38, %v5037_v50  ;;  %v15319_v53 = vpack.c.bf16 %v5011_v56, %v5004_v51 }
 0x5c9   :  { %5371 = vmatmul.mubr.f32.vlgmr.msra.gmra.mrb[44].mxu0 %v18401_v16  ;;  %v5143_v19 = vsub.f32 %v18516_v11, %v22079_v26  ;;  %v5177_v9 = vand.u32 4294901760, %v18563_v18  ;;  %v22080_v41 = vand.u32 4294901760, %v18447_v55  ;;  %v15321_v54 = vpack.c.bf16 %v5137_v15, %v5130_v6 }
 0x5ca   :  { %15412 = vmatpush3.bf16.msra.mxu0 %v15411_v44  ;;  %5377 = vmatprep.mubr.f32.mxu0 %v18406_v33  ;;  %v5151_v12 = vand.u32 4294901760, %v5150_v14  ;;  %v5164_v3 = vsub.f32 %v18528_v45, %v5163_v40  ;;  %v5018_v42 = vand.u32 4294901760, %v5017_v61  ;;  %v5031_v56 = vsub.f32 %v18535_v37, %v5030_v32 }
 0x5cb   :  { %4950 = vmatmul.mubr.f32.gmra.mrb[70].mxu1 %v22080_v41  ;;  %15414 = vmatprep.subr.bf16.mxu0 %v18453_v27  ;;  %v22081_v44 = vand.u32 4294901760, %v18489_v49  ;;  %v22082_v55 = vand.u32 4294901760, %v18493_v62  ;;  %v5157_v27 = vsub.f32 %v18523_v35, %v5156_v60  ;;  %v5045_v15 = vsub.f32 %v18554_v17, %v5044_v5 }
 0x5cc   :  { %15320 = vmatpush3.bf16.msra.mxu1 %v15319_v53  ;;  %4959 = vmatprep.mubr.f32.mxu1 %v4958_v63  ;;  %v5170_v14 = vand.u32 4294901760, %v18566_v4  ;;  %v22083_v61 = vand.u32 4294901760, %v18482_v24  ;;  %v22084_v63 = vand.u32 4294901760, %v18484_v43  ;;  %v5144_v49 = vand.u32 4294901760, %v5143_v19 }
 0x5cd   :  { %v15415_v51 = vpack.c.bf16 %v22082_v55, %v22081_v44  ;;  %15322 = vmatprep.subr.bf16.mxu1 %v15321_v54  ;;  %5380 = vmatmul.mubr.f32.gmra.mrb[46].mxu0 %v18409_v34  ;;  %v5052_v62 = vsub.f32 %v18547_v25, %v5051_v10  ;;  %v5039_v26 = vand.u32 4294901760, %v5038_v1  ;;  %v5065_v53 = vand.u32 4294901760, %v18585_v2 }
 0x5ce   :  { %v15417_v6 = vpack.c.bf16 %v22084_v63, %v22083_v61  ;;  %v15323_v41 = vpack.c.bf16 %v5025_v22, %v5018_v42  ;;  %5386 = vmatprep.mubr.f32.mxu0 %v18419_v36  ;;  %v5191_v54 = vand.u32 4294901760, %v18576_v13  ;;  %v22085_v24 = vand.u32 4294901760, %v18475_v52 }
 0x5cf   :  { %15416 = vmatpush3.bf16.msra.mxu0 %v15415_v51  ;;  %v15325_v43 = vpack.c.bf16 %v5151_v12, %v5144_v49  ;;  %v5165_v19 = vand.u32 4294901760, %v5164_v3  ;;  %v5178_v44 = vsub.f32 %v18563_v18, %v5177_v9  ;;  %v5032_v55 = vand.u32 4294901760, %v5031_v56 }
 0x5d0   :  { %4965 = vmatmul.mubr.f32.gmra.mrb[72].mxu1 %v22085_v24  ;;  %15418 = vmatprep.subr.bf16.mxu0 %v15417_v6  ;;  %v5058_v1 = vand.u32 4294901760, %v18581_v7  ;;  %v22086_v22 = vand.u32 4294901760, %v18621_v0  ;;  %v22087_v42 = vand.u32 4294901760, %v18511_v29  ;;  %v22088_v51 = vand.u32 4294901760, %v18499_v58 }
 0x5d1   :  { %15324 = vmatpush3.bf16.msra.mxu1 %v15323_v41  ;;  %v5158_v61 = vand.u32 4294901760, %v5157_v27  ;;  %v5046_v63 = vand.u32 4294901760, %v5045_v15  ;;  %v5184_v12 = vand.u32 4294901760, %v18588_v8  ;;  %v22089_v3 = vand.u32 4294901760, %v18516_v11  ;;  %5389 = vmatmul.mubr.f32.gmra.mrb[48].mxu0 %v18424_v39  ;;  %v4725_v15 = vpop.permute.xlu1 %4724 }
 0x5d2   :  { %4974 = vmatprep.mubr.f32.mxu1 %v22086_v22  ;;  %v15419_v52 = vpack.c.bf16 %v22088_v51, %v22087_v42  ;;  %15326 = vmatprep.subr.bf16.mxu1 %v15325_v43  ;;  %v22090_v56 = vand.u32 4294901760, %v18518_v21  ;;  %v5171_v0 = vsub.f32 %v18566_v4, %v5170_v14  ;;  %v5053_v29 = vand.u32 4294901760, %v5052_v62  ;;  %v4723_v22 = vpop.permute.xlu0 %4722 }
 0x5d3   :  { %v5079_v58 = vand.u32 4294901760, %v18594_v57  ;;  %v5066_v27 = vsub.f32 %v18585_v2, %v5065_v53  ;;  %v15327_v49 = vpack.c.bf16 %v5039_v26, %v5032_v55  ;;  %5395 = vmatprep.mubr.f32.mxu0 %v18459_v30  ;;  %v5205_v21 = vand.u32 4294901760, %v18610_v28 }
 0x5d4   :  { %v15421_v6 = vpack.c.bf16 %v22090_v56, %v22089_v3  ;;  %15420 = vmatpush3.bf16.msra.mxu0 %v15419_v52  ;;  %4980 = vmatmul.mubr.f32.gmra.mrb[74].mxu1 %v4979_v48  ;;  %v15329_v11 = vpack.c.bf16 %v5165_v19, %v5158_v61  ;;  %v5179_v41 = vand.u32 4294901760, %v5178_v44  ;;  %v5192_v62 = vsub.f32 %v18576_v13, %v5191_v54  ;;  %v22091_v44 = vld [vmem:[#allocation29_spill] sm:$0xff]  ;;  %v4751_v13 = vld [vmem:[#allocation3 + $0x100] sm:$0xff] }
 0x5d5   :  { %v5072_v24 = vand.u32 4294901760, %v18602_v31  ;;  %v5059_v43 = vsub.f32 %v18581_v7, %v5058_v1  ;;  %15328 = vmatpush3.bf16.msra.mxu1 %v15327_v49  ;;  %v15423_v48 = vpack.c.bf16 %v5037_v50, %v5030_v32  ;;  %v15425_v26 = vpack.c.bf16 %v5163_v40, %v5156_v60  ;;  %5210 = vmatprep.mubr.f32.mxu1 %v18336_v20 }
 0x5d6   :  { %15422 = vmatprep.subr.bf16.mxu0 %v15421_v6  ;;  %v5198_v19 = vand.u32 4294901760, %v18614_v46  ;;  %v18775_v55 = vmul.f32 %v22091_v44, %v4725_v15  ;;  %15330 = vmatprep.subr.bf16.mxu1 %v15329_v11  ;;  %v5172_v42 = vand.u32 4294901760, %v5171_v0  ;;  %v5185_v37 = vsub.f32 %v18588_v8, %v5184_v12 }
 0x5d7   :  { %5398 = vmatmul.mubr.f32.gmra.mrb[50].mxu0 %v18480_v23  ;;  %v5080_v35 = vsub.f32 %v18594_v57, %v5079_v58  ;;  %v5067_v45 = vand.u32 4294901760, %v5066_v27  ;;  %v5093_v38 = vand.u32 4294901760, %v18640_v59  ;;  %v15331_v40 = vpack.c.bf16 %v5053_v29, %v5046_v63 }
 0x5d8   :  { %15424 = vmatpush3.bf16.msra.mxu0 %v15423_v48  ;;  %5705 = vmatprep.mubr.f32.mxu0 %v18336_v20  ;;  %v18787_v50 = vmul.f32 %v22091_v44, %v4723_v22  ;;  %v15333_v60 = vpack.c.bf16 %v5179_v41, %v5172_v42  ;;  %v5193_v32 = vand.u32 4294901760, %v5192_v62  ;;  %v5206_v51 = vsub.f32 %v18610_v28, %v5205_v21  ;;  %v4729_v62 = vpop.permute.xlu1 %4728  ;;  %v4727_v22 = vpop.permute.xlu0 %4726 }
 0x5d9   :  { %15426 = vmatprep.subr.bf16.mxu0 %v15425_v26  ;;  %v5073_v52 = vsub.f32 %v18602_v31, %v5072_v24  ;;  %v5060_v61 = vand.u32 4294901760, %v5059_v43  ;;  %v5086_v3 = vand.u32 4294901760, %v18636_v47  ;;  %15332 = vmatpush3.bf16.msra.mxu1 %v15331_v40  ;;  %v15427_v63 = vpack.c.bf16 %v5051_v10, %v5044_v5  ;;  %v4748_v43 = vld [vmem:[#allocation3 + $0xe8] sm:$0xff] }
 0x5da   :  { %v5862_v56 = vand.u32 4294901760, %v18775_v55  ;;  %15334 = vmatprep.subr.bf16.mxu1 %v15333_v60  ;;  %v15429_v6 = vpack.c.bf16 %v5177_v9, %v5170_v14  ;;  %v5186_v0 = vand.u32 4294901760, %v5185_v37  ;;  %v5199_v29 = vsub.f32 %v18614_v46, %v5198_v19  ;;  %v4745_v46 = vld [vmem:[#allocation3 + $0xd0] sm:$0xff] }
 0x5db   :  { %v5081_v27 = vand.u32 4294901760, %v5080_v35  ;;  %v5094_v15 = vsub.f32 %v18640_v59, %v5093_v38  ;;  %v15335_v17 = vpack.c.bf16 %v5067_v45, %v5060_v61  ;;  %v5859_v25 = vand.u32 4294901760, %v18787_v50  ;;  %v22092_v35 = vld [vmem:[#allocation42_spill] sm:$0xff]  ;;  %v22093_v60 = vld [vmem:[#allocation8_spill] sm:$0xff] }
 0x5dc   :  { %15428 = vmatpush3.bf16.msra.mxu0 %v15427_v63  ;;  %v15337_v5 = vpack.c.bf16 %v5193_v32, %v5186_v0  ;;  %v5207_v10 = vand.u32 4294901760, %v5206_v51  ;;  %v5074_v49 = vand.u32 4294901760, %v5073_v52  ;;  %v5087_v4 = vsub.f32 %v18636_v47, %v5086_v3  ;;  %v22094_v51 = vld [vmem:[#allocation46_spill] sm:$0xff]  ;;  %v22095_v52 = vld [vmem:[#allocation43_spill] sm:$0xff] }
 0x5dd   :  { %15430 = vmatprep.subr.bf16.mxu0 %v15429_v6  ;;  %15336 = vmatpush3.bf16.msra.mxu1 %v15335_v17  ;;  %v15431_v18 = vpack.c.bf16 %v5065_v53, %v5058_v1  ;;  %v18816_v9 = vsub.f32 %v18775_v55, %v5862_v56  ;;  %v15433_v14 = vpack.c.bf16 %v5191_v54, %v5184_v12  ;;  %v5200_v11 = vand.u32 4294901760, %v5199_v29  ;;  %v22097_v17 = vld [vmem:[#allocation16_spill] sm:$0xff] }
 0x5de   :  { %15338 = vmatprep.subr.bf16.mxu1 %v15337_v5  ;;  %v5095_v41 = vand.u32 4294901760, %v5094_v15  ;;  %v15339_v47 = vpack.c.bf16 %v5081_v27, %v5074_v49  ;;  %v18823_v7 = vsub.f32 %v18787_v50, %v5859_v25  ;;  %v4817_v53 = vsel %vm1007_vm2, %v4745_v46, 0  ;;  %v22098_v5 = vld [vmem:[#allocation32_spill] sm:$0xff] }
 0x5df   :  { %v15341_v2 = vpack.c.bf16 %v5207_v10, %v5200_v11  ;;  %v5088_v1 = vand.u32 4294901760, %v5087_v4  ;;  %v15435_v8 = vpack.c.bf16 %v5079_v58, %v5072_v24  ;;  %v5977_v54 = vand.u32 4294901760, %v18816_v9  ;;  %v4754_v24 = vld [vmem:[#allocation3 + $0x118] sm:$0xff]  ;;  %v22100_v4 = vld [vmem:[#allocation15_spill] sm:$0xff] }
 0x5e0   :  { %15432 = vmatpush3.bf16.msra.mxu0 %v15431_v18  ;;  %v4737_v12 = vmul.f32 %v22091_v44, %v4729_v62  ;;  %v15437_v48 = vpack.c.bf16 %v5205_v21, %v5198_v19  ;;  %v4820_v26 = vsel %vm1007_vm2, %v4748_v43, 0  ;;  %v18835_v42 = vand.u32 4294901760, %v4817_v53  ;;  %v22099_v10 = vld [vmem:[#allocation33_spill] sm:$0xff]  ;;  %v22102_v43 = vld [vmem:[#allocation20_spill] sm:$0xff] }
 0x5e1   :  { %15434 = vmatprep.subr.bf16.mxu0 %v15433_v14  ;;  %15340 = vmatpush3.bf16.msra.mxu1 %v15339_v47  ;;  %v15343_v55 = vpack.c.bf16 %v5095_v41, %v5088_v1  ;;  %v5970_v31 = vand.u32 4294901760, %v18823_v7  ;;  %v4736_v57 = vmul.f32 %v22091_v44, %v4727_v22  ;;  %v4823_v58 = vsel %vm1007_vm2, %v4751_v13, 0  ;;  %v22101_v47 = vld [vmem:[#allocation14_spill] sm:$0xff] }
 0x5e2   :  { %15342 = vmatprep.subr.bf16.mxu1 %v15341_v2  ;;  %v15439_v37 = vpack.c.bf16 %v5093_v38, %v5086_v3  ;;  %v18842_v28 = vand.u32 4294901760, %v4820_v26  ;;  %v18844_v21 = vpack.c.bf16 %v5862_v56, %v5859_v25  ;;  %v5868_v19 = vand.u32 4294901760, %v4737_v12  ;;  %v22096_v56 = vld [vmem:[#allocation30_spill] sm:$0xff]  ;;  %v22103_v2 = vld [vmem:[#allocation19_spill] sm:$0xff] }
 0x5e3   :  { %v5978_v45 = vsub.f32 %v18816_v9, %v5977_v54  ;;  %v18851_v40 = vsub.f32 %v4817_v53, %v18835_v42  ;;  %v18853_v50 = vand.u32 4294901760, %v4823_v58  ;;  %v4826_v59 = vsel %vm1007_vm2, %v4754_v24, 0  ;;  %v22104_v53 = vld [vmem:[#allocation18_spill] sm:$0xff]  ;;  %v22109_v24 = vld [vmem:[#allocation11_spill] sm:$0xff] }
 0x5e4   :  { %15436 = vmatpush3.bf16.msra.mxu0 %v15435_v8  ;;  %v5865_v38 = vand.u32 4294901760, %v4736_v57  ;;  %v5971_v32 = vsub.f32 %v18823_v7, %v5970_v31  ;;  %v18864_v61 = vsub.f32 %v4820_v26, %v18842_v28  ;;  %v18868_v63 = vsub.f32 %v4737_v12, %v5868_v19 }
 0x5e5   :  { %15438 = vmatprep.subr.bf16.mxu0 %v15437_v48  ;;  %15344 = vmatpush3.bf16.msra.mxu1 %v15343_v55  ;;  %v5979_v6 = vand.u32 4294901760, %v5978_v45  ;;  %v18872_v0 = vand.u32 4294901760, %v4826_v59  ;;  %v5929_v29 = vand.u32 4294901760, %v18851_v40  ;;  %v18878_v27 = vsub.f32 %v4823_v58, %v18853_v50  ;;  %v22105_v48 = vld [vmem:[#allocation17_spill] sm:$0xff]  ;;  %v22106_v55 = vld [vmem:[#allocation34_spill] sm:$0xff] }
 0x5e6   :  { %15378 = vmatprep.subr.bf16.mxu1 %v22092_v35  ;;  %v18866_v3 = vpack.c.bf16 %v5868_v19, %v5865_v38  ;;  %v18880_v15 = vsub.f32 %v4736_v57, %v5865_v38  ;;  %v5972_v25 = vand.u32 4294901760, %v5971_v32  ;;  %v5991_v49 = vand.u32 4294901760, %v18868_v63  ;;  %v22107_v57 = vld [vmem:[#allocation21_spill] sm:$0xff]  ;;  %v22110_v32 = vld [vmem:[#allocation23_spill] sm:$0xff] }
 0x5e7   :  { %v5939_v46 = vand.u32 4294901760, %v18864_v61  ;;  %v18891_v14 = vsub.f32 %v4826_v59, %v18872_v0  ;;  %v5930_v11 = vsub.f32 %v18851_v40, %v5929_v29  ;;  %v5949_v41 = vand.u32 4294901760, %v18878_v27 }
 0x5e8   :  { %15440 = vmatpush3.bf16.msra.mxu0 %v15439_v37  ;;  %5212 = vmatmul.mubr.f32.vlgmr.msra.gmra.mrb[76].mxu1 %v22093_v60  ;;  %v15481_v18 = vpack.c.bf16 %v5979_v6, %v5972_v25  ;;  %v5984_v62 = vand.u32 4294901760, %v18880_v15  ;;  %v5992_v22 = vsub.f32 %v18868_v63, %v5991_v49  ;;  %v22108_v58 = vand.u32 4294901760, %v22107_v57  ;;  %v22111_v6 = vld [vmem:[#allocation35_spill] sm:$0xff]  ;;  %v22112_v57 = vld [vmem:[#allocation24_spill] sm:$0xff] }
 0x5e9   :  { %15474 = vmatprep.subr.bf16.mxu0 %v18844_v21  ;;  %15380 = vmatpush3.bf16.msra.mxu1 %v22094_v51  ;;  %v5940_v1 = vsub.f32 %v18864_v61, %v5939_v46  ;;  %v5959_v8 = vand.u32 4294901760, %v18891_v14  ;;  %v5931_v13 = vand.u32 4294901760, %v5930_v11  ;;  %v5950_v12 = vsub.f32 %v18878_v27, %v5949_v41 }
 0x5ea   :  { %5217 = vmatprep.mubr.f32.mxu1 %v22095_v52  ;;  %15382 = vmatprep.subr.bf16.mxu1 %v22096_v56  ;;  %v5985_v26 = vsub.f32 %v18880_v15, %v5984_v62  ;;  %v5993_v19 = vand.u32 4294901760, %v5992_v22  ;;  %v15489_v22 = vpack.c.bf16 %v18816_v9, %v18823_v7  ;;  %v15509_v9 = vpack.c.bf16 %v5991_v49, %v5984_v62  ;;  %v4799_v49 = vpop.permute.xlu0 %4798 }
 0x5eb   :  { %5707 = vmatmul.mubr.f32.vlgmr.msra.gmra.mrb[52].mxu0 %v22093_v60  ;;  %v5941_v37 = vand.u32 4294901760, %v5940_v1  ;;  %v5960_v45 = vsub.f32 %v18891_v14, %v5959_v8  ;;  %v5951_v59 = vand.u32 4294901760, %v5950_v12  ;;  %v22113_v1 = vld [vmem:[#allocation37_spill] sm:$0xff]  ;;  %v22115_v12 = vld [vmem:[#allocation36_spill] sm:$0xff] }
 0x5ec   :  { %15476 = vmatpush3.bf16.msra.mxu0 %v18844_v21  ;;  %5712 = vmatprep.mubr.f32.mxu0 %v22095_v52  ;;  %v5986_v38 = vand.u32 4294901760, %v5985_v26  ;;  %v22116_v26 = vld [vmem:[#allocation38_spill] sm:$0xff] }
 0x5ed   :  { %5219 = vmatmul.mubr.f32.gmra.mrb[78].mxu1 %v22097_v17  ;;  %15478 = vmatprep.subr.bf16.mxu0 %v18866_v3  ;;  %v5961_v11 = vand.u32 4294901760, %v5960_v45 }
 0x5ee   :  { %15384 = vmatpush3.bf16.msra.mxu1 %v22098_v5  ;;  %5224 = vmatprep.mubr.f32.mxu1 %v22099_v10  ;;  %v15485_v25 = vpack.c.bf16 %v5993_v19, %v5986_v38 }
 0x5ef   :  { %15386 = vmatprep.subr.bf16.mxu1 %v22100_v4  ;;  %5714 = vmatmul.mubr.f32.gmra.mrb[54].mxu0 %v22097_v17 }
 0x5f0   :  { %15480 = vmatpush3.bf16.msra.mxu0 %v18866_v3  ;;  %5719 = vmatprep.mubr.f32.mxu0 %v22099_v10 }
 0x5f1   :  { %5226 = vmatmul.mubr.f32.gmra.mrb[80].mxu1 %v22101_v47  ;;  %15482 = vmatprep.subr.bf16.mxu0 %v15481_v18 }
 0x5f2   :  { %15388 = vmatpush3.bf16.msra.mxu1 %v22102_v43  ;;  %5231 = vmatprep.mubr.f32.mxu1 %v22103_v2 }
 0x5f3   :  { %15390 = vmatprep.subr.bf16.mxu1 %v22104_v53  ;;  %5721 = vmatmul.mubr.f32.gmra.mrb[56].mxu0 %v22101_v47 }
 0x5f4   :  { %5726 = vmatprep.mubr.f32.mxu0 %v22103_v2 }
 0x5f5   :  { %5233 = vmatmul.mubr.f32.gmra.mrb[82].mxu1 %v22105_v48 }
 0x5f6   :  { %15392 = vmatpush3.bf16.msra.mxu1 %v22106_v55  ;;  %5502 = vmatprep.mubr.f32.mxu1 %v22108_v58  ;;  %v22117_v58 = vand.u32 4294901760, %v18401_v16  ;;  %v22120_v16 = vand.u32 4294901760, %v18419_v36  ;;  %v22122_v36 = vand.u32 4294901760, %v18459_v30 }
 0x5f7   :  { %15394 = vmatprep.subr.bf16.mxu1 %v22109_v24  ;;  %5728 = vmatmul.mubr.f32.gmra.mrb[58].mxu0 %v22105_v48 }
 0x5f8   :  { %14425 = vmatprep.mubr.f32.mxu0 %v5931_v13  ;;  %v22114_v13 = vld [vmem:[#allocation12_spill] sm:$0xff] }
 0x5fa   :  { %15396 = vmatpush3.bf16.msra.mxu1 %v22110_v32 }
 0x5fb   :  { %15398 = vmatprep.subr.bf16.mxu1 %v22111_v6  ;;  %14426 = vmatmul.mubr.f32.vlgmr.msra.gmra.mrb[60].mxu0 %v5941_v37  ;;  %v22118_v37 = vand.u32 4294901760, %v18406_v33  ;;  %v15505_v33 = vpack.c.bf16 %v5977_v54, %v5970_v31 }
 0x5fc   :  { %15484 = vmatpush3.bf16.msra.mxu0 %v15481_v18  ;;  %14428 = vmatprep.mubr.f32.mxu0 %v5951_v59  ;;  %v15493_v18 = vpack.c.bf16 %v18868_v63, %v18880_v15 }
 0x5fd   :  { %15486 = vmatprep.subr.bf16.mxu0 %v15485_v25 }
 0x5fe   :  { %15400 = vmatpush3.bf16.msra.mxu1 %v22112_v57 }
 0x5ff   :  { %15402 = vmatprep.subr.bf16.mxu1 %v22113_v1  ;;  %14429 = vmatmul.mubr.f32.gmra.mrb[62].mxu0 %v5961_v11 }
 0x600   :  { %15488 = vmatpush3.bf16.msra.mxu0 %v15485_v25  ;;  %14439 = vmatprep.mubr.f32.mxu0 %v18835_v42 }
 0x601   :  { %15490 = vmatprep.subr.bf16.mxu0 %v15489_v22 }
 0x602   :  { %15404 = vmatpush3.bf16.msra.mxu1 %v22114_v13 }
 0x603   :  { %15406 = vmatprep.subr.bf16.mxu1 %v22115_v12  ;;  %14440 = vmatmul.mubr.f32.vlgmr.msra.gmra.mrb[60].mxu0 %v18842_v28 }
 0x604   :  { %15492 = vmatpush3.bf16.msra.mxu0 %v15489_v22  ;;  %14442 = vmatprep.mubr.f32.mxu0 %v18853_v50 }
 0x605   :  { %15494 = vmatprep.subr.bf16.mxu0 %v15493_v18 }
 0x606   :  { %15408 = vmatpush3.bf16.msra.mxu1 %v22116_v26 }
 0x607   :  { %15442 = vmatprep.subr.bf16.mxu1 %v22092_v35  ;;  %14443 = vmatmul.mubr.f32.gmra.mrb[62].mxu0 %v18872_v0  ;;  %v22119_v35 = vand.u32 4294901760, %v18409_v34  ;;  %v22121_v34 = vand.u32 4294901760, %v18424_v39  ;;  %v22123_v39 = vand.u32 4294901760, %v18480_v23 }
 0x608   :  { %15496 = vmatpush3.bf16.msra.mxu0 %v15493_v18  ;;  %14453 = vmatprep.mubr.f32.mxu0 %v18851_v40 }
 0x609   :  { %15498 = vmatprep.subr.bf16.mxu0 %v18844_v21  ;;  %5506 = vmatmul.mubr.f32.vlgmr.msra.gmra.mrb[84].mxu1 %v22117_v58 }
 0x60a   :  { %15444 = vmatpush3.bf16.msra.mxu1 %v22094_v51  ;;  %5513 = vmatprep.mubr.f32.mxu1 %v22118_v37 }
 0x60b   :  { %15446 = vmatprep.subr.bf16.mxu1 %v22096_v56  ;;  %14454 = vmatmul.mubr.f32.vlgmr.msra.gmra.mrb[60].mxu0 %v18864_v61 }
 0x60c   :  { %15500 = vmatpush3.bf16.msra.mxu0 %v18844_v21  ;;  %14456 = vmatprep.mubr.f32.mxu0 %v18878_v27 }
 0x60d   :  { %15502 = vmatprep.subr.bf16.mxu0 %v18866_v3  ;;  %5517 = vmatmul.mubr.f32.gmra.mrb[86].mxu1 %v22119_v35 }
 0x60e   :  { %15448 = vmatpush3.bf16.msra.mxu1 %v22098_v5  ;;  %5524 = vmatprep.mubr.f32.mxu1 %v22120_v16 }
 0x60f   :  { %15450 = vmatprep.subr.bf16.mxu1 %v22100_v4  ;;  %14457 = vmatmul.mubr.f32.gmra.mrb[62].mxu0 %v18891_v14 }
 0x610   :  { %15504 = vmatpush3.bf16.msra.mxu0 %v18866_v3  ;;  %14467 = vmatprep.mubr.f32.mxu0 %v5929_v29 }
 0x611   :  { %15506 = vmatprep.subr.bf16.mxu0 %v15505_v33  ;;  %5528 = vmatmul.mubr.f32.gmra.mrb[88].mxu1 %v22121_v34 }
 0x612   :  { %15452 = vmatpush3.bf16.msra.mxu1 %v22102_v43  ;;  %5535 = vmatprep.mubr.f32.mxu1 %v22122_v36 }
 0x613   :  { %15454 = vmatprep.subr.bf16.mxu1 %v22104_v53  ;;  %14468 = vmatmul.mubr.f32.vlgmr.msra.gmra.mrb[60].mxu0 %v5939_v46  ;;  %v4804_v53 = vpop.permute.xlu1 %4803 }
 0x614   :  { %15508 = vmatpush3.bf16.msra.mxu0 %v15505_v33  ;;  %14470 = vmatprep.mubr.f32.mxu0 %v5949_v41 }
 0x615   :  { %15510 = vmatprep.subr.bf16.mxu0 %v15509_v9  ;;  %5539 = vmatmul.mubr.f32.gmra.mrb[90].mxu1 %v22123_v39 }
 0x616   :  { %15456 = vmatpush3.bf16.msra.mxu1 %v22106_v55  ;;  %5830 = vmatprep.mubr.f32.mxu1 %v18336_v20 }
 0x617   :  { %15458 = vmatprep.subr.bf16.mxu1 %v22109_v24  ;;  %14471 = vmatmul.mubr.f32.gmra.mrb[62].mxu0 %v5959_v8  ;;  %v4814_v58 = vpop.permute.xlu1 %4813 }
 0x618   :  { %15512 = vmatpush3.bf16.msra.mxu0 %v15509_v9  ;;  %14481 = vmatprep.mubr.f32.mxu0 %v18835_v42 }
 0x619   :  { %15514 = vmatprep.subr.bf16.mxu0 %v18844_v21 }
 0x61a   :  { %15460 = vmatpush3.bf16.msra.mxu1 %v22110_v32 }
 0x61b   :  { %15462 = vmatprep.subr.bf16.mxu1 %v22111_v6  ;;  %14482 = vmatmul.mubr.f32.vlgmr.msra.gmra.mrb[60].mxu0 %v18842_v28  ;;  %v4809_v6 = vpop.permute.xlu0 %4808 }
 0x61c   :  { %15516 = vmatpush3.bf16.msra.mxu0 %v18844_v21  ;;  %14484 = vmatprep.mubr.f32.mxu0 %v18853_v50 }
 0x61d   :  { %15518 = vmatprep.subr.bf16.mxu0 %v18866_v3 }
 0x61e   :  { %15464 = vmatpush3.bf16.msra.mxu1 %v22112_v57 }
 0x61f   :  { %15466 = vmatprep.subr.bf16.mxu1 %v22113_v1  ;;  %14485 = vmatmul.mubr.f32.gmra.mrb[62].mxu0 %v18872_v0 }
 0x620   :  { %15520 = vmatpush3.bf16.msra.mxu0 %v18866_v3  ;;  %14495 = vmatprep.mubr.f32.mxu0 %v18835_v42 }
 0x622   :  { %15468 = vmatpush3.bf16.msra.mxu1 %v22114_v13 }
 0x623   :  { %15470 = vmatprep.subr.bf16.mxu1 %v22115_v12  ;;  %14496 = vmatmul.mubr.f32.vlgmr.msra.gmra.mrb[60].mxu0 %v18842_v28 }
 0x624   :  { %14498 = vmatprep.mubr.f32.mxu0 %v18853_v50 }
 0x626   :  { %15472 = vmatpush3.bf16.msra.mxu1 %v22116_v26 }
 0x627   :  { %14499 = vmatmul.mubr.f32.gmra.mrb[62].mxu0 %v18872_v0 }
 0x629   :  { %5832 = vmatmul.mubr.f32.vlgmr.msra.gmra.mrb[92].mxu1 %v22093_v60 }
 0x62a   :  { %5837 = vmatprep.mubr.f32.mxu1 %v22095_v52 }
 0x62d   :  { %5839 = vmatmul.mubr.f32.gmra.mrb[94].mxu1 %v22097_v17 }
 0x62e   :  { %5844 = vmatprep.mubr.f32.mxu1 %v22099_v10 }
 0x631   :  { %5846 = vmatmul.mubr.f32.gmra.mrb[96].mxu1 %v22101_v47 }
 0x632   :  { %5851 = vmatprep.mubr.f32.mxu1 %v22103_v2 }
 0x635   :  { %5853 = vmatmul.mubr.f32.gmra.mrb[98].mxu1 %v22105_v48 }
 0x699   :  { %v12937_v23 = vpop.f32.mrb[68].mxu1 }
 0x69a   :  { %v12938_v20 = vpop.f32.mrb[69].mxu1 }
 0x69b   :  { %v12939_v30 = vadd.f32 %v12938_v20, %v12937_v23 }
 0x69c   :  { %v13025_v7 = vpop.f32.mrb[44].mxu0 }
 0x69d   :  { %v13026_v54 = vpop.f32.mrb[45].mxu0  ;;  %v4937_v46 = vadd.f32 %v12939_v30, %v4799_v49 }
 0x69e   :  { %v12940_v42 = vpop.f32.mrb[70].mxu1  ;;  %v13027_v31 = vadd.f32 %v13026_v54, %v13025_v7 }
 0x69f   :  { %v12941_v28 = vpop.f32.mrb[71].mxu1 }
 0x6a0   :  { %v12942_v21 = vadd.f32 %v12941_v28, %v12940_v42  ;;  %v13028_v40 = vpop.f32.mrb[46].mxu0 }
 0x6a1   :  { %v13029_v50 = vpop.f32.mrb[47].mxu0 }
 0x6a2   :  { %v13030_v51 = vadd.f32 %v13029_v50, %v13028_v40  ;;  %v4952_v48 = vadd.f32 %v12942_v21, %v4804_v53 }
 0x6a3   :  { %v12943_v60 = vpop.f32.mrb[72].mxu1 }
 0x6a4   :  { %v12944_v52 = vpop.f32.mrb[73].mxu1  ;;  %v13031_v3 = vpop.f32.mrb[48].mxu0 }
 0x6a5   :  { %v12945_v61 = vadd.f32 %v12944_v52, %v12943_v60  ;;  %v13032_v63 = vpop.f32.mrb[49].mxu0 }
 0x6a6   :  { %v13033_v0 = vadd.f32 %v13032_v63, %v13031_v3 }
 0x6a7   :  { %v12946_v56 = vpop.f32.mrb[74].mxu1  ;;  %v4967_v11 = vadd.f32 %v12945_v61, %v4809_v6 }
 0x6a8   :  { %v12947_v29 = vpop.f32.mrb[75].mxu1 }
 0x6a9   :  { %v12948_v27 = vadd.f32 %v12947_v29, %v12946_v56 }
 0x6aa   :  { %v13034_v15 = vpop.f32.mrb[50].mxu0 }
 0x6ab   :  { %v13035_v17 = vpop.f32.mrb[51].mxu0  ;;  %v4982_v35 = vadd.f32 %v12948_v27, %v4814_v58 }
 0x6ac   :  { %v13036_v5 = vadd.f32 %v13035_v17, %v13034_v15 }
 0x6bb   :  { %v12981_v10 = vpop.f32.mrb[76].mxu1 }
 0x6bc   :  { %v12982_v4 = vpop.f32.mrb[77].mxu1 }
 0x6bd   :  { %v12983_v14 = vadd.f32 %v12982_v4, %v12981_v10 }
 0x6be   :  { %v13113_v41 = vpop.f32.mrb[52].mxu0 }
 0x6bf   :  { %v13114_v62 = vpop.f32.mrb[53].mxu0  ;;  %v5214_v47 = vadd.f32 %v12983_v14, %v4937_v46 }
 0x6c0   :  { %v12984_v43 = vpop.f32.mrb[78].mxu1  ;;  %v13115_v2 = vadd.f32 %v13114_v62, %v13113_v41 }
 0x6c1   :  { %v12985_v8 = vpop.f32.mrb[79].mxu1  ;;  %v5373_v19 = vadd.f32 %v13027_v31, %v5214_v47 }
 0x6c2   :  { %v12986_v55 = vadd.f32 %v12985_v8, %v12984_v43  ;;  %v13116_v24 = vpop.f32.mrb[54].mxu0 }
 0x6c3   :  { %v13117_v45 = vpop.f32.mrb[55].mxu0 }
 0x6c4   :  { %v5221_v59 = vadd.f32 %v12986_v55, %v4952_v48  ;;  %v12987_v38 = vpop.f32.mrb[80].mxu1  ;;  %v13118_v32 = vadd.f32 %v13117_v45, %v13116_v24 }
 0x6c5   :  { %v12988_v25 = vpop.f32.mrb[81].mxu1 }
 0x6c6   :  { %v12989_v57 = vadd.f32 %v12988_v25, %v12987_v38  ;;  %v13119_v1 = vpop.f32.mrb[56].mxu0  ;;  %v5382_v22 = vadd.f32 %v13030_v51, %v5221_v59 }
 0x6c7   :  { %v13120_v13 = vpop.f32.mrb[57].mxu0 }
 0x6c8   :  { %v5228_v12 = vadd.f32 %v12989_v57, %v4967_v11  ;;  %v12990_v18 = vpop.f32.mrb[82].mxu1  ;;  %v13121_v26 = vadd.f32 %v13120_v13, %v13119_v1 }
 0x6c9   :  { %v12991_v37 = vpop.f32.mrb[83].mxu1 }
 0x6ca   :  { %v12992_v16 = vadd.f32 %v12991_v37, %v12990_v18  ;;  %v13122_v33 = vpop.f32.mrb[58].mxu0  ;;  %v5391_v34 = vadd.f32 %v13033_v0, %v5228_v12 }
 0x6cb   :  { %v13123_v36 = vpop.f32.mrb[59].mxu0 }
 0x6cc   :  { %v5235_v9 = vadd.f32 %v12992_v16, %v4982_v35  ;;  %v13124_v39 = vadd.f32 %v13123_v36, %v13122_v33 }
 0x6ce   :  { %v5400_v23 = vadd.f32 %v13036_v5, %v5235_v9 }
 0x6dc   :  { %v13069_v20 = vpop.f32.mrb[84].mxu1 }
 0x6dd   :  { %v13070_v30 = vpop.f32.mrb[85].mxu1 }
 0x6de   :  { %v13071_v7 = vadd.f32 %v13070_v30, %v13069_v20 }
 0x6e0   :  { %v5508_v54 = vadd.f32 %v13071_v7, %v5373_v19  ;;  %v13072_v42 = vpop.f32.mrb[86].mxu1 }
 0x6e1   :  { %v13073_v31 = vpop.f32.mrb[87].mxu1 }
 0x6e2   :  { %v13074_v28 = vadd.f32 %v13073_v31, %v13072_v42  ;;  %v5709_v21 = vadd.f32 %v13115_v2, %v5508_v54 }
 0x6e4   :  { %v5519_v40 = vadd.f32 %v13074_v28, %v5382_v22  ;;  %v13075_v50 = vpop.f32.mrb[88].mxu1 }
 0x6e5   :  { %v13076_v60 = vpop.f32.mrb[89].mxu1 }
 0x6e6   :  { %v13077_v51 = vadd.f32 %v13076_v60, %v13075_v50  ;;  %v5716_v52 = vadd.f32 %v13118_v32, %v5519_v40 }
 0x6e8   :  { %v5530_v61 = vadd.f32 %v13077_v51, %v5391_v34  ;;  %v13078_v3 = vpop.f32.mrb[90].mxu1 }
 0x6e9   :  { %v13079_v63 = vpop.f32.mrb[91].mxu1 }
 0x6ea   :  { %v13080_v56 = vadd.f32 %v13079_v63, %v13078_v3  ;;  %v5723_v0 = vadd.f32 %v13121_v26, %v5530_v61  ;;  %v6646_v61 = vld [vmem:[#allocation3 + $0x128] sm:$0xff] }
 0x6eb   :  { %v19092_v3 = vand.u32 4294901760, %v6646_v61 }
 0x6ec   :  { %v5541_v29 = vadd.f32 %v13080_v56, %v5400_v23 }
 0x6ed   :  { %v19095_v63 = vsub.f32 %v6646_v61, %v19092_v3 }
 0x6ee   :  { %v5730_v27 = vadd.f32 %v13124_v39, %v5541_v29 }
 0x6ef   :  { %22126 = vst [vmem:[#allocation6_spill] sm:$0xff] %v19095_v63  ;;  %v21605_v56 = vand.u32 4294901760, %v19095_v63  ;;  %7270 = vmatprep.mubr.f32.mxu0 %v19095_v63 }
 0x6f1   :  { %v6829_v29 = vsub.f32 %v19095_v63, %v21605_v56 }
 0x6f6   :  { %v14497_v15 = vpop.f32.mrb[60].mxu0 }
 0x6f7   :  { %v6450_v17 = vpop.f32.mrb[61].mxu0 }
 0x6fa   :  { %v14500_v5 = vpop.f32.mrb[62].mxu0 }
 0x6fb   :  { %v6462_v10 = vpop.f32.mrb[63].mxu0 }
 0x6fc   :  { %v13157_v49 = vpop.f32.mrb[92].mxu1 }
 0x6fd   :  { %v13158_v4 = vpop.f32.mrb[93].mxu1 }
 0x6fe   :  { %v13159_v46 = vadd.f32 %v13158_v4, %v13157_v49  ;;  %v22127_v49 = vld [vmem:[#allocation13_spill] sm:$0xff] }
 0x700   :  { %v5834_v14 = vadd.f32 %v13159_v46, %v5709_v21  ;;  %v13160_v41 = vpop.f32.mrb[94].mxu1 }
 0x701   :  { %v13161_v62 = vpop.f32.mrb[95].mxu1 }
 0x702   :  { %v16258_v47 = vadd.f32 %v6450_v17, %v5834_v14  ;;  %v13162_v43 = vadd.f32 %v13161_v62, %v13160_v41  ;;  %v12217_v17 = vld [vmem:[%s21388_s4 + $0x70] sm:$0xff] }
 0x704   :  { %v19017_v2 = vmax.f32 %v16258_v47, 0.0  ;;  %v5841_v53 = vadd.f32 %v13162_v43, %v5716_v52  ;;  %v13163_v8 = vpop.f32.mrb[96].mxu1 }
 0x705   :  { %v13164_v48 = vpop.f32.mrb[97].mxu1 }
 0x706   :  { %v16257_v55 = vadd.f32 %v14497_v15, %v5841_v53  ;;  %v13165_v24 = vadd.f32 %v13164_v48, %v13163_v8  ;;  %6480 = vrot.lane.b32.xlu0 %v19017_v2, %s16452_s1  ;;  %v6779_v19 = vand.u32 4294901760, %v19017_v2  ;;  %v12216_v15 = vld [vmem:[%s21388_s4 + $0x68] sm:$0xff] }
 0x708   :  { %v19022_v45 = vmax.f32 %v16257_v55, 0.0  ;;  %v5848_v59 = vadd.f32 %v13165_v24, %v5723_v0  ;;  %v13166_v38 = vpop.f32.mrb[98].mxu1  ;;  %v7001_v32 = vsub.f32 %v19017_v2, %v6779_v19  ;;  %v12215_v0 = vld [vmem:[%s21388_s4 + $0x60] sm:$0xff] }
 0x709   :  { %v13167_v6 = vpop.f32.mrb[99].mxu1 }
 0x70a   :  { %v16260_v25 = vadd.f32 %v6462_v10, %v5848_v59  ;;  %v13168_v11 = vadd.f32 %v13167_v6, %v13166_v38  ;;  %6482 = vrot.lane.b32.xlu1 %v19022_v45, %s16452_s1  ;;  %6564 = vrot.lane.b32.xlu0 %v19017_v2, %s16453_s2  ;;  %v6782_v57 = vand.u32 4294901760, %v19022_v45  ;;  %v7002_v1 = vand.u32 4294901760, %v7001_v32  ;;  %v6649_v59 = vld [vmem:[#allocation3 + $0x140] sm:$0xff]  ;;  %v6648_v38 = vld [vmem:[#allocation3 + $0x138] sm:$0xff] }
 0x70c   :  { %v6474_v22 = vmax.f32 %v16260_v25, 0.0  ;;  %v5855_v13 = vadd.f32 %v13168_v11, %v5730_v27  ;;  %v19030_v12 = vpack.c.bf16 %v6782_v57, %v6779_v19  ;;  %v7008_v18 = vsub.f32 %v19022_v45, %v6782_v57 }
 0x70d   :  { %v7003_v26 = vsub.f32 %v7001_v32, %v7002_v1  ;;  %v6830_v27 = vand.u32 4294901760, %v6829_v29  ;;  %v19137_v11 = vand.u32 4294901760, %v6649_v59  ;;  %v19139_v57 = vand.u32 4294901760, %v6648_v38 }
 0x70e   :  { %22124 = vst [vmem:[#allocation39_spill] sm:$0xff] %v19030_v12  ;;  %v16259_v58 = vadd.f32 %v14500_v5, %v5855_v13  ;;  %6566 = vrot.lane.b32.xlu1 %v19022_v45, %s16453_s2  ;;  %6500 = vrot.lane.b32.xlu0 %v19017_v2, %s16454_s6  ;;  %v15585_v37 = vpack.c.bf16 %v7008_v18, %v7001_v32  ;;  %v6785_v35 = vand.u32 4294901760, %v6474_v22  ;;  %v7009_v16 = vand.u32 4294901760, %v7008_v18  ;;  %v12218_v5 = vld [vmem:[%s21388_s4 + $0x78] sm:$0xff] }
 0x70f   :  { %15522 = vmatprep.subr.bf16.mxu1 %v19030_v12  ;;  %v7004_v23 = vand.u32 4294901760, %v7003_v26  ;;  %6831 = vmatprep.mubr.f32.mxu1 %v6830_v27  ;;  %22130 = vst [vmem:[#allocation42_spill] sm:$0xff] %v19137_v11  ;;  %22131 = vst [vmem:[#allocation8_spill] sm:$0xff] %v19139_v57 }
 0x710   :  { %v6475_v33 = vmax.f32 %v16259_v58, 0.0  ;;  %15586 = vmatprep.subr.bf16.mxu0 %v15585_v37  ;;  %v19038_v34 = vsub.f32 %v6474_v22, %v6785_v35  ;;  %v7010_v36 = vsub.f32 %v7008_v18, %v7009_v16  ;;  %v19040_v9 = vpack.c.bf16 %v7009_v16, %v7002_v1  ;;  %v6652_v1 = vld [vmem:[#allocation3 + $0x158] sm:$0xff] }
 0x711   :  { %v19148_v58 = vand.u32 4294901760, %v6652_v1  ;;  %v19151_v37 = vsub.f32 %v6649_v59, %v19137_v11 }
 0x712   :  { %6502 = vrot.lane.b32.xlu1 %v19022_v45, %s16454_s6  ;;  %6584 = vrot.lane.b32.xlu0 %v19017_v2, %s16455_s7  ;;  %v6788_v39 = vand.u32 4294901760, %v6475_v33  ;;  %v7011_v20 = vand.u32 4294901760, %v7010_v36  ;;  %v7016_v30 = vand.u32 4294901760, %v19038_v34 }
 0x713   :  { %22132 = vst [vmem:[#allocation46_spill] sm:$0xff] %v19148_v58 }
 0x714   :  { %v19047_v7 = vpack.c.bf16 %v6788_v39, %v6785_v35  ;;  %v19049_v54 = vsub.f32 %v6475_v33, %v6788_v39  ;;  %v19051_v42 = vpack.c.bf16 %v7011_v20, %v7004_v23  ;;  %v7017_v28 = vsub.f32 %v19038_v34, %v7016_v30  ;;  %v6655_v23 = vld [vmem:[#allocation3 + $0x170] sm:$0xff] }
 0x715   :  { %v19154_v35 = vsub.f32 %v6648_v38, %v19139_v57  ;;  %v19164_v39 = vsub.f32 %v6652_v1, %v19148_v58  ;;  %v21602_v20 = vand.u32 4294901760, %v19151_v37  ;;  %v19180_v61 = vand.u32 4294901760, %v6655_v23 }
 0x716   :  { %22125 = vst [vmem:[#allocation7_spill] sm:$0xff] %v19047_v7  ;;  %6586 = vrot.lane.b32.xlu1 %v19022_v45, %s16455_s7  ;;  %6520 = vrot.lane.b32.xlu0 %v19017_v2, %s16456_s8  ;;  %v15589_v31 = vpack.c.bf16 %v19049_v54, %v19038_v34  ;;  %v7023_v21 = vand.u32 4294901760, %v19049_v54  ;;  %v7018_v60 = vand.u32 4294901760, %v7017_v28 }
 0x717   :  { %22135 = vst [vmem:[#allocation30_spill] sm:$0xff] %v19180_v61  ;;  %v21604_v27 = vand.u32 4294901760, %v19164_v39 }
 0x718   :  { %v7024_v40 = vsub.f32 %v19049_v54, %v7023_v21  ;;  %v19062_v50 = vpack.c.bf16 %v7023_v21, %v7016_v30  ;;  %v21601_v30 = vand.u32 4294901760, %v19154_v35 }
 0x71a   :  { %6522 = vrot.lane.b32.xlu1 %v19022_v45, %s16456_s8  ;;  %6604 = vrot.lane.b32.xlu0 %v19017_v2, %s16457_s9  ;;  %v7025_v51 = vand.u32 4294901760, %v7024_v40 }
 0x71c   :  { %v19068_v52 = vpack.c.bf16 %v7025_v51, %v7018_v60 }
 0x71e   :  { %6606 = vrot.lane.b32.xlu1 %v19022_v45, %s16457_s9  ;;  %6540 = vrot.lane.b32.xlu0 %v19017_v2, %s16458_s10 }
 0x722   :  { %6542 = vrot.lane.b32.xlu1 %v19022_v45, %s16458_s10  ;;  %6484 = vrot.lane.b32.xlu0 %v6474_v22, %s16452_s1 }
 0x726   :  { %6486 = vrot.lane.b32.xlu1 %v6475_v33, %s16452_s1  ;;  %6568 = vrot.lane.b32.xlu0 %v6474_v22, %s16453_s2 }
 0x72a   :  { %6570 = vrot.lane.b32.xlu1 %v6475_v33, %s16453_s2  ;;  %6504 = vrot.lane.b32.xlu0 %v6474_v22, %s16454_s6 }
 0x72e   :  { %6506 = vrot.lane.b32.xlu1 %v6475_v33, %s16454_s6  ;;  %6588 = vrot.lane.b32.xlu0 %v6474_v22, %s16455_s7 }
 0x732   :  { %6590 = vrot.lane.b32.xlu1 %v6475_v33, %s16455_s7  ;;  %6524 = vrot.lane.b32.xlu0 %v6474_v22, %s16456_s8 }
 0x736   :  { %6526 = vrot.lane.b32.xlu1 %v6475_v33, %s16456_s8  ;;  %6608 = vrot.lane.b32.xlu0 %v6474_v22, %s16457_s9 }
 0x73a   :  { %6610 = vrot.lane.b32.xlu1 %v6475_v33, %s16457_s9  ;;  %6544 = vrot.lane.b32.xlu0 %v6474_v22, %s16458_s10 }
 0x73e   :  { %6546 = vrot.lane.b32.xlu1 %v6475_v33, %s16458_s10  ;;  %6624 = vrot.lane.b32.xlu0 %v19017_v2, %s16459_s11 }
 0x742   :  { %6626 = vrot.lane.b32.xlu1 %v19022_v45, %s16459_s11  ;;  %6628 = vrot.lane.b32.xlu0 %v6474_v22, %s16459_s11  ;;  %v6645_v45 = vld [vmem:[#allocation3 + $0x120] sm:$0xff]  ;;  %v6651_v22 = vld [vmem:[#allocation3 + $0x150] sm:$0xff] }
 0x743   :  { %v19135_v25 = vand.u32 4294901760, %v6645_v45  ;;  %v19156_v16 = vand.u32 4294901760, %v6651_v22 }
 0x745   :  { %22129 = vst [vmem:[#allocation9_spill] sm:$0xff] %v19135_v25  ;;  %v19146_v26 = vsub.f32 %v6645_v45, %v19135_v25  ;;  %22133 = vst [vmem:[#allocation43_spill] sm:$0xff] %v19156_v16  ;;  %v19169_v54 = vsub.f32 %v6651_v22, %v19156_v16  ;;  %v22141_v16 = vld [vmem:[#allocation27_spill] sm:$0xff] }
 0x746   :  { %6630 = vrot.lane.b32.xlu1 %v6475_v33, %s16459_s11  ;;  %6700 = vperm.xlu0 %16422, %v12215_v0   ;;  %v6654_v0 = vld [vmem:[#allocation3 + $0x168] sm:$0xff] }
 0x747   :  { %v21603_v36 = vand.u32 4294901760, %v19146_v26 }
 0x749   :  { %v19178_v51 = vsub.f32 %v19146_v26, %v21603_v36 }
 0x74a   :  { %6705 = vperm.xlu1 %16423, %v12216_v15   ;;  %6710 = vperm.xlu0 %16422, %v12217_v17   ;;  %v19187_v15 = vsub.f32 %v19151_v37, %v21602_v20  ;;  %v19192_v17 = vsub.f32 %v19154_v35, %v21601_v30  ;;  %v22138_v30 = vld [vmem:[#allocation26_spill] sm:$0xff] }
 0x74e   :  { %6715 = vperm.xlu1 %16423, %v12218_v5   ;;  %v21607_v5 = vand.u32 4294901760, %v19169_v54 }
 0x778   :  { %v6481_v10 = vpop.permute.xlu0 %6480 }
 0x779   :  { %v6492_v4 = vmul.f32 %v22127_v49, %v6481_v10  ;;  %v22136_v10 = vld [vmem:[#allocation25_spill] sm:$0xff] }
 0x77b   :  { %v6731_v41 = vand.u32 4294901760, %v6492_v4 }
 0x77c   :  { %v6483_v46 = vpop.permute.xlu1 %6482  ;;  %v6565_v14 = vpop.permute.xlu0 %6564 }
 0x77d   :  { %v6493_v62 = vmul.f32 %v22127_v49, %v6483_v46  ;;  %v19120_v53 = vsub.f32 %v6492_v4, %v6731_v41  ;;  %v19196_v46 = vand.u32 4294901760, %v6654_v0 }
 0x77f   :  { %v6734_v47 = vand.u32 4294901760, %v6493_v62  ;;  %22137 = vst [vmem:[#allocation16_spill] sm:$0xff] %v19196_v46  ;;  %v19219_v36 = vsub.f32 %v6654_v0, %v19196_v46 }
 0x780   :  { %v6567_v43 = vpop.permute.xlu1 %6566  ;;  %v6501_v2 = vpop.permute.xlu0 %6500 }
 0x781   :  { %v19122_v8 = vpack.c.bf16 %v6734_v47, %v6731_v41  ;;  %v19124_v48 = vsub.f32 %v6493_v62, %v6734_v47  ;;  %v6512_v45 = vmul.f32 %v22136_v10, %v6501_v2 }
 0x783   :  { %22128 = vst [vmem:[#allocation10_spill] sm:$0xff] %v19122_v8  ;;  %15524 = vmatpush3.bf16.msra.mxu1 %v19122_v8  ;;  %v15587_v55 = vpack.c.bf16 %v19124_v48, %v19120_v53 }
 0x784   :  { %v6503_v24 = vpop.permute.xlu1 %6502  ;;  %v6585_v19 = vpop.permute.xlu0 %6584  ;;  %15526 = vmatprep.subr.bf16.mxu1 %v19047_v7 }
 0x785   :  { %15588 = vmatpush3.bf16.msra.mxu0 %v15587_v55  ;;  %v6513_v4 = vmul.f32 %v22136_v10, %v6503_v24  ;;  %v19200_v55 = vsub.f32 %v6655_v23, %v19180_v61  ;;  %v19207_v24 = vsub.f32 %v19164_v39, %v21604_v27  ;;  %v19215_v23 = vsub.f32 %v19169_v54, %v21607_v5 }
 0x786   :  { %15590 = vmatprep.subr.bf16.mxu0 %v15589_v31  ;;  %v22134_v31 = vld [vmem:[#allocation22_spill] sm:$0xff]  ;;  %v6596_v20 = vmul.f32 %v22138_v30, %v6585_v19 }
 0x787   :  { %v6576_v28 = vmul.f32 %v22134_v31, %v6565_v14  ;;  %v6577_v21 = vmul.f32 %v22134_v31, %v6567_v43  ;;  %v6746_v2 = vand.u32 4294901760, %v6513_v4 }
 0x788   :  { %v6587_v32 = vpop.permute.xlu1 %6586  ;;  %v19133_v6 = vpop.permute.xlu0 %6520 }
 0x789   :  { %v6791_v14 = vand.u32 4294901760, %v6576_v28  ;;  %v6794_v41 = vand.u32 4294901760, %v6577_v21  ;;  %v19237_v46 = vsub.f32 %v6513_v4, %v6746_v2 }
 0x78b   :  { %v19221_v27 = vsub.f32 %v6576_v28, %v6791_v14  ;;  %v19223_v56 = vsub.f32 %v6577_v21, %v6794_v41  ;;  %v19235_v21 = vpack.c.bf16 %v6794_v41, %v6791_v14 }
 0x78c   :  { %v19141_v13 = vpop.permute.xlu1 %6522  ;;  %v19143_v18 = vpop.permute.xlu0 %6604 }
 0x78d   :  { %22140 = vst [vmem:[#allocation33_spill] sm:$0xff] %v19235_v21  ;;  %v6533_v43 = vmul.f32 %v22141_v16, %v19141_v13  ;;  %v15593_v4 = vpack.c.bf16 %v19223_v56, %v19221_v27 }
 0x78f   :  { %v6758_v7 = vand.u32 4294901760, %v6533_v43 }
 0x790   :  { %v19158_v33 = vpop.permute.xlu1 %6606  ;;  %v19160_v34 = vpop.permute.xlu0 %6540 }
 0x791   :  { %v19285_v11 = vsub.f32 %v6533_v43, %v6758_v7 }
 0x794   :  { %v19173_v40 = vpop.permute.xlu1 %6542  ;;  %v6485_v60 = vpop.permute.xlu0 %6484 }
 0x795   :  { %v6494_v29 = vmul.f32 %v22127_v49, %v6485_v60 }
 0x797   :  { %v6737_v59 = vand.u32 4294901760, %v6494_v29 }
 0x798   :  { %v6487_v62 = vpop.permute.xlu1 %6486  ;;  %v6569_v47 = vpop.permute.xlu0 %6568 }
 0x799   :  { %v6495_v38 = vmul.f32 %v22127_v49, %v6487_v62  ;;  %v6578_v1 = vmul.f32 %v22134_v31, %v6569_v47  ;;  %v6597_v47 = vmul.f32 %v22138_v30, %v6587_v32  ;;  %v6743_v49 = vand.u32 4294901760, %v6512_v45 }
 0x79a   :  { %v19227_v5 = vsub.f32 %v6494_v29, %v6737_v59  ;;  %v6803_v32 = vand.u32 4294901760, %v6596_v20 }
 0x79b   :  { %v6740_v62 = vand.u32 4294901760, %v6495_v38  ;;  %v6797_v61 = vand.u32 4294901760, %v6578_v1  ;;  %v19249_v14 = vsub.f32 %v6512_v45, %v6743_v49  ;;  %v19251_v13 = vpack.c.bf16 %v6746_v2, %v6743_v49 }
 0x79c   :  { %v6571_v22 = vpop.permute.xlu1 %6570  ;;  %v6505_v60 = vpop.permute.xlu0 %6504 }
 0x79d   :  { %v19229_v63 = vpack.c.bf16 %v6740_v62, %v6737_v59  ;;  %v19231_v19 = vsub.f32 %v6495_v38, %v6740_v62  ;;  %v6579_v0 = vmul.f32 %v22134_v31, %v6571_v22  ;;  %v6514_v28 = vmul.f32 %v22136_v10, %v6505_v60  ;;  %22142 = vst [vmem:[#allocation15_spill] sm:$0xff] %v19251_v13 }
 0x79e   :  { %v6806_v59 = vand.u32 4294901760, %v6597_v47  ;;  %v6532_v38 = vmul.f32 %v22141_v16, %v19133_v6  ;;  %v19254_v58 = vsub.f32 %v6578_v1, %v6797_v61  ;;  %v15595_v49 = vpack.c.bf16 %v19237_v46, %v19249_v14 }
 0x79f   :  { %22139 = vst [vmem:[#allocation32_spill] sm:$0xff] %v19229_v63  ;;  %v15591_v29 = vpack.c.bf16 %v19231_v19, %v19227_v5  ;;  %15528 = vmatpush3.bf16.msra.mxu1 %v19229_v63  ;;  %v6800_v22 = vand.u32 4294901760, %v6579_v0  ;;  %v6749_v41 = vand.u32 4294901760, %v6514_v28 }
 0x7a0   :  { %v6507_v62 = vpop.permute.xlu1 %6506  ;;  %v6589_v60 = vpop.permute.xlu0 %6588  ;;  %15530 = vmatprep.subr.bf16.mxu1 %v19235_v21  ;;  %v19261_v21 = vsub.f32 %v6596_v20, %v6803_v32  ;;  %v19266_v2 = vsub.f32 %v6597_v47, %v6806_v59  ;;  %v6755_v1 = vand.u32 4294901760, %v6532_v38 }
 0x7a1   :  { %v6515_v31 = vmul.f32 %v22136_v10, %v6507_v62  ;;  %15592 = vmatpush3.bf16.msra.mxu0 %v15591_v29  ;;  %v19256_v63 = vsub.f32 %v6579_v0, %v6800_v22  ;;  %v6598_v6 = vmul.f32 %v22138_v30, %v6589_v60  ;;  %v19259_v57 = vpack.c.bf16 %v6800_v22, %v6797_v61  ;;  %v22144_v0 = vld [vmem:[#allocation28_spill] sm:$0xff] }
 0x7a2   :  { %15594 = vmatprep.subr.bf16.mxu0 %v15593_v4  ;;  %v6617_v29 = vmul.f32 %v22144_v0, %v19158_v33  ;;  %v19273_v61 = vsub.f32 %v6514_v28, %v6749_v41  ;;  %v6616_v10 = vmul.f32 %v22144_v0, %v19143_v18  ;;  %v22147_v28 = vld [vmem:[#allocation31_spill] sm:$0xff]  ;;  %v15601_v43 = vpack.c.bf16 %v19266_v2, %v19261_v21 }
 0x7a3   :  { %22143 = vst [vmem:[#allocation14_spill] sm:$0xff] %v19259_v57  ;;  %v6752_v45 = vand.u32 4294901760, %v6515_v31  ;;  %15532 = vmatpush3.bf16.msra.mxu1 %v19251_v13  ;;  %v15597_v20 = vpack.c.bf16 %v19256_v63, %v19254_v58  ;;  %v6809_v33 = vand.u32 4294901760, %v6598_v6 }
 0x7a4   :  { %v6591_v62 = vpop.permute.xlu1 %6590  ;;  %v6525_v60 = vpop.permute.xlu0 %6524  ;;  %15534 = vmatprep.subr.bf16.mxu1 %v19259_v57  ;;  %v19283_v57 = vpack.c.bf16 %v6806_v59, %v6803_v32  ;;  %v6818_v18 = vand.u32 4294901760, %v6617_v29 }
 0x7a5   :  { %v19275_v22 = vpack.c.bf16 %v6752_v45, %v6749_v41  ;;  %v19277_v4 = vsub.f32 %v6515_v31, %v6752_v45  ;;  %v6599_v47 = vmul.f32 %v22138_v30, %v6591_v62  ;;  %15596 = vmatpush3.bf16.msra.mxu0 %v15595_v49  ;;  %v6534_v13 = vmul.f32 %v22141_v16, %v6525_v60 }
 0x7a6   :  { %15598 = vmatprep.subr.bf16.mxu0 %v15597_v20  ;;  %22146 = vst [vmem:[#allocation19_spill] sm:$0xff] %v19283_v57  ;;  %v6553_v41 = vmul.f32 %v22147_v28, %v19173_v40  ;;  %v19292_v49 = vsub.f32 %v6532_v38, %v6755_v1  ;;  %v6552_v62 = vmul.f32 %v22147_v28, %v19160_v34  ;;  %v6815_v38 = vand.u32 4294901760, %v6616_v10 }
 0x7a7   :  { %22145 = vst [vmem:[#allocation20_spill] sm:$0xff] %v19275_v22  ;;  %v15599_v31 = vpack.c.bf16 %v19277_v4, %v19273_v61  ;;  %v6812_v45 = vand.u32 4294901760, %v6599_v47  ;;  %15536 = vmatpush3.bf16.msra.mxu1 %v19275_v22  ;;  %v19299_v40 = vpack.c.bf16 %v6758_v7, %v6755_v1  ;;  %v6761_v20 = vand.u32 4294901760, %v6534_v13 }
 0x7a8   :  { %v6527_v60 = vpop.permute.xlu1 %6526  ;;  %v6609_v32 = vpop.permute.xlu0 %6608  ;;  %15538 = vmatprep.subr.bf16.mxu1 %v19283_v57  ;;  %v19304_v22 = vsub.f32 %v6598_v6, %v6809_v33  ;;  %v6770_v57 = vand.u32 4294901760, %v6553_v41  ;;  %v15603_v7 = vpack.c.bf16 %v19285_v11, %v19292_v49  ;;  %v6767_v6 = vand.u32 4294901760, %v6552_v62 }
 0x7a9   :  { %22148 = vst [vmem:[#allocation18_spill] sm:$0xff] %v19299_v40  ;;  %v19301_v59 = vsub.f32 %v6599_v47, %v6812_v45  ;;  %v6535_v30 = vmul.f32 %v22141_v16, %v6527_v60  ;;  %15600 = vmatpush3.bf16.msra.mxu0 %v15599_v31  ;;  %v6618_v34 = vmul.f32 %v22144_v0, %v6609_v32 }
 0x7aa   :  { %15602 = vmatprep.subr.bf16.mxu0 %v15601_v43  ;;  %v19307_v8 = vpack.c.bf16 %v6812_v45, %v6809_v33  ;;  %v19314_v31 = vsub.f32 %v6617_v29, %v6818_v18  ;;  %v19319_v45 = vsub.f32 %v6534_v13, %v6761_v20  ;;  %v19326_v47 = vsub.f32 %v6616_v10, %v6815_v38 }
 0x7ab   :  { %v6764_v25 = vand.u32 4294901760, %v6535_v30  ;;  %15540 = vmatpush3.bf16.msra.mxu1 %v19299_v40  ;;  %v15605_v33 = vpack.c.bf16 %v19301_v59, %v19304_v22  ;;  %v6821_v29 = vand.u32 4294901760, %v6618_v34  ;;  %v19329_v12 = vpack.c.bf16 %v6818_v18, %v6815_v38 }
 0x7ac   :  { %22149 = vst [vmem:[#allocation17_spill] sm:$0xff] %v19307_v8  ;;  %v6611_v60 = vpop.permute.xlu1 %6610  ;;  %v6545_v16 = vpop.permute.xlu0 %6544  ;;  %15542 = vmatprep.subr.bf16.mxu1 %v19307_v8  ;;  %v6890_v8 = vand.u32 4294901760, %v19120_v53  ;;  %v19332_v44 = vsub.f32 %v6553_v41, %v6770_v57  ;;  %v15609_v41 = vpack.c.bf16 %v19314_v31, %v19326_v47 }
 0x7ad   :  { %v19321_v32 = vpack.c.bf16 %v6764_v25, %v6761_v20  ;;  %v19323_v43 = vsub.f32 %v6535_v30, %v6764_v25  ;;  %v6619_v1 = vmul.f32 %v22144_v0, %v6611_v60  ;;  %15604 = vmatpush3.bf16.msra.mxu0 %v15603_v7  ;;  %v6554_v40 = vmul.f32 %v22147_v28, %v6545_v16 }
 0x7ae   :  { %15606 = vmatprep.subr.bf16.mxu0 %v15605_v33  ;;  %22151 = vst [vmem:[#allocation21_spill] sm:$0xff] %v19329_v12  ;;  %v22152_v30 = vand.u32 4294901760, %v19124_v48  ;;  %v19340_v20 = vsub.f32 %v6552_v62, %v6767_v6  ;;  %v19342_v16 = vpack.c.bf16 %v6770_v57, %v6767_v6  ;;  %v19352_v62 = vsub.f32 %v6618_v34, %v6821_v29 }
 0x7af   :  { %22150 = vst [vmem:[#allocation34_spill] sm:$0xff] %v19321_v32  ;;  %v15607_v13 = vpack.c.bf16 %v19323_v43, %v19319_v45  ;;  %v6824_v25 = vand.u32 4294901760, %v6619_v1  ;;  %15544 = vmatpush3.bf16.msra.mxu1 %v19321_v32  ;;  %v6773_v60 = vand.u32 4294901760, %v6554_v40  ;;  %v22155_v6 = vand.u32 4294901760, %v19200_v55 }
 0x7b0   :  { %v6898_v10 = vsub.f32 %v19124_v48, %v22152_v30  ;;  %22153 = vst [vmem:[#allocation11_spill] sm:$0xff] %v19342_v16  ;;  %v6547_v18 = vpop.permute.xlu1 %6546  ;;  %15546 = vmatprep.subr.bf16.mxu1 %v19329_v12  ;;  %v6891_v38 = vsub.f32 %v19120_v53, %v6890_v8  ;;  %v22156_v53 = vand.u32 4294901760, %v19231_v19  ;;  %v22165_v32 = vand.u32 4294901760, %v19256_v63 }
 0x7b1   :  { %v19348_v7 = vsub.f32 %v6619_v1, %v6824_v25  ;;  %v6555_v33 = vmul.f32 %v22147_v28, %v6547_v18  ;;  %15608 = vmatpush3.bf16.msra.mxu0 %v15607_v13  ;;  %v19354_v57 = vpack.c.bf16 %v6824_v25, %v6821_v29  ;;  %v19359_v0 = vsub.f32 %v19200_v55, %v22155_v6 }
 0x7b2   :  { %15610 = vmatprep.subr.bf16.mxu0 %v15609_v41  ;;  %v15611_v1 = vpack.c.bf16 %v19332_v44, %v19340_v20  ;;  %v6899_v34 = vand.u32 4294901760, %v6898_v10  ;;  %v6912_v6 = vsub.f32 %v19231_v19, %v22156_v53  ;;  %v19374_v30 = vsub.f32 %v6554_v40, %v6773_v60 }
 0x7b3   :  { %22154 = vst [vmem:[#allocation23_spill] sm:$0xff] %v19354_v57  ;;  %v6776_v13 = vand.u32 4294901760, %v6555_v33  ;;  %15548 = vmatpush3.bf16.msra.mxu1 %v19342_v16  ;;  %v15613_v25 = vpack.c.bf16 %v19348_v7, %v19352_v62  ;;  %v22158_v29 = vand.u32 4294901760, %v19223_v56  ;;  %v6892_v12 = vand.u32 4294901760, %v6891_v38 }
 0x7b4   :  { %15550 = vmatprep.subr.bf16.mxu1 %v19354_v57  ;;  %v6860_v57 = vand.u32 4294901760, %v19207_v24  ;;  %v22160_v24 = vand.u32 4294901760, %v19221_v27  ;;  %v6913_v40 = vand.u32 4294901760, %v6912_v6  ;;  %v7065_v10 = vand.u32 4294901760, %v19266_v2 }
 0x7b5   :  { %v19376_v18 = vpack.c.bf16 %v6776_v13, %v6773_v60  ;;  %v19378_v28 = vsub.f32 %v6555_v33, %v6776_v13  ;;  %15612 = vmatpush3.bf16.msra.mxu0 %v15611_v1  ;;  %v7038_v41 = vsub.f32 %v19223_v56, %v22158_v29  ;;  %v22159_v60 = vand.u32 4294901760, %v19227_v5 }
 0x7b6   :  { %15614 = vmatprep.subr.bf16.mxu0 %v15613_v25  ;;  %v7031_v29 = vsub.f32 %v19221_v27, %v22160_v24  ;;  %v22161_v25 = vand.u32 4294901760, %v19219_v36  ;;  %v6939_v13 = vand.u32 4294901760, %v19277_v4  ;;  %v22163_v24 = vand.u32 4294901760, %v19178_v51 }
 0x7b7   :  { %22157 = vst [vmem:[#allocation35_spill] sm:$0xff] %v19376_v18  ;;  %v6905_v33 = vsub.f32 %v19227_v5, %v22159_v60  ;;  %v15615_v1 = vpack.c.bf16 %v19378_v28, %v19374_v30  ;;  %15552 = vmatpush3.bf16.msra.mxu1 %v19376_v18  ;;  %v22162_v60 = vand.u32 4294901760, %v19237_v46  ;;  %v22164_v38 = vand.u32 4294901760, %v19124_v48 }
 0x7b8   :  { %15554 = vmatprep.subr.bf16.mxu1 %v19051_v42  ;;  %v19402_v53 = vsub.f32 %v19219_v36, %v22161_v25  ;;  %v15555_v42 = vpack.c.bf16 %v6899_v34, %v6892_v12  ;;  %v7039_v18 = vand.u32 4294901760, %v7038_v41  ;;  %v22166_v6 = vand.u32 4294901760, %v19249_v14 }
 0x7b9   :  { %v6926_v16 = vsub.f32 %v19237_v46, %v22162_v60  ;;  %15616 = vmatpush3.bf16.msra.mxu0 %v15615_v1  ;;  %v15651_v25 = vpack.c.bf16 %v22164_v38, %v6890_v8  ;;  %v7052_v60 = vsub.f32 %v19256_v63, %v22165_v32  ;;  %v7058_v12 = vand.u32 4294901760, %v19261_v21 }
 0x7ba   :  { %6837 = vmatmul.mubr.f32.vlgmr.msra.gmra.mrb[100].mxu1 %v22163_v24  ;;  %15650 = vmatprep.subr.bf16.mxu0 %v19040_v9  ;;  %v6919_v1 = vsub.f32 %v19249_v14, %v22166_v6  ;;  %v6906_v34 = vand.u32 4294901760, %v6905_v33  ;;  %v6932_v51 = vand.u32 4294901760, %v19273_v61  ;;  %v22167_v9 = vand.u32 4294901760, %v19187_v15 }
 0x7bb   :  { %15556 = vmatpush3.bf16.msra.mxu1 %v15555_v42  ;;  %v6946_v8 = vand.u32 4294901760, %v19292_v49  ;;  %v7032_v48 = vand.u32 4294901760, %v7031_v29  ;;  %v22168_v32 = vand.u32 4294901760, %v19254_v58  ;;  %v6881_v38 = vand.u32 4294901760, %v19402_v53 }
 0x7bc   :  { %6846 = vmatprep.mubr.f32.mxu1 %v22167_v9  ;;  %15558 = vmatprep.subr.bf16.mxu1 %v19068_v52  ;;  %v6927_v33 = vand.u32 4294901760, %v6926_v16  ;;  %v6953_v24 = vand.u32 4294901760, %v19285_v11  ;;  %v6940_v15 = vsub.f32 %v19277_v4, %v6939_v13  ;;  %v15559_v42 = vpack.c.bf16 %v6913_v40, %v6906_v34 }
 0x7bd   :  { %7273 = vmatmul.mubr.f32.vlgmr.msra.gmra.mrb[64].mxu0 %v19146_v26  ;;  %v7045_v41 = vsub.f32 %v19254_v58, %v22168_v32  ;;  %v7079_v52 = vand.u32 4294901760, %v19301_v59  ;;  %v22169_v29 = vand.u32 4294901760, %v19192_v17  ;;  %v15561_v6 = vpack.c.bf16 %v7039_v18, %v7032_v48 }
 0x7be   :  { %15652 = vmatpush3.bf16.msra.mxu0 %v15651_v25  ;;  %7279 = vmatprep.mubr.f32.mxu0 %v19151_v37  ;;  %v7053_v53 = vand.u32 4294901760, %v7052_v60  ;;  %v7066_v16 = vsub.f32 %v19266_v2, %v7065_v10  ;;  %v6920_v9 = vand.u32 4294901760, %v6919_v1  ;;  %v6933_v40 = vsub.f32 %v19273_v61, %v6932_v51 }
 0x7bf   :  { %6852 = vmatmul.mubr.f32.gmra.mrb[102].mxu1 %v22169_v29  ;;  %15654 = vmatprep.subr.bf16.mxu0 %v19062_v50  ;;  %v22170_v25 = vand.u32 4294901760, %v19227_v5  ;;  %v22171_v17 = vand.u32 4294901760, %v19231_v19  ;;  %v7059_v50 = vsub.f32 %v19261_v21, %v7058_v12  ;;  %v6947_v18 = vsub.f32 %v19292_v49, %v6946_v8 }
 0x7c0   :  { %15560 = vmatpush3.bf16.msra.mxu1 %v15559_v42  ;;  %6861 = vmatprep.mubr.f32.mxu1 %v6860_v57  ;;  %v7072_v60 = vand.u32 4294901760, %v19304_v22  ;;  %v22172_v1 = vand.u32 4294901760, %v19221_v27  ;;  %v22173_v57 = vand.u32 4294901760, %v19223_v56  ;;  %v7046_v5 = vand.u32 4294901760, %v7045_v41 }
 0x7c1   :  { %v15655_v34 = vpack.c.bf16 %v22171_v17, %v22170_v25  ;;  %15562 = vmatprep.subr.bf16.mxu1 %v15561_v6  ;;  %7282 = vmatmul.mubr.f32.gmra.mrb[66].mxu0 %v19154_v35  ;;  %v6954_v19 = vsub.f32 %v19285_v11, %v6953_v24  ;;  %v6941_v32 = vand.u32 4294901760, %v6940_v15  ;;  %v6967_v42 = vand.u32 4294901760, %v19323_v43 }
 0x7c2   :  { %v15657_v48 = vpack.c.bf16 %v22173_v57, %v22172_v1  ;;  %v15563_v29 = vpack.c.bf16 %v6927_v33, %v6920_v9  ;;  %7288 = vmatprep.mubr.f32.mxu0 %v19164_v39  ;;  %v7093_v6 = vand.u32 4294901760, %v19314_v31  ;;  %v22174_v27 = vand.u32 4294901760, %v19215_v23 }
 0x7c3   :  { %15656 = vmatpush3.bf16.msra.mxu0 %v15655_v34  ;;  %v15565_v56 = vpack.c.bf16 %v7053_v53, %v7046_v5  ;;  %v7067_v41 = vand.u32 4294901760, %v7066_v16  ;;  %v7080_v25 = vsub.f32 %v19301_v59, %v7079_v52  ;;  %v6934_v17 = vand.u32 4294901760, %v6933_v40 }
 0x7c4   :  { %6867 = vmatmul.mubr.f32.gmra.mrb[104].mxu1 %v22174_v27  ;;  %15658 = vmatprep.subr.bf16.mxu0 %v15657_v48  ;;  %v6960_v15 = vand.u32 4294901760, %v19319_v45  ;;  %v22175_v33 = vand.u32 4294901760, %v19359_v0  ;;  %v22176_v9 = vand.u32 4294901760, %v19249_v14  ;;  %v22177_v34 = vand.u32 4294901760, %v19237_v46 }
 0x7c5   :  { %15564 = vmatpush3.bf16.msra.mxu1 %v15563_v29  ;;  %v7060_v1 = vand.u32 4294901760, %v7059_v50  ;;  %v6948_v57 = vand.u32 4294901760, %v6947_v18  ;;  %v7086_v53 = vand.u32 4294901760, %v19326_v47  ;;  %v22178_v16 = vand.u32 4294901760, %v19254_v58  ;;  %7291 = vmatmul.mubr.f32.gmra.mrb[68].mxu0 %v19169_v54  ;;  %v6627_v18 = vpop.permute.xlu1 %6626 }
 0x7c6   :  { %6876 = vmatprep.mubr.f32.mxu1 %v22175_v33  ;;  %v15659_v23 = vpack.c.bf16 %v22177_v34, %v22176_v9  ;;  %15566 = vmatprep.subr.bf16.mxu1 %v15565_v56  ;;  %v22179_v40 = vand.u32 4294901760, %v19256_v63  ;;  %v7073_v0 = vsub.f32 %v19304_v22, %v7072_v60  ;;  %v6955_v14 = vand.u32 4294901760, %v6954_v19  ;;  %v6625_v33 = vpop.permute.xlu0 %6624 }
 0x7c7   :  { %v6981_v46 = vand.u32 4294901760, %v19332_v44  ;;  %v6968_v50 = vsub.f32 %v19323_v43, %v6967_v42  ;;  %v15567_v5 = vpack.c.bf16 %v6941_v32, %v6934_v17  ;;  %7297 = vmatprep.mubr.f32.mxu0 %v19200_v55  ;;  %v7107_v63 = vand.u32 4294901760, %v19348_v7 }
 0x7c8   :  { %v15661_v48 = vpack.c.bf16 %v22179_v40, %v22178_v16  ;;  %15660 = vmatpush3.bf16.msra.mxu0 %v15659_v23  ;;  %6882 = vmatmul.mubr.f32.gmra.mrb[106].mxu1 %v6881_v38  ;;  %v15569_v58 = vpack.c.bf16 %v7067_v41, %v7060_v1  ;;  %v7081_v29 = vand.u32 4294901760, %v7080_v25  ;;  %v7094_v19 = vsub.f32 %v19314_v31, %v7093_v6  ;;  %v22180_v25 = vld [vmem:[#allocation29_spill] sm:$0xff]  ;;  %v6653_v31 = vld [vmem:[#allocation3 + $0x160] sm:$0xff] }
 0x7c9   :  { %v6974_v27 = vand.u32 4294901760, %v19340_v20  ;;  %v6961_v56 = vsub.f32 %v19319_v45, %v6960_v15  ;;  %15568 = vmatpush3.bf16.msra.mxu1 %v15567_v5  ;;  %v15663_v38 = vpack.c.bf16 %v6939_v13, %v6932_v51  ;;  %v15665_v32 = vpack.c.bf16 %v7065_v10, %v7058_v12  ;;  %7112 = vmatprep.mubr.f32.mxu1 %v19092_v3 }
 0x7ca   :  { %15662 = vmatprep.subr.bf16.mxu0 %v15661_v48  ;;  %v7100_v41 = vand.u32 4294901760, %v19352_v62  ;;  %v19513_v17 = vmul.f32 %v22180_v25, %v6627_v18  ;;  %15570 = vmatprep.subr.bf16.mxu1 %v15569_v58  ;;  %v7074_v9 = vand.u32 4294901760, %v7073_v0  ;;  %v7087_v61 = vsub.f32 %v19326_v47, %v7086_v53 }
 0x7cb   :  { %7300 = vmatmul.mubr.f32.gmra.mrb[70].mxu0 %v19219_v36  ;;  %v6982_v21 = vsub.f32 %v19332_v44, %v6981_v46  ;;  %v6969_v2 = vand.u32 4294901760, %v6968_v50  ;;  %v6995_v4 = vand.u32 4294901760, %v19378_v28  ;;  %v15571_v10 = vpack.c.bf16 %v6955_v14, %v6948_v57 }
 0x7cc   :  { %15664 = vmatpush3.bf16.msra.mxu0 %v15663_v38  ;;  %7607 = vmatprep.mubr.f32.mxu0 %v19092_v3  ;;  %v19525_v13 = vmul.f32 %v22180_v25, %v6625_v33  ;;  %v15573_v12 = vpack.c.bf16 %v7081_v29, %v7074_v9  ;;  %v7095_v51 = vand.u32 4294901760, %v7094_v19  ;;  %v7108_v34 = vsub.f32 %v19348_v7, %v7107_v63  ;;  %v6631_v19 = vpop.permute.xlu1 %6630  ;;  %v6629_v33 = vpop.permute.xlu0 %6628 }
 0x7cd   :  { %15666 = vmatprep.subr.bf16.mxu0 %v15665_v32  ;;  %v6975_v23 = vsub.f32 %v19340_v20, %v6974_v27  ;;  %v6962_v1 = vand.u32 4294901760, %v6961_v56  ;;  %v6988_v16 = vand.u32 4294901760, %v19374_v30  ;;  %15572 = vmatpush3.bf16.msra.mxu1 %v15571_v10  ;;  %v15667_v57 = vpack.c.bf16 %v6953_v24, %v6946_v8  ;;  %v6650_v56 = vld [vmem:[#allocation3 + $0x148] sm:$0xff] }
 0x7ce   :  { %v7764_v40 = vand.u32 4294901760, %v19513_v17  ;;  %15574 = vmatprep.subr.bf16.mxu1 %v15573_v12  ;;  %v15669_v48 = vpack.c.bf16 %v7079_v52, %v7072_v60  ;;  %v7088_v0 = vand.u32 4294901760, %v7087_v61  ;;  %v7101_v14 = vsub.f32 %v19352_v62, %v7100_v41  ;;  %v6647_v62 = vld [vmem:[#allocation3 + $0x130] sm:$0xff]  ;;  %v22182_v12 = vld [vmem:[#allocation9_spill] sm:$0xff] }
 0x7cf   :  { %v6983_v50 = vand.u32 4294901760, %v6982_v21  ;;  %v6996_v18 = vsub.f32 %v19378_v28, %v6995_v4  ;;  %v15575_v49 = vpack.c.bf16 %v6969_v2, %v6962_v1  ;;  %v7761_v11 = vand.u32 4294901760, %v19525_v13  ;;  %v22181_v21 = vld [vmem:[#allocation39_spill] sm:$0xff] }
 0x7d0   :  { %15668 = vmatpush3.bf16.msra.mxu0 %v15667_v57  ;;  %v15577_v8 = vpack.c.bf16 %v7095_v51, %v7088_v0  ;;  %v7109_v24 = vand.u32 4294901760, %v7108_v34  ;;  %v6976_v5 = vand.u32 4294901760, %v6975_v23  ;;  %v6989_v22 = vsub.f32 %v19374_v30, %v6988_v16  ;;  %v22183_v34 = vld [vmem:[#allocation10_spill] sm:$0xff] }
 0x7d1   :  { %15670 = vmatprep.subr.bf16.mxu0 %v15669_v48  ;;  %15576 = vmatpush3.bf16.msra.mxu1 %v15575_v49  ;;  %v15671_v59 = vpack.c.bf16 %v6967_v42, %v6960_v15  ;;  %v19554_v52 = vsub.f32 %v19513_v17, %v7764_v40  ;;  %v15673_v60 = vpack.c.bf16 %v7093_v6, %v7086_v53  ;;  %v7102_v58 = vand.u32 4294901760, %v7101_v14  ;;  %v22184_v23 = vld [vmem:[#allocation42_spill] sm:$0xff]  ;;  %v22186_v49 = vld [vmem:[#allocation8_spill] sm:$0xff] }
 0x7d2   :  { %15578 = vmatprep.subr.bf16.mxu1 %v15577_v8  ;;  %v6997_v29 = vand.u32 4294901760, %v6996_v18  ;;  %v15579_v30 = vpack.c.bf16 %v6983_v50, %v6976_v5  ;;  %v19561_v45 = vsub.f32 %v19525_v13, %v7761_v11  ;;  %v6719_v42 = vsel %vm1007_vm2, %v6647_v62, 0  ;;  %v22187_v8 = vld [vmem:[#allocation32_spill] sm:$0xff] }
 0x7d3   :  { %v15581_v43 = vpack.c.bf16 %v7109_v24, %v7102_v58  ;;  %v6990_v15 = vand.u32 4294901760, %v6989_v22  ;;  %v15675_v47 = vpack.c.bf16 %v6981_v46, %v6974_v27  ;;  %v7879_v6 = vand.u32 4294901760, %v19554_v52  ;;  %v6656_v27 = vld [vmem:[#allocation3 + $0x178] sm:$0xff]  ;;  %v22188_v24 = vld [vmem:[#allocation46_spill] sm:$0xff] }
 0x7d4   :  { %15672 = vmatpush3.bf16.msra.mxu0 %v15671_v59  ;;  %v6639_v53 = vmul.f32 %v22180_v25, %v6631_v19  ;;  %v15677_v38 = vpack.c.bf16 %v7107_v63, %v7100_v41  ;;  %v6722_v32 = vsel %vm1007_vm2, %v6650_v56, 0  ;;  %v19573_v9 = vand.u32 4294901760, %v6719_v42  ;;  %v22189_v22 = vld [vmem:[#allocation33_spill] sm:$0xff]  ;;  %v22191_v56 = vld [vmem:[#allocation15_spill] sm:$0xff] }
 0x7d5   :  { %15674 = vmatprep.subr.bf16.mxu0 %v15673_v60  ;;  %15580 = vmatpush3.bf16.msra.mxu1 %v15579_v30  ;;  %v15583_v17 = vpack.c.bf16 %v6997_v29, %v6990_v15  ;;  %v7872_v20 = vand.u32 4294901760, %v19561_v45  ;;  %v6638_v44 = vmul.f32 %v22180_v25, %v6629_v33  ;;  %v6725_v46 = vsel %vm1007_vm2, %v6653_v31, 0  ;;  %v22190_v30 = vld [vmem:[#allocation43_spill] sm:$0xff] }
 0x7d6   :  { %15582 = vmatprep.subr.bf16.mxu1 %v15581_v43  ;;  %v15679_v61 = vpack.c.bf16 %v6995_v4, %v6988_v16  ;;  %v19580_v7 = vand.u32 4294901760, %v6722_v32  ;;  %v19582_v63 = vpack.c.bf16 %v7764_v40, %v7761_v11  ;;  %v7770_v41 = vand.u32 4294901760, %v6639_v53  ;;  %v22185_v40 = vld [vmem:[#allocation7_spill] sm:$0xff]  ;;  %v22192_v43 = vld [vmem:[#allocation30_spill] sm:$0xff] }
 0x7d7   :  { %v7880_v2 = vsub.f32 %v19554_v52, %v7879_v6  ;;  %v19589_v10 = vsub.f32 %v6719_v42, %v19573_v9  ;;  %v19591_v13 = vand.u32 4294901760, %v6725_v46  ;;  %v6728_v28 = vsel %vm1007_vm2, %v6656_v27, 0  ;;  %v22193_v42 = vld [vmem:[#allocation14_spill] sm:$0xff]  ;;  %v22198_v27 = vld [vmem:[#allocation19_spill] sm:$0xff] }
 0x7d8   :  { %15676 = vmatpush3.bf16.msra.mxu0 %v15675_v47  ;;  %v7767_v4 = vand.u32 4294901760, %v6638_v44  ;;  %v7873_v51 = vsub.f32 %v19561_v45, %v7872_v20  ;;  %v19602_v1 = vsub.f32 %v6722_v32, %v19580_v7  ;;  %v19606_v57 = vsub.f32 %v6639_v53, %v7770_v41 }
 0x7d9   :  { %15678 = vmatprep.subr.bf16.mxu0 %v15677_v38  ;;  %15584 = vmatpush3.bf16.msra.mxu1 %v15583_v17  ;;  %v7881_v48 = vand.u32 4294901760, %v7880_v2  ;;  %v19610_v0 = vand.u32 4294901760, %v6728_v28  ;;  %v7831_v14 = vand.u32 4294901760, %v19589_v10  ;;  %v19616_v50 = vsub.f32 %v6725_v46, %v19591_v13  ;;  %v22194_v38 = vld [vmem:[#allocation16_spill] sm:$0xff] }
 0x7da   :  { %15618 = vmatprep.subr.bf16.mxu1 %v22181_v21  ;;  %v19604_v16 = vpack.c.bf16 %v7770_v41, %v7767_v4  ;;  %v19618_v18 = vsub.f32 %v6638_v44, %v7767_v4  ;;  %v7874_v11 = vand.u32 4294901760, %v7873_v51  ;;  %v7893_v5 = vand.u32 4294901760, %v19606_v57  ;;  %v22195_v17 = vld [vmem:[#allocation20_spill] sm:$0xff]  ;;  %v22196_v44 = vld [vmem:[#allocation6_spill] sm:$0xff] }
 0x7db   :  { %v7841_v62 = vand.u32 4294901760, %v19602_v1  ;;  %v19629_v60 = vsub.f32 %v6728_v28, %v19610_v0  ;;  %v7832_v58 = vsub.f32 %v19589_v10, %v7831_v14  ;;  %v7851_v29 = vand.u32 4294901760, %v19616_v50  ;;  %v22199_v51 = vld [vmem:[#allocation18_spill] sm:$0xff] }
 0x7dc   :  { %15680 = vmatpush3.bf16.msra.mxu0 %v15679_v61  ;;  %7114 = vmatmul.mubr.f32.vlgmr.msra.gmra.mrb[108].mxu1 %v22182_v12  ;;  %v15721_v59 = vpack.c.bf16 %v7881_v48, %v7874_v11  ;;  %v7886_v19 = vand.u32 4294901760, %v19618_v18  ;;  %v7894_v33 = vsub.f32 %v19606_v57, %v7893_v5  ;;  %v22197_v46 = vand.u32 4294901760, %v22196_v44  ;;  %v22200_v48 = vld [vmem:[#allocation17_spill] sm:$0xff]  ;;  %v22201_v44 = vld [vmem:[#allocation34_spill] sm:$0xff] }
 0x7dd   :  { %15714 = vmatprep.subr.bf16.mxu0 %v19582_v63  ;;  %15620 = vmatpush3.bf16.msra.mxu1 %v22183_v34  ;;  %v7842_v15 = vsub.f32 %v19602_v1, %v7841_v62  ;;  %v7861_v47 = vand.u32 4294901760, %v19629_v60  ;;  %v7833_v31 = vand.u32 4294901760, %v7832_v58  ;;  %v7852_v53 = vsub.f32 %v19616_v50, %v7851_v29 }
 0x7de   :  { %7119 = vmatprep.mubr.f32.mxu1 %v22184_v23  ;;  %15622 = vmatprep.subr.bf16.mxu1 %v22185_v40  ;;  %v7887_v32 = vsub.f32 %v19618_v18, %v7886_v19  ;;  %v7895_v41 = vand.u32 4294901760, %v7894_v33  ;;  %v15729_v33 = vpack.c.bf16 %v19554_v52, %v19561_v45  ;;  %v15749_v52 = vpack.c.bf16 %v7893_v5, %v7886_v19  ;;  %v6701_v5 = vpop.permute.xlu0 %6700 }
 0x7df   :  { %7609 = vmatmul.mubr.f32.vlgmr.msra.gmra.mrb[72].mxu0 %v22182_v12  ;;  %v7843_v61 = vand.u32 4294901760, %v7842_v15  ;;  %v7862_v2 = vsub.f32 %v19629_v60, %v7861_v47  ;;  %v7853_v28 = vand.u32 4294901760, %v7852_v53  ;;  %v22202_v15 = vld [vmem:[#allocation21_spill] sm:$0xff]  ;;  %v22204_v53 = vld [vmem:[#allocation23_spill] sm:$0xff] }
 0x7e0   :  { %15716 = vmatpush3.bf16.msra.mxu0 %v19582_v63  ;;  %7614 = vmatprep.mubr.f32.mxu0 %v22184_v23  ;;  %v7888_v4 = vand.u32 4294901760, %v7887_v32  ;;  %v22205_v32 = vld [vmem:[#allocation35_spill] sm:$0xff] }
 0x7e1   :  { %7121 = vmatmul.mubr.f32.gmra.mrb[110].mxu1 %v22186_v49  ;;  %15718 = vmatprep.subr.bf16.mxu0 %v19604_v16  ;;  %v7863_v58 = vand.u32 4294901760, %v7862_v2 }
 0x7e2   :  { %15624 = vmatpush3.bf16.msra.mxu1 %v22187_v8  ;;  %7126 = vmatprep.mubr.f32.mxu1 %v22188_v24  ;;  %v15725_v11 = vpack.c.bf16 %v7895_v41, %v7888_v4 }
 0x7e3   :  { %15626 = vmatprep.subr.bf16.mxu1 %v22189_v22  ;;  %7616 = vmatmul.mubr.f32.gmra.mrb[74].mxu0 %v22186_v49 }
 0x7e4   :  { %15720 = vmatpush3.bf16.msra.mxu0 %v19604_v16  ;;  %7621 = vmatprep.mubr.f32.mxu0 %v22188_v24 }
 0x7e5   :  { %7128 = vmatmul.mubr.f32.gmra.mrb[112].mxu1 %v22190_v30  ;;  %15722 = vmatprep.subr.bf16.mxu0 %v15721_v59 }
 0x7e6   :  { %15628 = vmatpush3.bf16.msra.mxu1 %v22191_v56  ;;  %7133 = vmatprep.mubr.f32.mxu1 %v22192_v43 }
 0x7e7   :  { %15630 = vmatprep.subr.bf16.mxu1 %v22193_v42  ;;  %7623 = vmatmul.mubr.f32.gmra.mrb[76].mxu0 %v22190_v30 }
 0x7e8   :  { %7628 = vmatprep.mubr.f32.mxu0 %v22192_v43 }
 0x7e9   :  { %7135 = vmatmul.mubr.f32.gmra.mrb[114].mxu1 %v22194_v38 }
 0x7ea   :  { %15632 = vmatpush3.bf16.msra.mxu1 %v22195_v17  ;;  %7404 = vmatprep.mubr.f32.mxu1 %v22197_v46  ;;  %v22206_v46 = vand.u32 4294901760, %v19146_v26  ;;  %v22209_v26 = vand.u32 4294901760, %v19164_v39  ;;  %v22211_v39 = vand.u32 4294901760, %v19200_v55 }
 0x7eb   :  { %15634 = vmatprep.subr.bf16.mxu1 %v22198_v27  ;;  %7630 = vmatmul.mubr.f32.gmra.mrb[78].mxu0 %v22194_v38 }
 0x7ec   :  { %14509 = vmatprep.mubr.f32.mxu0 %v7833_v31  ;;  %v22203_v31 = vld [vmem:[#allocation11_spill] sm:$0xff] }
 0x7ee   :  { %15636 = vmatpush3.bf16.msra.mxu1 %v22199_v51 }
 0x7ef   :  { %15638 = vmatprep.subr.bf16.mxu1 %v22200_v48  ;;  %14510 = vmatmul.mubr.f32.vlgmr.msra.gmra.mrb[80].mxu0 %v7843_v61  ;;  %v22207_v61 = vand.u32 4294901760, %v19151_v37  ;;  %v15745_v37 = vpack.c.bf16 %v7879_v6, %v7872_v20 }
 0x7f0   :  { %15724 = vmatpush3.bf16.msra.mxu0 %v15721_v59  ;;  %14512 = vmatprep.mubr.f32.mxu0 %v7853_v28  ;;  %v15733_v59 = vpack.c.bf16 %v19606_v57, %v19618_v18 }
 0x7f1   :  { %15726 = vmatprep.subr.bf16.mxu0 %v15725_v11 }
 0x7f2   :  { %15640 = vmatpush3.bf16.msra.mxu1 %v22201_v44 }
 0x7f3   :  { %15642 = vmatprep.subr.bf16.mxu1 %v22202_v15  ;;  %14513 = vmatmul.mubr.f32.gmra.mrb[82].mxu0 %v7863_v58 }
 0x7f4   :  { %15728 = vmatpush3.bf16.msra.mxu0 %v15725_v11  ;;  %14523 = vmatprep.mubr.f32.mxu0 %v19573_v9 }
 0x7f5   :  { %15730 = vmatprep.subr.bf16.mxu0 %v15729_v33 }
 0x7f6   :  { %15644 = vmatpush3.bf16.msra.mxu1 %v22203_v31 }
 0x7f7   :  { %15646 = vmatprep.subr.bf16.mxu1 %v22204_v53  ;;  %14524 = vmatmul.mubr.f32.vlgmr.msra.gmra.mrb[80].mxu0 %v19580_v7 }
 0x7f8   :  { %15732 = vmatpush3.bf16.msra.mxu0 %v15729_v33  ;;  %14526 = vmatprep.mubr.f32.mxu0 %v19591_v13 }
 0x7f9   :  { %15734 = vmatprep.subr.bf16.mxu0 %v15733_v59 }
 0x7fa   :  { %15648 = vmatpush3.bf16.msra.mxu1 %v22205_v32 }
 0x7fb   :  { %15682 = vmatprep.subr.bf16.mxu1 %v22181_v21  ;;  %14527 = vmatmul.mubr.f32.gmra.mrb[82].mxu0 %v19610_v0  ;;  %v22208_v21 = vand.u32 4294901760, %v19154_v35  ;;  %v22210_v35 = vand.u32 4294901760, %v19169_v54  ;;  %v22212_v54 = vand.u32 4294901760, %v19219_v36 }
 0x7fc   :  { %15736 = vmatpush3.bf16.msra.mxu0 %v15733_v59  ;;  %14537 = vmatprep.mubr.f32.mxu0 %v19589_v10 }
 0x7fd   :  { %15738 = vmatprep.subr.bf16.mxu0 %v19582_v63  ;;  %7408 = vmatmul.mubr.f32.vlgmr.msra.gmra.mrb[116].mxu1 %v22206_v46 }
 0x7fe   :  { %15684 = vmatpush3.bf16.msra.mxu1 %v22183_v34  ;;  %7415 = vmatprep.mubr.f32.mxu1 %v22207_v61 }
 0x7ff   :  { %15686 = vmatprep.subr.bf16.mxu1 %v22185_v40  ;;  %14538 = vmatmul.mubr.f32.vlgmr.msra.gmra.mrb[80].mxu0 %v19602_v1 }
 0x800   :  { %15740 = vmatpush3.bf16.msra.mxu0 %v19582_v63  ;;  %14540 = vmatprep.mubr.f32.mxu0 %v19616_v50 }
 0x801   :  { %15742 = vmatprep.subr.bf16.mxu0 %v19604_v16  ;;  %7419 = vmatmul.mubr.f32.gmra.mrb[118].mxu1 %v22208_v21 }
 0x802   :  { %15688 = vmatpush3.bf16.msra.mxu1 %v22187_v8  ;;  %7426 = vmatprep.mubr.f32.mxu1 %v22209_v26 }
 0x803   :  { %15690 = vmatprep.subr.bf16.mxu1 %v22189_v22  ;;  %14541 = vmatmul.mubr.f32.gmra.mrb[82].mxu0 %v19629_v60 }
 0x804   :  { %15744 = vmatpush3.bf16.msra.mxu0 %v19604_v16  ;;  %14551 = vmatprep.mubr.f32.mxu0 %v7831_v14 }
 0x805   :  { %15746 = vmatprep.subr.bf16.mxu0 %v15745_v37  ;;  %7430 = vmatmul.mubr.f32.gmra.mrb[120].mxu1 %v22210_v35 }
 0x806   :  { %15692 = vmatpush3.bf16.msra.mxu1 %v22191_v56  ;;  %7437 = vmatprep.mubr.f32.mxu1 %v22211_v39 }
 0x807   :  { %15694 = vmatprep.subr.bf16.mxu1 %v22193_v42  ;;  %14552 = vmatmul.mubr.f32.vlgmr.msra.gmra.mrb[80].mxu0 %v7841_v62  ;;  %v6706_v42 = vpop.permute.xlu1 %6705 }
 0x808   :  { %15748 = vmatpush3.bf16.msra.mxu0 %v15745_v37  ;;  %14554 = vmatprep.mubr.f32.mxu0 %v7851_v29 }
 0x809   :  { %15750 = vmatprep.subr.bf16.mxu0 %v15749_v52  ;;  %7441 = vmatmul.mubr.f32.gmra.mrb[122].mxu1 %v22212_v54 }
 0x80a   :  { %15696 = vmatpush3.bf16.msra.mxu1 %v22195_v17  ;;  %7732 = vmatprep.mubr.f32.mxu1 %v19092_v3 }
 0x80b   :  { %15698 = vmatprep.subr.bf16.mxu1 %v22198_v27  ;;  %14555 = vmatmul.mubr.f32.gmra.mrb[82].mxu0 %v7861_v47  ;;  %v6716_v46 = vpop.permute.xlu1 %6715 }
 0x80c   :  { %15752 = vmatpush3.bf16.msra.mxu0 %v15749_v52  ;;  %14565 = vmatprep.mubr.f32.mxu0 %v19573_v9 }
 0x80d   :  { %15754 = vmatprep.subr.bf16.mxu0 %v19582_v63 }
 0x80e   :  { %15700 = vmatpush3.bf16.msra.mxu1 %v22199_v51 }
 0x80f   :  { %15702 = vmatprep.subr.bf16.mxu1 %v22200_v48  ;;  %14566 = vmatmul.mubr.f32.vlgmr.msra.gmra.mrb[80].mxu0 %v19580_v7  ;;  %v6711_v48 = vpop.permute.xlu0 %6710 }
 0x810   :  { %15756 = vmatpush3.bf16.msra.mxu0 %v19582_v63  ;;  %14568 = vmatprep.mubr.f32.mxu0 %v19591_v13 }
 0x811   :  { %15758 = vmatprep.subr.bf16.mxu0 %v19604_v16 }
 0x812   :  { %15704 = vmatpush3.bf16.msra.mxu1 %v22201_v44 }
 0x813   :  { %15706 = vmatprep.subr.bf16.mxu1 %v22202_v15  ;;  %14569 = vmatmul.mubr.f32.gmra.mrb[82].mxu0 %v19610_v0 }
 0x814   :  { %15760 = vmatpush3.bf16.msra.mxu0 %v19604_v16  ;;  %14579 = vmatprep.mubr.f32.mxu0 %v19573_v9 }
 0x816   :  { %15708 = vmatpush3.bf16.msra.mxu1 %v22203_v31 }
 0x817   :  { %15710 = vmatprep.subr.bf16.mxu1 %v22204_v53  ;;  %14580 = vmatmul.mubr.f32.vlgmr.msra.gmra.mrb[80].mxu0 %v19580_v7 }
 0x818   :  { %14582 = vmatprep.mubr.f32.mxu0 %v19591_v13 }
 0x81a   :  { %15712 = vmatpush3.bf16.msra.mxu1 %v22205_v32 }
 0x81b   :  { %14583 = vmatmul.mubr.f32.gmra.mrb[82].mxu0 %v19610_v0 }
 0x81d   :  { %7734 = vmatmul.mubr.f32.vlgmr.msra.gmra.mrb[124].mxu1 %v22182_v12 }
 0x81e   :  { %7739 = vmatprep.mubr.f32.mxu1 %v22184_v23 }
 0x821   :  { %7741 = vmatmul.mubr.f32.gmra.mrb[126].mxu1 %v22186_v49 }
 0x822   :  { %7746 = vmatprep.mubr.f32.mxu1 %v22188_v24 }
 0x825   :  { %7748 = vmatmul.mubr.f32.gmra.mrb[128].mxu1 %v22190_v30 }
 0x826   :  { %7753 = vmatprep.mubr.f32.mxu1 %v22192_v43 }
 0x829   :  { %7755 = vmatmul.mubr.f32.gmra.mrb[130].mxu1 %v22194_v38 }
 0x88d   :  { %v13249_v3 = vpop.f32.mrb[100].mxu1 }
 0x88e   :  { %v13250_v36 = vpop.f32.mrb[101].mxu1 }
 0x88f   :  { %v13251_v55 = vadd.f32 %v13250_v36, %v13249_v3 }
 0x890   :  { %v13337_v45 = vpop.f32.mrb[64].mxu0 }
 0x891   :  { %v13338_v6 = vpop.f32.mrb[65].mxu0  ;;  %v6839_v62 = vadd.f32 %v13251_v55, %v6701_v5 }
 0x892   :  { %v13252_v9 = vpop.f32.mrb[102].mxu1  ;;  %v13339_v20 = vadd.f32 %v13338_v6, %v13337_v45 }
 0x893   :  { %v13253_v7 = vpop.f32.mrb[103].mxu1 }
 0x894   :  { %v13254_v63 = vadd.f32 %v13253_v7, %v13252_v9  ;;  %v13340_v10 = vpop.f32.mrb[66].mxu0 }
 0x895   :  { %v13341_v13 = vpop.f32.mrb[67].mxu0 }
 0x896   :  { %v13342_v34 = vadd.f32 %v13341_v13, %v13340_v10  ;;  %v6854_v38 = vadd.f32 %v13254_v63, %v6706_v42 }
 0x897   :  { %v13255_v12 = vpop.f32.mrb[104].mxu1 }
 0x898   :  { %v13256_v23 = vpop.f32.mrb[105].mxu1  ;;  %v13343_v16 = vpop.f32.mrb[68].mxu0 }
 0x899   :  { %v13257_v1 = vadd.f32 %v13256_v23, %v13255_v12  ;;  %v13344_v57 = vpop.f32.mrb[69].mxu0 }
 0x89a   :  { %v13345_v0 = vadd.f32 %v13344_v57, %v13343_v16 }
 0x89b   :  { %v13258_v40 = vpop.f32.mrb[106].mxu1  ;;  %v6869_v58 = vadd.f32 %v13257_v1, %v6711_v48 }
 0x89c   :  { %v13259_v14 = vpop.f32.mrb[107].mxu1 }
 0x89d   :  { %v13260_v50 = vadd.f32 %v13259_v14, %v13258_v40 }
 0x89e   :  { %v13346_v18 = vpop.f32.mrb[70].mxu0 }
 0x89f   :  { %v13347_v49 = vpop.f32.mrb[71].mxu0  ;;  %v6884_v21 = vadd.f32 %v13260_v50, %v6716_v46 }
 0x8a0   :  { %v13348_v8 = vadd.f32 %v13347_v49, %v13346_v18 }
 0x8af   :  { %v13293_v24 = vpop.f32.mrb[108].mxu1 }
 0x8b0   :  { %v13294_v22 = vpop.f32.mrb[109].mxu1 }
 0x8b1   :  { %v13295_v60 = vadd.f32 %v13294_v22, %v13293_v24 }
 0x8b2   :  { %v13425_v29 = vpop.f32.mrb[72].mxu0 }
 0x8b3   :  { %v13426_v19 = vpop.f32.mrb[73].mxu0  ;;  %v7116_v30 = vadd.f32 %v13295_v60, %v6839_v62 }
 0x8b4   :  { %v13296_v56 = vpop.f32.mrb[110].mxu1  ;;  %v13427_v43 = vadd.f32 %v13426_v19, %v13425_v29 }
 0x8b5   :  { %v13297_v47 = vpop.f32.mrb[111].mxu1  ;;  %v7275_v41 = vadd.f32 %v13339_v20, %v7116_v30 }
 0x8b6   :  { %v13298_v17 = vadd.f32 %v13297_v47, %v13296_v56  ;;  %v13428_v27 = vpop.f32.mrb[74].mxu0 }
 0x8b7   :  { %v13429_v2 = vpop.f32.mrb[75].mxu0 }
 0x8b8   :  { %v7123_v28 = vadd.f32 %v13298_v17, %v6854_v38  ;;  %v13299_v4 = vpop.f32.mrb[112].mxu1  ;;  %v13430_v51 = vadd.f32 %v13429_v2, %v13428_v27 }
 0x8b9   :  { %v13300_v11 = vpop.f32.mrb[113].mxu1 }
 0x8ba   :  { %v13301_v44 = vadd.f32 %v13300_v11, %v13299_v4  ;;  %v13431_v15 = vpop.f32.mrb[76].mxu0  ;;  %v7284_v33 = vadd.f32 %v13342_v34, %v7123_v28  ;;  %v22215_v28 = vld [vmem:[#allocation41_spill] sm:$0xff] }
 0x8bb   :  { %v13432_v31 = vpop.f32.mrb[77].mxu0 }
 0x8bc   :  { %v7130_v53 = vadd.f32 %v13301_v44, %v6869_v58  ;;  %v13302_v59 = vpop.f32.mrb[114].mxu1  ;;  %v13433_v32 = vadd.f32 %v13432_v31, %v13431_v15 }
 0x8bd   :  { %v13303_v61 = vpop.f32.mrb[115].mxu1 }
 0x8be   :  { %v13304_v26 = vadd.f32 %v13303_v61, %v13302_v59  ;;  %v13434_v37 = vpop.f32.mrb[78].mxu0  ;;  %v7293_v35 = vadd.f32 %v13345_v0, %v7130_v53  ;;  %v22217_v53 = vld [vmem:[#allocation44_spill] sm:$0xff] }
 0x8bf   :  { %v13435_v39 = vpop.f32.mrb[79].mxu0 }
 0x8c0   :  { %v7137_v52 = vadd.f32 %v13304_v26, %v6884_v21  ;;  %v13436_v54 = vadd.f32 %v13435_v39, %v13434_v37 }
 0x8c2   :  { %v7302_v3 = vadd.f32 %v13348_v8, %v7137_v52  ;;  %v22219_v52 = vld [vmem:[#allocation45_spill] sm:$0xff] }
 0x8d0   :  { %v13381_v36 = vpop.f32.mrb[116].mxu1 }
 0x8d1   :  { %v13382_v55 = vpop.f32.mrb[117].mxu1 }
 0x8d2   :  { %v13383_v45 = vadd.f32 %v13382_v55, %v13381_v36 }
 0x8d4   :  { %v7410_v6 = vadd.f32 %v13383_v45, %v7275_v41  ;;  %v13384_v9 = vpop.f32.mrb[118].mxu1 }
 0x8d5   :  { %v13385_v20 = vpop.f32.mrb[119].mxu1 }
 0x8d6   :  { %v13386_v7 = vadd.f32 %v13385_v20, %v13384_v9  ;;  %v7611_v63 = vadd.f32 %v13427_v43, %v7410_v6  ;;  %v22213_v43 = vld [vmem:[#allocation40_spill] sm:$0xff] }
 0x8d8   :  { %v7421_v10 = vadd.f32 %v13386_v7, %v7284_v33  ;;  %v13387_v13 = vpop.f32.mrb[120].mxu1 }
 0x8d9   :  { %v13388_v12 = vpop.f32.mrb[121].mxu1 }
 0x8da   :  { %v13389_v34 = vadd.f32 %v13388_v12, %v13387_v13  ;;  %v7618_v23 = vadd.f32 %v13430_v51, %v7421_v10 }
 0x8dc   :  { %v7432_v1 = vadd.f32 %v13389_v34, %v7293_v35  ;;  %v13390_v16 = vpop.f32.mrb[122].mxu1 }
 0x8dd   :  { %v13391_v57 = vpop.f32.mrb[123].mxu1 }
 0x8de   :  { %v13392_v40 = vadd.f32 %v13391_v57, %v13390_v16  ;;  %v7625_v0 = vadd.f32 %v13433_v32, %v7432_v1  ;;  %v8552_v16 = vld [vmem:[#allocation3 + $0x188] sm:$0xff] }
 0x8df   :  { %v19864_v57 = vand.u32 4294901760, %v8552_v16 }
 0x8e0   :  { %v7443_v14 = vadd.f32 %v13392_v40, %v7302_v3 }
 0x8e1   :  { %22223 = vst [vmem:[#allocation9_spill] sm:$0xff] %v19864_v57  ;;  %v19867_v40 = vsub.f32 %v8552_v16, %v19864_v57  ;;  %9018 = vmatprep.mubr.f32.mxu0 %v19864_v57  ;;  %v8557_v16 = vld [vmem:[#allocation3 + $0x1b0] sm:$0xff] }
 0x8e2   :  { %v7632_v50 = vadd.f32 %v13436_v54, %v7443_v14  ;;  %v12219_v14 = vld [vmem:[%s21388_s4 + $0x80] sm:$0xff] }
 0x8e3   :  { %22224 = vst [vmem:[#allocation10_spill] sm:$0xff] %v19867_v40 }
 0x8ea   :  { %v14581_v18 = vpop.f32.mrb[80].mxu0 }
 0x8eb   :  { %v8352_v49 = vpop.f32.mrb[81].mxu0 }
 0x8ee   :  { %v14584_v8 = vpop.f32.mrb[82].mxu0 }
 0x8ef   :  { %v8364_v24 = vpop.f32.mrb[83].mxu0 }
 0x8f0   :  { %v13469_v5 = vpop.f32.mrb[124].mxu1 }
 0x8f1   :  { %v13470_v22 = vpop.f32.mrb[125].mxu1 }
 0x8f2   :  { %v13471_v62 = vadd.f32 %v13470_v22, %v13469_v5  ;;  %v22225_v22 = vld [vmem:[#allocation13_spill] sm:$0xff] }
 0x8f4   :  { %v7736_v60 = vadd.f32 %v13471_v62, %v7611_v63  ;;  %v13472_v29 = vpop.f32.mrb[126].mxu1 }
 0x8f5   :  { %v13473_v19 = vpop.f32.mrb[127].mxu1 }
 0x8f6   :  { %v16262_v30 = vadd.f32 %v8352_v49, %v7736_v60  ;;  %v13474_v56 = vadd.f32 %v13473_v19, %v13472_v29  ;;  %v12220_v49 = vld [vmem:[%s21388_s4 + $0x88] sm:$0xff] }
 0x8f8   :  { %v8374_v42 = vadd.f32 %v16262_v30, %v22213_v43  ;;  %v7743_v47 = vadd.f32 %v13474_v56, %v7618_v23  ;;  %v13475_v38 = vpop.f32.mrb[128].mxu1  ;;  %v8551_v43 = vld [vmem:[#allocation3 + $0x180] sm:$0xff] }
 0x8f9   :  { %v13476_v17 = vpop.f32.mrb[129].mxu1 }
 0x8fa   :  { %v19756_v27 = vmax.f32 %v8374_v42, 0.0  ;;  %v16261_v41 = vadd.f32 %v14581_v18, %v7743_v47  ;;  %v13477_v2 = vadd.f32 %v13476_v17, %v13475_v38 }
 0x8fc   :  { %22214 = vst [vmem:[#allocation24_spill] sm:$0xff] %v19756_v27  ;;  %v8375_v4 = vadd.f32 %v16261_v41, %v22215_v28  ;;  %v7750_v51 = vadd.f32 %v13477_v2, %v7625_v0  ;;  %v13478_v48 = vpop.f32.mrb[130].mxu1  ;;  %8386 = vrot.lane.b32.xlu0 %v19756_v27, %s16452_s1  ;;  %v8685_v11 = vand.u32 4294901760, %v19756_v27  ;;  %v21662_v0 = vand.u32 4294901760, %v19867_v40  ;;  %v8555_v41 = vld [vmem:[#allocation3 + $0x1a0] sm:$0xff] }
 0x8fd   :  { %v13479_v58 = vpop.f32.mrb[131].mxu1 }
 0x8fe   :  { %v19762_v44 = vmax.f32 %v8375_v4, 0.0  ;;  %v16264_v15 = vadd.f32 %v8364_v24, %v7750_v51  ;;  %v13480_v33 = vadd.f32 %v13479_v58, %v13478_v48  ;;  %v19765_v31 = vsub.f32 %v19756_v27, %v8685_v11  ;;  %v12222_v24 = vld [vmem:[%s21388_s4 + $0x98] sm:$0xff]  ;;  %v22227_v4 = vld [vmem:[#allocation22_spill] sm:$0xff] }
 0x8ff   :  { %v19904_v48 = vand.u32 4294901760, %v8551_v43 }
 0x900   :  { %22216 = vst [vmem:[#allocation37_spill] sm:$0xff] %v19762_v44  ;;  %v8376_v59 = vadd.f32 %v16264_v15, %v22217_v53  ;;  %v7757_v32 = vadd.f32 %v13480_v33, %v7632_v50  ;;  %8388 = vrot.lane.b32.xlu1 %v19762_v44, %s16452_s1  ;;  %8470 = vrot.lane.b32.xlu0 %v19756_v27, %s16453_s2  ;;  %v8688_v46 = vand.u32 4294901760, %v19762_v44  ;;  %v8908_v61 = vand.u32 4294901760, %v19765_v31 }
 0x901   :  { %v8735_v50 = vsub.f32 %v19867_v40, %v21662_v0  ;;  %22228 = vst [vmem:[#allocation7_spill] sm:$0xff] %v19904_v48 }
 0x902   :  { %v19774_v21 = vmax.f32 %v8376_v59, 0.0  ;;  %v16263_v26 = vadd.f32 %v14584_v8, %v7757_v32  ;;  %v19776_v37 = vpack.c.bf16 %v8688_v46, %v8685_v11  ;;  %v19779_v35 = vsub.f32 %v19762_v44, %v8688_v46  ;;  %v12221_v8 = vld [vmem:[%s21388_s4 + $0x90] sm:$0xff]  ;;  %v8554_v11 = vld [vmem:[#allocation3 + $0x198] sm:$0xff] }
 0x903   :  { %v8909_v39 = vsub.f32 %v19765_v31, %v8908_v61  ;;  %v8736_v18 = vand.u32 4294901760, %v8735_v50  ;;  %v19923_v32 = vand.u32 4294901760, %v8555_v41 }
 0x904   :  { %22218 = vst [vmem:[#allocation12_spill] sm:$0xff] %v19774_v21  ;;  %v8377_v54 = vadd.f32 %v16263_v26, %v22219_v52  ;;  %8472 = vrot.lane.b32.xlu1 %v19762_v44, %s16453_s2  ;;  %8406 = vrot.lane.b32.xlu0 %v19756_v27, %s16454_s6  ;;  %v8915_v3 = vand.u32 4294901760, %v19779_v35  ;;  %v8691_v36 = vand.u32 4294901760, %v19774_v21 }
 0x905   :  { %15762 = vmatprep.subr.bf16.mxu1 %v19776_v37  ;;  %v8910_v20 = vand.u32 4294901760, %v8909_v39  ;;  %8737 = vmatprep.mubr.f32.mxu1 %v8736_v18  ;;  %22230 = vst [vmem:[#allocation32_spill] sm:$0xff] %v19923_v32 }
 0x906   :  { %v19792_v45 = vmax.f32 %v8377_v54, 0.0  ;;  %v8916_v6 = vsub.f32 %v19779_v35, %v8915_v3  ;;  %v19795_v9 = vpack.c.bf16 %v8915_v3, %v8908_v61  ;;  %v19805_v10 = vsub.f32 %v19774_v21, %v8691_v36  ;;  %v22231_v61 = vld [vmem:[#allocation25_spill] sm:$0xff] }
 0x907   :  { %v19930_v54 = vand.u32 4294901760, %v8554_v11 }
 0x908   :  { %22220 = vst [vmem:[#allocation36_spill] sm:$0xff] %v19792_v45  ;;  %22221 = vst [vmem:[#allocation38_spill] sm:$0xff] %v19795_v9  ;;  %8408 = vrot.lane.b32.xlu1 %v19762_v44, %s16454_s6  ;;  %8490 = vrot.lane.b32.xlu0 %v19756_v27, %s16455_s7  ;;  %v8917_v7 = vand.u32 4294901760, %v8916_v6  ;;  %v8694_v63 = vand.u32 4294901760, %v19792_v45  ;;  %v8922_v34 = vand.u32 4294901760, %v19805_v10 }
 0x909   :  { %22232 = vst [vmem:[#allocation46_spill] sm:$0xff] %v19930_v54 }
 0x90a   :  { %v15793_v13 = vpack.c.bf16 %v8917_v7, %v8910_v20  ;;  %v19810_v12 = vsub.f32 %v19792_v45, %v8694_v63  ;;  %v19913_v15 = vpack.c.bf16 %v8694_v63, %v8691_v36  ;;  %v8923_v33 = vsub.f32 %v19805_v10, %v8922_v34  ;;  %v8558_v7 = vld [vmem:[#allocation3 + $0x1b8] sm:$0xff] }
 0x90b   :  { %v19938_v20 = vsub.f32 %v8551_v43, %v19904_v48 }
 0x90c   :  { %8492 = vrot.lane.b32.xlu1 %v19762_v44, %s16455_s7  ;;  %8426 = vrot.lane.b32.xlu0 %v19756_v27, %s16456_s8  ;;  %v8929_v23 = vand.u32 4294901760, %v19810_v12  ;;  %22229 = vst [vmem:[#allocation8_spill] sm:$0xff] %v19913_v15 }
 0x90d   :  { %15794 = vmatprep.subr.bf16.mxu0 %v15793_v13  ;;  %22233 = vst [vmem:[#allocation33_spill] sm:$0xff] %v19938_v20  ;;  %v22234_v13 = vld [vmem:[#allocation26_spill] sm:$0xff] }
 0x90e   :  { %v19822_v1 = vpack.c.bf16 %v8929_v23, %v8922_v34  ;;  %v8930_v59 = vsub.f32 %v19810_v12, %v8929_v23  ;;  %v8924_v23 = vand.u32 4294901760, %v8923_v33 }
 0x910   :  { %22222 = vst [vmem:[#allocation39_spill] sm:$0xff] %v19822_v1  ;;  %8428 = vrot.lane.b32.xlu1 %v19762_v44, %s16456_s8  ;;  %8510 = vrot.lane.b32.xlu0 %v19756_v27, %s16457_s9 }
 0x914   :  { %8512 = vrot.lane.b32.xlu1 %v19762_v44, %s16457_s9  ;;  %8446 = vrot.lane.b32.xlu0 %v19756_v27, %s16458_s10 }
 0x918   :  { %8448 = vrot.lane.b32.xlu1 %v19762_v44, %s16458_s10  ;;  %8390 = vrot.lane.b32.xlu0 %v19774_v21, %s16452_s1 }
 0x91c   :  { %8392 = vrot.lane.b32.xlu1 %v19792_v45, %s16452_s1  ;;  %8474 = vrot.lane.b32.xlu0 %v19774_v21, %s16453_s2 }
 0x920   :  { %8476 = vrot.lane.b32.xlu1 %v19792_v45, %s16453_s2  ;;  %8410 = vrot.lane.b32.xlu0 %v19774_v21, %s16454_s6 }
 0x924   :  { %8412 = vrot.lane.b32.xlu1 %v19792_v45, %s16454_s6  ;;  %8494 = vrot.lane.b32.xlu0 %v19774_v21, %s16455_s7 }
 0x928   :  { %8496 = vrot.lane.b32.xlu1 %v19792_v45, %s16455_s7  ;;  %8430 = vrot.lane.b32.xlu0 %v19774_v21, %s16456_s8 }
 0x92c   :  { %8432 = vrot.lane.b32.xlu1 %v19792_v45, %s16456_s8  ;;  %8514 = vrot.lane.b32.xlu0 %v19774_v21, %s16457_s9 }
 0x930   :  { %8516 = vrot.lane.b32.xlu1 %v19792_v45, %s16457_s9  ;;  %8450 = vrot.lane.b32.xlu0 %v19774_v21, %s16458_s10 }
 0x934   :  { %8452 = vrot.lane.b32.xlu1 %v19792_v45, %s16458_s10  ;;  %8530 = vrot.lane.b32.xlu0 %v19756_v27, %s16459_s11 }
 0x938   :  { %8532 = vrot.lane.b32.xlu1 %v19762_v44, %s16459_s11  ;;  %8534 = vrot.lane.b32.xlu0 %v19774_v21, %s16459_s11 }
 0x93c   :  { %8536 = vrot.lane.b32.xlu1 %v19792_v45, %s16459_s11  ;;  %8606 = vperm.xlu0 %16422, %v12219_v14  }
 0x940   :  { %8611 = vperm.xlu1 %16423, %v12220_v49   ;;  %8616 = vperm.xlu0 %16422, %v12221_v8   ;;  %v8931_v49 = vand.u32 4294901760, %v8930_v59  ;;  %v19948_v8 = vsub.f32 %v8555_v41, %v19923_v32  ;;  %v22240_v41 = vld [vmem:[#allocation27_spill] sm:$0xff] }
 0x942   :  { %22236 = vst [vmem:[#allocation15_spill] sm:$0xff] %v19948_v8 }
 0x944   :  { %8621 = vperm.xlu1 %16423, %v12222_v24  }
 0x96e   :  { %v8387_v5 = vpop.permute.xlu0 %8386 }
 0x96f   :  { %v8398_v62 = vmul.f32 %v22225_v22, %v8387_v5 }
 0x971   :  { %v8637_v60 = vand.u32 4294901760, %v8398_v62 }
 0x972   :  { %v8389_v29 = vpop.permute.xlu1 %8388  ;;  %v8471_v19 = vpop.permute.xlu0 %8470 }
 0x973   :  { %v19893_v30 = vsub.f32 %v8398_v62, %v8637_v60  ;;  %v8399_v56 = vmul.f32 %v22225_v22, %v8389_v29  ;;  %v19902_v51 = vmul.f32 %v22227_v4, %v8471_v19  ;;  %v19952_v29 = vsub.f32 %v8554_v11, %v19930_v54 }
 0x974   :  { %v19954_v19 = vand.u32 4294901760, %v8558_v7 }
 0x975   :  { %v8640_v42 = vand.u32 4294901760, %v8399_v56  ;;  %v8796_v47 = vand.u32 4294901760, %v19893_v30  ;;  %v21668_v36 = vand.u32 4294901760, %v19902_v51  ;;  %22237 = vst [vmem:[#allocation30_spill] sm:$0xff] %v19952_v29 }
 0x976   :  { %v8473_v38 = vpop.permute.xlu1 %8472  ;;  %v8407_v17 = vpop.permute.xlu0 %8406  ;;  %22238 = vst [vmem:[#allocation14_spill] sm:$0xff] %v19954_v19 }
 0x977   :  { %v19897_v2 = vpack.c.bf16 %v8640_v42, %v8637_v60  ;;  %v19899_v28 = vsub.f32 %v8399_v56, %v8640_v42  ;;  %v19907_v58 = vmul.f32 %v22227_v4, %v8473_v38  ;;  %v8797_v46 = vsub.f32 %v19893_v30, %v8796_v47 }
 0x978   :  { %v19927_v26 = vmul.f32 %v22231_v61, %v8407_v17  ;;  %v19959_v56 = vsub.f32 %v19902_v51, %v21668_v36  ;;  %v21663_v42 = vand.u32 4294901760, %v19938_v20 }
 0x979   :  { %22226 = vst [vmem:[#allocation42_spill] sm:$0xff] %v19897_v2  ;;  %v8803_v53 = vand.u32 4294901760, %v19899_v28  ;;  %15764 = vmatpush3.bf16.msra.mxu1 %v19897_v2  ;;  %v21666_v63 = vand.u32 4294901760, %v19907_v58  ;;  %v8798_v24 = vand.u32 4294901760, %v8797_v46  ;;  %v15797_v46 = vpack.c.bf16 %v8931_v49, %v8924_v23 }
 0x97a   :  { %v8409_v39 = vpop.permute.xlu1 %8408  ;;  %v8491_v52 = vpop.permute.xlu0 %8490  ;;  %15766 = vmatprep.subr.bf16.mxu1 %v19913_v15  ;;  %v21665_v5 = vand.u32 4294901760, %v19927_v26  ;;  %v21677_v23 = vand.u32 4294901760, %v19952_v29  ;;  %v19997_v49 = vsub.f32 %v8558_v7, %v19954_v19  ;;  %v22245_v21 = vand.u32 4294901760, %v19959_v56 }
 0x97b   :  { %v8804_v3 = vsub.f32 %v19899_v28, %v8803_v53  ;;  %v19935_v6 = vmul.f32 %v22231_v61, %v8409_v39  ;;  %v19942_v34 = vmul.f32 %v22234_v13, %v8491_v52  ;;  %v19944_v14 = vpack.c.bf16 %v8803_v53, %v8796_v47 }
 0x97c   :  { %v19965_v47 = vand.u32 4294901760, %v8557_v16  ;;  %v19970_v38 = vsub.f32 %v19907_v58, %v21666_v63  ;;  %v19985_v39 = vsub.f32 %v19927_v26, %v21665_v5  ;;  %v22244_v5 = vld [vmem:[#allocation28_spill] sm:$0xff]  ;;  %v22251_v9 = vand.u32 4294901760, %v19907_v58 }
 0x97d   :  { %22235 = vst [vmem:[#allocation43_spill] sm:$0xff] %v19944_v14  ;;  %v8805_v50 = vand.u32 4294901760, %v8804_v3  ;;  %v21664_v18 = vand.u32 4294901760, %v19935_v6  ;;  %v21667_v17 = vand.u32 4294901760, %v19942_v34 }
 0x97e   :  { %v8493_v62 = vpop.permute.xlu1 %8492  ;;  %v8427_v60 = vpop.permute.xlu0 %8426  ;;  %22239 = vst [vmem:[#allocation16_spill] sm:$0xff] %v19965_v47  ;;  %v22246_v45 = vand.u32 4294901760, %v19970_v38 }
 0x97f   :  { %v19962_v43 = vmul.f32 %v22234_v13, %v8493_v62  ;;  %v19974_v11 = vmul.f32 %v22240_v41, %v8427_v60  ;;  %v15795_v33 = vpack.c.bf16 %v8805_v50, %v8798_v24  ;;  %v19979_v53 = vsub.f32 %v19935_v6, %v21664_v18 }
 0x980   :  { %v21671_v50 = vand.u32 4294901760, %v19948_v8  ;;  %v19993_v60 = vsub.f32 %v19938_v20, %v21663_v42  ;;  %v20004_v55 = vsub.f32 %v19942_v34, %v21667_v17  ;;  %v8944_v27 = vsub.f32 %v19970_v38, %v22246_v45 }
 0x981   :  { %v8712_v59 = vand.u32 4294901760, %v19962_v43  ;;  %v21669_v52 = vand.u32 4294901760, %v19974_v11  ;;  %15796 = vmatpush3.bf16.msra.mxu0 %v15795_v33  ;;  %v22247_v33 = vand.u32 4294901760, %v19979_v53  ;;  %v22250_v20 = vand.u32 4294901760, %v19902_v51 }
 0x982   :  { %v8429_v3 = vpop.permute.xlu1 %8428  ;;  %v8511_v62 = vpop.permute.xlu0 %8510  ;;  %15798 = vmatprep.subr.bf16.mxu0 %v15797_v46  ;;  %22241 = vst [vmem:[#allocation20_spill] sm:$0xff] %v20004_v55  ;;  %v20007_v46 = vsub.f32 %v8557_v16, %v19965_v47  ;;  %v20025_v16 = vsub.f32 %v19948_v8, %v21671_v50  ;;  %v8937_v50 = vsub.f32 %v19959_v56, %v22245_v21  ;;  %v22248_v21 = vand.u32 4294901760, %v19985_v39 }
 0x983   :  { %v8439_v24 = vmul.f32 %v22240_v41, %v8429_v3  ;;  %v20011_v42 = vsub.f32 %v19962_v43, %v8712_v59  ;;  %v20017_v18 = vsub.f32 %v19974_v11, %v21669_v52  ;;  %v20020_v63 = vmul.f32 %v22244_v5, %v8511_v62  ;;  %v20027_v3 = vld [vmem:[#allocation3 + $0x1d0] sm:$0xff]  ;;  %v20029_v43 = vld [vmem:[#allocation3 + $0x1c8] sm:$0xff] }
 0x984   :  { %v20035_v52 = vsub.f32 %v19952_v29, %v21677_v23  ;;  %v8832_v57 = vsub.f32 %v19979_v53, %v22247_v33  ;;  %v20051_v62 = vand.u32 4294901760, %v20027_v3  ;;  %v20054_v0 = vand.u32 4294901760, %v20029_v43 }
 0x985   :  { %22242 = vst [vmem:[#allocation6_spill] sm:$0xff] %v20011_v42  ;;  %22243 = vst [vmem:[#allocation19_spill] sm:$0xff] %v20017_v18  ;;  %v8664_v7 = vand.u32 4294901760, %v8439_v24  ;;  %v8825_v25 = vsub.f32 %v19985_v39, %v22248_v21  ;;  %v8721_v44 = vand.u32 4294901760, %v20020_v63  ;;  %v20070_v47 = vpack.c.bf16 %v22251_v9, %v22250_v20 }
 0x986   :  { %v8513_v17 = vpop.permute.xlu1 %8512  ;;  %v8447_v36 = vpop.permute.xlu0 %8446  ;;  %v22253_v21 = vand.u32 4294901760, %v19927_v26  ;;  %v22254_v45 = vand.u32 4294901760, %v19935_v6  ;;  %v8938_v19 = vand.u32 4294901760, %v8937_v50  ;;  %v8945_v33 = vand.u32 4294901760, %v8944_v27 }
 0x987   :  { %v20062_v8 = vsub.f32 %v8439_v24, %v8664_v7  ;;  %v8523_v23 = vmul.f32 %v22244_v5, %v8513_v17  ;;  %22252 = vst [vmem:[#allocation17_spill] sm:$0xff] %v20070_v47  ;;  %v22256_v24 = vand.u32 4294901760, %v20004_v55  ;;  %v8833_v54 = vand.u32 4294901760, %v8832_v57 }
 0x988   :  { %v20076_v40 = vpack.c.bf16 %v22254_v45, %v22253_v21  ;;  %v22258_v9 = vand.u32 4294901760, %v20011_v42  ;;  %v8826_v26 = vand.u32 4294901760, %v8825_v25  ;;  %v22259_v6 = vand.u32 4294901760, %v20017_v18 }
 0x989   :  { %22249 = vst [vmem:[#allocation18_spill] sm:$0xff] %v20062_v8  ;;  %v8965_v17 = vsub.f32 %v20004_v55, %v22256_v24  ;;  %v20093_v27 = vsub.f32 %v20020_v63, %v8721_v44  ;;  %v22261_v57 = vand.u32 4294901760, %v19942_v34  ;;  %v8724_v24 = vand.u32 4294901760, %v8523_v23 }
 0x98a   :  { %v8449_v29 = vpop.permute.xlu1 %8448  ;;  %v8391_v1 = vpop.permute.xlu0 %8390  ;;  %22255 = vst [vmem:[#allocation34_spill] sm:$0xff] %v20076_v40  ;;  %v8972_v58 = vsub.f32 %v20011_v42, %v22258_v9  ;;  %v20090_v20 = vsub.f32 %v20017_v18, %v22259_v6  ;;  %v22263_v9 = vand.u32 4294901760, %v19974_v11  ;;  %v20108_v18 = vpack.c.bf16 %v8945_v33, %v8938_v19 }
 0x98b   :  { %v8400_v14 = vmul.f32 %v22225_v22, %v8391_v1  ;;  %v22257_v1 = vld [vmem:[#allocation31_spill] sm:$0xff]  ;;  %22260 = vst [vmem:[#allocation21_spill] sm:$0xff] %v20093_v27  ;;  %v8966_v42 = vand.u32 4294901760, %v8965_v17  ;;  %v20121_v33 = vsub.f32 %v8523_v23, %v8724_v24 }
 0x98c   :  { %v20082_v32 = vmul.f32 %v22257_v1, %v8447_v36  ;;  %v20097_v36 = vpack.c.bf16 %v8712_v59, %v22261_v57  ;;  %v20105_v6 = vpack.c.bf16 %v8664_v7, %v22263_v9  ;;  %v20111_v57 = vpack.c.bf16 %v8833_v54, %v8826_v26 }
 0x98d   :  { %v8643_v51 = vand.u32 4294901760, %v8400_v14  ;;  %v8973_v21 = vand.u32 4294901760, %v8972_v58  ;;  %v20128_v58 = vmul.f32 %v22257_v1, %v8449_v29 }
 0x98e   :  { %v8393_v50 = vpop.permute.xlu1 %8392  ;;  %v8475_v45 = vpop.permute.xlu0 %8474  ;;  %22262 = vst [vmem:[#allocation11_spill] sm:$0xff] %v20097_v36  ;;  %v21704_v34 = vand.u32 4294901760, %v20082_v32 }
 0x98f   :  { %v20100_v55 = vsub.f32 %v8400_v14, %v8643_v51  ;;  %v8401_v25 = vmul.f32 %v22225_v22, %v8393_v50  ;;  %v8484_v63 = vmul.f32 %v22227_v4, %v8475_v45  ;;  %v22264_v45 = vand.u32 4294901760, %v20062_v8 }
 0x991   :  { %v8646_v59 = vand.u32 4294901760, %v8401_v25  ;;  %v21705_v50 = vand.u32 4294901760, %v20100_v55  ;;  %v8703_v11 = vand.u32 4294901760, %v8484_v63  ;;  %v20119_v19 = vsub.f32 %v20062_v8, %v22264_v45 }
 0x992   :  { %v8477_v7 = vpop.permute.xlu1 %8476  ;;  %v8411_v9 = vpop.permute.xlu0 %8410  ;;  %v20137_v45 = vsub.f32 %v20082_v32, %v21704_v34  ;;  %v8676_v8 = vand.u32 4294901760, %v20128_v58 }
 0x993   :  { %v20123_v17 = vpack.c.bf16 %v8646_v59, %v8643_v51  ;;  %v20125_v54 = vsub.f32 %v8401_v25, %v8646_v59  ;;  %v20130_v26 = vsub.f32 %v8484_v63, %v8703_v11  ;;  %v8485_v14 = vmul.f32 %v22227_v4, %v8477_v7 }
 0x994   :  { %v8420_v15 = vmul.f32 %v22231_v61, %v8411_v9  ;;  %v20141_v51 = vpack.c.bf16 %v8724_v24, %v8721_v44  ;;  %v20143_v25 = vpack.c.bf16 %v8973_v21, %v8966_v42  ;;  %v8811_v29 = vsub.f32 %v20100_v55, %v21705_v50 }
 0x995   :  { %22265 = vst [vmem:[#allocation23_spill] sm:$0xff] %v20123_v17  ;;  %v21711_v23 = vand.u32 4294901760, %v20125_v54  ;;  %15768 = vmatpush3.bf16.msra.mxu1 %v20123_v17  ;;  %v8706_v59 = vand.u32 4294901760, %v8485_v14  ;;  %v22267_v21 = vand.u32 4294901760, %v20093_v27  ;;  %v20188_v48 = vsub.f32 %v20128_v58, %v8676_v8 }
 0x996   :  { %22266 = vst [vmem:[#allocation35_spill] sm:$0xff] %v20141_v51  ;;  %v8655_v7 = vand.u32 4294901760, %v8420_v15  ;;  %v8413_v9 = vpop.permute.xlu1 %8412  ;;  %v8495_v4 = vpop.permute.xlu0 %8494  ;;  %15770 = vmatprep.subr.bf16.mxu1 %v20070_v47 }
 0x997   :  { %v8818_v34 = vsub.f32 %v20125_v54, %v21711_v23  ;;  %v8421_v44 = vmul.f32 %v22231_v61, %v8413_v9  ;;  %v8504_v42 = vmul.f32 %v22234_v13, %v8495_v4  ;;  %v20158_v24 = vsub.f32 %v20093_v27, %v22267_v21 }
 0x998   :  { %v20161_v63 = vsub.f32 %v8485_v14, %v8706_v59  ;;  %v20163_v22 = vsub.f32 %v8420_v15, %v8655_v7  ;;  %v20165_v47 = vpack.c.bf16 %v8706_v59, %v8703_v11  ;;  %v8812_v4 = vand.u32 4294901760, %v8811_v29 }
 0x999   :  { %v8819_v23 = vand.u32 4294901760, %v8818_v34  ;;  %v8658_v17 = vand.u32 4294901760, %v8421_v44  ;;  %v8715_v9 = vand.u32 4294901760, %v8504_v42  ;;  %15772 = vmatpush3.bf16.msra.mxu1 %v20076_v40  ;;  %v22269_v15 = vand.u32 4294901760, %v20130_v26 }
 0x99a   :  { %22268 = vst [vmem:[#allocation40_spill] sm:$0xff] %v20165_v47  ;;  %v8497_v27 = vpop.permute.xlu1 %8496  ;;  %v8431_v50 = vpop.permute.xlu0 %8430  ;;  %15774 = vmatprep.subr.bf16.mxu1 %v20165_v47  ;;  %v22272_v2 = vand.u32 4294901760, %v20161_v63 }
 0x99b   :  { %v8951_v14 = vsub.f32 %v20130_v26, %v22269_v15  ;;  %v20175_v11 = vpack.c.bf16 %v8658_v17, %v8655_v7  ;;  %v20177_v34 = vsub.f32 %v8421_v44, %v8658_v17  ;;  %v20179_v59 = vsub.f32 %v8504_v42, %v8715_v9 }
 0x99c   :  { %v8505_v29 = vmul.f32 %v22234_v13, %v8497_v27  ;;  %v8440_v21 = vmul.f32 %v22240_v41, %v8431_v50  ;;  %v15799_v40 = vpack.c.bf16 %v8819_v23, %v8812_v4  ;;  %v8958_v47 = vsub.f32 %v20161_v63, %v22272_v2 }
 0x99d   :  { %22270 = vst [vmem:[#allocation41_spill] sm:$0xff] %v20175_v11  ;;  %22271 = vst [vmem:[#allocation44_spill] sm:$0xff] %v20177_v34  ;;  %v21730_v7 = vand.u32 4294901760, %v20177_v34  ;;  %15776 = vmatpush3.bf16.msra.mxu1 %v20175_v11  ;;  %v22273_v27 = vand.u32 4294901760, %v20163_v22  ;;  %v8952_v2 = vand.u32 4294901760, %v8951_v14  ;;  %v22274_v14 = vand.u32 4294901760, %v20179_v59 }
 0x99e   :  { %v8718_v44 = vand.u32 4294901760, %v8505_v29  ;;  %v8667_v50 = vand.u32 4294901760, %v8440_v21  ;;  %15800 = vmatpush3.bf16.msra.mxu0 %v15799_v40  ;;  %v8433_v23 = vpop.permute.xlu1 %8432  ;;  %v8515_v4 = vpop.permute.xlu0 %8514  ;;  %15778 = vmatprep.subr.bf16.mxu1 %v20097_v36  ;;  %v8959_v58 = vand.u32 4294901760, %v8958_v47 }
 0x99f   :  { %v8839_v42 = vsub.f32 %v20163_v22, %v22273_v27  ;;  %v8846_v15 = vsub.f32 %v20177_v34, %v21730_v7  ;;  %v8441_v17 = vmul.f32 %v22240_v41, %v8433_v23  ;;  %v8524_v13 = vmul.f32 %v22244_v5, %v8515_v4  ;;  %15802 = vmatprep.subr.bf16.mxu0 %v20108_v18 }
 0x9a0   :  { %v20200_v61 = vsub.f32 %v8505_v29, %v8718_v44  ;;  %v20205_v27 = vsub.f32 %v8440_v21, %v8667_v50  ;;  %v20207_v40 = vpack.c.bf16 %v8718_v44, %v8715_v9  ;;  %v15805_v11 = vpack.c.bf16 %v8959_v58, %v8952_v2 }
 0x9a1   :  { %v8979_v47 = vsub.f32 %v20179_v59, %v22274_v14  ;;  %v8847_v36 = vand.u32 4294901760, %v8846_v15  ;;  %v8670_v29 = vand.u32 4294901760, %v8441_v17  ;;  %v8727_v34 = vand.u32 4294901760, %v8524_v13  ;;  %15780 = vmatpush3.bf16.msra.mxu1 %v20105_v6 }
 0x9a2   :  { %v21733_v7 = vand.u32 4294901760, %v20200_v61  ;;  %v22275_v18 = vand.u32 4294901760, %v20082_v32  ;;  %v8840_v9 = vand.u32 4294901760, %v8839_v42  ;;  %v21734_v44 = vand.u32 4294901760, %v20205_v27  ;;  %15804 = vmatpush3.bf16.msra.mxu0 %v20111_v57  ;;  %v8517_v4 = vpop.permute.xlu1 %8516  ;;  %v8451_v2 = vpop.permute.xlu0 %8450  ;;  %15782 = vmatprep.subr.bf16.mxu1 %v20207_v40 }
 0x9a3   :  { %v20222_v58 = vpack.c.bf16 %v8670_v29, %v8667_v50  ;;  %v20224_v15 = vsub.f32 %v8441_v17, %v8670_v29  ;;  %v20226_v14 = vsub.f32 %v8524_v13, %v8727_v34  ;;  %v8525_v23 = vmul.f32 %v22244_v5, %v8517_v4  ;;  %15806 = vmatprep.subr.bf16.mxu0 %v15805_v11 }
 0x9a4   :  { %v20217_v21 = vpack.c.bf16 %v8676_v8, %v22275_v18  ;;  %v8460_v8 = vmul.f32 %v22257_v1, %v8451_v2  ;;  %v15807_v42 = vpack.c.bf16 %v8847_v36, %v8840_v9  ;;  %v8986_v57 = vsub.f32 %v20200_v61, %v21733_v7 }
 0x9a5   :  { %v21737_v18 = vand.u32 4294901760, %v20224_v15  ;;  %v8730_v50 = vand.u32 4294901760, %v8525_v23  ;;  %15784 = vmatpush3.bf16.msra.mxu1 %v20222_v58  ;;  %v8980_v17 = vand.u32 4294901760, %v8979_v47  ;;  %v22276_v13 = vand.u32 4294901760, %v20121_v33 }
 0x9a6   :  { %v8867_v11 = vsub.f32 %v20205_v27, %v21734_v44  ;;  %v8679_v9 = vand.u32 4294901760, %v8460_v8  ;;  %15808 = vmatpush3.bf16.msra.mxu0 %v15807_v42  ;;  %v8453_v4 = vpop.permute.xlu1 %8452  ;;  %15786 = vmatprep.subr.bf16.mxu1 %v20141_v51  ;;  %v8987_v2 = vand.u32 4294901760, %v8986_v57  ;;  %v22277_v44 = vand.u32 4294901760, %v20090_v20 }
 0x9a7   :  { %v9000_v29 = vsub.f32 %v20121_v33, %v22276_v13  ;;  %v8874_v47 = vsub.f32 %v20224_v15, %v21737_v18  ;;  %v20247_v7 = vsub.f32 %v8525_v23, %v8730_v50  ;;  %v8461_v13 = vmul.f32 %v22257_v1, %v8453_v4  ;;  %15810 = vmatprep.subr.bf16.mxu0 %v20143_v25 }
 0x9a8   :  { %v22278_v36 = vand.u32 4294901760, %v20119_v19  ;;  %v22279_v42 = vand.u32 4294901760, %v20188_v48  ;;  %v20258_v57 = vsub.f32 %v8460_v8, %v8679_v9  ;;  %v20260_v41 = vpack.c.bf16 %v8730_v50, %v8727_v34 }
 0x9a9   :  { %v15813_v18 = vpack.c.bf16 %v8987_v2, %v8980_v17  ;;  %v8875_v23 = vand.u32 4294901760, %v8874_v47  ;;  %v21742_v51 = vand.u32 4294901760, %v20247_v7  ;;  %v8682_v4 = vand.u32 4294901760, %v8461_v13  ;;  %15788 = vmatpush3.bf16.msra.mxu1 %v20217_v21 }
 0x9aa   :  { %v15811_v32 = vpack.c.bf16 %v22278_v36, %v22277_v44  ;;  %v8888_v5 = vsub.f32 %v20188_v48, %v22279_v42  ;;  %v9001_v25 = vand.u32 4294901760, %v9000_v29  ;;  %v22280_v20 = vand.u32 4294901760, %v20137_v45  ;;  %15790 = vmatprep.subr.bf16.mxu1 %v20260_v41 }
 0x9ab   :  { %v8868_v44 = vand.u32 4294901760, %v8867_v11  ;;  %v21741_v36 = vand.u32 4294901760, %v20258_v57  ;;  %v22281_v34 = vand.u32 4294901760, %v20226_v14  ;;  %v20272_v50 = vpack.c.bf16 %v8682_v4, %v8679_v9 }
 0x9ac   :  { %v8881_v19 = vsub.f32 %v20137_v45, %v22280_v20  ;;  %15812 = vmatpush3.bf16.msra.mxu0 %v15811_v32  ;;  %v20274_v17 = vsub.f32 %v8461_v13, %v8682_v4  ;;  %v8994_v29 = vand.u32 4294901760, %v20158_v24  ;;  %v20279_v2 = vsub.f32 %v20027_v3, %v20051_v62 }
 0x9ad   :  { %v9007_v8 = vsub.f32 %v20226_v14, %v22281_v34  ;;  %15814 = vmatprep.subr.bf16.mxu0 %v15813_v18  ;;  %v8889_v11 = vand.u32 4294901760, %v8888_v5  ;;  %v15815_v47 = vpack.c.bf16 %v8875_v23, %v8868_v44  ;;  %v9014_v32 = vsub.f32 %v20247_v7, %v21742_v51  ;;  %15792 = vmatpush3.bf16.msra.mxu1 %v20272_v50 }
 0x9ae   :  { %v20286_v42 = vsub.f32 %v20029_v43, %v20054_v0  ;;  %v8895_v18 = vsub.f32 %v20258_v57, %v21741_v36  ;;  %v21740_v24 = vand.u32 4294901760, %v20274_v17  ;;  %v15817_v3 = vpack.c.bf16 %v9001_v25, %v8994_v29 }
 0x9af   :  { %v22282_v5 = vand.u32 4294901760, %v19997_v49  ;;  %v8882_v13 = vand.u32 4294901760, %v8881_v19  ;;  %v22283_v23 = vpack.c.bf16 %v19779_v35, %v19765_v31  ;;  %v9008_v43 = vand.u32 4294901760, %v9007_v8 }
 0x9b0   :  { %15816 = vmatpush3.bf16.msra.mxu0 %v15815_v47  ;;  %v9015_v4 = vand.u32 4294901760, %v9014_v32  ;;  %v15829_v20 = vpack.c.bf16 %v19810_v12, %v19805_v10  ;;  %v15827_v44 = vpack.c.bf16 %v19899_v28, %v19893_v30  ;;  %v8902_v25 = vsub.f32 %v20274_v17, %v21740_v24  ;;  %v22309_v24 = vld [vmem:[#allocation35_spill] sm:$0xff] }
 0x9b1   :  { %v8765_v9 = vsub.f32 %v19997_v49, %v22282_v5  ;;  %15826 = vmatprep.subr.bf16.mxu1 %v22283_v23  ;;  %15818 = vmatprep.subr.bf16.mxu0 %v15817_v3  ;;  %v8757_v19 = vand.u32 4294901760, %v20035_v52  ;;  %v21744_v34 = vand.u32 4294901760, %v20279_v2  ;;  %v22284_v31 = vand.u32 4294901760, %v19993_v60 }
 0x9b2   :  { %v15819_v35 = vpack.c.bf16 %v8889_v11, %v8882_v13  ;;  %v15821_v8 = vpack.c.bf16 %v9015_v4, %v9008_v43  ;;  %v22285_v29 = vand.u32 4294901760, %v20007_v46  ;;  %v21743_v12 = vand.u32 4294901760, %v20286_v42  ;;  %v22287_v43 = vld [vmem:[#allocation7_spill] sm:$0xff]  ;;  %v22288_v4 = vld [vmem:[#allocation42_spill] sm:$0xff] }
 0x9b3   :  { %8743 = vmatmul.mubr.f32.vlgmr.msra.gmra.mrb[132].mxu1 %v22284_v31  ;;  %v8896_v30 = vand.u32 4294901760, %v8895_v18  ;;  %v8903_v28 = vand.u32 4294901760, %v8902_v25  ;;  %v22286_v47 = vand.u32 4294901760, %v20025_v16  ;;  %v8766_v52 = vand.u32 4294901760, %v8765_v9  ;;  %v22290_v25 = vld [vmem:[#allocation8_spill] sm:$0xff] }
 0x9b4   :  { %v8771_v10 = vsub.f32 %v20007_v46, %v22285_v29  ;;  %15828 = vmatpush3.bf16.msra.mxu1 %v15827_v44  ;;  %15820 = vmatpush3.bf16.msra.mxu0 %v15819_v35  ;;  %v15831_v60 = vpack.c.bf16 %v20125_v54, %v20100_v55  ;;  %v8780_v32 = vsub.f32 %v20279_v2, %v21744_v34  ;;  %v22292_v31 = vld [vmem:[#allocation20_spill] sm:$0xff]  ;;  %v22293_v35 = vld [vmem:[#allocation6_spill] sm:$0xff]  ;;  %v22315_v36 = vand.u32 4294901760, %v20125_v54 }
 0x9b5   :  { %8752 = vmatprep.mubr.f32.mxu1 %v22286_v47  ;;  %15830 = vmatprep.subr.bf16.mxu1 %v15829_v20  ;;  %v15823_v11 = vpack.c.bf16 %v8903_v28, %v8896_v30  ;;  %v15833_v18 = vpack.c.bf16 %v19970_v38, %v19959_v56  ;;  %v8786_v16 = vsub.f32 %v20286_v42, %v21743_v12  ;;  %v22289_v20 = vld [vmem:[#allocation44_spill] sm:$0xff]  ;;  %v22294_v29 = vld [vmem:[#allocation46_spill] sm:$0xff]  ;;  %v22296_v30 = vld [vmem:[#allocation19_spill] sm:$0xff]  ;;  %v22317_v12 = vand.u32 4294901760, %v19959_v56 }
 0x9b6   :  { %15822 = vmatprep.subr.bf16.mxu0 %v15821_v8  ;;  %v8772_v3 = vand.u32 4294901760, %v8771_v10  ;;  %v15835_v5 = vpack.c.bf16 %v19979_v53, %v19985_v39  ;;  %v8781_v9 = vand.u32 4294901760, %v8780_v32  ;;  %v15837_v13 = vpack.c.bf16 %v20161_v63, %v20130_v26  ;;  %v22295_v10 = vld [vmem:[#allocation23_spill] sm:$0xff]  ;;  %v22297_v28 = vld [vmem:[#allocation18_spill] sm:$0xff] }
 0x9b7   :  { %8758 = vmatmul.mubr.f32.gmra.mrb[134].mxu1 %v8757_v19  ;;  %v8787_v23 = vand.u32 4294901760, %v8786_v16  ;;  %v15839_v44 = vpack.c.bf16 %v22289_v20, %v20163_v22  ;;  %v22291_v19 = vld [vmem:[#allocation32_spill] sm:$0xff]  ;;  %v15841_v8 = vpack.c.bf16 %v22293_v35, %v22292_v31  ;;  %v15843_v47 = vpack.c.bf16 %v22297_v28, %v22296_v30  ;;  %v22300_v32 = vld [vmem:[#allocation10_spill] sm:$0xff] }
 0x9b8   :  { %15832 = vmatpush3.bf16.msra.mxu1 %v15831_v60  ;;  %8767 = vmatprep.mubr.f32.mxu1 %v8766_v52  ;;  %v22298_v52 = vld [vmem:[#allocation17_spill] sm:$0xff]  ;;  %v22299_v60 = vld [vmem:[#allocation14_spill] sm:$0xff]  ;;  %v15847_v16 = vpack.c.bf16 %v20224_v15, %v20205_v27  ;;  %v22318_v34 = vand.u32 4294901760, %v19970_v38  ;;  %v22320_v54 = vand.u32 4294901760, %v19979_v53  ;;  %v22321_v56 = vand.u32 4294901760, %v20130_v26 }
 0x9b9   :  { %15824 = vmatpush3.bf16.msra.mxu0 %v15823_v11  ;;  %15834 = vmatprep.subr.bf16.mxu1 %v15833_v18  ;;  %v15845_v11 = vpack.c.bf16 %v20200_v61, %v20179_v59  ;;  %v22301_v18 = vld [vmem:[#allocation16_spill] sm:$0xff]  ;;  %v22322_v38 = vand.u32 4294901760, %v20161_v63  ;;  %v22324_v53 = vand.u32 4294901760, %v20163_v22  ;;  %v22326_v63 = vld [vmem:[#allocation29_spill] sm:$0xff] }
 0x9ba   :  { %15858 = vmatprep.subr.bf16.mxu0 %v19776_v37 }
 0x9bb   :  { %8773 = vmatmul.mubr.f32.gmra.mrb[136].mxu1 %v8772_v3  ;;  %v22302_v3 = vld [vmem:[#allocation34_spill] sm:$0xff] }
 0x9bc   :  { %9020 = vmatmul.mubr.f32.vlgmr.msra.gmra.mrb[84].mxu0 %v22287_v43  ;;  %15836 = vmatpush3.bf16.msra.mxu1 %v15835_v5  ;;  %v22303_v5 = vld [vmem:[#allocation40_spill] sm:$0xff] }
 0x9bd   :  { %15860 = vmatpush3.bf16.msra.mxu0 %v22288_v4  ;;  %15838 = vmatprep.subr.bf16.mxu1 %v15837_v13 }
 0x9be   :  { %15862 = vmatprep.subr.bf16.mxu0 %v22290_v25  ;;  %8782 = vmatprep.mubr.f32.mxu1 %v8781_v9  ;;  %v22304_v9 = vld [vmem:[#allocation21_spill] sm:$0xff] }
 0x9bf   :  { %9025 = vmatprep.mubr.f32.mxu0 %v22291_v19  ;;  %8788 = vmatmul.mubr.f32.gmra.mrb[138].mxu1 %v8787_v23  ;;  %v15849_v13 = vpack.c.bf16 %v20121_v33, %v22304_v9  ;;  %v22305_v23 = vld [vmem:[#allocation41_spill] sm:$0xff] }
 0x9c0   :  { %9027 = vmatmul.mubr.f32.gmra.mrb[86].mxu0 %v22294_v29  ;;  %15840 = vmatpush3.bf16.msra.mxu1 %v15839_v44  ;;  %v15851_v44 = vpack.c.bf16 %v20188_v48, %v20137_v45 }
 0x9c1   :  { %15864 = vmatpush3.bf16.msra.mxu0 %v22295_v10  ;;  %15842 = vmatprep.subr.bf16.mxu1 %v15841_v8  ;;  %v22306_v8 = vld [vmem:[#allocation11_spill] sm:$0xff] }
 0x9c2   :  { %15866 = vmatprep.subr.bf16.mxu0 %v22298_v52  ;;  %9032 = vmatprep.mubr.f32.mxu0 %v22299_v60 }
 0x9c3   :  { %9176 = vmatprep.mubr.f32.mxu1 %v22300_v32 }
 0x9c4   :  { %9034 = vmatmul.mubr.f32.gmra.mrb[88].mxu0 %v22301_v18  ;;  %15844 = vmatpush3.bf16.msra.mxu1 %v15843_v47  ;;  %v22307_v47 = vand.u32 4294901760, %v22300_v32  ;;  %v22310_v32 = vld [vmem:[#allocation33_spill] sm:$0xff] }
 0x9c5   :  { %15868 = vmatpush3.bf16.msra.mxu0 %v22302_v3  ;;  %15846 = vmatprep.subr.bf16.mxu1 %v15845_v11  ;;  %v15853_v11 = vpack.c.bf16 %v20247_v7, %v20226_v14 }
 0x9c6   :  { %15870 = vmatprep.subr.bf16.mxu0 %v22303_v5  ;;  %9039 = vmatprep.mubr.f32.mxu0 %v20051_v62 }
 0x9c8   :  { %9041 = vmatmul.mubr.f32.gmra.mrb[90].mxu0 %v20054_v0  ;;  %15848 = vmatpush3.bf16.msra.mxu1 %v15847_v16  ;;  %v15855_v16 = vpack.c.bf16 %v20274_v17, %v20258_v57 }
 0x9c9   :  { %15872 = vmatpush3.bf16.msra.mxu0 %v22305_v23  ;;  %15850 = vmatprep.subr.bf16.mxu1 %v15849_v13  ;;  %v22308_v13 = vld [vmem:[#allocation38_spill] sm:$0xff] }
 0x9ca   :  { %15874 = vmatprep.subr.bf16.mxu0 %v22306_v8  ;;  %9310 = vmatprep.mubr.f32.mxu0 %v22307_v47  ;;  %v22311_v47 = vld [vmem:[#allocation43_spill] sm:$0xff] }
 0x9cc   :  { %15852 = vmatpush3.bf16.msra.mxu1 %v15851_v44  ;;  %v22312_v44 = vld [vmem:[#allocation15_spill] sm:$0xff] }
 0x9cd   :  { %15876 = vmatpush3.bf16.msra.mxu0 %v20105_v6  ;;  %15854 = vmatprep.subr.bf16.mxu1 %v15853_v11  ;;  %v22313_v11 = vld [vmem:[#allocation39_spill] sm:$0xff] }
 0x9ce   :  { %15878 = vmatprep.subr.bf16.mxu0 %v20207_v40 }
 0x9d0   :  { %15856 = vmatpush3.bf16.msra.mxu1 %v15855_v16  ;;  %v22314_v16 = vand.u32 4294901760, %v20100_v55  ;;  %v22319_v55 = vand.u32 4294901760, %v19985_v39  ;;  %v22325_v39 = vand.u32 4294901760, %v22289_v20  ;;  %v22331_v20 = vand.u32 4294901760, %v19997_v49 }
 0x9d1   :  { %15880 = vmatpush3.bf16.msra.mxu0 %v20222_v58  ;;  %15890 = vmatprep.subr.bf16.mxu1 %v22308_v13  ;;  %v22316_v13 = vld [vmem:[#allocation30_spill] sm:$0xff] }
 0x9d2   :  { %15882 = vmatprep.subr.bf16.mxu0 %v22309_v24  ;;  %v15895_v51 = vpack.c.bf16 %v22315_v36, %v22314_v16  ;;  %v15899_v36 = vpack.c.bf16 %v22320_v54, %v22319_v55  ;;  %v15903_v26 = vpack.c.bf16 %v22325_v39, %v22324_v53  ;;  %v22327_v16 = vand.u32 4294901760, %v22312_v44 }
 0x9d3   :  { %9179 = vmatmul.mubr.f32.vlgmr.msra.gmra.mrb[140].mxu1 %v22310_v32  ;;  %v22335_v54 = vand.u32 4294901760, %v20200_v61  ;;  %v22340_v61 = vand.u32 4294901760, %v20224_v15  ;;  %v8556_v15 = vld [vmem:[#allocation3 + $0x1a8] sm:$0xff]  ;;  %v22346_v39 = vand.u32 4294901760, %v20226_v14  ;;  %v22349_v14 = vand.u32 4294901760, %v20274_v17 }
 0x9d4   :  { %15892 = vmatpush3.bf16.msra.mxu1 %v22311_v47  ;;  %9185 = vmatprep.mubr.f32.mxu1 %v22312_v44  ;;  %v15897_v47 = vpack.c.bf16 %v22318_v34, %v22317_v12  ;;  %v15901_v34 = vpack.c.bf16 %v22322_v38, %v22321_v56  ;;  %v22323_v12 = vand.u32 4294901760, %v22310_v32  ;;  %v22329_v32 = vand.u32 4294901760, %v22293_v35  ;;  %v22336_v56 = vld [vmem:[#allocation9_spill] sm:$0xff] }
 0x9d5   :  { %15884 = vmatpush3.bf16.msra.mxu0 %v20217_v21  ;;  %15894 = vmatprep.subr.bf16.mxu1 %v22313_v11  ;;  %v22332_v44 = vand.u32 4294901760, %v22296_v30 }
 0x9d6   :  { %15886 = vmatprep.subr.bf16.mxu0 %v20260_v41 }
 0x9d7   :  { %9188 = vmatmul.mubr.f32.gmra.mrb[142].mxu1 %v22316_v13 }
 0x9d8   :  { %15896 = vmatpush3.bf16.msra.mxu1 %v15895_v51  ;;  %9194 = vmatprep.mubr.f32.mxu1 %v19997_v49  ;;  %v8533_v51 = vpop.permute.xlu1 %8532  ;;  %v22338_v49 = vand.u32 4294901760, %v20279_v2 }
 0x9d9   :  { %15888 = vmatpush3.bf16.msra.mxu0 %v20272_v50  ;;  %15898 = vmatprep.subr.bf16.mxu1 %v15897_v47  ;;  %v8543_v11 = vmul.f32 %v22326_v63, %v8533_v51  ;;  %v22342_v51 = vand.u32 4294901760, %v20121_v33  ;;  %v22344_v33 = vand.u32 4294901760, %v20137_v45  ;;  %v8559_v45 = vld [vmem:[#allocation3 + $0x1c0] sm:$0xff] }
 0x9da   :  { %15922 = vmatprep.subr.bf16.mxu0 %v19776_v37  ;;  %v8531_v37 = vpop.permute.xlu0 %8530 }
 0x9db   :  { %9197 = vmatmul.mubr.f32.gmra.mrb[144].mxu1 %v20007_v46  ;;  %v8542_v22 = vmul.f32 %v22326_v63, %v8531_v37  ;;  %v9670_v55 = vand.u32 4294901760, %v8543_v11 }
 0x9dc   :  { %9314 = vmatmul.mubr.f32.vlgmr.msra.gmra.mrb[92].mxu0 %v22323_v12  ;;  %15900 = vmatpush3.bf16.msra.mxu1 %v15899_v36  ;;  %v22343_v12 = vand.u32 4294901760, %v20286_v42 }
 0x9dd   :  { %15924 = vmatpush3.bf16.msra.mxu0 %v22288_v4  ;;  %15902 = vmatprep.subr.bf16.mxu1 %v15901_v34  ;;  %v22328_v4 = vand.u32 4294901760, %v22292_v31  ;;  %v22333_v31 = vand.u32 4294901760, %v22297_v28  ;;  %v8553_v28 = vld [vmem:[#allocation3 + $0x190] sm:$0xff]  ;;  %v20442_v38 = vsub.f32 %v8543_v11, %v9670_v55  ;;  %v22341_v34 = vand.u32 4294901760, %v22304_v9 }
 0x9de   :  { %15926 = vmatprep.subr.bf16.mxu0 %v22290_v25  ;;  %9203 = vmatprep.mubr.f32.mxu1 %v20279_v2  ;;  %v22330_v25 = vand.u32 4294901760, %v22316_v13  ;;  %v22334_v13 = vand.u32 4294901760, %v20179_v59  ;;  %v22339_v59 = vand.u32 4294901760, %v20205_v27  ;;  %v8625_v27 = vsel %vm1007_vm2, %v8553_v28, 0 }
 0x9df   :  { %9321 = vmatprep.mubr.f32.mxu0 %v22327_v16  ;;  %9206 = vmatmul.mubr.f32.gmra.mrb[146].mxu1 %v20286_v42  ;;  %v15905_v47 = vpack.c.bf16 %v22329_v32, %v22328_v4  ;;  %v15907_v35 = vpack.c.bf16 %v22333_v31, %v22332_v44  ;;  %v22345_v9 = vand.u32 4294901760, %v20188_v48  ;;  %v9785_v53 = vand.u32 4294901760, %v20442_v38  ;;  %v8562_v4 = vld [vmem:[#allocation3 + $0x1d8] sm:$0xff] }
 0x9e0   :  { %9325 = vmatmul.mubr.f32.gmra.mrb[94].mxu0 %v22330_v25  ;;  %15904 = vmatpush3.bf16.msra.mxu1 %v15903_v26  ;;  %v15909_v36 = vpack.c.bf16 %v22335_v54, %v22334_v13  ;;  %v15911_v30 = vpack.c.bf16 %v22340_v61, %v22339_v59  ;;  %v20467_v16 = vand.u32 4294901760, %v8625_v27 }
 0x9e1   :  { %15928 = vmatpush3.bf16.msra.mxu0 %v22295_v10  ;;  %15906 = vmatprep.subr.bf16.mxu1 %v15905_v47  ;;  %v22337_v10 = vand.u32 4294901760, %v20007_v46  ;;  %v8537_v46 = vpop.permute.xlu1 %8536  ;;  %v15915_v42 = vpack.c.bf16 %v22345_v9, %v22344_v33 }
 0x9e2   :  { %15930 = vmatprep.subr.bf16.mxu0 %v22298_v52  ;;  %9332 = vmatprep.mubr.f32.mxu0 %v22331_v20  ;;  %v9667_v52 = vand.u32 4294901760, %v8542_v22  ;;  %v8545_v37 = vmul.f32 %v22326_v63, %v8537_v46  ;;  %v20486_v31 = vsub.f32 %v8625_v27, %v20467_v16 }
 0x9e3   :  { %9513 = vmatprep.mubr.f32.mxu1 %v22336_v56 }
 0x9e4   :  { %9336 = vmatmul.mubr.f32.gmra.mrb[96].mxu0 %v22337_v10  ;;  %15908 = vmatpush3.bf16.msra.mxu1 %v15907_v35  ;;  %v20450_v2 = vsub.f32 %v8542_v22, %v9667_v52  ;;  %v9676_v32 = vand.u32 4294901760, %v8545_v37  ;;  %v20477_v25 = vpack.c.bf16 %v9670_v55, %v9667_v52  ;;  %v9786_v22 = vsub.f32 %v20442_v38, %v9785_v53 }
 0x9e5   :  { %15932 = vmatpush3.bf16.msra.mxu0 %v22302_v3  ;;  %15910 = vmatprep.subr.bf16.mxu1 %v15909_v36  ;;  %v15913_v3 = vpack.c.bf16 %v22342_v51, %v22341_v34  ;;  %v9737_v36 = vand.u32 4294901760, %v20486_v31 }
 0x9e6   :  { %15934 = vmatprep.subr.bf16.mxu0 %v22303_v5  ;;  %9343 = vmatprep.mubr.f32.mxu0 %v22338_v49  ;;  %v8535_v5 = vpop.permute.xlu0 %8534  ;;  %v9778_v48 = vand.u32 4294901760, %v20450_v2  ;;  %v20499_v55 = vsub.f32 %v8545_v37, %v9676_v32  ;;  %v9787_v13 = vand.u32 4294901760, %v9786_v22  ;;  %v15969_v33 = vpack.c.bf16 %v20442_v38, %v20450_v2 }
 0x9e7   :  { %v8544_v11 = vmul.f32 %v22326_v63, %v8535_v5 }
 0x9e8   :  { %9347 = vmatmul.mubr.f32.gmra.mrb[98].mxu0 %v22343_v12  ;;  %15912 = vmatpush3.bf16.msra.mxu1 %v15911_v30  ;;  %v9799_v52 = vand.u32 4294901760, %v20499_v55 }
 0x9e9   :  { %15936 = vmatpush3.bf16.msra.mxu0 %v22305_v23  ;;  %15914 = vmatprep.subr.bf16.mxu1 %v15913_v3  ;;  %v22347_v23 = vand.u32 4294901760, %v20247_v7  ;;  %v22348_v7 = vand.u32 4294901760, %v20258_v57  ;;  %v9673_v44 = vand.u32 4294901760, %v8544_v11  ;;  %v9779_v57 = vsub.f32 %v20450_v2, %v9778_v48 }
 0x9ea   :  { %15938 = vmatprep.subr.bf16.mxu0 %v22306_v8  ;;  %9638 = vmatprep.mubr.f32.mxu0 %v22336_v56  ;;  %v8628_v8 = vsel %vm1007_vm2, %v8556_v15, 0  ;;  %v9800_v46 = vsub.f32 %v20499_v55, %v9799_v52 }
 0x9eb   :  { %v15917_v26 = vpack.c.bf16 %v22347_v23, %v22346_v39  ;;  %v15919_v47 = vpack.c.bf16 %v22349_v14, %v22348_v7  ;;  %v20482_v20 = vand.u32 4294901760, %v8628_v8  ;;  %v20494_v17 = vpack.c.bf16 %v9676_v32, %v9673_v44  ;;  %v8612_v14 = vpop.permute.xlu1 %8611 }
 0x9ec   :  { %15916 = vmatpush3.bf16.msra.mxu1 %v15915_v42  ;;  %v20510_v56 = vsub.f32 %v8544_v11, %v9673_v44  ;;  %v9801_v5 = vand.u32 4294901760, %v9800_v46 }
 0x9ed   :  { %15940 = vmatpush3.bf16.msra.mxu0 %v20105_v6  ;;  %15918 = vmatprep.subr.bf16.mxu1 %v15917_v26  ;;  %v8631_v6 = vsel %vm1007_vm2, %v8559_v45, 0  ;;  %v20503_v54 = vsub.f32 %v8628_v8, %v20482_v20  ;;  %v8607_v26 = vpop.permute.xlu0 %8606 }
 0x9ee   :  { %15942 = vmatprep.subr.bf16.mxu0 %v20207_v40  ;;  %v8634_v40 = vsel %vm1007_vm2, %v8562_v4, 0  ;;  %v20497_v35 = vand.u32 4294901760, %v8631_v6 }
 0x9ef   :  { %v9747_v59 = vand.u32 4294901760, %v20503_v54 }
 0x9f0   :  { %15920 = vmatpush3.bf16.msra.mxu1 %v15919_v47  ;;  %v20516_v10 = vsub.f32 %v8631_v6, %v20497_v35 }
 0x9f1   :  { %15944 = vmatpush3.bf16.msra.mxu0 %v20222_v58  ;;  %15954 = vmatprep.subr.bf16.mxu1 %v20477_v25  ;;  %v20505_v58 = vand.u32 4294901760, %v8634_v40  ;;  %v9748_v28 = vsub.f32 %v20503_v54, %v9747_v59 }
 0x9f2   :  { %15946 = vmatprep.subr.bf16.mxu0 %v22309_v24  ;;  %v9780_v24 = vand.u32 4294901760, %v9779_v57  ;;  %v9757_v30 = vand.u32 4294901760, %v20516_v10 }
 0x9f3   :  { %9515 = vmatmul.mubr.f32.vlgmr.msra.gmra.mrb[148].mxu1 %v22287_v43  ;;  %v20522_v61 = vsub.f32 %v8634_v40, %v20505_v58  ;;  %v9749_v12 = vand.u32 4294901760, %v9748_v28 }
 0x9f4   :  { %15956 = vmatpush3.bf16.msra.mxu1 %v20477_v25  ;;  %9520 = vmatprep.mubr.f32.mxu1 %v22291_v19  ;;  %v15961_v49 = vpack.c.bf16 %v9787_v13, %v9780_v24  ;;  %v9758_v3 = vsub.f32 %v20516_v10, %v9757_v30  ;;  %v8622_v13 = vpop.permute.xlu1 %8621 }
 0x9f5   :  { %15948 = vmatpush3.bf16.msra.mxu0 %v20217_v21  ;;  %15958 = vmatprep.subr.bf16.mxu1 %v20494_v17  ;;  %v9792_v21 = vand.u32 4294901760, %v20510_v56  ;;  %v9767_v34 = vand.u32 4294901760, %v20522_v61 }
 0x9f6   :  { %15950 = vmatprep.subr.bf16.mxu0 %v20260_v41  ;;  %v9738_v41 = vsub.f32 %v20486_v31, %v9737_v36  ;;  %v9759_v15 = vand.u32 4294901760, %v9758_v3 }
 0x9f7   :  { %9522 = vmatmul.mubr.f32.gmra.mrb[150].mxu1 %v22294_v29  ;;  %v9768_v27 = vsub.f32 %v20522_v61, %v9767_v34 }
 0x9f8   :  { %15960 = vmatpush3.bf16.msra.mxu1 %v20494_v17  ;;  %9527 = vmatprep.mubr.f32.mxu1 %v22299_v60  ;;  %v9739_v51 = vand.u32 4294901760, %v9738_v41 }
 0x9f9   :  { %15952 = vmatpush3.bf16.msra.mxu0 %v20272_v50  ;;  %15962 = vmatprep.subr.bf16.mxu1 %v15961_v49  ;;  %v9793_v50 = vsub.f32 %v20510_v56, %v9792_v21 }
 0x9fb   :  { %9529 = vmatmul.mubr.f32.gmra.mrb[152].mxu1 %v22301_v18 }
 0x9fc   :  { %9640 = vmatmul.mubr.f32.vlgmr.msra.gmra.mrb[100].mxu0 %v22287_v43  ;;  %9534 = vmatprep.mubr.f32.mxu1 %v20051_v62  ;;  %v9794_v43 = vand.u32 4294901760, %v9793_v50 }
 0x9fd   :  { %9645 = vmatprep.mubr.f32.mxu0 %v22291_v19  ;;  %v9769_v19 = vand.u32 4294901760, %v9768_v27 }
 0x9fe   :  { %v15965_v37 = vpack.c.bf16 %v9801_v5, %v9794_v43 }
 0x9ff   :  { %9536 = vmatmul.mubr.f32.gmra.mrb[154].mxu1 %v20054_v0 }
 0xa00   :  { %9647 = vmatmul.mubr.f32.gmra.mrb[102].mxu0 %v22294_v29  ;;  %14593 = vmatprep.mubr.f32.mxu1 %v9739_v51  ;;  %v15973_v29 = vpack.c.bf16 %v20499_v55, %v20510_v56 }
 0xa01   :  { %9652 = vmatprep.mubr.f32.mxu0 %v22299_v60 }
 0xa03   :  { %14594 = vmatmul.mubr.f32.vlgmr.msra.gmra.mrb[156].mxu1 %v9749_v12 }
 0xa04   :  { %9654 = vmatmul.mubr.f32.gmra.mrb[104].mxu0 %v22301_v18  ;;  %15964 = vmatpush3.bf16.msra.mxu1 %v15961_v49 }
 0xa05   :  { %15966 = vmatprep.subr.bf16.mxu1 %v15965_v37  ;;  %9659 = vmatprep.mubr.f32.mxu0 %v20051_v62  ;;  %v15989_v62 = vpack.c.bf16 %v9799_v52, %v9792_v21 }
 0xa06   :  { %14596 = vmatprep.mubr.f32.mxu1 %v9759_v15 }
 0xa07   :  { %14597 = vmatmul.mubr.f32.gmra.mrb[158].mxu1 %v9769_v19 }
 0xa08   :  { %9661 = vmatmul.mubr.f32.gmra.mrb[106].mxu0 %v20054_v0  ;;  %15968 = vmatpush3.bf16.msra.mxu1 %v15965_v37  ;;  %v15985_v0 = vpack.c.bf16 %v9785_v53, %v9778_v48 }
 0xa09   :  { %15970 = vmatprep.subr.bf16.mxu1 %v15969_v33  ;;  %14607 = vmatprep.mubr.f32.mxu1 %v20467_v16 }
 0xa0b   :  { %14608 = vmatmul.mubr.f32.vlgmr.msra.gmra.mrb[156].mxu1 %v20482_v20 }
 0xa0c   :  { %15972 = vmatpush3.bf16.msra.mxu1 %v15969_v33  ;;  %14610 = vmatprep.mubr.f32.mxu1 %v20497_v35 }
 0xa0d   :  { %15974 = vmatprep.subr.bf16.mxu1 %v15973_v29 }
 0xa0f   :  { %14611 = vmatmul.mubr.f32.gmra.mrb[158].mxu1 %v20505_v58 }
 0xa10   :  { %15976 = vmatpush3.bf16.msra.mxu1 %v15973_v29  ;;  %14621 = vmatprep.mubr.f32.mxu1 %v20486_v31  ;;  %v8617_v31 = vpop.permute.xlu0 %8616 }
 0xa11   :  { %15978 = vmatprep.subr.bf16.mxu1 %v20477_v25 }
 0xa13   :  { %14622 = vmatmul.mubr.f32.vlgmr.msra.gmra.mrb[156].mxu1 %v20503_v54 }
 0xa14   :  { %15980 = vmatpush3.bf16.msra.mxu1 %v20477_v25  ;;  %14624 = vmatprep.mubr.f32.mxu1 %v20516_v10 }
 0xa15   :  { %15982 = vmatprep.subr.bf16.mxu1 %v20494_v17 }
 0xa17   :  { %14625 = vmatmul.mubr.f32.gmra.mrb[158].mxu1 %v20522_v61 }
 0xa18   :  { %15984 = vmatpush3.bf16.msra.mxu1 %v20494_v17  ;;  %14635 = vmatprep.mubr.f32.mxu1 %v9737_v36 }
 0xa19   :  { %15986 = vmatprep.subr.bf16.mxu1 %v15985_v0 }
 0xa1b   :  { %14636 = vmatmul.mubr.f32.vlgmr.msra.gmra.mrb[156].mxu1 %v9747_v59 }
 0xa1c   :  { %15988 = vmatpush3.bf16.msra.mxu1 %v15985_v0  ;;  %14638 = vmatprep.mubr.f32.mxu1 %v9757_v30 }
 0xa1d   :  { %15990 = vmatprep.subr.bf16.mxu1 %v15989_v62 }
 0xa1f   :  { %14639 = vmatmul.mubr.f32.gmra.mrb[158].mxu1 %v9767_v34 }
 0xa20   :  { %15992 = vmatpush3.bf16.msra.mxu1 %v15989_v62  ;;  %14649 = vmatprep.mubr.f32.mxu1 %v20467_v16 }
 0xa21   :  { %15994 = vmatprep.subr.bf16.mxu1 %v20477_v25 }
 0xa23   :  { %14650 = vmatmul.mubr.f32.vlgmr.msra.gmra.mrb[156].mxu1 %v20482_v20 }
 0xa24   :  { %15996 = vmatpush3.bf16.msra.mxu1 %v20477_v25  ;;  %14652 = vmatprep.mubr.f32.mxu1 %v20497_v35 }
 0xa25   :  { %15998 = vmatprep.subr.bf16.mxu1 %v20494_v17 }
 0xa27   :  { %14653 = vmatmul.mubr.f32.gmra.mrb[158].mxu1 %v20505_v58 }
 0xa28   :  { %16000 = vmatpush3.bf16.msra.mxu1 %v20494_v17  ;;  %14663 = vmatprep.mubr.f32.mxu1 %v20467_v16 }
 0xa2b   :  { %14664 = vmatmul.mubr.f32.vlgmr.msra.gmra.mrb[156].mxu1 %v20482_v20 }
 0xa2c   :  { %14666 = vmatprep.mubr.f32.mxu1 %v20497_v35 }
 0xa2f   :  { %14667 = vmatmul.mubr.f32.gmra.mrb[158].mxu1 %v20505_v58 }
 0xa86   :  { %v13561_v60 = vpop.f32.mrb[132].mxu1 }
 0xa87   :  { %v13562_v18 = vpop.f32.mrb[133].mxu1 }
 0xa88   :  { %v13563_v38 = vadd.f32 %v13562_v18, %v13561_v60 }
 0xa8a   :  { %v13564_v2 = vpop.f32.mrb[134].mxu1  ;;  %v8745_v45 = vadd.f32 %v13563_v38, %v8607_v26 }
 0xa8b   :  { %v13565_v9 = vpop.f32.mrb[135].mxu1 }
 0xa8c   :  { %v13566_v42 = vadd.f32 %v13565_v9, %v13564_v2 }
 0xa8e   :  { %v13567_v53 = vpop.f32.mrb[136].mxu1  ;;  %v8760_v22 = vadd.f32 %v13566_v42, %v8612_v14 }
 0xa8f   :  { %v13605_v39 = vpop.f32.mrb[84].mxu0  ;;  %v13568_v23 = vpop.f32.mrb[137].mxu1 }
 0xa90   :  { %v13569_v11 = vadd.f32 %v13568_v23, %v13567_v53  ;;  %v13606_v8 = vpop.f32.mrb[85].mxu0 }
 0xa91   :  { %v13607_v16 = vadd.f32 %v13606_v8, %v13605_v39 }
 0xa92   :  { %v13570_v48 = vpop.f32.mrb[138].mxu1  ;;  %v8775_v57 = vadd.f32 %v13569_v11, %v8617_v31 }
 0xa93   :  { %v9022_v4 = vadd.f32 %v13607_v16, %v8745_v45  ;;  %v13608_v32 = vpop.f32.mrb[86].mxu0  ;;  %v13571_v7 = vpop.f32.mrb[139].mxu1 }
 0xa94   :  { %v13572_v47 = vadd.f32 %v13571_v7, %v13570_v48  ;;  %v13609_v25 = vpop.f32.mrb[87].mxu0 }
 0xa95   :  { %v13610_v20 = vadd.f32 %v13609_v25, %v13608_v32 }
 0xa96   :  { %v8790_v58 = vadd.f32 %v13572_v47, %v8622_v13 }
 0xa97   :  { %v9029_v6 = vadd.f32 %v13610_v20, %v8760_v22  ;;  %v13611_v44 = vpop.f32.mrb[88].mxu0 }
 0xa98   :  { %v13612_v40 = vpop.f32.mrb[89].mxu0 }
 0xa99   :  { %v13613_v17 = vadd.f32 %v13612_v40, %v13611_v44 }
 0xa9b   :  { %v9036_v35 = vadd.f32 %v13613_v17, %v8775_v57  ;;  %v13614_v55 = vpop.f32.mrb[90].mxu0 }
 0xa9c   :  { %v13615_v54 = vpop.f32.mrb[91].mxu0 }
 0xa9d   :  { %v13616_v36 = vadd.f32 %v13615_v54, %v13614_v55 }
 0xa9f   :  { %v9043_v56 = vadd.f32 %v13616_v36, %v8790_v58 }
 0xaa6   :  { %v13649_v24 = vpop.f32.mrb[140].mxu1 }
 0xaa7   :  { %v13650_v10 = vpop.f32.mrb[141].mxu1 }
 0xaa8   :  { %v13651_v52 = vadd.f32 %v13650_v10, %v13649_v24 }
 0xaaa   :  { %v9181_v49 = vadd.f32 %v13651_v52, %v9022_v4  ;;  %v13652_v59 = vpop.f32.mrb[142].mxu1 }
 0xaab   :  { %v13653_v61 = vpop.f32.mrb[143].mxu1 }
 0xaac   :  { %v13654_v41 = vadd.f32 %v13653_v61, %v13652_v59 }
 0xaae   :  { %v9190_v21 = vadd.f32 %v13654_v41, %v9029_v6  ;;  %v13655_v30 = vpop.f32.mrb[144].mxu1 }
 0xaaf   :  { %v13693_v28 = vpop.f32.mrb[92].mxu0  ;;  %v13656_v46 = vpop.f32.mrb[145].mxu1 }
 0xab0   :  { %v13657_v34 = vadd.f32 %v13656_v46, %v13655_v30  ;;  %v13694_v51 = vpop.f32.mrb[93].mxu0 }
 0xab1   :  { %v13695_v50 = vadd.f32 %v13694_v51, %v13693_v28 }
 0xab2   :  { %v9199_v3 = vadd.f32 %v13657_v34, %v9036_v35  ;;  %v13658_v12 = vpop.f32.mrb[146].mxu1 }
 0xab3   :  { %v9316_v5 = vadd.f32 %v13695_v50, %v9181_v49  ;;  %v13696_v27 = vpop.f32.mrb[94].mxu0  ;;  %v13659_v43 = vpop.f32.mrb[147].mxu1 }
 0xab4   :  { %v13660_v15 = vadd.f32 %v13659_v43, %v13658_v12  ;;  %v13697_v37 = vpop.f32.mrb[95].mxu0 }
 0xab5   :  { %v13698_v19 = vadd.f32 %v13697_v37, %v13696_v27 }
 0xab6   :  { %v9208_v33 = vadd.f32 %v13660_v15, %v9043_v56 }
 0xab7   :  { %v9327_v29 = vadd.f32 %v13698_v19, %v9190_v21  ;;  %v13699_v0 = vpop.f32.mrb[96].mxu0 }
 0xab8   :  { %v13700_v62 = vpop.f32.mrb[97].mxu0 }
 0xab9   :  { %v13701_v60 = vadd.f32 %v13700_v62, %v13699_v0 }
 0xabb   :  { %v9338_v18 = vadd.f32 %v13701_v60, %v9199_v3  ;;  %v13702_v38 = vpop.f32.mrb[98].mxu0 }
 0xabc   :  { %v13703_v2 = vpop.f32.mrb[99].mxu0 }
 0xabd   :  { %v13704_v9 = vadd.f32 %v13703_v2, %v13702_v38 }
 0xabf   :  { %v9349_v42 = vadd.f32 %v13704_v9, %v9208_v33 }
 0xac6   :  { %v13737_v53 = vpop.f32.mrb[148].mxu1 }
 0xac7   :  { %v13738_v39 = vpop.f32.mrb[149].mxu1 }
 0xac8   :  { %v13739_v23 = vadd.f32 %v13738_v39, %v13737_v53 }
 0xaca   :  { %v9517_v26 = vadd.f32 %v13739_v23, %v9316_v5  ;;  %v13740_v11 = vpop.f32.mrb[150].mxu1 }
 0xacb   :  { %v13741_v8 = vpop.f32.mrb[151].mxu1 }
 0xacc   :  { %v13742_v45 = vadd.f32 %v13741_v8, %v13740_v11 }
 0xace   :  { %v9524_v16 = vadd.f32 %v13742_v45, %v9327_v29  ;;  %v13743_v48 = vpop.f32.mrb[152].mxu1 }
 0xacf   :  { %v13781_v4 = vpop.f32.mrb[100].mxu0  ;;  %v13744_v32 = vpop.f32.mrb[153].mxu1 }
 0xad0   :  { %v13745_v7 = vadd.f32 %v13744_v32, %v13743_v48  ;;  %v13782_v14 = vpop.f32.mrb[101].mxu0  ;;  %v10454_v32 = vld [vmem:[#allocation3 + $0x1e8] sm:$0xff] }
 0xad1   :  { %v13783_v47 = vadd.f32 %v13782_v14, %v13781_v4 }
 0xad2   :  { %v9531_v25 = vadd.f32 %v13745_v7, %v9338_v18  ;;  %v13746_v22 = vpop.f32.mrb[154].mxu1  ;;  %v20678_v7 = vand.u32 4294901760, %v10454_v32 }
 0xad3   :  { %v13784_v20 = vpop.f32.mrb[102].mxu0  ;;  %v13747_v6 = vpop.f32.mrb[155].mxu1  ;;  %v9642_v44 = vadd.f32 %v13783_v47, %v9517_v26 }
 0xad4   :  { %v13748_v31 = vadd.f32 %v13747_v6, %v13746_v22  ;;  %v13785_v40 = vpop.f32.mrb[103].mxu0  ;;  %22353 = vst [vmem:[#allocation42_spill] sm:$0xff] %v20678_v7  ;;  %v20681_v14 = vsub.f32 %v10454_v32, %v20678_v7  ;;  %10920 = vmatprep.mubr.f32.mxu1 %v20678_v7  ;;  %v12224_v22 = vld [vmem:[%s21388_s4 + $0xa8] sm:$0xff]  ;;  %v12223_v6 = vld [vmem:[%s21388_s4 + $0xa0] sm:$0xff] }
 0xad5   :  { %v13786_v57 = vadd.f32 %v13785_v40, %v13784_v20 }
 0xad6   :  { %v9538_v17 = vadd.f32 %v13748_v31, %v9349_v42  ;;  %22354 = vst [vmem:[#allocation44_spill] sm:$0xff] %v20681_v14  ;;  %v21745_v47 = vand.u32 4294901760, %v20681_v14  ;;  %v12225_v31 = vld [vmem:[%s21388_s4 + $0xb0] sm:$0xff] }
 0xad7   :  { %v13787_v35 = vpop.f32.mrb[104].mxu0  ;;  %v9649_v55 = vadd.f32 %v13786_v57, %v9524_v16  ;;  %v22355_v57 = vld [vmem:[#allocation13_spill] sm:$0xff] }
 0xad8   :  { %v13788_v13 = vpop.f32.mrb[105].mxu0 }
 0xad9   :  { %v13789_v54 = vadd.f32 %v13788_v13, %v13787_v35 }
 0xadb   :  { %v13790_v58 = vpop.f32.mrb[106].mxu0  ;;  %v9656_v36 = vadd.f32 %v13789_v54, %v9531_v25  ;;  %v10637_v25 = vsub.f32 %v20681_v14, %v21745_v47 }
 0xadc   :  { %v13791_v56 = vpop.f32.mrb[107].mxu0 }
 0xadd   :  { %v13792_v24 = vadd.f32 %v13791_v56, %v13790_v58  ;;  %v10638_v20 = vand.u32 4294901760, %v10637_v25  ;;  %v22356_v56 = vld [vmem:[#allocation22_spill] sm:$0xff] }
 0xade   :  { %v22362_v25 = vld [vmem:[#allocation26_spill] sm:$0xff] }
 0xadf   :  { %v9663_v10 = vadd.f32 %v13792_v24, %v9538_v17  ;;  %10639 = vmatprep.mubr.f32.mxu0 %v10638_v20 }
 0xafe   :  { %v14665_v52 = vpop.f32.mrb[156].mxu1 }
 0xaff   :  { %v16265_v49 = vadd.f32 %v14665_v52, %v9649_v55  ;;  %v10258_v59 = vpop.f32.mrb[157].mxu1  ;;  %v10453_v52 = vld [vmem:[#allocation3 + $0x1e0] sm:$0xff] }
 0xb00   :  { %v16266_v61 = vadd.f32 %v10258_v59, %v9642_v44  ;;  %v12226_v44 = vld [vmem:[%s21388_s4 + $0xb8] sm:$0xff] }
 0xb01   :  { %v20586_v41 = vmax.f32 %v16265_v49, 0.0 }
 0xb02   :  { %v20588_v21 = vmax.f32 %v16266_v61, 0.0  ;;  %v14668_v30 = vpop.f32.mrb[158].mxu1 }
 0xb03   :  { %v16267_v28 = vadd.f32 %v14668_v30, %v9663_v10  ;;  %v10270_v46 = vpop.f32.mrb[159].mxu1  ;;  %10290 = vrot.lane.b32.xlu1 %v20586_v41, %s16452_s1  ;;  %v10590_v34 = vand.u32 4294901760, %v20586_v41 }
 0xb04   :  { %v16268_v51 = vadd.f32 %v10270_v46, %v9656_v36  ;;  %10288 = vrot.lane.b32.xlu0 %v20588_v21, %s16452_s1  ;;  %v10587_v50 = vand.u32 4294901760, %v20588_v21  ;;  %v10457_v46 = vld [vmem:[#allocation3 + $0x200] sm:$0xff] }
 0xb05   :  { %v20596_v3 = vmax.f32 %v16267_v28, 0.0  ;;  %v20599_v12 = vsub.f32 %v20586_v41, %v10590_v34  ;;  %v20724_v28 = vand.u32 4294901760, %v10453_v52 }
 0xb06   :  { %v10282_v5 = vmax.f32 %v16268_v51, 0.0  ;;  %v20601_v27 = vpack.c.bf16 %v10590_v34, %v10587_v50  ;;  %v20604_v43 = vsub.f32 %v20588_v21, %v10587_v50 }
 0xb07   :  { %10374 = vrot.lane.b32.xlu1 %v20586_v41, %s16453_s2  ;;  %v10817_v15 = vand.u32 4294901760, %v20599_v12  ;;  %v10596_v37 = vand.u32 4294901760, %v20596_v3 }
 0xb08   :  { %10372 = vrot.lane.b32.xlu0 %v20588_v21, %s16453_s2  ;;  %16002 = vmatprep.subr.bf16.mxu0 %v20601_v27  ;;  %v10810_v19 = vand.u32 4294901760, %v20604_v43  ;;  %v10593_v33 = vand.u32 4294901760, %v10282_v5 }
 0xb09   :  { %v10818_v0 = vsub.f32 %v20599_v12, %v10817_v15  ;;  %v20618_v62 = vsub.f32 %v20596_v3, %v10596_v37 }
 0xb0a   :  { %v10811_v60 = vsub.f32 %v20604_v43, %v10810_v19  ;;  %v20621_v18 = vpack.c.bf16 %v10596_v37, %v10593_v33  ;;  %v20623_v38 = vsub.f32 %v10282_v5, %v10593_v33  ;;  %v20625_v2 = vpack.c.bf16 %v10817_v15, %v10810_v19  ;;  %v10456_v37 = vld [vmem:[#allocation3 + $0x1f8] sm:$0xff] }
 0xb0b   :  { %10310 = vrot.lane.b32.xlu1 %v20586_v41, %s16454_s6  ;;  %v10819_v9 = vand.u32 4294901760, %v10818_v0  ;;  %v10831_v42 = vand.u32 4294901760, %v20618_v62 }
 0xb0c   :  { %22350 = vst [vmem:[#allocation45_spill] sm:$0xff] %v20621_v18  ;;  %22351 = vst [vmem:[#allocation31_spill] sm:$0xff] %v20625_v2  ;;  %10308 = vrot.lane.b32.xlu0 %v20588_v21, %s16454_s6  ;;  %v10812_v53 = vand.u32 4294901760, %v10811_v60  ;;  %v10824_v39 = vand.u32 4294901760, %v20623_v38 }
 0xb0d   :  { %v10832_v26 = vsub.f32 %v20618_v62, %v10831_v42 }
 0xb0e   :  { %v16033_v11 = vpack.c.bf16 %v10819_v9, %v10812_v53  ;;  %v10825_v8 = vsub.f32 %v20623_v38, %v10824_v39  ;;  %v20637_v45 = vpack.c.bf16 %v10831_v42, %v10824_v39  ;;  %v20738_v9 = vand.u32 4294901760, %v10457_v46  ;;  %v10460_v42 = vld [vmem:[#allocation3 + $0x218] sm:$0xff] }
 0xb0f   :  { %10394 = vrot.lane.b32.xlu1 %v20586_v41, %s16455_s7  ;;  %v10833_v16 = vand.u32 4294901760, %v10832_v26 }
 0xb10   :  { %22352 = vst [vmem:[#allocation7_spill] sm:$0xff] %v20637_v45  ;;  %10392 = vrot.lane.b32.xlu0 %v20588_v21, %s16455_s7  ;;  %16034 = vmatprep.subr.bf16.mxu1 %v16033_v11  ;;  %v10826_v48 = vand.u32 4294901760, %v10825_v8  ;;  %22358 = vst [vmem:[#allocation8_spill] sm:$0xff] %v20738_v9  ;;  %v20744_v8 = vsub.f32 %v10453_v52, %v20724_v28 }
 0xb12   :  { %v20643_v4 = vpack.c.bf16 %v10833_v16, %v10826_v48  ;;  %22360 = vst [vmem:[#allocation20_spill] sm:$0xff] %v20744_v8  ;;  %v20746_v16 = vand.u32 4294901760, %v10456_v37 }
 0xb13   :  { %10330 = vrot.lane.b32.xlu1 %v20586_v41, %s16456_s8 }
 0xb14   :  { %10328 = vrot.lane.b32.xlu0 %v20588_v21, %s16456_s8  ;;  %22361 = vst [vmem:[#allocation6_spill] sm:$0xff] %v20746_v16  ;;  %v20783_v52 = vsub.f32 %v10456_v37, %v20746_v16 }
 0xb16   :  { %22365 = vst [vmem:[#allocation19_spill] sm:$0xff] %v20783_v52  ;;  %v22374_v45 = vand.u32 4294901760, %v20783_v52 }
 0xb17   :  { %10414 = vrot.lane.b32.xlu1 %v20586_v41, %s16457_s9 }
 0xb18   :  { %10412 = vrot.lane.b32.xlu0 %v20588_v21, %s16457_s9 }
 0xb1b   :  { %10350 = vrot.lane.b32.xlu1 %v20586_v41, %s16458_s10 }
 0xb1c   :  { %10348 = vrot.lane.b32.xlu0 %v20588_v21, %s16458_s10 }
 0xb1f   :  { %10294 = vrot.lane.b32.xlu1 %v20596_v3, %s16452_s1 }
 0xb20   :  { %10292 = vrot.lane.b32.xlu0 %v10282_v5, %s16452_s1 }
 0xb23   :  { %10378 = vrot.lane.b32.xlu1 %v20596_v3, %s16453_s2 }
 0xb24   :  { %10376 = vrot.lane.b32.xlu0 %v10282_v5, %s16453_s2 }
 0xb27   :  { %10314 = vrot.lane.b32.xlu1 %v20596_v3, %s16454_s6 }
 0xb28   :  { %10312 = vrot.lane.b32.xlu0 %v10282_v5, %s16454_s6 }
 0xb2b   :  { %10398 = vrot.lane.b32.xlu1 %v20596_v3, %s16455_s7 }
 0xb2c   :  { %10396 = vrot.lane.b32.xlu0 %v10282_v5, %s16455_s7 }
 0xb2f   :  { %10334 = vrot.lane.b32.xlu1 %v20596_v3, %s16456_s8 }
 0xb30   :  { %10332 = vrot.lane.b32.xlu0 %v10282_v5, %s16456_s8 }
 0xb33   :  { %10418 = vrot.lane.b32.xlu1 %v20596_v3, %s16457_s9 }
 0xb34   :  { %10416 = vrot.lane.b32.xlu0 %v10282_v5, %s16457_s9 }
 0xb37   :  { %10354 = vrot.lane.b32.xlu1 %v20596_v3, %s16458_s10 }
 0xb38   :  { %10352 = vrot.lane.b32.xlu0 %v10282_v5, %s16458_s10 }
 0xb3b   :  { %10434 = vrot.lane.b32.xlu1 %v20586_v41, %s16459_s11 }
 0xb3c   :  { %10432 = vrot.lane.b32.xlu0 %v20588_v21, %s16459_s11 }
 0xb3f   :  { %10438 = vrot.lane.b32.xlu1 %v20596_v3, %s16459_s11  ;;  %v22357_v3 = vld [vmem:[#allocation25_spill] sm:$0xff] }
 0xb40   :  { %10436 = vrot.lane.b32.xlu0 %v10282_v5, %s16459_s11 }
 0xb43   :  { %10513 = vperm.xlu1 %16423, %v12224_v22  }
 0xb44   :  { %10508 = vperm.xlu0 %16422, %v12223_v6   ;;  %v10459_v6 = vld [vmem:[#allocation3 + $0x210] sm:$0xff] }
 0xb47   :  { %10523 = vperm.xlu1 %16423, %v12226_v44  }
 0xb48   :  { %10518 = vperm.xlu0 %16422, %v12225_v31  }
 0xb75   :  { %v10291_v40 = vpop.permute.xlu1 %10290 }
 0xb76   :  { %v10301_v17 = vmul.f32 %v22355_v57, %v10291_v40  ;;  %v10289_v35 = vpop.permute.xlu0 %10288  ;;  %v20764_v40 = vand.u32 4294901760, %v10460_v42 }
 0xb77   :  { %v10300_v55 = vmul.f32 %v22355_v57, %v10289_v35 }
 0xb78   :  { %v10542_v13 = vand.u32 4294901760, %v10301_v17  ;;  %22363 = vst [vmem:[#allocation46_spill] sm:$0xff] %v20764_v40 }
 0xb79   :  { %v10539_v54 = vand.u32 4294901760, %v10300_v55  ;;  %v10375_v58 = vpop.permute.xlu1 %10374 }
 0xb7a   :  { %v20709_v36 = vsub.f32 %v10301_v17, %v10542_v13  ;;  %v20712_v24 = vmul.f32 %v22356_v56, %v10375_v58  ;;  %v10373_v10 = vpop.permute.xlu0 %10372 }
 0xb7b   :  { %v20714_v49 = vpack.c.bf16 %v10542_v13, %v10539_v54  ;;  %v20716_v59 = vsub.f32 %v10300_v55, %v10539_v54  ;;  %v20719_v61 = vmul.f32 %v22356_v56, %v10373_v10  ;;  %v20778_v13 = vsub.f32 %v10457_v46, %v20738_v9 }
 0xb7c   :  { %v10705_v41 = vand.u32 4294901760, %v20709_v36  ;;  %v21749_v51 = vand.u32 4294901760, %v20712_v24  ;;  %v21751_v10 = vand.u32 4294901760, %v20744_v8  ;;  %v22376_v14 = vand.u32 4294901760, %v20712_v24 }
 0xb7d   :  { %v10698_v21 = vand.u32 4294901760, %v20716_v59  ;;  %v10311_v30 = vpop.permute.xlu1 %10310  ;;  %16004 = vmatpush3.bf16.msra.mxu0 %v20714_v49  ;;  %v21750_v50 = vand.u32 4294901760, %v20719_v61  ;;  %22364 = vst [vmem:[#allocation23_spill] sm:$0xff] %v20778_v13 }
 0xb7e   :  { %v10706_v34 = vsub.f32 %v20709_v36, %v10705_v41  ;;  %v20730_v5 = vmul.f32 %v22357_v3, %v10311_v30  ;;  %v10309_v15 = vpop.permute.xlu0 %10308  ;;  %16006 = vmatprep.subr.bf16.mxu0 %v20621_v18  ;;  %v20751_v48 = vsub.f32 %v20712_v24, %v21749_v51 }
 0xb7f   :  { %v10699_v19 = vsub.f32 %v20716_v59, %v10698_v21  ;;  %v20735_v33 = vmul.f32 %v22357_v3, %v10309_v15  ;;  %v20740_v53 = vpack.c.bf16 %v10705_v41, %v10698_v21  ;;  %v20756_v32 = vsub.f32 %v20719_v61, %v21750_v50 }
 0xb80   :  { %v10707_v0 = vand.u32 4294901760, %v10706_v34  ;;  %v21747_v60 = vand.u32 4294901760, %v20730_v5  ;;  %v20785_v41 = vand.u32 4294901760, %v10459_v6  ;;  %v21753_v21 = vand.u32 4294901760, %v20751_v48  ;;  %v22367_v34 = vld [vmem:[#allocation27_spill] sm:$0xff] }
 0xb81   :  { %22359 = vst [vmem:[#allocation32_spill] sm:$0xff] %v20740_v53  ;;  %v10700_v39 = vand.u32 4294901760, %v10699_v19  ;;  %v21748_v26 = vand.u32 4294901760, %v20735_v33  ;;  %v10395_v11 = vpop.permute.xlu1 %10394  ;;  %v21752_v30 = vand.u32 4294901760, %v20756_v32  ;;  %v22380_v24 = vand.u32 4294901760, %v20735_v33 }
 0xb82   :  { %v20759_v22 = vmul.f32 %v22362_v25, %v10395_v11  ;;  %v10393_v20 = vpop.permute.xlu0 %10392  ;;  %v20769_v17 = vsub.f32 %v20730_v5, %v21747_v60  ;;  %22366 = vst [vmem:[#allocation18_spill] sm:$0xff] %v20785_v41  ;;  %v10846_v50 = vsub.f32 %v20751_v48, %v21753_v21 }
 0xb83   :  { %v20762_v44 = vmul.f32 %v22362_v25, %v10393_v20  ;;  %v16035_v31 = vpack.c.bf16 %v10707_v0, %v10700_v39  ;;  %v20774_v35 = vsub.f32 %v20735_v33, %v21748_v26  ;;  %v20801_v39 = vsub.f32 %v10460_v42, %v20764_v40 }
 0xb84   :  { %v21746_v55 = vand.u32 4294901760, %v20759_v22  ;;  %v21757_v11 = vand.u32 4294901760, %v20769_v17  ;;  %v20815_v42 = vsub.f32 %v10459_v6, %v20785_v41  ;;  %v10839_v51 = vsub.f32 %v20756_v32, %v21752_v30 }
 0xb85   :  { %v10611_v54 = vand.u32 4294901760, %v20762_v44  ;;  %v10331_v58 = vpop.permute.xlu1 %10330  ;;  %16036 = vmatpush3.bf16.msra.mxu1 %v16035_v31  ;;  %v21758_v20 = vand.u32 4294901760, %v20774_v35  ;;  %v22373_v6 = vand.u32 4294901760, %v20778_v13  ;;  %v22375_v41 = vand.u32 4294901760, %v20719_v61 }
 0xb86   :  { %v10341_v15 = vmul.f32 %v22367_v34, %v10331_v58  ;;  %v10329_v19 = vpop.permute.xlu0 %10328  ;;  %16038 = vmatprep.subr.bf16.mxu1 %v20643_v4  ;;  %v20794_v46 = vsub.f32 %v20759_v22, %v21746_v55  ;;  %v20806_v58 = vld [vmem:[#allocation3 + $0x230] sm:$0xff] }
 0xb87   :  { %v20797_v0 = vsub.f32 %v20762_v44, %v10611_v54  ;;  %v10340_v37 = vmul.f32 %v22367_v34, %v10329_v19  ;;  %v20811_v44 = vsub.f32 %v20744_v8, %v21751_v10  ;;  %v22371_v55 = vld [vmem:[#allocation28_spill] sm:$0xff]  ;;  %v10727_v30 = vsub.f32 %v20774_v35, %v21758_v20  ;;  %v20841_v10 = vld [vmem:[#allocation3 + $0x228] sm:$0xff] }
 0xb88   :  { %22368 = vst [vmem:[#allocation17_spill] sm:$0xff] %v20794_v46  ;;  %v10566_v31 = vand.u32 4294901760, %v10341_v15  ;;  %v20846_v63 = vsub.f32 %v20778_v13, %v22373_v6  ;;  %v10847_v8 = vand.u32 4294901760, %v10846_v50  ;;  %v20860_v6 = vpack.c.bf16 %v22376_v14, %v22375_v41 }
 0xb89   :  { %22369 = vst [vmem:[#allocation14_spill] sm:$0xff] %v20797_v0  ;;  %v10563_v47 = vand.u32 4294901760, %v10340_v37  ;;  %v10415_v23 = vpop.permute.xlu1 %10414  ;;  %v22378_v13 = vand.u32 4294901760, %v20797_v0  ;;  %v10728_v50 = vand.u32 4294901760, %v10727_v30  ;;  %v22381_v14 = vand.u32 4294901760, %v20730_v5 }
 0xb8a   :  { %v20817_v29 = vsub.f32 %v10341_v15, %v10566_v31  ;;  %v10425_v60 = vmul.f32 %v22371_v55, %v10415_v23  ;;  %v10413_v26 = vpop.permute.xlu0 %10412  ;;  %v20830_v15 = vand.u32 4294901760, %v20806_v58  ;;  %v10734_v23 = vsub.f32 %v20769_v17, %v21757_v11  ;;  %22377 = vst [vmem:[#allocation34_spill] sm:$0xff] %v20860_v6 }
 0xb8b   :  { %v20838_v4 = vsub.f32 %v10340_v37, %v10563_v47  ;;  %v10424_v21 = vmul.f32 %v22371_v55, %v10413_v26  ;;  %v20851_v11 = vsub.f32 %v20783_v52, %v22374_v45  ;;  %v10840_v26 = vand.u32 4294901760, %v10839_v51 }
 0xb8c   :  { %22370 = vst [vmem:[#allocation10_spill] sm:$0xff] %v20817_v29  ;;  %v10626_v19 = vand.u32 4294901760, %v10425_v60  ;;  %v10867_v45 = vsub.f32 %v20797_v0, %v22378_v13  ;;  %v22379_v52 = vand.u32 4294901760, %v20794_v46  ;;  %v20869_v37 = vand.u32 4294901760, %v20841_v10 }
 0xb8d   :  { %22372 = vst [vmem:[#allocation16_spill] sm:$0xff] %v20838_v4  ;;  %v10351_v7 = vpop.permute.xlu1 %10350  ;;  %v10735_v51 = vand.u32 4294901760, %v10734_v23  ;;  %v10623_v61 = vand.u32 4294901760, %v10424_v21  ;;  %v20876_v41 = vpack.c.bf16 %v22381_v14, %v22380_v24  ;;  %v22385_v30 = vand.u32 4294901760, %v20817_v29 }
 0xb8e   :  { %v10349_v53 = vpop.permute.xlu0 %10348  ;;  %v10874_v20 = vsub.f32 %v20794_v46, %v22379_v52  ;;  %v20878_v40 = vsub.f32 %v10425_v60, %v10626_v19  ;;  %v10361_v13 = vmul.f32 %v22257_v1, %v10351_v7  ;;  %v22383_v52 = vand.u32 4294901760, %v20759_v22 }
 0xb8f   :  { %v10762_v23 = vsub.f32 %v20817_v29, %v22385_v30  ;;  %v10360_v2 = vmul.f32 %v22257_v1, %v10349_v53  ;;  %v20890_v24 = vpack.c.bf16 %v10847_v8, %v10840_v26  ;;  %v20892_v60 = vpack.c.bf16 %v10566_v31, %v10563_v47 }
 0xb90   :  { %22382 = vst [vmem:[#allocation40_spill] sm:$0xff] %v20878_v40  ;;  %v20883_v46 = vpack.c.bf16 %v22383_v52, %v10611_v54  ;;  %v10868_v14 = vand.u32 4294901760, %v10867_v45  ;;  %v10875_v16 = vand.u32 4294901760, %v10874_v20  ;;  %v22387_v22 = vand.u32 4294901760, %v20838_v4 }
 0xb91   :  { %v10295_v0 = vpop.permute.xlu1 %10294  ;;  %22386 = vst [vmem:[#allocation41_spill] sm:$0xff] %v20892_v60  ;;  %v20898_v52 = vsub.f32 %v10424_v21, %v10623_v61  ;;  %v20900_v29 = vpack.c.bf16 %v10735_v51, %v10728_v50  ;;  %v20903_v47 = vpack.c.bf16 %v10626_v19, %v10623_v61  ;;  %v10763_v31 = vand.u32 4294901760, %v10762_v23 }
 0xb92   :  { %22384 = vst [vmem:[#allocation21_spill] sm:$0xff] %v20883_v46  ;;  %v10303_v33 = vmul.f32 %v22355_v57, %v10295_v0  ;;  %v10293_v5 = vpop.permute.xlu0 %10292  ;;  %v10755_v54 = vsub.f32 %v20838_v4, %v22387_v22  ;;  %v10578_v0 = vand.u32 4294901760, %v10361_v13  ;;  %v20913_v50 = vpack.c.bf16 %v10875_v16, %v10868_v14 }
 0xb93   :  { %v10302_v7 = vmul.f32 %v22355_v57, %v10293_v5  ;;  %22388 = vst [vmem:[#allocation11_spill] sm:$0xff] %v20898_v52  ;;  %22389 = vst [vmem:[#allocation38_spill] sm:$0xff] %v20903_v47  ;;  %v10575_v57 = vand.u32 4294901760, %v10360_v2 }
 0xb94   :  { %v10548_v30 = vand.u32 4294901760, %v10303_v33  ;;  %v10756_v53 = vand.u32 4294901760, %v10755_v54  ;;  %v20917_v23 = vsub.f32 %v10361_v13, %v10578_v0 }
 0xb95   :  { %v10545_v8 = vand.u32 4294901760, %v10302_v7  ;;  %v10379_v26 = vpop.permute.xlu1 %10378  ;;  %v20926_v16 = vpack.c.bf16 %v10578_v0, %v10575_v57  ;;  %v20943_v4 = vsub.f32 %v10360_v2, %v10575_v57 }
 0xb96   :  { %v20905_v45 = vsub.f32 %v10303_v33, %v10548_v30  ;;  %v10387_v20 = vmul.f32 %v22356_v56, %v10379_v26  ;;  %v10377_v5 = vpop.permute.xlu0 %10376 }
 0xb97   :  { %v20908_v22 = vpack.c.bf16 %v10548_v30, %v10545_v8  ;;  %v20910_v21 = vsub.f32 %v10302_v7, %v10545_v8  ;;  %v10386_v51 = vmul.f32 %v22356_v56, %v10377_v5  ;;  %v22391_v7 = vand.u32 4294901760, %v20878_v40 }
 0xb98   :  { %v21783_v19 = vand.u32 4294901760, %v20905_v45  ;;  %v10608_v61 = vand.u32 4294901760, %v10387_v20 }
 0xb99   :  { %22390 = vst [vmem:[#allocation35_spill] sm:$0xff] %v20908_v22  ;;  %v21792_v33 = vand.u32 4294901760, %v20910_v21  ;;  %v10605_v26 = vand.u32 4294901760, %v10386_v51  ;;  %v10315_v9 = vpop.permute.xlu1 %10314  ;;  %16008 = vmatpush3.bf16.msra.mxu0 %v20908_v22  ;;  %v20924_v56 = vsub.f32 %v20878_v40, %v22391_v7 }
 0xb9a   :  { %v10720_v14 = vsub.f32 %v20905_v45, %v21783_v19  ;;  %v20931_v54 = vsub.f32 %v10387_v20, %v10608_v61  ;;  %v10323_v13 = vmul.f32 %v22357_v3, %v10315_v9  ;;  %v10313_v30 = vpop.permute.xlu0 %10312  ;;  %16010 = vmatprep.subr.bf16.mxu0 %v20860_v6 }
 0xb9b   :  { %v10713_v8 = vsub.f32 %v20910_v21, %v21792_v33  ;;  %v20938_v5 = vsub.f32 %v10386_v51, %v10605_v26  ;;  %v10322_v0 = vmul.f32 %v22357_v3, %v10313_v30  ;;  %v20941_v7 = vpack.c.bf16 %v10608_v61, %v10605_v26 }
 0xb9c   :  { %v10721_v19 = vand.u32 4294901760, %v10720_v14  ;;  %v21795_v20 = vand.u32 4294901760, %v20931_v54  ;;  %v10560_v40 = vand.u32 4294901760, %v10323_v13  ;;  %v20948_v33 = vpack.c.bf16 %v10763_v31, %v10756_v53 }
 0xb9d   :  { %22392 = vst [vmem:[#allocation33_spill] sm:$0xff] %v20941_v7  ;;  %v10714_v9 = vand.u32 4294901760, %v10713_v8  ;;  %v21796_v22 = vand.u32 4294901760, %v20938_v5  ;;  %v10557_v6 = vand.u32 4294901760, %v10322_v0  ;;  %v10399_v18 = vpop.permute.xlu1 %10398  ;;  %16012 = vmatpush3.bf16.msra.mxu0 %v20876_v41 }
 0xb9e   :  { %v20951_v3 = vsub.f32 %v10323_v13, %v10560_v40  ;;  %v10407_v2 = vmul.f32 %v22362_v25, %v10399_v18  ;;  %v10397_v57 = vpop.permute.xlu0 %10396  ;;  %16014 = vmatprep.subr.bf16.mxu0 %v20941_v7  ;;  %v10860_v61 = vsub.f32 %v20931_v54, %v21795_v20 }
 0xb9f   :  { %v20958_v26 = vpack.c.bf16 %v10560_v40, %v10557_v6  ;;  %v20960_v14 = vsub.f32 %v10322_v0, %v10557_v6  ;;  %v10406_v53 = vmul.f32 %v22362_v25, %v10397_v57  ;;  %v16039_v31 = vpack.c.bf16 %v10721_v19, %v10714_v9 }
 0xba0   :  { %v21797_v30 = vand.u32 4294901760, %v20951_v3  ;;  %v10620_v13 = vand.u32 4294901760, %v10407_v2  ;;  %v10853_v18 = vsub.f32 %v20938_v5, %v21796_v22  ;;  %v10861_v8 = vand.u32 4294901760, %v10860_v61 }
 0xba1   :  { %22393 = vst [vmem:[#allocation43_spill] sm:$0xff] %v20958_v26  ;;  %v21804_v7 = vand.u32 4294901760, %v20960_v14  ;;  %v10617_v20 = vand.u32 4294901760, %v10406_v53  ;;  %v10335_v40 = vpop.permute.xlu1 %10334  ;;  %16016 = vmatpush3.bf16.msra.mxu0 %v20958_v26  ;;  %16040 = vmatpush3.bf16.msra.mxu1 %v16039_v31  ;;  %v22394_v25 = vand.u32 4294901760, %v20898_v52 }
 0xba2   :  { %v10748_v19 = vsub.f32 %v20951_v3, %v21797_v30  ;;  %v20978_v0 = vsub.f32 %v10407_v2, %v10620_v13  ;;  %v10343_v9 = vmul.f32 %v22367_v34, %v10335_v40  ;;  %v10333_v57 = vpop.permute.xlu0 %10332  ;;  %16018 = vmatprep.subr.bf16.mxu0 %v20883_v46  ;;  %16042 = vmatprep.subr.bf16.mxu1 %v20890_v24  ;;  %v10854_v61 = vand.u32 4294901760, %v10853_v18 }
 0xba3   :  { %v20973_v6 = vsub.f32 %v20898_v52, %v22394_v25  ;;  %v10741_v31 = vsub.f32 %v20960_v14, %v21804_v7  ;;  %v20986_v25 = vsub.f32 %v10406_v53, %v10617_v20  ;;  %v10342_v22 = vmul.f32 %v22367_v34, %v10333_v57 }
 0xba4   :  { %v20989_v51 = vpack.c.bf16 %v10620_v13, %v10617_v20  ;;  %v10749_v2 = vand.u32 4294901760, %v10748_v19  ;;  %v21807_v30 = vand.u32 4294901760, %v20978_v0  ;;  %v10572_v40 = vand.u32 4294901760, %v10343_v9 }
 0xba5   :  { %v16045_v26 = vpack.c.bf16 %v10861_v8, %v10854_v61  ;;  %v22396_v46 = vand.u32 4294901760, %v20917_v23  ;;  %v10742_v18 = vand.u32 4294901760, %v10741_v31  ;;  %v21808_v52 = vand.u32 4294901760, %v20986_v25  ;;  %v10419_v53 = vpop.permute.xlu1 %10418  ;;  %16020 = vmatpush3.bf16.msra.mxu0 %v20892_v60  ;;  %16044 = vmatpush3.bf16.msra.mxu1 %v20900_v29 }
 0xba6   :  { %22395 = vst [vmem:[#allocation15_spill] sm:$0xff] %v20989_v51  ;;  %v10569_v7 = vand.u32 4294901760, %v10342_v22  ;;  %v21000_v34 = vsub.f32 %v10343_v9, %v10572_v40  ;;  %v10427_v20 = vmul.f32 %v22371_v55, %v10419_v53  ;;  %v10417_v13 = vpop.permute.xlu0 %10416  ;;  %16022 = vmatprep.subr.bf16.mxu0 %v20989_v51  ;;  %v10903_v8 = vand.u32 4294901760, %v20924_v56 }
 0xba7   :  { %v20995_v24 = vsub.f32 %v20917_v23, %v22396_v46  ;;  %16046 = vmatprep.subr.bf16.mxu1 %v16045_v26  ;;  %v10888_v46 = vsub.f32 %v20978_v0, %v21807_v30  ;;  %v10426_v29 = vmul.f32 %v22371_v55, %v10417_v13  ;;  %v16047_v9 = vpack.c.bf16 %v10749_v2, %v10742_v18 }
 0xba8   :  { %v21008_v19 = vpack.c.bf16 %v10572_v40, %v10569_v7  ;;  %v21010_v57 = vsub.f32 %v10342_v22, %v10569_v7  ;;  %v21809_v61 = vand.u32 4294901760, %v21000_v34  ;;  %v10632_v31 = vand.u32 4294901760, %v10427_v20 }
 0xba9   :  { %v10881_v26 = vsub.f32 %v20986_v25, %v21808_v52  ;;  %v10889_v53 = vand.u32 4294901760, %v10888_v46  ;;  %v22398_v51 = vand.u32 4294901760, %v20943_v4  ;;  %v10629_v40 = vand.u32 4294901760, %v10426_v29  ;;  %v10355_v22 = vpop.permute.xlu1 %10354  ;;  %16048 = vmatpush3.bf16.msra.mxu1 %v16047_v9 }
 0xbaa   :  { %22397 = vst [vmem:[#allocation39_spill] sm:$0xff] %v21008_v19  ;;  %v21821_v56 = vand.u32 4294901760, %v21010_v57  ;;  %16024 = vmatpush3.bf16.msra.mxu0 %v21008_v19  ;;  %v10896_v55 = vand.u32 4294901760, %v20973_v6  ;;  %v10776_v7 = vsub.f32 %v21000_v34, %v21809_v61  ;;  %v21026_v2 = vsub.f32 %v10427_v20, %v10632_v31  ;;  %v10353_v13 = vpop.permute.xlu0 %10352  ;;  %16050 = vmatprep.subr.bf16.mxu1 %v20913_v50 }
 0xbab   :  { %v10783_v30 = vsub.f32 %v20943_v4, %v22398_v51  ;;  %v10363_v18 = vmul.f32 %v22257_v1, %v10355_v22  ;;  %16026 = vmatprep.subr.bf16.mxu0 %v20903_v47  ;;  %v10882_v51 = vand.u32 4294901760, %v10881_v26  ;;  %v21034_v9 = vsub.f32 %v10426_v29, %v10629_v40 }
 0xbac   :  { %v10769_v46 = vsub.f32 %v21010_v57, %v21821_v56  ;;  %v10362_v6 = vmul.f32 %v22257_v1, %v10353_v13  ;;  %v21037_v52 = vpack.c.bf16 %v10632_v31, %v10629_v40  ;;  %v10777_v20 = vand.u32 4294901760, %v10776_v7 }
 0xbad   :  { %v21818_v61 = vand.u32 4294901760, %v21026_v2  ;;  %v10584_v22 = vand.u32 4294901760, %v10363_v18  ;;  %v16053_v19 = vpack.c.bf16 %v10889_v53, %v10882_v51  ;;  %v21819_v47 = vand.u32 4294901760, %v21034_v9  ;;  %16052 = vmatpush3.bf16.msra.mxu1 %v20948_v33 }
 0xbae   :  { %v10770_v60 = vand.u32 4294901760, %v10769_v46  ;;  %v10581_v50 = vand.u32 4294901760, %v10362_v6  ;;  %16028 = vmatpush3.bf16.msra.mxu0 %v20926_v16  ;;  %v21045_v29 = vsub.f32 %v20806_v58, %v20830_v15  ;;  %v10791_v1 = vand.u32 4294901760, %v20995_v24 }
 0xbaf   :  { %v21048_v31 = vsub.f32 %v10363_v18, %v10584_v22  ;;  %16030 = vmatprep.subr.bf16.mxu0 %v21037_v52  ;;  %16054 = vmatprep.subr.bf16.mxu1 %v16053_v19  ;;  %v10916_v26 = vsub.f32 %v21026_v2, %v21818_v61  ;;  %v21056_v53 = vsub.f32 %v20841_v10, %v20869_v37  ;;  %v10784_v33 = vand.u32 4294901760, %v10783_v30 }
 0xbb0   :  { %v21058_v40 = vpack.c.bf16 %v10584_v22, %v10581_v50  ;;  %v21060_v58 = vsub.f32 %v10362_v6, %v10581_v50  ;;  %v16055_v7 = vpack.c.bf16 %v10777_v20, %v10770_v60  ;;  %v16057_v18 = vpack.c.bf16 %v10903_v8, %v10896_v55 }
 0xbb1   :  { %v21816_v24 = vand.u32 4294901760, %v21048_v31  ;;  %v10909_v19 = vsub.f32 %v21034_v9, %v21819_v47  ;;  %v10917_v13 = vand.u32 4294901760, %v10916_v26  ;;  %v22399_v10 = vand.u32 4294901760, %v20801_v39 }
 0xbb2   :  { %v21817_v51 = vand.u32 4294901760, %v21060_v58  ;;  %16032 = vmatpush3.bf16.msra.mxu0 %v21058_v40  ;;  %16056 = vmatpush3.bf16.msra.mxu1 %v16055_v7  ;;  %v22400_v8 = vpack.c.bf16 %v20599_v12, %v20604_v43  ;;  %v10653_v46 = vand.u32 4294901760, %v20846_v63  ;;  %v10659_v6 = vand.u32 4294901760, %v20851_v11 }
 0xbb3   :  { %v10667_v30 = vsub.f32 %v20801_v39, %v22399_v10  ;;  %v10804_v60 = vsub.f32 %v21048_v31, %v21816_v24  ;;  %16058 = vmatprep.subr.bf16.mxu1 %v16057_v18  ;;  %v10910_v55 = vand.u32 4294901760, %v10909_v19  ;;  %v16067_v20 = vpack.c.bf16 %v20709_v36, %v20716_v59  ;;  %v22425_v24 = vld [vmem:[#allocation38_spill] sm:$0xff] }
 0xbb4   :  { %16066 = vmatprep.subr.bf16.mxu0 %v22400_v8  ;;  %v10797_v22 = vsub.f32 %v21060_v58, %v21817_v51  ;;  %v16059_v50 = vpack.c.bf16 %v10791_v1, %v10784_v33  ;;  %v21822_v26 = vand.u32 4294901760, %v21045_v29  ;;  %v22401_v18 = vand.u32 4294901760, %v20811_v44  ;;  %v22426_v51 = vld [vmem:[#allocation31_spill] sm:$0xff] }
 0xbb5   :  { %v10805_v7 = vand.u32 4294901760, %v10804_v60  ;;  %v16061_v12 = vpack.c.bf16 %v10917_v13, %v10910_v55  ;;  %v22402_v43 = vand.u32 4294901760, %v20815_v42  ;;  %v21820_v11 = vand.u32 4294901760, %v21056_v53  ;;  %v22404_v55 = vld [vmem:[#allocation45_spill] sm:$0xff] }
 0xbb6   :  { %10645 = vmatmul.mubr.f32.vlgmr.msra.gmra.mrb[108].mxu0 %v22401_v18  ;;  %v10798_v19 = vand.u32 4294901760, %v10797_v22  ;;  %16060 = vmatpush3.bf16.msra.mxu1 %v16059_v50  ;;  %v22403_v36 = vpack.c.bf16 %v20618_v62, %v20623_v38  ;;  %v16071_v59 = vpack.c.bf16 %v20905_v45, %v20910_v21  ;;  %v10668_v1 = vand.u32 4294901760, %v10667_v30  ;;  %v22407_v22 = vld [vmem:[#allocation14_spill] sm:$0xff]  ;;  %v22408_v50 = vld [vmem:[#allocation17_spill] sm:$0xff]  ;;  %v22409_v18 = vld [vmem:[#allocation35_spill] sm:$0xff] }
 0xbb7   :  { %v10673_v63 = vsub.f32 %v20815_v42, %v22402_v43  ;;  %16068 = vmatpush3.bf16.msra.mxu0 %v16067_v20  ;;  %16062 = vmatprep.subr.bf16.mxu1 %v16061_v12  ;;  %v10682_v33 = vsub.f32 %v21045_v29, %v21822_v26  ;;  %v16073_v13 = vpack.c.bf16 %v20751_v48, %v20756_v32  ;;  %v22406_v20 = vld [vmem:[#allocation6_spill] sm:$0xff]  ;;  %v22411_v43 = vld [vmem:[#allocation16_spill] sm:$0xff]  ;;  %v22432_v61 = vand.u32 4294901760, %v20905_v45 }
 0xbb8   :  { %16070 = vmatprep.subr.bf16.mxu0 %v22403_v36  ;;  %10654 = vmatprep.mubr.f32.mxu0 %v10653_v46  ;;  %v16063_v44 = vpack.c.bf16 %v10805_v7, %v10798_v19  ;;  %v10688_v62 = vsub.f32 %v21056_v53, %v21820_v11  ;;  %v16075_v38 = vpack.c.bf16 %v20769_v17, %v20774_v35  ;;  %v22410_v12 = vld [vmem:[#allocation34_spill] sm:$0xff]  ;;  %v22433_v11 = vld [vmem:[#allocation19_spill] sm:$0xff]  ;;  %v22435_v56 = vand.u32 4294901760, %v20751_v48 }
 0xbb9   :  { %v10674_v10 = vand.u32 4294901760, %v10673_v63  ;;  %v10683_v30 = vand.u32 4294901760, %v10682_v33  ;;  %v16077_v60 = vpack.c.bf16 %v20931_v54, %v20938_v5  ;;  %v16079_v46 = vpack.c.bf16 %v20951_v3, %v20960_v14  ;;  %v22412_v63 = vld [vmem:[#allocation10_spill] sm:$0xff]  ;;  %v22416_v33 = vld [vmem:[#allocation33_spill] sm:$0xff] }
 0xbba   :  { %10660 = vmatmul.mubr.f32.gmra.mrb[110].mxu0 %v10659_v6  ;;  %16064 = vmatpush3.bf16.msra.mxu1 %v16063_v44  ;;  %v10689_v8 = vand.u32 4294901760, %v10688_v62  ;;  %v22405_v6 = vld [vmem:[#allocation8_spill] sm:$0xff]  ;;  %v16081_v7 = vpack.c.bf16 %v22408_v50, %v22407_v22  ;;  %v16083_v19 = vpack.c.bf16 %v22412_v63, %v22411_v43  ;;  %v22413_v36 = vld [vmem:[#allocation46_spill] sm:$0xff]  ;;  %v22437_v45 = vand.u32 4294901760, %v20769_v17 }
 0xbbb   :  { %16072 = vmatpush3.bf16.msra.mxu0 %v16071_v59  ;;  %16098 = vmatprep.subr.bf16.mxu1 %v20601_v27  ;;  %v22414_v59 = vld [vmem:[#allocation44_spill] sm:$0xff]  ;;  %v22415_v44 = vld [vmem:[#allocation18_spill] sm:$0xff]  ;;  %v22439_v48 = vand.u32 4294901760, %v20938_v5  ;;  %v22442_v17 = vand.u32 4294901760, %v20960_v14  ;;  %v22449_v14 = vand.u32 4294901760, %v22411_v43  ;;  %v22456_v43 = vand.u32 4294901760, %v21010_v57 }
 0xbbc   :  { %16074 = vmatprep.subr.bf16.mxu0 %v16073_v13  ;;  %10669 = vmatprep.mubr.f32.mxu0 %v10668_v1  ;;  %v16085_v1 = vpack.c.bf16 %v20978_v0, %v20986_v25  ;;  %v16087_v13 = vpack.c.bf16 %v21000_v34, %v21010_v57  ;;  %v22418_v62 = vld [vmem:[#allocation40_spill] sm:$0xff]  ;;  %v10458_v57 = vld [vmem:[#allocation3 + $0x208] sm:$0xff] }
 0xbbd   :  { %10922 = vmatmul.mubr.f32.vlgmr.msra.gmra.mrb[160].mxu1 %v20724_v28 }
 0xbbe   :  { %10675 = vmatmul.mubr.f32.gmra.mrb[112].mxu0 %v10674_v10  ;;  %16100 = vmatpush3.bf16.msra.mxu1 %v20714_v49  ;;  %v22417_v10 = vld [vmem:[#allocation11_spill] sm:$0xff] }
 0xbbf   :  { %16076 = vmatpush3.bf16.msra.mxu0 %v16075_v38  ;;  %16102 = vmatprep.subr.bf16.mxu1 %v22404_v55  ;;  %v16089_v38 = vpack.c.bf16 %v22418_v62, %v22417_v10 }
 0xbc0   :  { %16078 = vmatprep.subr.bf16.mxu0 %v16077_v60  ;;  %10684 = vmatprep.mubr.f32.mxu0 %v10683_v30  ;;  %v22419_v30 = vld [vmem:[#allocation43_spill] sm:$0xff]  ;;  %v22420_v60 = vld [vmem:[#allocation21_spill] sm:$0xff] }
 0xbc1   :  { %10927 = vmatprep.mubr.f32.mxu1 %v22405_v6 }
 0xbc2   :  { %10690 = vmatmul.mubr.f32.gmra.mrb[114].mxu0 %v10689_v8  ;;  %10929 = vmatmul.mubr.f32.gmra.mrb[162].mxu1 %v22406_v20  ;;  %v16091_v8 = vpack.c.bf16 %v20917_v23, %v20943_v4 }
 0xbc3   :  { %16080 = vmatpush3.bf16.msra.mxu0 %v16079_v46  ;;  %16104 = vmatpush3.bf16.msra.mxu1 %v22409_v18  ;;  %v22421_v46 = vand.u32 4294901760, %v22414_v59 }
 0xbc4   :  { %16082 = vmatprep.subr.bf16.mxu0 %v16081_v7  ;;  %16106 = vmatprep.subr.bf16.mxu1 %v22410_v12  ;;  %v16093_v7 = vpack.c.bf16 %v21026_v2, %v21034_v9 }
 0xbc5   :  { %10934 = vmatprep.mubr.f32.mxu1 %v22413_v36  ;;  %11078 = vmatprep.mubr.f32.mxu0 %v22414_v59  ;;  %v22427_v59 = vld [vmem:[#allocation20_spill] sm:$0xff] }
 0xbc6   :  { %10936 = vmatmul.mubr.f32.gmra.mrb[164].mxu1 %v22415_v44 }
 0xbc7   :  { %16084 = vmatpush3.bf16.msra.mxu0 %v16083_v19  ;;  %16108 = vmatpush3.bf16.msra.mxu1 %v20876_v41  ;;  %v22422_v19 = vld [vmem:[#allocation41_spill] sm:$0xff] }
 0xbc8   :  { %16086 = vmatprep.subr.bf16.mxu0 %v16085_v1  ;;  %16110 = vmatprep.subr.bf16.mxu1 %v22416_v33  ;;  %v22423_v1 = vld [vmem:[#allocation15_spill] sm:$0xff] }
 0xbc9   :  { %10941 = vmatprep.mubr.f32.mxu1 %v20830_v15 }
 0xbca   :  { %10943 = vmatmul.mubr.f32.gmra.mrb[166].mxu1 %v20869_v37 }
 0xbcb   :  { %16088 = vmatpush3.bf16.msra.mxu0 %v16087_v13  ;;  %16112 = vmatpush3.bf16.msra.mxu1 %v22419_v30  ;;  %v16095_v13 = vpack.c.bf16 %v21048_v31, %v21060_v58 }
 0xbcc   :  { %16090 = vmatprep.subr.bf16.mxu0 %v16089_v38  ;;  %16114 = vmatprep.subr.bf16.mxu1 %v22420_v60  ;;  %v22424_v38 = vld [vmem:[#allocation39_spill] sm:$0xff] }
 0xbcd   :  { %11212 = vmatprep.mubr.f32.mxu1 %v22421_v46  ;;  %v22429_v46 = vld [vmem:[#allocation7_spill] sm:$0xff] }
 0xbcf   :  { %16092 = vmatpush3.bf16.msra.mxu0 %v16091_v8  ;;  %16116 = vmatpush3.bf16.msra.mxu1 %v22422_v19  ;;  %v22428_v8 = vld [vmem:[#allocation32_spill] sm:$0xff] }
 0xbd0   :  { %16094 = vmatprep.subr.bf16.mxu0 %v16093_v7  ;;  %16118 = vmatprep.subr.bf16.mxu1 %v22423_v1  ;;  %v22430_v7 = vld [vmem:[#allocation23_spill] sm:$0xff] }
 0xbd3   :  { %16096 = vmatpush3.bf16.msra.mxu0 %v16095_v13  ;;  %16120 = vmatpush3.bf16.msra.mxu1 %v22424_v38  ;;  %v22431_v13 = vand.u32 4294901760, %v20910_v21  ;;  %v22436_v21 = vand.u32 4294901760, %v20774_v35  ;;  %v22443_v35 = vand.u32 4294901760, %v20951_v3  ;;  %v22448_v3 = vand.u32 4294901760, %v20801_v39 }
 0xbd4   :  { %16122 = vmatprep.subr.bf16.mxu1 %v22425_v24  ;;  %16130 = vmatprep.subr.bf16.mxu0 %v22426_v51  ;;  %v22434_v51 = vand.u32 4294901760, %v20756_v32  ;;  %v22438_v32 = vand.u32 4294901760, %v22427_v59 }
 0xbd5   :  { %v16135_v47 = vpack.c.bf16 %v22432_v61, %v22431_v13  ;;  %v16139_v61 = vpack.c.bf16 %v22437_v45, %v22436_v21  ;;  %v16143_v5 = vpack.c.bf16 %v22443_v35, %v22442_v17  ;;  %v22447_v13 = vand.u32 4294901760, %v22408_v50  ;;  %v22451_v21 = vld [vmem:[#allocation42_spill] sm:$0xff] }
 0xbd6   :  { %11081 = vmatmul.mubr.f32.vlgmr.msra.gmra.mrb[116].mxu0 %v22427_v59  ;;  %v16137_v26 = vpack.c.bf16 %v22435_v56, %v22434_v51  ;;  %v22440_v56 = vand.u32 4294901760, %v20931_v54  ;;  %v22444_v54 = vld [vmem:[#allocation29_spill] sm:$0xff]  ;;  %v22450_v51 = vand.u32 4294901760, %v22412_v63  ;;  %v22452_v50 = vand.u32 4294901760, %v20815_v42 }
 0xbd7   :  { %16124 = vmatpush3.bf16.msra.mxu1 %v20926_v16  ;;  %16132 = vmatpush3.bf16.msra.mxu0 %v22428_v8  ;;  %v10433_v8 = vpop.permute.xlu0 %10432  ;;  %v22457_v63 = vand.u32 4294901760, %v21000_v34  ;;  %v22464_v17 = vand.u32 4294901760, %v21026_v2 }
 0xbd8   :  { %16126 = vmatprep.subr.bf16.mxu1 %v21037_v52  ;;  %16134 = vmatprep.subr.bf16.mxu0 %v22429_v46  ;;  %v10444_v46 = vmul.f32 %v22444_v54, %v10433_v8 }
 0xbd9   :  { %11087 = vmatprep.mubr.f32.mxu0 %v22430_v7 }
 0xbda   :  { %11090 = vmatmul.mubr.f32.gmra.mrb[118].mxu0 %v22433_v11  ;;  %v11569_v45 = vand.u32 4294901760, %v10444_v46 }
 0xbdb   :  { %16128 = vmatpush3.bf16.msra.mxu1 %v21058_v40  ;;  %16136 = vmatpush3.bf16.msra.mxu0 %v16135_v47  ;;  %v16141_v47 = vpack.c.bf16 %v22440_v56, %v22439_v48  ;;  %v10437_v56 = vpop.permute.xlu0 %10436 }
 0xbdc   :  { %16138 = vmatprep.subr.bf16.mxu0 %v16137_v26  ;;  %16162 = vmatprep.subr.bf16.mxu1 %v20601_v27  ;;  %v10435_v26 = vpop.permute.xlu1 %10434  ;;  %v22441_v27 = vand.u32 4294901760, %v22430_v7  ;;  %v10446_v8 = vmul.f32 %v22444_v54, %v10437_v56 }
 0xbdd   :  { %11096 = vmatprep.mubr.f32.mxu0 %v20801_v39  ;;  %v10445_v59 = vmul.f32 %v22444_v54, %v10435_v26  ;;  %v22455_v39 = vand.u32 4294901760, %v21045_v29 }
 0xbde   :  { %11099 = vmatmul.mubr.f32.gmra.mrb[120].mxu0 %v20815_v42  ;;  %11216 = vmatmul.mubr.f32.vlgmr.msra.gmra.mrb[168].mxu1 %v22438_v32  ;;  %v16151_v42 = vpack.c.bf16 %v22457_v63, %v22456_v43  ;;  %v10455_v32 = vld [vmem:[#allocation3 + $0x1f0] sm:$0xff] }
 0xbdf   :  { %16140 = vmatpush3.bf16.msra.mxu0 %v16139_v61  ;;  %16164 = vmatpush3.bf16.msra.mxu1 %v20714_v49  ;;  %v22445_v49 = vand.u32 4294901760, %v22433_v11  ;;  %v16147_v11 = vpack.c.bf16 %v22450_v51, %v22449_v14  ;;  %v22454_v61 = vand.u32 4294901760, %v20978_v0  ;;  %v10527_v34 = vsel %vm1007_vm2, %v10455_v32, 0 }
 0xbe0   :  { %16142 = vmatprep.subr.bf16.mxu0 %v16141_v47  ;;  %16166 = vmatprep.subr.bf16.mxu1 %v22404_v55  ;;  %v22446_v55 = vand.u32 4294901760, %v22407_v22  ;;  %v11572_v22 = vand.u32 4294901760, %v10445_v59  ;;  %v10439_v0 = vpop.permute.xlu1 %10438 }
 0xbe1   :  { %11105 = vmatprep.mubr.f32.mxu0 %v21045_v29  ;;  %11223 = vmatprep.mubr.f32.mxu1 %v22441_v27  ;;  %v22460_v29 = vand.u32 4294901760, %v22418_v62  ;;  %v10447_v26 = vmul.f32 %v22444_v54, %v10439_v0  ;;  %v21247_v54 = vand.u32 4294901760, %v10527_v34 }
 0xbe2   :  { %11108 = vmatmul.mubr.f32.gmra.mrb[122].mxu0 %v21056_v53  ;;  %11227 = vmatmul.mubr.f32.gmra.mrb[170].mxu1 %v22445_v49  ;;  %v16145_v7 = vpack.c.bf16 %v22447_v13, %v22446_v55  ;;  %v21220_v48 = vsub.f32 %v10445_v59, %v11572_v22  ;;  %v22465_v49 = vand.u32 4294901760, %v21060_v58  ;;  %v21256_v13 = vpack.c.bf16 %v11572_v22, %v11569_v45 }
 0xbe3   :  { %16144 = vmatpush3.bf16.msra.mxu0 %v16143_v5  ;;  %16168 = vmatpush3.bf16.msra.mxu1 %v22409_v18  ;;  %v22453_v18 = vand.u32 4294901760, %v20986_v25  ;;  %v21222_v25 = vsub.f32 %v10444_v46, %v11569_v45  ;;  %v10461_v5 = vld [vmem:[#allocation3 + $0x220] sm:$0xff]  ;;  %v11578_v59 = vand.u32 4294901760, %v10447_v26  ;;  %v11575_v46 = vand.u32 4294901760, %v10446_v8 }
 0xbe4   :  { %16146 = vmatprep.subr.bf16.mxu0 %v16145_v7  ;;  %16170 = vmatprep.subr.bf16.mxu1 %v22410_v12  ;;  %v11687_v62 = vand.u32 4294901760, %v21220_v48  ;;  %v10533_v55 = vsel %vm1007_vm2, %v10461_v5, 0  ;;  %v10514_v5 = vpop.permute.xlu1 %10513 }
 0xbe5   :  { %11234 = vmatprep.mubr.f32.mxu1 %v22448_v3  ;;  %11415 = vmatprep.mubr.f32.mxu0 %v22451_v21  ;;  %v16149_v12 = vpack.c.bf16 %v22454_v61, %v22453_v18  ;;  %v21273_v3 = vand.u32 4294901760, %v10533_v55  ;;  %v21275_v14 = vsub.f32 %v10447_v26, %v11578_v59  ;;  %v21277_v51 = vpack.c.bf16 %v11578_v59, %v11575_v46 }
 0xbe6   :  { %11238 = vmatmul.mubr.f32.gmra.mrb[172].mxu1 %v22452_v50 }
 0xbe7   :  { %16148 = vmatpush3.bf16.msra.mxu0 %v16147_v11  ;;  %16172 = vmatpush3.bf16.msra.mxu1 %v20876_v41  ;;  %v22458_v41 = vand.u32 4294901760, %v21056_v53  ;;  %v22461_v53 = vand.u32 4294901760, %v20943_v4  ;;  %v10530_v4 = vsel %vm1007_vm2, %v10458_v57, 0  ;;  %v21279_v11 = vsub.f32 %v10446_v8, %v11575_v46 }
 0xbe8   :  { %16150 = vmatprep.subr.bf16.mxu0 %v16149_v12  ;;  %16174 = vmatprep.subr.bf16.mxu1 %v22416_v33  ;;  %v22459_v33 = vand.u32 4294901760, %v22417_v10  ;;  %v22462_v10 = vand.u32 4294901760, %v20917_v23  ;;  %v10464_v23 = vld [vmem:[#allocation3 + $0x238] sm:$0xff]  ;;  %v21264_v7 = vand.u32 4294901760, %v10530_v4  ;;  %v21293_v50 = vsub.f32 %v10533_v55, %v21273_v3 }
 0xbe9   :  { %11245 = vmatprep.mubr.f32.mxu1 %v22455_v39  ;;  %v10536_v58 = vsel %vm1007_vm2, %v10464_v23, 0  ;;  %v11701_v18 = vand.u32 4294901760, %v21275_v14  ;;  %v11694_v61 = vand.u32 4294901760, %v21279_v11 }
 0xbea   :  { %11249 = vmatmul.mubr.f32.gmra.mrb[174].mxu1 %v22458_v41  ;;  %v16153_v47 = vpack.c.bf16 %v22460_v29, %v22459_v33  ;;  %v16155_v27 = vpack.c.bf16 %v22462_v10, %v22461_v53  ;;  %v21283_v22 = vsub.f32 %v10530_v4, %v21264_v7  ;;  %v21285_v45 = vand.u32 4294901760, %v10536_v58  ;;  %v10509_v53 = vpop.permute.xlu0 %10508 }
 0xbeb   :  { %16152 = vmatpush3.bf16.msra.mxu0 %v16151_v42  ;;  %16176 = vmatpush3.bf16.msra.mxu1 %v22419_v30  ;;  %v11680_v30 = vand.u32 4294901760, %v21222_v25  ;;  %v11659_v43 = vand.u32 4294901760, %v21293_v50  ;;  %v11702_v42 = vsub.f32 %v21275_v14, %v11701_v18 }
 0xbec   :  { %16154 = vmatprep.subr.bf16.mxu0 %v16153_v47  ;;  %16178 = vmatprep.subr.bf16.mxu1 %v22420_v60  ;;  %v22463_v60 = vand.u32 4294901760, %v21034_v9  ;;  %v22466_v9 = vand.u32 4294901760, %v21048_v31  ;;  %v21268_v31 = vsub.f32 %v10527_v34, %v21247_v54  ;;  %v11649_v12 = vand.u32 4294901760, %v21283_v22 }
 0xbed   :  { %11540 = vmatprep.mubr.f32.mxu1 %v22451_v21  ;;  %v21301_v39 = vsub.f32 %v10536_v58, %v21285_v45  ;;  %v11660_v56 = vsub.f32 %v21293_v50, %v11659_v43  ;;  %v11703_v33 = vand.u32 4294901760, %v11702_v42 }
 0xbee   :  { %v16157_v35 = vpack.c.bf16 %v22464_v17, %v22463_v60  ;;  %v16159_v2 = vpack.c.bf16 %v22466_v9, %v22465_v49  ;;  %v11650_v63 = vsub.f32 %v21283_v22, %v11649_v12 }
 0xbef   :  { %16156 = vmatpush3.bf16.msra.mxu0 %v16155_v27  ;;  %16180 = vmatpush3.bf16.msra.mxu1 %v22422_v19  ;;  %v11681_v19 = vsub.f32 %v21222_v25, %v11680_v30  ;;  %v11669_v32 = vand.u32 4294901760, %v21301_v39  ;;  %v11661_v47 = vand.u32 4294901760, %v11660_v56 }
 0xbf0   :  { %16158 = vmatprep.subr.bf16.mxu0 %v16157_v35  ;;  %16182 = vmatprep.subr.bf16.mxu1 %v22423_v1  ;;  %v11688_v1 = vsub.f32 %v21220_v48, %v11687_v62 }
 0xbf1   :  { %v11670_v29 = vsub.f32 %v21301_v39, %v11669_v32 }
 0xbf2   :  { %v11689_v21 = vand.u32 4294901760, %v11688_v1 }
 0xbf3   :  { %16160 = vmatpush3.bf16.msra.mxu0 %v16159_v2  ;;  %16184 = vmatpush3.bf16.msra.mxu1 %v22424_v38  ;;  %v11682_v38 = vand.u32 4294901760, %v11681_v19  ;;  %v11671_v34 = vand.u32 4294901760, %v11670_v29  ;;  %v10519_v19 = vpop.permute.xlu0 %10518 }
 0xbf4   :  { %16186 = vmatprep.subr.bf16.mxu1 %v22425_v24  ;;  %16194 = vmatprep.subr.bf16.mxu0 %v21256_v13  ;;  %v11639_v24 = vand.u32 4294901760, %v21268_v31 }
 0xbf6   :  { %11417 = vmatmul.mubr.f32.vlgmr.msra.gmra.mrb[124].mxu0 %v20724_v28 }
 0xbf7   :  { %16188 = vmatpush3.bf16.msra.mxu1 %v20926_v16  ;;  %16196 = vmatpush3.bf16.msra.mxu0 %v21256_v13  ;;  %v16201_v16 = vpack.c.bf16 %v11689_v21, %v11682_v38 }
 0xbf8   :  { %16190 = vmatprep.subr.bf16.mxu1 %v21037_v52  ;;  %16198 = vmatprep.subr.bf16.mxu0 %v21277_v51  ;;  %v11640_v52 = vsub.f32 %v21268_v31, %v11639_v24 }
 0xbf9   :  { %11422 = vmatprep.mubr.f32.mxu0 %v22405_v6 }
 0xbfa   :  { %11424 = vmatmul.mubr.f32.gmra.mrb[126].mxu0 %v22406_v20  ;;  %v11641_v0 = vand.u32 4294901760, %v11640_v52 }
 0xbfb   :  { %16192 = vmatpush3.bf16.msra.mxu1 %v21058_v40  ;;  %16200 = vmatpush3.bf16.msra.mxu0 %v21277_v51  ;;  %v11695_v40 = vsub.f32 %v21279_v11, %v11694_v61 }
 0xbfc   :  { %16202 = vmatprep.subr.bf16.mxu0 %v16201_v16  ;;  %11429 = vmatprep.mubr.f32.mxu0 %v22413_v36 }
 0xbfd   :  { %v11696_v41 = vand.u32 4294901760, %v11695_v40 }
 0xbfe   :  { %11431 = vmatmul.mubr.f32.gmra.mrb[128].mxu0 %v22415_v44  ;;  %11542 = vmatmul.mubr.f32.vlgmr.msra.gmra.mrb[176].mxu1 %v20724_v28  ;;  %v11651_v28 = vand.u32 4294901760, %v11650_v63 }
 0xbff   :  { %11436 = vmatprep.mubr.f32.mxu0 %v20830_v15  ;;  %11547 = vmatprep.mubr.f32.mxu1 %v22405_v6  ;;  %v16205_v6 = vpack.c.bf16 %v11703_v33, %v11696_v41 }
 0xc02   :  { %11438 = vmatmul.mubr.f32.gmra.mrb[130].mxu0 %v20869_v37  ;;  %11549 = vmatmul.mubr.f32.gmra.mrb[178].mxu1 %v22406_v20  ;;  %v16209_v20 = vpack.c.bf16 %v21220_v48, %v21222_v25 }
 0xc03   :  { %11554 = vmatprep.mubr.f32.mxu1 %v22413_v36  ;;  %14677 = vmatprep.mubr.f32.mxu0 %v11641_v0  ;;  %v16213_v36 = vpack.c.bf16 %v21275_v14, %v21279_v11  ;;  %v10524_v14 = vpop.permute.xlu1 %10523 }
 0xc06   :  { %11556 = vmatmul.mubr.f32.gmra.mrb[180].mxu1 %v22415_v44  ;;  %14678 = vmatmul.mubr.f32.vlgmr.msra.gmra.mrb[132].mxu0 %v11651_v28 }
 0xc07   :  { %16204 = vmatpush3.bf16.msra.mxu0 %v16201_v16  ;;  %11561 = vmatprep.mubr.f32.mxu1 %v20830_v15  ;;  %v16225_v15 = vpack.c.bf16 %v11687_v62, %v11680_v30 }
 0xc08   :  { %16206 = vmatprep.subr.bf16.mxu0 %v16205_v6  ;;  %14680 = vmatprep.mubr.f32.mxu0 %v11661_v47 }
 0xc0a   :  { %11563 = vmatmul.mubr.f32.gmra.mrb[182].mxu1 %v20869_v37  ;;  %14681 = vmatmul.mubr.f32.gmra.mrb[134].mxu0 %v11671_v34  ;;  %v16229_v37 = vpack.c.bf16 %v11701_v18, %v11694_v61 }
 0xc0b   :  { %16208 = vmatpush3.bf16.msra.mxu0 %v16205_v6  ;;  %14691 = vmatprep.mubr.f32.mxu0 %v21247_v54 }
 0xc0c   :  { %16210 = vmatprep.subr.bf16.mxu0 %v16209_v20 }
 0xc0e   :  { %14692 = vmatmul.mubr.f32.vlgmr.msra.gmra.mrb[132].mxu0 %v21264_v7 }
 0xc0f   :  { %16212 = vmatpush3.bf16.msra.mxu0 %v16209_v20  ;;  %14694 = vmatprep.mubr.f32.mxu0 %v21273_v3 }
 0xc10   :  { %16214 = vmatprep.subr.bf16.mxu0 %v16213_v36 }
 0xc12   :  { %14695 = vmatmul.mubr.f32.gmra.mrb[134].mxu0 %v21285_v45 }
 0xc13   :  { %16216 = vmatpush3.bf16.msra.mxu0 %v16213_v36  ;;  %14705 = vmatprep.mubr.f32.mxu0 %v21268_v31 }
 0xc14   :  { %16218 = vmatprep.subr.bf16.mxu0 %v21256_v13 }
 0xc16   :  { %14706 = vmatmul.mubr.f32.vlgmr.msra.gmra.mrb[132].mxu0 %v21283_v22 }
 0xc17   :  { %16220 = vmatpush3.bf16.msra.mxu0 %v21256_v13  ;;  %14708 = vmatprep.mubr.f32.mxu0 %v21293_v50 }
 0xc18   :  { %16222 = vmatprep.subr.bf16.mxu0 %v21277_v51 }
 0xc1a   :  { %14709 = vmatmul.mubr.f32.gmra.mrb[134].mxu0 %v21301_v39 }
 0xc1b   :  { %16224 = vmatpush3.bf16.msra.mxu0 %v21277_v51  ;;  %14719 = vmatprep.mubr.f32.mxu0 %v11639_v24 }
 0xc1c   :  { %16226 = vmatprep.subr.bf16.mxu0 %v16225_v15 }
 0xc1e   :  { %14720 = vmatmul.mubr.f32.vlgmr.msra.gmra.mrb[132].mxu0 %v11649_v12 }
 0xc1f   :  { %16228 = vmatpush3.bf16.msra.mxu0 %v16225_v15  ;;  %14722 = vmatprep.mubr.f32.mxu0 %v11659_v43 }
 0xc20   :  { %16230 = vmatprep.subr.bf16.mxu0 %v16229_v37 }
 0xc22   :  { %14723 = vmatmul.mubr.f32.gmra.mrb[134].mxu0 %v11669_v32 }
 0xc23   :  { %16232 = vmatpush3.bf16.msra.mxu0 %v16229_v37  ;;  %14733 = vmatprep.mubr.f32.mxu0 %v21247_v54 }
 0xc24   :  { %16234 = vmatprep.subr.bf16.mxu0 %v21256_v13 }
 0xc26   :  { %14734 = vmatmul.mubr.f32.vlgmr.msra.gmra.mrb[132].mxu0 %v21264_v7 }
 0xc27   :  { %16236 = vmatpush3.bf16.msra.mxu0 %v21256_v13  ;;  %14736 = vmatprep.mubr.f32.mxu0 %v21273_v3 }
 0xc28   :  { %16238 = vmatprep.subr.bf16.mxu0 %v21277_v51 }
 0xc2a   :  { %14737 = vmatmul.mubr.f32.gmra.mrb[134].mxu0 %v21285_v45 }
 0xc2b   :  { %16240 = vmatpush3.bf16.msra.mxu0 %v21277_v51  ;;  %14747 = vmatprep.mubr.f32.mxu0 %v21247_v54 }
 0xc2e   :  { %14748 = vmatmul.mubr.f32.vlgmr.msra.gmra.mrb[132].mxu0 %v21264_v7 }
 0xc2f   :  { %14750 = vmatprep.mubr.f32.mxu0 %v21273_v3 }
 0xc32   :  { %14751 = vmatmul.mubr.f32.gmra.mrb[134].mxu0 %v21285_v45 }
 0xc89   :  { %v13873_v44 = vpop.f32.mrb[108].mxu0 }
 0xc8a   :  { %v13874_v48 = vpop.f32.mrb[109].mxu0 }
 0xc8b   :  { %v13875_v25 = vadd.f32 %v13874_v48, %v13873_v44 }
 0xc8d   :  { %v13876_v57 = vpop.f32.mrb[110].mxu0  ;;  %v10647_v60 = vadd.f32 %v13875_v25, %v10509_v53 }
 0xc8e   :  { %v13877_v26 = vpop.f32.mrb[111].mxu0 }
 0xc8f   :  { %v13878_v8 = vadd.f32 %v13877_v26, %v13876_v57 }
 0xc90   :  { %v13917_v27 = vpop.f32.mrb[160].mxu1 }
 0xc91   :  { %v13879_v10 = vpop.f32.mrb[112].mxu0  ;;  %v13918_v30 = vpop.f32.mrb[161].mxu1  ;;  %v10662_v49 = vadd.f32 %v13878_v8, %v10514_v5 }
 0xc92   :  { %v13880_v62 = vpop.f32.mrb[113].mxu0  ;;  %v13919_v35 = vadd.f32 %v13918_v30, %v13917_v27 }
 0xc93   :  { %v13881_v17 = vadd.f32 %v13880_v62, %v13879_v10 }
 0xc94   :  { %v10924_v54 = vadd.f32 %v13919_v35, %v10647_v60 }
 0xc95   :  { %v13882_v4 = vpop.f32.mrb[114].mxu0  ;;  %v13920_v23 = vpop.f32.mrb[162].mxu1  ;;  %v10677_v7 = vadd.f32 %v13881_v17, %v10519_v19 }
 0xc96   :  { %v13883_v59 = vpop.f32.mrb[115].mxu0  ;;  %v13921_v46 = vpop.f32.mrb[163].mxu1 }
 0xc97   :  { %v13884_v9 = vadd.f32 %v13883_v59, %v13882_v4  ;;  %v13922_v2 = vadd.f32 %v13921_v46, %v13920_v23 }
 0xc99   :  { %v10931_v55 = vadd.f32 %v13922_v2, %v10662_v49  ;;  %v13923_v13 = vpop.f32.mrb[164].mxu1  ;;  %v10692_v11 = vadd.f32 %v13884_v9, %v10524_v14 }
 0xc9a   :  { %v13924_v1 = vpop.f32.mrb[165].mxu1 }
 0xc9b   :  { %v13925_v31 = vadd.f32 %v13924_v1, %v13923_v13 }
 0xc9d   :  { %v10938_v58 = vadd.f32 %v13925_v31, %v10677_v7  ;;  %v13926_v3 = vpop.f32.mrb[166].mxu1 }
 0xc9e   :  { %v13927_v51 = vpop.f32.mrb[167].mxu1 }
 0xc9f   :  { %v13928_v38 = vadd.f32 %v13927_v51, %v13926_v3 }
 0xca1   :  { %v10945_v21 = vadd.f32 %v13928_v38, %v10692_v11 }
 0xca9   :  { %v13961_v22 = vpop.f32.mrb[116].mxu0 }
 0xcaa   :  { %v13962_v45 = vpop.f32.mrb[117].mxu0 }
 0xcab   :  { %v13963_v24 = vadd.f32 %v13962_v45, %v13961_v22 }
 0xcad   :  { %v11083_v50 = vadd.f32 %v13963_v24, %v10924_v54  ;;  %v13964_v18 = vpop.f32.mrb[118].mxu0 }
 0xcae   :  { %v13965_v61 = vpop.f32.mrb[119].mxu0 }
 0xcaf   :  { %v13966_v16 = vadd.f32 %v13965_v61, %v13964_v18  ;;  %v22467_v18 = vld [vmem:[#allocation37_spill] sm:$0xff] }
 0xcb1   :  { %v11092_v12 = vadd.f32 %v13966_v16, %v10931_v55  ;;  %v13967_v39 = vpop.f32.mrb[120].mxu0  ;;  %v14005_v52 = vpop.f32.mrb[168].mxu1  ;;  %v22468_v16 = vld [vmem:[#allocation24_spill] sm:$0xff] }
 0xcb2   :  { %v13968_v43 = vpop.f32.mrb[121].mxu0  ;;  %v14006_v63 = vpop.f32.mrb[169].mxu1 }
 0xcb3   :  { %v13969_v40 = vadd.f32 %v13968_v43, %v13967_v39  ;;  %v14007_v42 = vadd.f32 %v14006_v63, %v14005_v52 }
 0xcb5   :  { %v11101_v32 = vadd.f32 %v13969_v40, %v10938_v58  ;;  %v11218_v0 = vadd.f32 %v14007_v42, %v11083_v50  ;;  %v13970_v56 = vpop.f32.mrb[122].mxu0  ;;  %v14008_v28 = vpop.f32.mrb[170].mxu1 }
 0xcb6   :  { %v13971_v41 = vpop.f32.mrb[123].mxu0  ;;  %v14009_v33 = vpop.f32.mrb[171].mxu1 }
 0xcb7   :  { %v13972_v29 = vadd.f32 %v13971_v41, %v13970_v56  ;;  %v14010_v47 = vadd.f32 %v14009_v33, %v14008_v28  ;;  %v22470_v56 = vld [vmem:[#allocation12_spill] sm:$0xff] }
 0xcb9   :  { %v11110_v6 = vadd.f32 %v13972_v29, %v10945_v21  ;;  %v11229_v34 = vadd.f32 %v14010_v47, %v11092_v12  ;;  %v14011_v20 = vpop.f32.mrb[172].mxu1 }
 0xcba   :  { %v14012_v36 = vpop.f32.mrb[173].mxu1 }
 0xcbb   :  { %v14013_v15 = vadd.f32 %v14012_v36, %v14011_v20 }
 0xcbd   :  { %v11240_v37 = vadd.f32 %v14013_v15, %v11101_v32  ;;  %v14014_v44 = vpop.f32.mrb[174].mxu1  ;;  %v22469_v32 = vld [vmem:[#allocation36_spill] sm:$0xff] }
 0xcbe   :  { %v14015_v48 = vpop.f32.mrb[175].mxu1 }
 0xcbf   :  { %v14016_v25 = vadd.f32 %v14015_v48, %v14014_v44 }
 0xcc1   :  { %v11251_v57 = vadd.f32 %v14016_v25, %v11110_v6 }
 0xcc9   :  { %v14049_v26 = vpop.f32.mrb[124].mxu0 }
 0xcca   :  { %v14050_v8 = vpop.f32.mrb[125].mxu0 }
 0xccb   :  { %v14051_v53 = vadd.f32 %v14050_v8, %v14049_v26 }
 0xccd   :  { %v11419_v10 = vadd.f32 %v14051_v53, %v11218_v0  ;;  %v14052_v27 = vpop.f32.mrb[126].mxu0 }
 0xcce   :  { %v14053_v62 = vpop.f32.mrb[127].mxu0 }
 0xccf   :  { %v14054_v30 = vadd.f32 %v14053_v62, %v14052_v27 }
 0xcd1   :  { %v11426_v60 = vadd.f32 %v14054_v30, %v11229_v34  ;;  %v14055_v17 = vpop.f32.mrb[128].mxu0  ;;  %v14093_v35 = vpop.f32.mrb[176].mxu1 }
 0xcd2   :  { %v14056_v5 = vpop.f32.mrb[129].mxu0  ;;  %v14094_v54 = vpop.f32.mrb[177].mxu1 }
 0xcd3   :  { %v14057_v4 = vadd.f32 %v14056_v5, %v14055_v17  ;;  %v14095_v23 = vadd.f32 %v14094_v54, %v14093_v35 }
 0xcd5   :  { %v11433_v59 = vadd.f32 %v14057_v4, %v11240_v37  ;;  %v14058_v46 = vpop.f32.mrb[130].mxu0  ;;  %v14096_v49 = vpop.f32.mrb[178].mxu1  ;;  %v11544_v9 = vadd.f32 %v14095_v23, %v11419_v10 }
 0xcd6   :  { %v14059_v2 = vpop.f32.mrb[131].mxu0  ;;  %v14097_v55 = vpop.f32.mrb[179].mxu1 }
 0xcd7   :  { %v14060_v13 = vadd.f32 %v14059_v2, %v14058_v46  ;;  %v14098_v19 = vadd.f32 %v14097_v55, %v14096_v49 }
 0xcd9   :  { %v11440_v1 = vadd.f32 %v14060_v13, %v11251_v57  ;;  %v14099_v7 = vpop.f32.mrb[180].mxu1  ;;  %v11551_v31 = vadd.f32 %v14098_v19, %v11426_v60 }
 0xcda   :  { %v14100_v58 = vpop.f32.mrb[181].mxu1 }
 0xcdb   :  { %v14101_v3 = vadd.f32 %v14100_v58, %v14099_v7 }
 0xcdd   :  { %v14102_v14 = vpop.f32.mrb[182].mxu1  ;;  %v11558_v51 = vadd.f32 %v14101_v3, %v11433_v59 }
 0xcde   :  { %v14103_v11 = vpop.f32.mrb[183].mxu1 }
 0xcdf   :  { %v14104_v38 = vadd.f32 %v14103_v11, %v14102_v14 }
 0xce1   :  { %v11565_v21 = vadd.f32 %v14104_v38, %v11440_v1 }
 0xd01   :  { %v14749_v22 = vpop.f32.mrb[132].mxu0 }
 0xd02   :  { %v16269_v45 = vadd.f32 %v14749_v22, %v11551_v31  ;;  %v12160_v24 = vpop.f32.mrb[133].mxu0 }
 0xd03   :  { %v16270_v50 = vadd.f32 %v12160_v24, %v11544_v9 }
 0xd04   :  { %v12183_v61 = vadd.f32 %v16269_v45, %v22467_v18 }
 0xd05   :  { %v12182_v12 = vadd.f32 %v16270_v50, %v22468_v16  ;;  %v14752_v39 = vpop.f32.mrb[134].mxu0 }
 0xd06   :  { %v12187_v52 = vmax.f32 %v12183_v61, 0.0  ;;  %v16271_v43 = vadd.f32 %v14752_v39, %v11565_v21  ;;  %v12172_v63 = vpop.f32.mrb[135].mxu0 }
 0xd07   :  { %v12186_v40 = vmax.f32 %v12182_v12, 0.0  ;;  %v16272_v42 = vadd.f32 %v12172_v63, %v11558_v51 }
 0xd08   :  { %12191 = vst [vmem:[%s21389_s5 + $0x8] sm:$0xff] %v12187_v52  ;;  %v12185_v0 = vadd.f32 %v16271_v43, %v22469_v32 }
 0xd09   :  { %12190 = vst [vmem:[%s21389_s5] sm:$0xff] %v12186_v40  ;;  %v12184_v28 = vadd.f32 %v16272_v42, %v22470_v56 }
 0xd0a   :  { %v12189_v41 = vmax.f32 %v12185_v0, 0.0 }
 0xd0b   :  { %v12188_v33 = vmax.f32 %v12184_v28, 0.0 }
 0xd0c   :  { %12193 = vst [vmem:[%s21389_s5 + $0x18] sm:$0xff] %v12189_v41 }
 0xd0d   :  { %12192 = vst [vmem:[%s21389_s5 + $0x10] sm:$0xff] %v12188_v33 }
 0xd0e   :  { %12198 = vsyncpa [#allocation4], 1 }

</bundles_post_ra>
